<compile_context>
chip_gen: v7x
topology: tpu7x:2x2x1
jax: 0.10.0
libtpu: 0.0.40
codegen_flags: <defaults>
</compile_context>

<pallas_src>
import jax
import jax.numpy as jnp
from jax.experimental import pallas as pl
from jax.experimental.pallas import tpu as pltpu

SELU_ALPHA = 1.6732632423543772
SELU_SCALE = 1.0507009873554805
BN_EPS = 1e-3

TRUNK_PARAMS = [
    "w1", "s1", "h1",
    "w2", "s2", "h2",
    "wmlv", "bmlv",
    "w4z", "s4", "h4",
    "w5", "s5", "h5",
    "w5mt", "s5mt", "h5mt",
]


def _selu(x):
    # clamp the exp argument so the discarded branch never produces inf
    return SELU_SCALE * jnp.where(
        x > 0.0, x, SELU_ALPHA * (jnp.exp(jnp.minimum(x, 0.0)) - 1.0))


def _softplus(x):
    # matches torch Softplus(beta=1, threshold=20)
    return jnp.where(x > 20.0, x, jnp.log1p(jnp.exp(jnp.minimum(x, 20.0))))


def _mm(a, b):
    # bf16 operands on the MXU, f32 accumulation
    return jnp.dot(a.astype(jnp.bfloat16), b, preferred_element_type=jnp.float32)


# --------------------------------------------------------------------------
# Pass 1: encoder + decoder trunk (per batch tile)
# --------------------------------------------------------------------------
def trunk_kernel(
    x_ref, eps_ref, bcon_ref,
    w1_ref, s1_ref, h1_ref,
    w2_ref, s2_ref, h2_ref,
    wmlv_ref, bmlv_ref,
    w4z_ref, s4_ref, h4_ref,
    w5_ref, s5_ref, h5_ref,
    w5mt_ref, s5mt_ref, h5mt_ref,
    muh_ref, thh_ref, z_ref, means_ref, stdev_ref,
):
    E = eps_ref.shape[1]
    H = muh_ref.shape[1]

    # ---- encoder ----
    h = _selu(_mm(x_ref[...], w1_ref[...]) * s1_ref[...] + h1_ref[...])   # fc1+bn1+SELU
    # dp1: identity (eval mode)
    h = _selu(_mm(h, w2_ref[...]) * s2_ref[...] + h2_ref[...])            # fc2+bn2+SELU
    # dp2: identity (eval mode)
    ml = _mm(h, wmlv_ref[...]) + bmlv_ref[...]                            # means || log_vars
    means = ml[:, :E]
    stdev = jnp.exp(0.5 * ml[:, E:]) + 1e-4
    z = means + stdev * eps_ref[...]                                      # reparameterize

    # ---- decoder trunk ----
    # cat([z, b], 1) @ W4 == z @ W4[:E] + b_act @ W4[E:];  the (K=8) b_act
    # contribution is precomputed in the wrapper and arrives as bcon_ref.
    d = _selu((_mm(z, w4z_ref[...]) + bcon_ref[...]) * s4_ref[...] + h4_ref[...])
    d = _selu(_mm(d, w5_ref[...]) * s5_ref[...] + h5_ref[...])
    mt = _selu(_mm(d, w5mt_ref[...]) * s5mt_ref[...] + h5mt_ref[...])     # mu || theta heads

    muh_ref[...] = mt[:, :H].astype(jnp.bfloat16)
    thh_ref[...] = mt[:, H:].astype(jnp.bfloat16)
    z_ref[...] = z
    means_ref[...] = means
    stdev_ref[...] = stdev


# --------------------------------------------------------------------------
# Pass 2: out_mu / out_alpha (gene-tiled, weights streamed once)
# --------------------------------------------------------------------------
def heads_kernel(muh_ref, thh_ref, wom_ref, bom_ref, woa_ref, boa_ref,
                 mu_ref, theta_ref):
    mu_ref[...] = _softplus(
        jnp.dot(muh_ref[...], wom_ref[...], preferred_element_type=jnp.float32)
        + bom_ref[...])
    theta_ref[...] = _softplus(
        jnp.dot(thh_ref[...], woa_ref[...], preferred_element_type=jnp.float32)
        + boa_ref[...])


# --------------------------------------------------------------------------
# Wrapper
# --------------------------------------------------------------------------
def _nbytes(a):
    return int(a.size) * int(a.dtype.itemsize)


def _vmem_limit(needed_bytes):
    """Request enough VMEM for the blocks, capped per device generation."""
    try:
        phys = int(pltpu.get_tpu_info().vmem_capacity_bytes)
    except Exception:
        phys = 128 << 20
    cap = (phys * 25) // 32  # ~100 MiB on 128-MiB parts, ~50 MiB on 64-MiB v7x
    return int(min(max(int(needed_bytes) + (8 << 20), 32 << 20), cap))


def _resident_spec(a):
    """Whole-array, constant-index, single-buffered BlockSpec."""
    zero = (0,) * a.ndim
    try:
        return pl.BlockSpec(a.shape, lambda *_: zero,
                            pipeline_mode=pl.Buffered(1))
    except TypeError:  # older BlockSpec without pipeline_mode
        return pl.BlockSpec(a.shape, lambda *_: zero)


def batch_vae_forward(x, batch, eps_noise, params, *,
                      tile_m=None, tile_n=None, tile_m_out=None):
    """Returns (dec, enc, means, stdev) matching BatchVAE.forward (eval mode)."""
    B, G_in = x.shape
    G = params["wom"].shape[1]
    H = params["wom"].shape[0]          # 512
    E = eps_noise.shape[1]
    D4 = params["w4b"].shape[1]         # 128

    tile_m = tile_m or min(B, 128)             # trunk batch tile (>=2 tiles => megacore)
    tile_n = tile_n or min(G, 512)             # gene tile for the output heads
    tile_m_out = tile_m_out or min(B, 1024)    # large batch tile for the output heads
    assert B % tile_m == 0 and B % tile_m_out == 0 and G % tile_n == 0
    assert tile_n == G or tile_n % 128 == 0
    assert tile_m == B or tile_m % 8 == 0
    assert tile_m_out == B or tile_m_out % 8 == 0

    # --- folded in the wrapper: one-hot batch Linear+BN+SELU and its K=8
    #     contribution through fc4 (avoids the worst-shaped MXU pass) ---
    b_act = _selu((batch @ params["wb"]) * params["sb"] + params["hb"])
    bcon = (b_act @ params["w4b"]).astype(jnp.float32)          # (B, 128)

    x_bf = x.astype(jnp.bfloat16)                                # halve x DMA/VMEM
    trunk_vals = [params[k] for k in TRUNK_PARAMS]
    weights_bytes = sum(_nbytes(a) for a in trunk_vals)

    # ---------------- pass 1: trunk ----------------
    trunk_block_bytes = (
        2 * (tile_m * G_in * 2 + tile_m * E * 4 + tile_m * D4 * 4)   # dbl-buffered inputs
        + weights_bytes                                              # single-buffered residents
        + 2 * (2 * tile_m * H * 2 + 3 * tile_m * E * 4)              # dbl-buffered outputs
    )
    flops1 = 2 * B * (G_in * 256 + 256 * 128 + 128 * 2 * E + E * 128
                      + 128 * 256 + 256 * 2 * H)
    trans1 = B * (256 + 128 + E + 128 + 256 + 2 * H)
    bytes1 = (B * G_in * 2 + B * E * 4 + B * D4 * 4 + weights_bytes
              + 2 * B * H * 2 + 3 * B * E * 4)

    muh, thh, z, means, stdev = pl.pallas_call(
        trunk_kernel,
        out_shape=(
            jax.ShapeDtypeStruct((B, H), jnp.bfloat16),
            jax.ShapeDtypeStruct((B, H), jnp.bfloat16),
            jax.ShapeDtypeStruct((B, E), jnp.float32),
            jax.ShapeDtypeStruct((B, E), jnp.float32),
            jax.ShapeDtypeStruct((B, E), jnp.float32),
        ),
        grid_spec=pltpu.PrefetchScalarGridSpec(
            num_scalar_prefetch=0,
            grid=(B // tile_m,),
            in_specs=[
                pl.BlockSpec((tile_m, G_in), lambda i: (i, 0)),   # x (bf16)
                pl.BlockSpec((tile_m, E), lambda i: (i, 0)),      # eps
                pl.BlockSpec((tile_m, D4), lambda i: (i, 0)),     # b_act @ W4[E:]
                *[_resident_spec(a) for a in trunk_vals],         # resident trunk weights
            ],
            out_specs=(
                pl.BlockSpec((tile_m, H), lambda i: (i, 0)),      # mu hidden (bf16)
                pl.BlockSpec((tile_m, H), lambda i: (i, 0)),      # theta hidden (bf16)
                pl.BlockSpec((tile_m, E), lambda i: (i, 0)),      # z
                pl.BlockSpec((tile_m, E), lambda i: (i, 0)),      # means
                pl.BlockSpec((tile_m, E), lambda i: (i, 0)),      # stdev
            ),
        ),
        compiler_params=pltpu.CompilerParams(
            dimension_semantics=("parallel",),
            vmem_limit_bytes=_vmem_limit(trunk_block_bytes),
        ),
        cost_estimate=pl.CostEstimate(
            flops=int(flops1), transcendentals=int(trans1),
            bytes_accessed=int(bytes1)),
    )(x_bf, eps_noise, bcon, *trunk_vals)
    # TODO(synk): at very large n_genes on v7x (64 MiB VMEM), w1 (n_genes x 256
    #             bf16) may not fit resident next to the x tiles; K-tile fc1
    #             with pltpu.emit_pipeline in that regime.

    # ---------------- pass 2: output heads ----------------
    n_gene_tiles = G // tile_n
    n_batch_tiles = B // tile_m_out
    heads_block_bytes = (
        2 * (2 * tile_m_out * H * 2)                   # hidden slabs (dbl-buffered)
        + 2 * (2 * (H * tile_n * 2 + tile_n * 4))      # wom/bom + woa/boa tiles
        + 2 * (2 * tile_m_out * tile_n * 4)            # mu/theta output tiles
    )
    hidden_refetch = n_gene_tiles if n_batch_tiles > 1 else 1
    flops2 = 2 * B * (2 * H * G)
    trans2 = 2 * B * 2 * G
    bytes2 = (2 * (H * G * 2 + G * 4)                  # wom/woa + biases, streamed once
              + hidden_refetch * 2 * B * H * 2         # hidden slabs
              + 2 * B * G * 4)                         # mu/theta writeback

    mu, theta = pl.pallas_call(
        heads_kernel,
        out_shape=(
            jax.ShapeDtypeStruct((B, G), jnp.float32),
            jax.ShapeDtypeStruct((B, G), jnp.float32),
        ),
        grid_spec=pltpu.PrefetchScalarGridSpec(
            num_scalar_prefetch=0,
            grid=(n_gene_tiles, n_batch_tiles),        # gene axis OUTER (weights stream once)
            in_specs=[
                pl.BlockSpec((tile_m_out, H), lambda j, i: (i, 0)),   # mu hidden
                pl.BlockSpec((tile_m_out, H), lambda j, i: (i, 0)),   # theta hidden
                pl.BlockSpec((H, tile_n), lambda j, i: (0, j)),       # wom tile
                pl.BlockSpec((1, tile_n), lambda j, i: (0, j)),       # bom tile
                pl.BlockSpec((H, tile_n), lambda j, i: (0, j)),       # woa tile
                pl.BlockSpec((1, tile_n), lambda j, i: (0, j)),       # boa tile
            ],
            out_specs=(
                pl.BlockSpec((tile_m_out, tile_n), lambda j, i: (i, j)),
                pl.BlockSpec((tile_m_out, tile_n), lambda j, i: (i, j)),
            ),
        ),
        compiler_params=pltpu.CompilerParams(
            dimension_semantics=("parallel", "arbitrary"),
            vmem_limit_bytes=_vmem_limit(heads_block_bytes),
        ),
        cost_estimate=pl.CostEstimate(
            flops=int(flops2), transcendentals=int(trans2),
            bytes_accessed=int(bytes2)),
    )(muh, thh, params["wom"], params["bom"], params["woa"], params["boa"])

    # TODO(synk): consumers that accept (mu, theta) separately can skip this
    #             stack copy; it only exists to match torch.stack((mu, theta), 1).
    dec = jnp.stack((mu, theta), axis=1)
    return dec, z, means, stdev


# --------------------------------------------------------------------------
# Parameters (eval-mode BN folded into scale/shift) and an f32 reference
# --------------------------------------------------------------------------
def init_params(key, n_genes, enc_dim, n_batch):
    keys = iter(jax.random.split(key, 64))

    def lin(fan_in, fan_out):
        w = jax.random.normal(next(keys), (fan_in, fan_out), jnp.float32) / jnp.sqrt(
            jnp.float32(fan_in))
        b = 0.01 * jax.random.normal(next(keys), (1, fan_out), jnp.float32)
        return w, b

    def bn(f):
        gamma = 1.0 + 0.1 * jax.random.normal(next(keys), (1, f), jnp.float32)
        beta = 0.01 * jax.random.normal(next(keys), (1, f), jnp.float32)
        rmean = 0.05 * jax.random.normal(next(keys), (1, f), jnp.float32)
        rvar = 1.0 + 0.1 * jnp.abs(jax.random.normal(next(keys), (1, f), jnp.float32))
        return gamma, beta, rmean, rvar

    def fold(bias, gamma, beta, rmean, rvar):
        # BN(x W + bias) in eval mode == (x W) * scale + shift
        scale = gamma / jnp.sqrt(rvar + BN_EPS)
        shift = beta + (bias - rmean) * scale
        return scale, shift

    def bf16(w):
        return w.astype(jnp.bfloat16)

    p = {}
    # ---- Encoder ----
    w1, b1 = lin(n_genes, 256)
    p["w1"] = bf16(w1); p["s1"], p["h1"] = fold(b1, *bn(256))
    w2, b2 = lin(256, 128)
    p["w2"] = bf16(w2); p["s2"], p["h2"] = fold(b2, *bn(128))
    wm, bm = lin(128, enc_dim)
    wlv, blv = lin(128, enc_dim)
    p["wmlv"] = bf16(jnp.concatenate([wm, wlv], axis=1))      # fused means || log_vars
    p["bmlv"] = jnp.concatenate([bm, blv], axis=1)
    # ---- Decoder ----
    wb, bb = lin(n_batch, n_batch)
    p["wb"] = wb                                              # folded in wrapper (f32)
    p["sb"], p["hb"] = fold(bb, *bn(n_batch))
    w4, b4 = lin(enc_dim + n_batch, 128)
    p["w4z"] = bf16(w4[:enc_dim, :])
    p["w4b"] = w4[enc_dim:, :]                                # folded in wrapper (f32)
    p["s4"], p["h4"] = fold(b4, *bn(128))
    w5, b5 = lin(128, 256)
    p["w5"] = bf16(w5); p["s5"], p["h5"] = fold(b5, *bn(256))
    w5m, b5m = lin(256, 512)
    w5t, b5t = lin(256, 512)
    p["w5mt"] = bf16(jnp.concatenate([w5m, w5t], axis=1))     # fused mu || theta heads
    s5m, h5m = fold(b5m, *bn(512))
    s5t, h5t = fold(b5t, *bn(512))
    p["s5mt"] = jnp.concatenate([s5m, s5t], axis=1)
    p["h5mt"] = jnp.concatenate([h5m, h5t], axis=1)
    wom, bom = lin(512, n_genes)
    p["wom"] = bf16(wom); p["bom"] = bom
    woa, boa = lin(512, n_genes)
    p["woa"] = bf16(woa); p["boa"] = boa
    return p


def batch_vae_reference(x, batch, eps_noise, params):
    """Pure-JAX f32 reference with identical (eval-mode) semantics."""
    f32 = lambda a: a.astype(jnp.float32)
    E = eps_noise.shape[1]
    H = params["wom"].shape[0]
    h = _selu((x @ f32(params["w1"])) * params["s1"] + params["h1"])
    h = _selu((h @ f32(params["w2"])) * params["s2"] + params["h2"])
    ml = h @ f32(params["wmlv"]) + params["bmlv"]
    means = ml[:, :E]
    stdev = jnp.exp(0.5 * ml[:, E:]) + 1e-4
    z = means + stdev * eps_noise
    b = _selu((batch @ params["wb"]) * params["sb"] + params["hb"])
    d = _selu((z @ f32(params["w4z"]) + b @ params["w4b"]) * params["s4"] + params["h4"])
    d = _selu((d @ f32(params["w5"])) * params["s5"] + params["h5"])
    mt = _selu((d @ f32(params["w5mt"])) * params["s5mt"] + params["h5mt"])
    mu = _softplus(mt[:, :H] @ f32(params["wom"]) + params["bom"])
    th = _softplus(mt[:, H:] @ f32(params["woa"]) + params["boa"])
    return jnp.stack((mu, th), axis=1), z, means, stdev


def _close(got, ref, rtol, atol):
    return bool(jnp.all(jnp.abs(got - ref) <= atol + rtol * jnp.abs(ref)))


if __name__ == "__main__":
    # Small but tiling-exercising shapes:
    #   trunk grid = (2,), heads grid = (2 gene tiles, 1 batch tile).
    B, N_GENES, ENC_DIM, N_BATCH = 256, 1024, 32, 8

    key = jax.random.PRNGKey(0)
    kx, kb, ke, kp = jax.random.split(key, 4)

    x = jax.random.normal(kx, (B, N_GENES), jnp.float32)            # gene expression
    batch_idx = jax.random.randint(kb, (B,), 0, N_BATCH)
    batch = jax.nn.one_hot(batch_idx, N_BATCH, dtype=jnp.float32)   # source one-hot
    eps_noise = jax.random.normal(ke, (B, ENC_DIM), jnp.float32)    # rsample noise

    params = init_params(kp, N_GENES, ENC_DIM, N_BATCH)

    dec, enc, means, stdev = batch_vae_forward(x, batch, eps_noise, params)
    jax.block_until_ready((dec, enc, means, stdev))

    assert dec.shape == (B, 2, N_GENES)
    assert enc.shape == (B, ENC_DIM)
    assert means.shape == (B, ENC_DIM)
    assert stdev.shape == (B, ENC_DIM)
    assert bool(jnp.all(jnp.isfinite(dec)))
    assert bool(jnp.all(dec >= 0.0))       # Softplus outputs are non-negative
    assert bool(jnp.all(stdev > 0.0))

    # f32 reference check (kernel uses bf16 MXU operands => loose tolerance)
    dec_r, enc_r, means_r, stdev_r = batch_vae_reference(x, batch, eps_noise, params)
    assert _close(dec, dec_r, rtol=0.1, atol=0.1)
    assert _close(enc, enc_r, rtol=0.1, atol=0.1)
    assert _close(means, means_r, rtol=0.1, atol=0.1)
    assert _close(stdev, stdev_r, rtol=0.1, atol=0.1)

    print("KERNEL_OK")
</pallas_src>

<mosaic_0001>
module attributes {stable_mosaic.version = 11 : i64} {
  func.func @trunk_kernel(%arg0: i32, %arg1: memref<128x1024xbf16, #tpu.memory_space<vmem>>, %arg2: memref<128x32xf32, #tpu.memory_space<vmem>>, %arg3: memref<128x128xf32, #tpu.memory_space<vmem>>, %arg4: memref<1024x256xbf16, #tpu.memory_space<vmem>>, %arg5: memref<1x256xf32, #tpu.memory_space<vmem>>, %arg6: memref<1x256xf32, #tpu.memory_space<vmem>>, %arg7: memref<256x128xbf16, #tpu.memory_space<vmem>>, %arg8: memref<1x128xf32, #tpu.memory_space<vmem>>, %arg9: memref<1x128xf32, #tpu.memory_space<vmem>>, %arg10: memref<128x64xbf16, #tpu.memory_space<vmem>>, %arg11: memref<1x64xf32, #tpu.memory_space<vmem>>, %arg12: memref<32x128xbf16, #tpu.memory_space<vmem>>, %arg13: memref<1x128xf32, #tpu.memory_space<vmem>>, %arg14: memref<1x128xf32, #tpu.memory_space<vmem>>, %arg15: memref<128x256xbf16, #tpu.memory_space<vmem>>, %arg16: memref<1x256xf32, #tpu.memory_space<vmem>>, %arg17: memref<1x256xf32, #tpu.memory_space<vmem>>, %arg18: memref<256x1024xbf16, #tpu.memory_space<vmem>>, %arg19: memref<1x1024xf32, #tpu.memory_space<vmem>>, %arg20: memref<1x1024xf32, #tpu.memory_space<vmem>>, %arg21: memref<128x512xbf16, #tpu.memory_space<vmem>>, %arg22: memref<128x512xbf16, #tpu.memory_space<vmem>>, %arg23: memref<128x32xf32, #tpu.memory_space<vmem>>, %arg24: memref<128x32xf32, #tpu.memory_space<vmem>>, %arg25: memref<128x32xf32, #tpu.memory_space<vmem>>) attributes {dimension_semantics = [#tpu.dimension_semantics<parallel>], iteration_bounds = array<i64: 2>, scalar_prefetch = 0 : i64, scratch_operands = 0 : i64, tpu.core_type = #tpu.core_type<tc>, window_params = [{transform_indices = @transform_0, window_bounds = array<i64: 128, 1024>}, {transform_indices = @transform_1, window_bounds = array<i64: 128, 32>}, {transform_indices = @transform_2, window_bounds = array<i64: 128, 128>}, {pipeline_mode = #tpu.pipeline_mode<synchronous>, transform_indices = @transform_3, window_bounds = array<i64: 1024, 256>}, {pipeline_mode = #tpu.pipeline_mode<synchronous>, transform_indices = @transform_4, window_bounds = array<i64: 1, 256>}, {pipeline_mode = #tpu.pipeline_mode<synchronous>, transform_indices = @transform_5, window_bounds = array<i64: 1, 256>}, {pipeline_mode = #tpu.pipeline_mode<synchronous>, transform_indices = @transform_6, window_bounds = array<i64: 256, 128>}, {pipeline_mode = #tpu.pipeline_mode<synchronous>, transform_indices = @transform_7, window_bounds = array<i64: 1, 128>}, {pipeline_mode = #tpu.pipeline_mode<synchronous>, transform_indices = @transform_8, window_bounds = array<i64: 1, 128>}, {pipeline_mode = #tpu.pipeline_mode<synchronous>, transform_indices = @transform_9, window_bounds = array<i64: 128, 64>}, {pipeline_mode = #tpu.pipeline_mode<synchronous>, transform_indices = @transform_10, window_bounds = array<i64: 1, 64>}, {pipeline_mode = #tpu.pipeline_mode<synchronous>, transform_indices = @transform_11, window_bounds = array<i64: 32, 128>}, {pipeline_mode = #tpu.pipeline_mode<synchronous>, transform_indices = @transform_12, window_bounds = array<i64: 1, 128>}, {pipeline_mode = #tpu.pipeline_mode<synchronous>, transform_indices = @transform_13, window_bounds = array<i64: 1, 128>}, {pipeline_mode = #tpu.pipeline_mode<synchronous>, transform_indices = @transform_14, window_bounds = array<i64: 128, 256>}, {pipeline_mode = #tpu.pipeline_mode<synchronous>, transform_indices = @transform_15, window_bounds = array<i64: 1, 256>}, {pipeline_mode = #tpu.pipeline_mode<synchronous>, transform_indices = @transform_16, window_bounds = array<i64: 1, 256>}, {pipeline_mode = #tpu.pipeline_mode<synchronous>, transform_indices = @transform_17, window_bounds = array<i64: 256, 1024>}, {pipeline_mode = #tpu.pipeline_mode<synchronous>, transform_indices = @transform_18, window_bounds = array<i64: 1, 1024>}, {pipeline_mode = #tpu.pipeline_mode<synchronous>, transform_indices = @transform_19, window_bounds = array<i64: 1, 1024>}, {transform_indices = @transform_20, window_bounds = array<i64: 128, 512>}, {transform_indices = @transform_21, window_bounds = array<i64: 128, 512>}, {transform_indices = @transform_22, window_bounds = array<i64: 128, 32>}, {transform_indices = @transform_23, window_bounds = array<i64: 128, 32>}, {transform_indices = @transform_24, window_bounds = array<i64: 128, 32>}]} {
    %c0 = arith.constant 0 : index
    %c0_0 = arith.constant 0 : index
    %0 = vector.load %arg1[%c0, %c0_0] : memref<128x1024xbf16, #tpu.memory_space<vmem>>, vector<128x1024xbf16>
    %c0_1 = arith.constant 0 : index
    %c0_2 = arith.constant 0 : index
    %1 = vector.load %arg4[%c0_1, %c0_2] : memref<1024x256xbf16, #tpu.memory_space<vmem>>, vector<1024x256xbf16>
    %cst = arith.constant dense<0.000000e+00> : vector<128x256xf32>
    %2 = tpu.matmul %0, %1, %cst {dimension_numbers = #tpu.dot_dimension_numbers<[1], [0], [0], [1], [0, 0, 1, 1], [], []>} : vector<128x1024xbf16>, vector<1024x256xbf16>, vector<128x256xf32> -> vector<128x256xf32>
    %c0_3 = arith.constant 0 : index
    %c0_4 = arith.constant 0 : index
    %3 = vector.load %arg5[%c0_3, %c0_4] : memref<1x256xf32, #tpu.memory_space<vmem>>, vector<1x256xf32>
    %4 = vector.broadcast %3 : vector<1x256xf32> to vector<128x256xf32>
    %5 = arith.mulf %2, %4 : vector<128x256xf32>
    %c0_5 = arith.constant 0 : index
    %c0_6 = arith.constant 0 : index
    %6 = vector.load %arg6[%c0_5, %c0_6] : memref<1x256xf32, #tpu.memory_space<vmem>>, vector<1x256xf32>
    %7 = vector.broadcast %6 : vector<1x256xf32> to vector<128x256xf32>
    %8 = arith.addf %5, %7 : vector<128x256xf32>
    %cst_7 = arith.constant 0.000000e+00 : f32
    %9 = vector.broadcast %cst_7 : f32 to vector<128x256xf32>
    %10 = arith.cmpf ogt, %8, %9 : vector<128x256xf32>
    %cst_8 = arith.constant 0.000000e+00 : f32
    %11 = vector.broadcast %cst_8 : f32 to vector<128x256xf32>
    %12 = arith.minimumf %8, %11 : vector<128x256xf32>
    %13 = math.exp %12 : vector<128x256xf32>
    %cst_9 = arith.constant 1.000000e+00 : f32
    %14 = vector.broadcast %cst_9 : f32 to vector<128x256xf32>
    %15 = arith.subf %13, %14 : vector<128x256xf32>
    %cst_10 = arith.constant 1.67326319 : f32
    %16 = vector.broadcast %cst_10 : f32 to vector<128x256xf32>
    %17 = arith.mulf %16, %15 : vector<128x256xf32>
    %18 = arith.select %10, %8, %17 : vector<128x256xi1>, vector<128x256xf32>
    %cst_11 = arith.constant 1.05070102 : f32
    %19 = vector.broadcast %cst_11 : f32 to vector<128x256xf32>
    %20 = arith.mulf %19, %18 : vector<128x256xf32>
    %c0_12 = arith.constant 0 : index
    %c0_13 = arith.constant 0 : index
    %21 = vector.load %arg7[%c0_12, %c0_13] : memref<256x128xbf16, #tpu.memory_space<vmem>>, vector<256x128xbf16>
    %22 = arith.truncf %20 : vector<128x256xf32> to vector<128x256xbf16>
    %cst_14 = arith.constant dense<0.000000e+00> : vector<128x128xf32>
    %23 = tpu.matmul %22, %21, %cst_14 {dimension_numbers = #tpu.dot_dimension_numbers<[1], [0], [0], [1], [0, 0, 1, 1], [], []>} : vector<128x256xbf16>, vector<256x128xbf16>, vector<128x128xf32> -> vector<128x128xf32>
    %c0_15 = arith.constant 0 : index
    %c0_16 = arith.constant 0 : index
    %24 = vector.load %arg8[%c0_15, %c0_16] : memref<1x128xf32, #tpu.memory_space<vmem>>, vector<1x128xf32>
    %25 = vector.broadcast %24 : vector<1x128xf32> to vector<128x128xf32>
    %26 = arith.mulf %23, %25 : vector<128x128xf32>
    %c0_17 = arith.constant 0 : index
    %c0_18 = arith.constant 0 : index
    %27 = vector.load %arg9[%c0_17, %c0_18] : memref<1x128xf32, #tpu.memory_space<vmem>>, vector<1x128xf32>
    %28 = vector.broadcast %27 : vector<1x128xf32> to vector<128x128xf32>
    %29 = arith.addf %26, %28 : vector<128x128xf32>
    %cst_19 = arith.constant 0.000000e+00 : f32
    %30 = vector.broadcast %cst_19 : f32 to vector<128x128xf32>
    %31 = arith.cmpf ogt, %29, %30 : vector<128x128xf32>
    %cst_20 = arith.constant 0.000000e+00 : f32
    %32 = vector.broadcast %cst_20 : f32 to vector<128x128xf32>
    %33 = arith.minimumf %29, %32 : vector<128x128xf32>
    %34 = math.exp %33 : vector<128x128xf32>
    %cst_21 = arith.constant 1.000000e+00 : f32
    %35 = vector.broadcast %cst_21 : f32 to vector<128x128xf32>
    %36 = arith.subf %34, %35 : vector<128x128xf32>
    %cst_22 = arith.constant 1.67326319 : f32
    %37 = vector.broadcast %cst_22 : f32 to vector<128x128xf32>
    %38 = arith.mulf %37, %36 : vector<128x128xf32>
    %39 = arith.select %31, %29, %38 : vector<128x128xi1>, vector<128x128xf32>
    %cst_23 = arith.constant 1.05070102 : f32
    %40 = vector.broadcast %cst_23 : f32 to vector<128x128xf32>
    %41 = arith.mulf %40, %39 : vector<128x128xf32>
    %c0_24 = arith.constant 0 : index
    %c0_25 = arith.constant 0 : index
    %42 = vector.load %arg10[%c0_24, %c0_25] : memref<128x64xbf16, #tpu.memory_space<vmem>>, vector<128x64xbf16>
    %43 = arith.truncf %41 : vector<128x128xf32> to vector<128x128xbf16>
    %cst_26 = arith.constant dense<0.000000e+00> : vector<128x64xf32>
    %44 = tpu.matmul %43, %42, %cst_26 {dimension_numbers = #tpu.dot_dimension_numbers<[1], [0], [0], [1], [0, 0, 1, 1], [], []>} : vector<128x128xbf16>, vector<128x64xbf16>, vector<128x64xf32> -> vector<128x64xf32>
    %c0_27 = arith.constant 0 : index
    %c0_28 = arith.constant 0 : index
    %45 = vector.load %arg11[%c0_27, %c0_28] : memref<1x64xf32, #tpu.memory_space<vmem>>, vector<1x64xf32>
    %46 = vector.broadcast %45 : vector<1x64xf32> to vector<128x64xf32>
    %47 = arith.addf %44, %46 : vector<128x64xf32>
    %48 = vector.extract_strided_slice %47 {offsets = [0, 0], sizes = [128, 32], strides = [1, 1]} : vector<128x64xf32> to vector<128x32xf32>
    %49 = vector.extract_strided_slice %47 {offsets = [0, 32], sizes = [128, 32], strides = [1, 1]} : vector<128x64xf32> to vector<128x32xf32>
    %cst_29 = arith.constant 5.000000e-01 : f32
    %50 = vector.broadcast %cst_29 : f32 to vector<128x32xf32>
    %51 = arith.mulf %50, %49 : vector<128x32xf32>
    %52 = math.exp %51 : vector<128x32xf32>
    %cst_30 = arith.constant 9.99999974E-5 : f32
    %53 = vector.broadcast %cst_30 : f32 to vector<128x32xf32>
    %54 = arith.addf %52, %53 : vector<128x32xf32>
    %c0_31 = arith.constant 0 : index
    %c0_32 = arith.constant 0 : index
    %55 = vector.load %arg2[%c0_31, %c0_32] : memref<128x32xf32, #tpu.memory_space<vmem>>, vector<128x32xf32>
    %56 = arith.mulf %54, %55 : vector<128x32xf32>
    %57 = arith.addf %48, %56 : vector<128x32xf32>
    %c0_33 = arith.constant 0 : index
    %c0_34 = arith.constant 0 : index
    %58 = vector.load %arg12[%c0_33, %c0_34] : memref<32x128xbf16, #tpu.memory_space<vmem>>, vector<32x128xbf16>
    %59 = arith.truncf %57 : vector<128x32xf32> to vector<128x32xbf16>
    %cst_35 = arith.constant dense<0.000000e+00> : vector<128x128xf32>
    %60 = tpu.matmul %59, %58, %cst_35 {dimension_numbers = #tpu.dot_dimension_numbers<[1], [0], [0], [1], [0, 0, 1, 1], [], []>} : vector<128x32xbf16>, vector<32x128xbf16>, vector<128x128xf32> -> vector<128x128xf32>
    %c0_36 = arith.constant 0 : index
    %c0_37 = arith.constant 0 : index
    %61 = vector.load %arg3[%c0_36, %c0_37] : memref<128x128xf32, #tpu.memory_space<vmem>>, vector<128x128xf32>
    %62 = arith.addf %60, %61 : vector<128x128xf32>
    %c0_38 = arith.constant 0 : index
    %c0_39 = arith.constant 0 : index
    %63 = vector.load %arg13[%c0_38, %c0_39] : memref<1x128xf32, #tpu.memory_space<vmem>>, vector<1x128xf32>
    %64 = vector.broadcast %63 : vector<1x128xf32> to vector<128x128xf32>
    %65 = arith.mulf %62, %64 : vector<128x128xf32>
    %c0_40 = arith.constant 0 : index
    %c0_41 = arith.constant 0 : index
    %66 = vector.load %arg14[%c0_40, %c0_41] : memref<1x128xf32, #tpu.memory_space<vmem>>, vector<1x128xf32>
    %67 = vector.broadcast %66 : vector<1x128xf32> to vector<128x128xf32>
    %68 = arith.addf %65, %67 : vector<128x128xf32>
    %cst_42 = arith.constant 0.000000e+00 : f32
    %69 = vector.broadcast %cst_42 : f32 to vector<128x128xf32>
    %70 = arith.cmpf ogt, %68, %69 : vector<128x128xf32>
    %cst_43 = arith.constant 0.000000e+00 : f32
    %71 = vector.broadcast %cst_43 : f32 to vector<128x128xf32>
    %72 = arith.minimumf %68, %71 : vector<128x128xf32>
    %73 = math.exp %72 : vector<128x128xf32>
    %cst_44 = arith.constant 1.000000e+00 : f32
    %74 = vector.broadcast %cst_44 : f32 to vector<128x128xf32>
    %75 = arith.subf %73, %74 : vector<128x128xf32>
    %cst_45 = arith.constant 1.67326319 : f32
    %76 = vector.broadcast %cst_45 : f32 to vector<128x128xf32>
    %77 = arith.mulf %76, %75 : vector<128x128xf32>
    %78 = arith.select %70, %68, %77 : vector<128x128xi1>, vector<128x128xf32>
    %cst_46 = arith.constant 1.05070102 : f32
    %79 = vector.broadcast %cst_46 : f32 to vector<128x128xf32>
    %80 = arith.mulf %79, %78 : vector<128x128xf32>
    %c0_47 = arith.constant 0 : index
    %c0_48 = arith.constant 0 : index
    %81 = vector.load %arg15[%c0_47, %c0_48] : memref<128x256xbf16, #tpu.memory_space<vmem>>, vector<128x256xbf16>
    %82 = arith.truncf %80 : vector<128x128xf32> to vector<128x128xbf16>
    %cst_49 = arith.constant dense<0.000000e+00> : vector<128x256xf32>
    %83 = tpu.matmul %82, %81, %cst_49 {dimension_numbers = #tpu.dot_dimension_numbers<[1], [0], [0], [1], [0, 0, 1, 1], [], []>} : vector<128x128xbf16>, vector<128x256xbf16>, vector<128x256xf32> -> vector<128x256xf32>
    %c0_50 = arith.constant 0 : index
    %c0_51 = arith.constant 0 : index
    %84 = vector.load %arg16[%c0_50, %c0_51] : memref<1x256xf32, #tpu.memory_space<vmem>>, vector<1x256xf32>
    %85 = vector.broadcast %84 : vector<1x256xf32> to vector<128x256xf32>
    %86 = arith.mulf %83, %85 : vector<128x256xf32>
    %c0_52 = arith.constant 0 : index
    %c0_53 = arith.constant 0 : index
    %87 = vector.load %arg17[%c0_52, %c0_53] : memref<1x256xf32, #tpu.memory_space<vmem>>, vector<1x256xf32>
    %88 = vector.broadcast %87 : vector<1x256xf32> to vector<128x256xf32>
    %89 = arith.addf %86, %88 : vector<128x256xf32>
    %cst_54 = arith.constant 0.000000e+00 : f32
    %90 = vector.broadcast %cst_54 : f32 to vector<128x256xf32>
    %91 = arith.cmpf ogt, %89, %90 : vector<128x256xf32>
    %cst_55 = arith.constant 0.000000e+00 : f32
    %92 = vector.broadcast %cst_55 : f32 to vector<128x256xf32>
    %93 = arith.minimumf %89, %92 : vector<128x256xf32>
    %94 = math.exp %93 : vector<128x256xf32>
    %cst_56 = arith.constant 1.000000e+00 : f32
    %95 = vector.broadcast %cst_56 : f32 to vector<128x256xf32>
    %96 = arith.subf %94, %95 : vector<128x256xf32>
    %cst_57 = arith.constant 1.67326319 : f32
    %97 = vector.broadcast %cst_57 : f32 to vector<128x256xf32>
    %98 = arith.mulf %97, %96 : vector<128x256xf32>
    %99 = arith.select %91, %89, %98 : vector<128x256xi1>, vector<128x256xf32>
    %cst_58 = arith.constant 1.05070102 : f32
    %100 = vector.broadcast %cst_58 : f32 to vector<128x256xf32>
    %101 = arith.mulf %100, %99 : vector<128x256xf32>
    %c0_59 = arith.constant 0 : index
    %c0_60 = arith.constant 0 : index
    %102 = vector.load %arg18[%c0_59, %c0_60] : memref<256x1024xbf16, #tpu.memory_space<vmem>>, vector<256x1024xbf16>
    %103 = arith.truncf %101 : vector<128x256xf32> to vector<128x256xbf16>
    %cst_61 = arith.constant dense<0.000000e+00> : vector<128x1024xf32>
    %104 = tpu.matmul %103, %102, %cst_61 {dimension_numbers = #tpu.dot_dimension_numbers<[1], [0], [0], [1], [0, 0, 1, 1], [], []>} : vector<128x256xbf16>, vector<256x1024xbf16>, vector<128x1024xf32> -> vector<128x1024xf32>
    %c0_62 = arith.constant 0 : index
    %c0_63 = arith.constant 0 : index
    %105 = vector.load %arg19[%c0_62, %c0_63] : memref<1x1024xf32, #tpu.memory_space<vmem>>, vector<1x1024xf32>
    %106 = vector.broadcast %105 : vector<1x1024xf32> to vector<128x1024xf32>
    %107 = arith.mulf %104, %106 : vector<128x1024xf32>
    %c0_64 = arith.constant 0 : index
    %c0_65 = arith.constant 0 : index
    %108 = vector.load %arg20[%c0_64, %c0_65] : memref<1x1024xf32, #tpu.memory_space<vmem>>, vector<1x1024xf32>
    %109 = vector.broadcast %108 : vector<1x1024xf32> to vector<128x1024xf32>
    %110 = arith.addf %107, %109 : vector<128x1024xf32>
    %cst_66 = arith.constant 0.000000e+00 : f32
    %111 = vector.broadcast %cst_66 : f32 to vector<128x1024xf32>
    %112 = arith.cmpf ogt, %110, %111 : vector<128x1024xf32>
    %cst_67 = arith.constant 0.000000e+00 : f32
    %113 = vector.broadcast %cst_67 : f32 to vector<128x1024xf32>
    %114 = arith.minimumf %110, %113 : vector<128x1024xf32>
    %115 = math.exp %114 : vector<128x1024xf32>
    %cst_68 = arith.constant 1.000000e+00 : f32
    %116 = vector.broadcast %cst_68 : f32 to vector<128x1024xf32>
    %117 = arith.subf %115, %116 : vector<128x1024xf32>
    %cst_69 = arith.constant 1.67326319 : f32
    %118 = vector.broadcast %cst_69 : f32 to vector<128x1024xf32>
    %119 = arith.mulf %118, %117 : vector<128x1024xf32>
    %120 = arith.select %112, %110, %119 : vector<128x1024xi1>, vector<128x1024xf32>
    %cst_70 = arith.constant 1.05070102 : f32
    %121 = vector.broadcast %cst_70 : f32 to vector<128x1024xf32>
    %122 = arith.mulf %121, %120 : vector<128x1024xf32>
    %123 = vector.extract_strided_slice %122 {offsets = [0, 0], sizes = [128, 512], strides = [1, 1]} : vector<128x1024xf32> to vector<128x512xf32>
    %124 = arith.truncf %123 : vector<128x512xf32> to vector<128x512xbf16>
    %c0_71 = arith.constant 0 : index
    %c0_72 = arith.constant 0 : index
    %125 = vector.load %arg21[%c0_71, %c0_72] : memref<128x512xbf16, #tpu.memory_space<vmem>>, vector<128x512xbf16>
    tpu.vector_store %arg21[%c0_71, %c0_72], %124 {strides = array<i32>} : memref<128x512xbf16, #tpu.memory_space<vmem>>, vector<128x512xbf16>,
    %126 = vector.extract_strided_slice %122 {offsets = [0, 512], sizes = [128, 512], strides = [1, 1]} : vector<128x1024xf32> to vector<128x512xf32>
    %127 = arith.truncf %126 : vector<128x512xf32> to vector<128x512xbf16>
    %c0_73 = arith.constant 0 : index
    %c0_74 = arith.constant 0 : index
    %128 = vector.load %arg22[%c0_73, %c0_74] : memref<128x512xbf16, #tpu.memory_space<vmem>>, vector<128x512xbf16>
    tpu.vector_store %arg22[%c0_73, %c0_74], %127 {strides = array<i32>} : memref<128x512xbf16, #tpu.memory_space<vmem>>, vector<128x512xbf16>,
    %c0_75 = arith.constant 0 : index
    %c0_76 = arith.constant 0 : index
    %129 = vector.load %arg23[%c0_75, %c0_76] : memref<128x32xf32, #tpu.memory_space<vmem>>, vector<128x32xf32>
    tpu.vector_store %arg23[%c0_75, %c0_76], %57 {strides = array<i32>} : memref<128x32xf32, #tpu.memory_space<vmem>>, vector<128x32xf32>,
    %c0_77 = arith.constant 0 : index
    %c0_78 = arith.constant 0 : index
    %130 = vector.load %arg24[%c0_77, %c0_78] : memref<128x32xf32, #tpu.memory_space<vmem>>, vector<128x32xf32>
    tpu.vector_store %arg24[%c0_77, %c0_78], %48 {strides = array<i32>} : memref<128x32xf32, #tpu.memory_space<vmem>>, vector<128x32xf32>,
    %c0_79 = arith.constant 0 : index
    %c0_80 = arith.constant 0 : index
    %131 = vector.load %arg25[%c0_79, %c0_80] : memref<128x32xf32, #tpu.memory_space<vmem>>, vector<128x32xf32>
    tpu.vector_store %arg25[%c0_79, %c0_80], %54 {strides = array<i32>} : memref<128x32xf32, #tpu.memory_space<vmem>>, vector<128x32xf32>,
    return
  }
  func.func @transform_0(%arg0: i32) -> (i32, i32) {
    %c0_i32 = arith.constant 0 : i32
    %c0_i32_0 = arith.constant 0 : i32
    return %arg0, %c0_i32 : i32, i32
  }
  func.func @transform_1(%arg0: i32) -> (i32, i32) {
    %c0_i32 = arith.constant 0 : i32
    %c0_i32_0 = arith.constant 0 : i32
    return %arg0, %c0_i32 : i32, i32
  }
  func.func @transform_2(%arg0: i32) -> (i32, i32) {
    %c0_i32 = arith.constant 0 : i32
    %c0_i32_0 = arith.constant 0 : i32
    return %arg0, %c0_i32 : i32, i32
  }
  func.func @transform_3(%arg0: i32) -> (i32, i32) {
    %c0_i32 = arith.constant 0 : i32
    %c0_i32_0 = arith.constant 0 : i32
    %c0_i32_1 = arith.constant 0 : i32
    return %c0_i32, %c0_i32_0 : i32, i32
  }
  func.func @transform_4(%arg0: i32) -> (i32, i32) {
    %c0_i32 = arith.constant 0 : i32
    %c0_i32_0 = arith.constant 0 : i32
    %c0_i32_1 = arith.constant 0 : i32
    return %c0_i32, %c0_i32_0 : i32, i32
  }
  func.func @transform_5(%arg0: i32) -> (i32, i32) {
    %c0_i32 = arith.constant 0 : i32
    %c0_i32_0 = arith.constant 0 : i32
    %c0_i32_1 = arith.constant 0 : i32
    return %c0_i32, %c0_i32_0 : i32, i32
  }
  func.func @transform_6(%arg0: i32) -> (i32, i32) {
    %c0_i32 = arith.constant 0 : i32
    %c0_i32_0 = arith.constant 0 : i32
    %c0_i32_1 = arith.constant 0 : i32
    return %c0_i32, %c0_i32_0 : i32, i32
  }
  func.func @transform_7(%arg0: i32) -> (i32, i32) {
    %c0_i32 = arith.constant 0 : i32
    %c0_i32_0 = arith.constant 0 : i32
    %c0_i32_1 = arith.constant 0 : i32
    return %c0_i32, %c0_i32_0 : i32, i32
  }
  func.func @transform_8(%arg0: i32) -> (i32, i32) {
    %c0_i32 = arith.constant 0 : i32
    %c0_i32_0 = arith.constant 0 : i32
    %c0_i32_1 = arith.constant 0 : i32
    return %c0_i32, %c0_i32_0 : i32, i32
  }
  func.func @transform_9(%arg0: i32) -> (i32, i32) {
    %c0_i32 = arith.constant 0 : i32
    %c0_i32_0 = arith.constant 0 : i32
    %c0_i32_1 = arith.constant 0 : i32
    return %c0_i32, %c0_i32_0 : i32, i32
  }
  func.func @transform_10(%arg0: i32) -> (i32, i32) {
    %c0_i32 = arith.constant 0 : i32
    %c0_i32_0 = arith.constant 0 : i32
    %c0_i32_1 = arith.constant 0 : i32
    return %c0_i32, %c0_i32_0 : i32, i32
  }
  func.func @transform_11(%arg0: i32) -> (i32, i32) {
    %c0_i32 = arith.constant 0 : i32
    %c0_i32_0 = arith.constant 0 : i32
    %c0_i32_1 = arith.constant 0 : i32
    return %c0_i32, %c0_i32_0 : i32, i32
  }
  func.func @transform_12(%arg0: i32) -> (i32, i32) {
    %c0_i32 = arith.constant 0 : i32
    %c0_i32_0 = arith.constant 0 : i32
    %c0_i32_1 = arith.constant 0 : i32
    return %c0_i32, %c0_i32_0 : i32, i32
  }
  func.func @transform_13(%arg0: i32) -> (i32, i32) {
    %c0_i32 = arith.constant 0 : i32
    %c0_i32_0 = arith.constant 0 : i32
    %c0_i32_1 = arith.constant 0 : i32
    return %c0_i32, %c0_i32_0 : i32, i32
  }
  func.func @transform_14(%arg0: i32) -> (i32, i32) {
    %c0_i32 = arith.constant 0 : i32
    %c0_i32_0 = arith.constant 0 : i32
    %c0_i32_1 = arith.constant 0 : i32
    return %c0_i32, %c0_i32_0 : i32, i32
  }
  func.func @transform_15(%arg0: i32) -> (i32, i32) {
    %c0_i32 = arith.constant 0 : i32
    %c0_i32_0 = arith.constant 0 : i32
    %c0_i32_1 = arith.constant 0 : i32
    return %c0_i32, %c0_i32_0 : i32, i32
  }
  func.func @transform_16(%arg0: i32) -> (i32, i32) {
    %c0_i32 = arith.constant 0 : i32
    %c0_i32_0 = arith.constant 0 : i32
    %c0_i32_1 = arith.constant 0 : i32
    return %c0_i32, %c0_i32_0 : i32, i32
  }
  func.func @transform_17(%arg0: i32) -> (i32, i32) {
    %c0_i32 = arith.constant 0 : i32
    %c0_i32_0 = arith.constant 0 : i32
    %c0_i32_1 = arith.constant 0 : i32
    return %c0_i32, %c0_i32_0 : i32, i32
  }
  func.func @transform_18(%arg0: i32) -> (i32, i32) {
    %c0_i32 = arith.constant 0 : i32
    %c0_i32_0 = arith.constant 0 : i32
    %c0_i32_1 = arith.constant 0 : i32
    return %c0_i32, %c0_i32_0 : i32, i32
  }
  func.func @transform_19(%arg0: i32) -> (i32, i32) {
    %c0_i32 = arith.constant 0 : i32
    %c0_i32_0 = arith.constant 0 : i32
    %c0_i32_1 = arith.constant 0 : i32
    return %c0_i32, %c0_i32_0 : i32, i32
  }
  func.func @transform_20(%arg0: i32) -> (i32, i32) {
    %c0_i32 = arith.constant 0 : i32
    %c0_i32_0 = arith.constant 0 : i32
    return %arg0, %c0_i32 : i32, i32
  }
  func.func @transform_21(%arg0: i32) -> (i32, i32) {
    %c0_i32 = arith.constant 0 : i32
    %c0_i32_0 = arith.constant 0 : i32
    return %arg0, %c0_i32 : i32, i32
  }
  func.func @transform_22(%arg0: i32) -> (i32, i32) {
    %c0_i32 = arith.constant 0 : i32
    %c0_i32_0 = arith.constant 0 : i32
    return %arg0, %c0_i32 : i32, i32
  }
  func.func @transform_23(%arg0: i32) -> (i32, i32) {
    %c0_i32 = arith.constant 0 : i32
    %c0_i32_0 = arith.constant 0 : i32
    return %arg0, %c0_i32 : i32, i32
  }
  func.func @transform_24(%arg0: i32) -> (i32, i32) {
    %c0_i32 = arith.constant 0 : i32
    %c0_i32_0 = arith.constant 0 : i32
    return %arg0, %c0_i32 : i32, i32
  }
}

</mosaic_0001>

<bundles_post_ra>
// kernel: tpu_custom_call.1
= control target key start
LH: loop header
LB: loop body
LE: loop exit
PB: predicated region body
PF: predicated region fallthrough
CT: control target
= control target key end

     0   :  { %s14112_s0 = inlined_call_operand.hbm [shape: bf16[256,1024], index: 0, kind: input, shape index: {}]   ;;  %s14113_s1 = inlined_call_operand.vmem [shape: f32[256,32], index: 1, kind: input, shape index: {}]   ;;  %s14114_s2 = inlined_call_operand.vmem [shape: f32[256,128], index: 2, kind: input, shape index: {}]   ;;  %s14115_s3 = inlined_call_operand.hbm [shape: bf16[1024,256], index: 3, kind: input, shape index: {}]   ;;  %s14116_s4 = inlined_call_operand.vmem [shape: f32[1,256], index: 4, kind: input, shape index: {}]   ;;  %s14117_s5 = inlined_call_operand.hbm [shape: f32[1,256], index: 5, kind: input, shape index: {}]   ;;  %s14118_s6 = inlined_call_operand.vmem [shape: bf16[256,128], index: 6, kind: input, shape index: {}]   ;;  %s14119_s7 = inlined_call_operand.hbm [shape: f32[1,128], index: 7, kind: input, shape index: {}]   ;;  %s14120_s8 = inlined_call_operand.hbm [shape: f32[1,128], index: 8, kind: input, shape index: {}]   ;;  %s14121_s9 = inlined_call_operand.vmem [shape: bf16[128,64], index: 9, kind: input, shape index: {}]   ;;  %s14122_s10 = inlined_call_operand.vmem [shape: f32[1,64], index: 10, kind: input, shape index: {}]   ;;  %s14123_s11 = inlined_call_operand.vmem [shape: bf16[32,128], index: 11, kind: input, shape index: {}]   ;;  %s14124_s12 = inlined_call_operand.vmem [shape: f32[1,128], index: 12, kind: input, shape index: {}]   ;;  %s14125_s13 = inlined_call_operand.vmem [shape: f32[1,128], index: 13, kind: input, shape index: {}]   ;;  %s14126_s14 = inlined_call_operand.hbm [shape: bf16[128,256], index: 14, kind: input, shape index: {}]   ;;  %s14127_s15 = inlined_call_operand.vmem [shape: f32[1,256], index: 15, kind: input, shape index: {}]   ;;  %s14128_s16 = inlined_call_operand.vmem [shape: f32[1,256], index: 16, kind: input, shape index: {}]   ;;  %s14129_s17 = inlined_call_operand.hbm [shape: bf16[256,1024], index: 17, kind: input, shape index: {}]   ;;  %s14130_s18 = inlined_call_operand.vmem [shape: f32[1,1024], index: 18, kind: input, shape index: {}]   ;;  %s14131_s19 = inlined_call_operand.vmem [shape: f32[1,1024], index: 19, kind: input, shape index: {}]   ;;  %s14132_s20 = inlined_call_operand.hbm [shape: bf16[256,512], index: 20, kind: output, shape index: {0}]   ;;  %s14133_s21 = inlined_call_operand.hbm [shape: bf16[256,512], index: 21, kind: output, shape index: {1}]   ;;  %s14134_s22 = inlined_call_operand.vmem [shape: f32[256,32], index: 22, kind: output, shape index: {2}]   ;;  %s14135_s23 = inlined_call_operand.vmem [shape: f32[256,32], index: 23, kind: output, shape index: {3}]   ;;  %s14136_s24 = inlined_call_operand.vmem [shape: f32[256,32], index: 24, kind: output, shape index: {4}]  }
   0x1   :  { %14204 = sst [smem:[#allocation52_spill]] %s14112_s0 }
   0x2   :  { %14205 = sst [smem:[#allocation53_spill]] %s14113_s1 }
   0x3   :  { %14206 = sst [smem:[#allocation54_spill]] %s14114_s2 }
   0x4   :  { %14207 = sst [smem:[#allocation55_spill]] %s14115_s3 }
   0x5   :  { %14208 = sst [smem:[#allocation56_spill]] %s14116_s4 }
   0x6   :  { %14209 = sst [smem:[#allocation57_spill]] %s14117_s5 }
   0x7   :  { %14210 = sst [smem:[#allocation58_spill]] %s14118_s6 }
   0x8   :  { %14211 = sst [smem:[#allocation59_spill]] %s14119_s7 }
   0x9   :  { %14212 = sst [smem:[#allocation60_spill]] %s14120_s8 }
   0xa   :  { %14213 = sst [smem:[#allocation61_spill]] %s14121_s9 }
   0xb   :  { %14214 = sst [smem:[#allocation62_spill]] %s14122_s10 }
   0xc   :  { %14215 = sst [smem:[#allocation63_spill]] %s14124_s12 }
   0xd   :  { %14216 = sst [smem:[#allocation64_spill]] %s14125_s13 }
   0xe   :  { %14217 = sst [smem:[#allocation65_spill]] %s14127_s15 }
   0xf   :  { %14218 = sst [smem:[#allocation66_spill]] %s14128_s16 }
  0x10   :  { %14219 = sst [smem:[#allocation67_spill]] %s14130_s18 }
  0x11   :  { %14220 = sst [smem:[#allocation68_spill]] %s14131_s19 }
  0x12   :  { %14221 = sst [smem:[#allocation69_spill]] %s14132_s20 }
  0x13   :  { %14222 = sst [smem:[#allocation70_spill]] %s14133_s21 }
  0x14   :  { %14223 = sst [smem:[#allocation71_spill]] %s14136_s24 }
  0x15   :  { %30 = vsyncpa [#allocation3], 0 }
  0x16   :  { %32 = vsyncpa [#allocation3 + $0x1], 0 }
  0x17   :  { %33 = vsyncpa [#allocation6], 0 }
  0x18   :  { %34 = vsyncpa [#allocation9], 0 }
  0x19   :  { %35 = vsyncpa [#allocation12], 0 }
  0x1a   :  { %36 = vsyncpa [#allocation4], 0 }
  0x1b   :  { %38 = vsyncpa [#allocation4 + $0x1], 0 }
  0x1c   :  { %39 = vsyncpa [#allocation16], 0 }
  0x1d   :  { %41 = vsyncpa [#allocation16 + $0x1], 0  ;;  %s10441_s5 = smov 0   ;;  %s10443_s26 = smov 0  }
  0x1e   :  { %s10445_s27 = smov 0   ;;  %s10447_s28 = smov 0  }
  0x1f LB: > { %s10298_s6 = smov [#allocation5]   ;;  %s10462_s29 = sadd.s32 4294967295, %s10296_s28   ;;  %s10296_s28 = sphi %s10447_s28, %s14430_s28   ;;  %s10292_s27 = sphi %s10445_s27, %s14429_s27   ;;  %s10288_s26 = sphi %s10443_s26, %s14428_s26   ;;  %s10284_s5 = sphi %s10441_s5, %s14427_s5  }
  0x20   : > { %s629_s2 = sshll.u32 %s10298_s6, 4  ;;  %p8098_p0 = scmp.ge.s32.totalorder %s10296_s28, 1  ;;  %s10467_s2 = int_to_ptr.vmem [resolvable:$true] %s629_s2 }
  0x21   : > { %p14149_p1 = scmp.eq.s32.totalorder %s10462_s29, 0  ;;  %p617_p2 = scmp.lt.s32.totalorder %s10296_s28, 3 }
  0x22   : > { %s10299_s7 = smov [#allocation8]   ;;  %s10300_s25 = smov [#allocation11]  }
  0x23   : > { %p10469_p3 = pnand %p8098_p0, %p617_p2  ;;  %s660_s30 = sshll.u32 %s10299_s7, 4  ;;  %s10482_s30 = int_to_ptr.vmem [resolvable:$true] %s660_s30 }
  0x24   : > { %s696_s8 = sshll.u32 %s10300_s25, 4  ;;  %s14226_s6 = sld [smem:[#allocation55_spill]]  ;;  %s10484_s8 = int_to_ptr.vmem [resolvable:$true] %s696_s8 }
  0x25   : > { %s14224_s0 = scalar_select %p10469_p3, 1, 0 }
  0x26   : > { %p9173_p5 = pneg %p10469_p3 }
  0x28   : > { %p10478_p6 = pnand %p9173_p5, %p14149_p1 }
  0x2a   : > { %s9988_s21 = scalar_lea.hbm %s14226_s6, 16384  ;;  %p10494_p8 = pneg %p10478_p6 }
  0x2b   : > { %p9989_p7 = scmp.ne.s32.totalorder %s14226_s6, %s9988_s21  ;;  %p9995_p11 = scmp.lt.u32.totalorder %s9988_s21, %s14226_s6 }
  0x2d   : > { %p9991_p9 = pnand %p10494_p8, %p9989_p7 }
  0x2f   : > { %p9992_p10 = pneg %p9991_p9 }
  0x31   : > { %p9997_p12 = pnand %p9995_p11, %p9992_p10 }
  0x33   : > { %10000 = shalt.err (!%p9997_p12)
}
  0x34   : > { %s10001_s19 = scalar_lea.vmem %s10467_s2, 16384  ;;  %p10009_p5 = scmp.lt.s32.totalorder %s10467_s2, %s10467_s2 }
  0x35   : > { %p10002_p13 = scmp.ne.s32.totalorder %s10467_s2, %s10001_s19  ;;  %p10010_p4 = scmp.lt.s32.totalorder %s10001_s19, %s10001_s19 }
  0x37   : > { %p10004_p0 = pnand %p10002_p13, %p10494_p8  ;;  %p10011_p7 = por %p10010_p4, %p10009_p5 }
  0x39   : > { %p10005_p2 = pneg %p10004_p0 }
  0x3b   : > { %p10012_p9 = pnand %p10011_p7, %p10005_p2 }
  0x3d   : > { %10015 = shalt.err (!%p10012_p9)
}
  0x3e   : > { %s10301_s20 = smov 128   ;;  %s10302_s18 = smov 8  }
  0x3f   : > { %9176 = dma.hbm_to_vmem [thread:$0]  (!%p10478_p6), %s14226_s6, 16384, %s10467_s2, [#allocation6], %s10301_s20, %s10301_s20, %s10302_s18  }
  0x40   : > { %s14228_s16 = sld [smem:[#allocation59_spill]] }
  0x46   : > { %s10016_s19 = scalar_lea.hbm %s14228_s16, 16 }
  0x47   : > { %p10017_p4 = scmp.ne.s32.totalorder %s14228_s16, %s10016_s19  ;;  %p10023_p12 = scmp.lt.u32.totalorder %s10016_s19, %s14228_s16 }
  0x49   : > { %p10019_p10 = pnand %p10017_p4, %p10494_p8 }
  0x4b   : > { %p10020_p11 = pneg %p10019_p10 }
  0x4d   : > { %p10025_p13 = pnand %p10023_p12, %p10020_p11 }
  0x4f   : > { %10028 = shalt.err (!%p10025_p13)
}
  0x50   : > { %s10029_s2 = scalar_lea.vmem %s10482_s30, 16  ;;  %s10036_s13 = scalar_lea.vmem %s10482_s30, 32 }
  0x51   : > { %p10030_p0 = scmp.ne.s32.totalorder %s10482_s30, %s10029_s2  ;;  %p10037_p7 = scmp.lt.s32.totalorder %s10482_s30, %s10482_s30 }
  0x52   : > { %p10038_p9 = scmp.lt.s32.totalorder %s10036_s13, %s10029_s2 }
  0x53   : > { %p10032_p2 = pnand %p10030_p0, %p10494_p8 }
  0x54   : > { %p10039_p4 = por %p10038_p9, %p10037_p7 }
  0x55   : > { %p10033_p5 = pneg %p10032_p2 }
  0x57   : > { %p10040_p10 = pnand %p10039_p4, %p10033_p5 }
  0x59   : > { %10043 = shalt.err (!%p10040_p10)
}
  0x5a   : > { %9182 = dma.hbm_to_vmem [thread:$0]  (!%p10478_p6), %s14228_s16, 16, %s10482_s30, [#allocation9]  }
  0x5b   : > { %s10044_s4 = scalar_lea.hbm %s14126_s14, 2048 }
  0x5c   : > { %p10045_p11 = scmp.ne.s32.totalorder %s14126_s14, %s10044_s4  ;;  %p10051_p0 = scmp.lt.u32.totalorder %s10044_s4, %s14126_s14 }
  0x5e   : > { %p10047_p12 = pnand %p10045_p11, %p10494_p8 }
  0x60   : > { %p10048_p13 = pneg %p10047_p12 }
  0x62   : > { %p10053_p2 = pnand %p10051_p0, %p10048_p13 }
  0x64   : > { %10056 = shalt.err (!%p10053_p2)
}
  0x65   : > { %s10057_s30 = scalar_lea.vmem %s10484_s8, 2048  ;;  %p10065_p4 = scmp.lt.s32.totalorder %s10484_s8, %s10484_s8 }
  0x66   : > { %p10058_p5 = scmp.ne.s32.totalorder %s10484_s8, %s10057_s30  ;;  %p10066_p10 = scmp.lt.s32.totalorder %s10057_s30, %s10057_s30 }
  0x68   : > { %p10060_p7 = pnand %p10058_p5, %p10494_p8  ;;  %p10067_p11 = por %p10066_p10, %p10065_p4 }
  0x6a   : > { %p10061_p9 = pneg %p10060_p7 }
  0x6c   : > { %p10068_p12 = pnand %p10067_p11, %p10061_p9 }
  0x6e   : > { %10071 = shalt.err (!%p10068_p12)
}
  0x6f   : > { %9188 = dma.hbm_to_vmem [thread:$0]  (!%p10478_p6), %s14126_s14, 2048, %s10484_s8, [#allocation12], %s10301_s20, %s10301_s20, %s10302_s18  }
  0x70   : > { %s10303_s15 = smov [#allocation7]   ;;  %s10304_s21 = smov [#allocation10]  }
  0x71   : > { %s646_s24 = sshll.u32 %s10303_s15, 4  ;;  %s671_s4 = sshll.u32 %s10304_s21, 4  ;;  %s647_s24 = int_to_ptr.vmem [resolvable:$true] %s646_s24  ;;  %s672_s4 = int_to_ptr.vmem [resolvable:$true] %s671_s4 }
  0x72   : > { %s14229_s19 = sld [smem:[#allocation57_spill]] }
  0x78   : > { %s10072_s2 = scalar_lea.hbm %s14229_s19, 32 }
  0x79   : > { %p10073_p13 = scmp.ne.s32.totalorder %s14229_s19, %s10072_s2  ;;  %p10079_p5 = scmp.lt.u32.totalorder %s10072_s2, %s14229_s19 }
  0x7b   : > { %p10075_p0 = pnand %p10073_p13, %p10494_p8 }
  0x7d   : > { %p10076_p2 = pneg %p10075_p0 }
  0x7f   : > { %p10081_p7 = pnand %p10079_p5, %p10076_p2 }
  0x81   : > { %10084 = shalt.err (!%p10081_p7)
}
  0x82   : > { %s10085_s8 = scalar_lea.vmem %s647_s24, 32  ;;  %p10093_p11 = scmp.lt.s32.totalorder %s647_s24, %s647_s24 }
  0x83   : > { %p10086_p9 = scmp.ne.s32.totalorder %s647_s24, %s10085_s8  ;;  %p10094_p12 = scmp.lt.s32.totalorder %s10085_s8, %s10085_s8 }
  0x85   : > { %p10088_p4 = pnand %p10086_p9, %p10494_p8  ;;  %p10095_p1 = por %p10094_p12, %p10093_p11 }
  0x87   : > { %p10089_p10 = pneg %p10088_p4 }
  0x89   : > { %p10096_p3 = pnand %p10095_p1, %p10089_p10 }
  0x8b   : > { %10099 = shalt.err (!%p10096_p3)
}
  0x8c   : > { %9179 = dma.hbm_to_vmem [thread:$0]  (!%p10478_p6), %s14229_s19, 32, %s647_s24, [#allocation6]  }
  0x8d   : > { %s14230_s12 = sld [smem:[#allocation60_spill]] }
  0x93   : > { %s10100_s15 = scalar_lea.hbm %s14230_s12, 16 }
  0x94   : > { %p10101_p13 = scmp.ne.s32.totalorder %s14230_s12, %s10100_s15  ;;  %p10107_p3 = scmp.lt.u32.totalorder %s10100_s15, %s14230_s12 }
  0x96   : > { %p10103_p0 = pnand %p10101_p13, %p10494_p8 }
  0x98   : > { %p10104_p1 = pneg %p10103_p0 }
  0x9a   : > { %p10109_p2 = pnand %p10107_p3, %p10104_p1 }
  0x9c   : > { %10112 = shalt.err (!%p10109_p2)
}
  0x9d   : > { %s10113_s30 = scalar_lea.vmem %s672_s4, 16  ;;  %s10120_s24 = scalar_lea.vmem %s672_s4, 32 }
  0x9e   : > { %p10114_p5 = scmp.ne.s32.totalorder %s672_s4, %s10113_s30  ;;  %p10121_p4 = scmp.lt.s32.totalorder %s672_s4, %s672_s4 }
  0x9f   : > { %p10122_p10 = scmp.lt.s32.totalorder %s10120_s24, %s10113_s30 }
  0xa0   : > { %p10116_p7 = pnand %p10114_p5, %p10494_p8 }
  0xa1   : > { %p10123_p11 = por %p10122_p10, %p10121_p4 }
  0xa2   : > { %p10117_p9 = pneg %p10116_p7 }
  0xa4   : > { %p10124_p12 = pnand %p10123_p11, %p10117_p9 }
  0xa6   : > { %10127 = shalt.err (!%p10124_p12)
}
  0xa7   : > { %9185 = dma.hbm_to_vmem [thread:$0]  (!%p10478_p6), %s14230_s12, 16, %s672_s4, [#allocation9]  }
  0xa8   : > { %s10305_s6 = smov [#allocation13]   ;;  %s10128_s15 = scalar_lea.hbm %s14129_s17, 16384 }
  0xa9   : > { %s715_s20 = sshll.u32 %s10305_s6, 4  ;;  %p10129_p13 = scmp.ne.s32.totalorder %s14129_s17, %s10128_s15  ;;  %s716_s20 = int_to_ptr.vmem [resolvable:$true] %s715_s20 }
  0xaa   : > { %p10135_p3 = scmp.lt.u32.totalorder %s10128_s15, %s14129_s17 }
  0xab   : > { %p10131_p0 = pnand %p10129_p13, %p10494_p8 }
  0xad   : > { %p10132_p1 = pneg %p10131_p0 }
  0xaf   : > { %p10137_p2 = pnand %p10135_p3, %p10132_p1 }
  0xb1   : > { %10140 = shalt.err (!%p10137_p2)
}
  0xb2   : > { %s10141_s4 = scalar_lea.vmem %s716_s20, 16384  ;;  %p10149_p4 = scmp.lt.s32.totalorder %s716_s20, %s716_s20 }
  0xb3   : > { %p10142_p5 = scmp.ne.s32.totalorder %s716_s20, %s10141_s4  ;;  %p10150_p10 = scmp.lt.s32.totalorder %s10141_s4, %s10141_s4 }
  0xb5   : > { %p10144_p7 = pnand %p10142_p5, %p10494_p8  ;;  %p10151_p11 = por %p10150_p10, %p10149_p4 }
  0xb7   : > { %p10145_p9 = pneg %p10144_p7 }
  0xb9   : > { %p10152_p12 = pnand %p10151_p11, %p10145_p9 }
  0xbb   : > { %10155 = shalt.err (!%p10152_p12)
}
  0xbc   : > { %s14151_s30 = smov 512   ;;  %s14152_s7 = smov 32  }
  0xbd   : > { %9191 = dma.hbm_to_vmem [thread:$0]  (!%p10478_p6), %s14129_s17, 16384, %s716_s20, [#allocation12], %s14151_s30, %s14151_s30, %s14152_s7  }
  0xbe   : > { %s8097_s8 = sadd.s32 4294967294, %s10296_s28   ;;  %s10627_s6 = sadd.s32 1, %s10296_s28  }
  0xbf   : > { %s51_s16 = ssub.s32 %s10296_s28, %s10627_s6  ;;  %s54_s18 = sadd.s32 1, %s10292_s27 }
  0xc0   : > { %p52_p8 = scmp.eq.s32.totalorder %s51_s16, 0  ;;  %p61_p13 = scmp.ne.s32.totalorder %s10292_s27, %s10288_s26 }
  0xc1   : > { %p62_p0 = scmp.eq.s32.totalorder %s10296_s28, 0  ;;  %p67_p1 = scmp.ne.s32.totalorder %s10288_s26, %s10284_s5 }
  0xc2   : > { %s10638_s3 = scalar_select %p52_p8, %s10292_s27, %s54_s18  }
  0xc3   : > { %p10640_p3 = por %p62_p0, %p61_p13  ;;  %p14232_p2 = scmp.eq.s32.totalorder %s10462_s29, 0 }
  0xc4   : > { %p500_p5 = scmp.eq.s32.totalorder %s10462_s29, 1  ;;  %p506_p7 = scmp.eq.s32.totalorder %s8097_s8, 1 }
  0xc5   : > { %p10646_p6 = por %p14232_p2, %p67_p1  ;;  %p9209_p9 = scmp.lt.s32.totalorder %s10296_s28, 2 }
  0xc6   : > { %s735_s21 = sand.u32 1, %s10292_s27   ;;  %p10653_p4 = por %p500_p5, %p61_p13 }
  0xc7   : > { %p10657_p10 = por %p506_p7, %p67_p1  ;;  %s8106_s2 = sshll.u32 %s735_s21, 9 }
  0xc8   : > { %s14234_s1 = scalar_select %p10653_p4, 1, 0 }
  0xc9   : > { %s14235_s25 = scalar_select %p10657_p10, 1, 0 }
  0xca   : > { %s8804_s4 = sshll.u32 %s10296_s28, 13  ;;  %s14236_s16 = sld [smem:[#allocation52_spill]] }
  0xcb   : > { %s739_s8 = scalar_lea.vmem [#allocation2], %s8106_s2  ;;  %p10671_p11 = pnand %p9209_p9, %p10640_p3 }
  0xcc   : > { %s747_s30 = sshll.u32 %s739_s8, 4  ;;  %s10675_s12 = scalar_lea.sflag [#allocation3], %s735_s21  ;;  %s10667_s30 = int_to_ptr.vmem [resolvable:$true] %s747_s30 }
  0xcd   : > { %p10158_p8 = pneg %p10671_p11 }
  0xd0   : > { %s10665_s18 = scalar_lea.hbm %s14236_s16, %s8804_s4  ;;  %s10161_s15 = scalar_lea.hbm %s14236_s16, 16384 }
  0xd1   : > { %s10156_s24 = scalar_lea.hbm %s10665_s18, 8192  ;;  %p10162_p1 = scmp.lt.u32.totalorder %s10665_s18, %s14236_s16 }
  0xd2   : > { %p10157_p12 = scmp.ne.s32.totalorder %s10665_s18, %s10156_s24  ;;  %p10163_p3 = scmp.lt.u32.totalorder %s10161_s15, %s10156_s24 }
  0xd3   : > { %p10165_p5 = scmp.lt.u32.totalorder %s10156_s24, %s10665_s18 }
  0xd4   : > { %p10159_p13 = pnand %p10158_p8, %p10157_p12  ;;  %p10164_p2 = por %p10163_p3, %p10162_p1 }
  0xd6   : > { %p10160_p0 = pneg %p10159_p13  ;;  %p10166_p7 = por %p10165_p5, %p10164_p2 }
  0xd8   : > { %p10167_p9 = pnand %p10166_p7, %p10160_p0 }
  0xda   : > { %10170 = shalt.err (!%p10167_p9)
}
  0xdb   : > { %s10171_s21 = scalar_lea.vmem %s10667_s30, 8192  ;;  %s10308_s2 = smov [#allocation2]  }
  0xdc   : > { %p10172_p12 = scmp.ne.s32.totalorder %s10667_s30, %s10171_s21  ;;  %s10176_s4 = sshll.u32 %s10308_s2, 4  ;;  %s10177_s4 = int_to_ptr.vmem [resolvable:$false] %s10176_s4 }
  0xdd   : > { %s10178_s13 = scalar_lea.vmem %s10177_s4, 16384  ;;  %p10179_p4 = scmp.lt.s32.totalorder %s10667_s30, %s10177_s4 }
  0xde   : > { %p10174_p13 = pnand %p10172_p12, %p10158_p8  ;;  %p10180_p1 = scmp.lt.s32.totalorder %s10178_s13, %s10171_s21 }
  0xe0   : > { %p10175_p10 = pneg %p10174_p13  ;;  %p10181_p3 = por %p10180_p1, %p10179_p4 }
  0xe2   : > { %p10182_p2 = pnand %p10181_p3, %p10175_p10 }
  0xe4   : > { %10185 = shalt.err (!%p10182_p2)
}
  0xe5   : > { %s14238_s24 = smov 32   ;;  %s14239_s15 = smov 512  }
  0xe6   : > { %9195 = dma.hbm_to_vmem [thread:$0]  (!%p10671_p11), %s10665_s18, 8192, %s10667_s30, %s10675_s12, %s14239_s15, %s14239_s15, %s14238_s24  }
  0xe7   : > { %p14240_p8 = scmp.ne.s32.totalorder %s14224_s0, 0 }
  0xe9   : > { %777 = sbr.rel (%p14240_p8) target bundleno = 2474 (0x9aa), region = 100 }
  0xf0   : > { %s10709_s8 = sand.u32 1, %s10288_s26  }
  0xf1   : > { %s8111_s21 = sshll.u32 %s10709_s8, 9  ;;  %s780_s2 = scalar_lea.sflag [#allocation3], %s10709_s8 }
  0xf2   : > { %s10713_s4 = scalar_lea.vmem [#allocation2], %s8111_s21 }
  0xf3   : > { %10259 = dma.done.wait (%p10646_p6), %s780_s2, 8192  }
  0xf4   : > { %10261 = vsyncadd (%p10646_p6), %s780_s2, 4294959104  ;;  %p14241_p4 = scmp.eq.s32.totalorder %s10462_s29, 0 }
  0xf6   : > { %10263 = dma.done.wait (%p14241_p4), [#allocation6], 16416   ;;  %p14242_p10 = pmov %p14241_p4 }
  0xf7   : > { %p14243_p11 = pmov %p14241_p4 }
  0xf8   : > { %10265 = vsyncadd (%p14242_p10), [#allocation6], 4294950880 }
  0xf9   : > { %10267 = dma.done.wait (%p14243_p11), [#allocation9], 32   ;;  %p14244_p0 = pmov %p14241_p4 }
  0xfb   : > { %10269 = vsyncadd (%p14244_p0), [#allocation9], 4294967264  ;;  %p14245_p5 = pmov %p14244_p0 }
  0xfc   : > { %p14246_p7 = pmov %p14244_p0 }
  0xfd   : > { %10271 = dma.done.wait (%p14245_p5), [#allocation12], 18432  }
  0xfe   : > { %10273 = vsyncadd (%p14246_p7), [#allocation12], 4294948864  ;;  %v9264_v0 = vld [vmem:[#allocation5 + $0x4] ss:$8 sps:$4 sm:$0xff]   ;;  %v9266_v1 = vld [vmem:[#allocation5] ss:$8 sps:$4 sm:$0xff]  }
  0xff   : > { %2088 = vmatprep.subr.bf16.mxu0 %v9264_v0  ;;  %v9267_v2 = vld [vmem:[#allocation5 + $0x14] ss:$8 sps:$4 sm:$0xff]   ;;  %v9269_v3 = vld [vmem:[#allocation5 + $0x10] ss:$8 sps:$4 sm:$0xff]   ;;  %v9270_v4 = vld [vmem:[#allocation5 + $0x24] ss:$8 sps:$4 sm:$0xff]  }
 0x100   : > { %2089 = vmatpush1.bf16.msra.mxu0 %v9266_v1  ;;  %v9272_v5 = vld [vmem:[#allocation5 + $0x20] ss:$8 sps:$4 sm:$0xff]   ;;  %v9273_v6 = vld [vmem:[#allocation5 + $0x34] ss:$8 sps:$4 sm:$0xff]   ;;  %v9275_v7 = vld [vmem:[#allocation5 + $0x30] ss:$8 sps:$4 sm:$0xff]  }
 0x101   : > { %2090 = vmatprep.subr.bf16.mxu0 %v9267_v2  ;;  %v9276_v8 = vld [vmem:[#allocation5 + $0x44] ss:$8 sps:$4 sm:$0xff]   ;;  %v9278_v9 = vld [vmem:[#allocation5 + $0x40] ss:$8 sps:$4 sm:$0xff]   ;;  %v9279_v10 = vld [vmem:[#allocation5 + $0x54] ss:$8 sps:$4 sm:$0xff]  }
 0x102   : > { %v9281_v11 = vld [vmem:[#allocation5 + $0x50] ss:$8 sps:$4 sm:$0xff]   ;;  %v9282_v12 = vld [vmem:[#allocation5 + $0x64] ss:$8 sps:$4 sm:$0xff]   ;;  %v9284_v16 = vld [vmem:[#allocation5 + $0x60] ss:$8 sps:$4 sm:$0xff]  }
 0x103   : > { %v936_v13 = vld [vmem:[%s10713_s4] sm:$0xff]  ;;  %v9285_v17 = vld [vmem:[#allocation5 + $0x74] ss:$8 sps:$4 sm:$0xff]   ;;  %v9287_v18 = vld [vmem:[#allocation5 + $0x70] ss:$8 sps:$4 sm:$0xff]   ;;  %s14247_s30 = sld [smem:[#allocation58_spill]] }
 0x104   : > { %2091 = vmatpush1.bf16.msra.mxu0 %v9269_v3  ;;  %v940_v14 = vld [vmem:[%s10713_s4 + $0x20] sm:$0xff]  ;;  %v9291_v21 = vld [vmem:[#allocation5 + $0x94] ss:$8 sps:$4 sm:$0xff]   ;;  %v9293_v22 = vld [vmem:[#allocation5 + $0x90] ss:$8 sps:$4 sm:$0xff]   ;;  %s14248_s9 = sld [smem:[#allocation61_spill]] }
 0x105   : > { %2092 = vmatprep.subr.bf16.mxu0 %v9270_v4  ;;  %v8131_v15 = vcombine.high %v936_v13, %v940_v14  ;;  %v9288_v19 = vld [vmem:[#allocation5 + $0x84] ss:$8 sps:$4 sm:$0xff]   ;;  %v9290_v20 = vld [vmem:[#allocation5 + $0x80] ss:$8 sps:$4 sm:$0xff]   ;;  %v9297_v25 = vld [vmem:[#allocation5 + $0xb4] ss:$8 sps:$4 sm:$0xff]   ;;  %v8130_v38 = vcombine.low %v936_v13, %v940_v14 }
 0x106   : > { %v9294_v23 = vld [vmem:[#allocation5 + $0xa4] ss:$8 sps:$4 sm:$0xff]   ;;  %v9296_v24 = vld [vmem:[#allocation5 + $0xa0] ss:$8 sps:$4 sm:$0xff]   ;;  %v9299_v26 = vld [vmem:[#allocation5 + $0xb0] ss:$8 sps:$4 sm:$0xff]  }
 0x107   : > { %2120 = vmatprep.mubr.bf16.mxu0 %v8131_v15  ;;  %v9300_v27 = vld [vmem:[#allocation5 + $0xc4] ss:$8 sps:$4 sm:$0xff]   ;;  %v9302_v28 = vld [vmem:[#allocation5 + $0xc0] ss:$8 sps:$4 sm:$0xff]   ;;  %v9303_v29 = vld [vmem:[#allocation5 + $0xd4] ss:$8 sps:$4 sm:$0xff]  }
 0x108   : > { %2093 = vmatpush1.bf16.msra.mxu0 %v9272_v5  ;;  %v9305_v30 = vld [vmem:[#allocation5 + $0xd0] ss:$8 sps:$4 sm:$0xff]   ;;  %v9306_v31 = vld [vmem:[#allocation5 + $0xe4] ss:$8 sps:$4 sm:$0xff]   ;;  %v9308_v32 = vld [vmem:[#allocation5 + $0xe0] ss:$8 sps:$4 sm:$0xff]  }
 0x109   : > { %2094 = vmatprep.subr.bf16.mxu0 %v9273_v6  ;;  %v9309_v33 = vld [vmem:[#allocation5 + $0xf4] ss:$8 sps:$4 sm:$0xff]   ;;  %v9311_v34 = vld [vmem:[#allocation5 + $0xf0] ss:$8 sps:$4 sm:$0xff]   ;;  %v9314_v35 = vld [vmem:[#allocation5 + $0x104] ss:$8 sps:$4 sm:$0xff]  }
 0x10a   : > { %v944_v36 = vld [vmem:[%s10713_s4 + $0x40] sm:$0xff]  ;;  %v9317_v41 = vld [vmem:[#allocation5 + $0x114] ss:$8 sps:$4 sm:$0xff]   ;;  %v9315_v42 = vld [vmem:[#allocation5 + $0x110] ss:$8 sps:$4 sm:$0xff]   ;;  %s14251_s20 = sld [smem:[#allocation56_spill]] }
 0x10b   : > { %v948_v37 = vld [vmem:[%s10713_s4 + $0x60] sm:$0xff]  ;;  %v9323_v49 = vld [vmem:[#allocation5 + $0x134] ss:$8 sps:$4 sm:$0xff]   ;;  %v9321_v50 = vld [vmem:[#allocation5 + $0x130] ss:$8 sps:$4 sm:$0xff]   ;;  %s8120_s15 = sshll.u32 %s10462_s29, 4 }
 0x10c   : > { %2095 = vmatpush1.bf16.msra.mxu0 %v9275_v7  ;;  %v9312_v39 = vld [vmem:[#allocation5 + $0x100] ss:$8 sps:$4 sm:$0xff]   ;;  %v8139_v40 = vcombine.high %v944_v36, %v948_v37  ;;  %v9320_v43 = vld [vmem:[#allocation5 + $0x124] ss:$8 sps:$4 sm:$0xff]   ;;  %v8138_v46 = vcombine.low %v944_v36, %v948_v37  ;;  %v9329_v57 = vld [vmem:[#allocation5 + $0x154] ss:$8 sps:$4 sm:$0xff]  }
 0x10d   : > { %2096 = vmatprep.subr.bf16.mxu0 %v9276_v8  ;;  %v952_v44 = vld [vmem:[%s10713_s4 + $0x80] sm:$0xff]  ;;  %v9327_v58 = vld [vmem:[#allocation5 + $0x150] ss:$8 sps:$4 sm:$0xff]   ;;  %v9335_v1 = vld [vmem:[#allocation5 + $0x174] ss:$8 sps:$4 sm:$0xff]   ;;  %p904_p6 = scmp.lt.s32.totalorder %s8120_s15, 31 }
 0x10e   : > { %v956_v45 = vld [vmem:[%s10713_s4 + $0xa0] sm:$0xff]  ;;  %v9333_v2 = vld [vmem:[#allocation5 + $0x170] ss:$8 sps:$4 sm:$0xff]   ;;  %v945_v36 = vld [vmem:[%s10713_s4 + $0x48] sm:$0xff]  ;;  %s14253_s0 = sld [smem:[#allocation53_spill]]  ;;  %s10309_s7 = smov 32  }
 0x10f   : > { %v9318_v47 = vld [vmem:[#allocation5 + $0x120] ss:$8 sps:$4 sm:$0xff]   ;;  %v8147_v48 = vcombine.high %v952_v44, %v956_v45  ;;  %v9326_v51 = vld [vmem:[#allocation5 + $0x144] ss:$8 sps:$4 sm:$0xff]   ;;  %v8146_v54 = vcombine.low %v952_v44, %v956_v45  ;;  %s14432_s15 = smov (!%p904_p6, %s8120_s15), 31  ;;  %s14254_s10 = sld [smem:[#allocation62_spill]] }
 0x110   : > { %2097 = vmatpush1.bf16.msra.mxu0 %v9278_v9  ;;  %v960_v52 = vld [vmem:[%s10713_s4 + $0xc0] sm:$0xff]  ;;  %v9341_v9 = vld [vmem:[#allocation5 + $0x194] ss:$8 sps:$4 sm:$0xff]   ;;  %v949_v37 = vld [vmem:[%s10713_s4 + $0x68] sm:$0xff]  ;;  %s11174_s21 = sshll.u32 %s14432_s15, 3  ;;  %s14255_s2 = sld [smem:[#allocation71_spill]] }
 0x111   : > { %2098 = vmatprep.subr.bf16.mxu0 %v9279_v10  ;;  %v964_v53 = vld [vmem:[%s10713_s4 + $0xe0] sm:$0xff]  ;;  %v9339_v10 = vld [vmem:[#allocation5 + $0x190] ss:$8 sps:$4 sm:$0xff]   ;;  %v953_v44 = vld [vmem:[%s10713_s4 + $0x88] sm:$0xff]  ;;  %s11492_s13 = scalar_lea.vmem %s14134_s22, %s11174_s21  ;;  %s14257_s24 = sld [smem:[#allocation63_spill]] }
 0x112   : > { %v9324_v55 = vld [vmem:[#allocation5 + $0x140] ss:$8 sps:$4 sm:$0xff]   ;;  %v8155_v56 = vcombine.high %v960_v52, %v964_v53  ;;  %v9332_v59 = vld [vmem:[#allocation5 + $0x164] ss:$8 sps:$4 sm:$0xff]   ;;  %v8154_v62 = vcombine.low %v960_v52, %v964_v53  ;;  %s14262_s18 = sld [smem:[#allocation66_spill]]  ;;  %s14200_s15 = sshll.u32 %s10462_s29, 12 }
 0x113   : > { %v968_v60 = vld [vmem:[%s10713_s4 + $0x100] sm:$0xff]  ;;  %v957_v45 = vld [vmem:[%s10713_s4 + $0xa8] sm:$0xff]  ;;  %p14406_p12 = scmp.ne.s32.totalorder %s14234_s1, 0 }
 0x114   : > { %2099 = vmatpush1.bf16.msra.mxu0 %v9281_v11  ;;  %v972_v61 = vld [vmem:[%s10713_s4 + $0x120] sm:$0xff]  ;;  %v961_v52 = vld [vmem:[%s10713_s4 + $0xc8] sm:$0xff]  ;;  %s11180_s12 = scalar_lea.vmem %s14253_s0, %s11174_s21  ;;  %s8118_s0 = sshll.u32 %s10709_s8, 8 }
 0x115   : > { %2100 = vmatprep.subr.bf16.mxu0 %v9282_v12  ;;  %v9330_v63 = vld [vmem:[#allocation5 + $0x160] ss:$8 sps:$4 sm:$0xff]   ;;  %v8163_v0 = vcombine.high %v968_v60, %v972_v61  ;;  %v9338_v3 = vld [vmem:[#allocation5 + $0x184] ss:$8 sps:$4 sm:$0xff]   ;;  %v8162_v6 = vcombine.low %v968_v60, %v972_v61 }
 0x116   : > { %v976_v4 = vld [vmem:[%s10713_s4 + $0x140] sm:$0xff]  ;;  %v965_v53 = vld [vmem:[%s10713_s4 + $0xe8] sm:$0xff] }
 0x117   : > { %v980_v5 = vld [vmem:[%s10713_s4 + $0x160] sm:$0xff]  ;;  %v969_v60 = vld [vmem:[%s10713_s4 + $0x108] sm:$0xff] }
 0x118   : > { %2101 = vmatpush1.bf16.msra.mxu0 %v9284_v16  ;;  %v9336_v7 = vld [vmem:[#allocation5 + $0x180] ss:$8 sps:$4 sm:$0xff]   ;;  %v8171_v8 = vcombine.high %v976_v4, %v980_v5  ;;  %v9344_v11 = vld [vmem:[#allocation5 + $0x1a4] ss:$8 sps:$4 sm:$0xff]   ;;  %v8170_v14 = vcombine.low %v976_v4, %v980_v5 }
 0x119   : > { %2102 = vmatprep.subr.bf16.mxu0 %v9285_v17  ;;  %v984_v12 = vld [vmem:[%s10713_s4 + $0x180] sm:$0xff]  ;;  %v9347_v17 = vld [vmem:[#allocation5 + $0x1b4] ss:$8 sps:$4 sm:$0xff]   ;;  %v973_v61 = vld [vmem:[%s10713_s4 + $0x128] sm:$0xff] }
 0x11a   : > { %v988_v13 = vld [vmem:[%s10713_s4 + $0x1a0] sm:$0xff]  ;;  %v977_v4 = vld [vmem:[%s10713_s4 + $0x148] sm:$0xff] }
 0x11b   : > { %v9342_v15 = vld [vmem:[#allocation5 + $0x1a0] ss:$8 sps:$4 sm:$0xff]   ;;  %v8179_v16 = vcombine.high %v984_v12, %v988_v13 }
 0x11c   : > { %2103 = vmatpush1.bf16.msra.mxu0 %v9287_v18  ;;  %v9345_v18 = vld [vmem:[#allocation5 + $0x1b0] ss:$8 sps:$4 sm:$0xff]   ;;  %v981_v5 = vld [vmem:[%s10713_s4 + $0x168] sm:$0xff] }
 0x11d   : > { %2104 = vmatprep.subr.bf16.mxu0 %v9288_v19  ;;  %v9350_v19 = vld [vmem:[#allocation5 + $0x1c4] ss:$8 sps:$4 sm:$0xff]  }
 0x120   : > { %2105 = vmatpush1.bf16.msra.mxu0 %v9290_v20  ;;  %v992_v20 = vld [vmem:[%s10713_s4 + $0x1c0] sm:$0xff] }
 0x121   : > { %2106 = vmatprep.subr.bf16.mxu0 %v9291_v21  ;;  %v996_v21 = vld [vmem:[%s10713_s4 + $0x1e0] sm:$0xff] }
 0x124   : > { %2107 = vmatpush1.bf16.msra.mxu0 %v9293_v22  ;;  %v8178_v22 = vcombine.low %v984_v12, %v988_v13  ;;  %v985_v12 = vld [vmem:[%s10713_s4 + $0x188] sm:$0xff] }
 0x125   : > { %2108 = vmatprep.subr.bf16.mxu0 %v9294_v23  ;;  %v9348_v23 = vld [vmem:[#allocation5 + $0x1c0] ss:$8 sps:$4 sm:$0xff]  }
 0x126   : > { %v989_v13 = vld [vmem:[%s10713_s4 + $0x1a8] sm:$0xff] }
 0x128   : > { %2109 = vmatpush1.bf16.msra.mxu0 %v9296_v24  ;;  %v8187_v24 = vcombine.high %v992_v20, %v996_v21 }
 0x129   : > { %2110 = vmatprep.subr.bf16.mxu0 %v9297_v25  ;;  %v9353_v25 = vld [vmem:[#allocation5 + $0x1d4] ss:$8 sps:$4 sm:$0xff]  }
 0x12c   : > { %2111 = vmatpush1.bf16.msra.mxu0 %v9299_v26  ;;  %v9351_v26 = vld [vmem:[#allocation5 + $0x1d0] ss:$8 sps:$4 sm:$0xff]  }
 0x12d   : > { %2112 = vmatprep.subr.bf16.mxu0 %v9300_v27  ;;  %v9356_v27 = vld [vmem:[#allocation5 + $0x1e4] ss:$8 sps:$4 sm:$0xff]  }
 0x130   : > { %2113 = vmatpush1.bf16.msra.mxu0 %v9302_v28  ;;  %v937_v28 = vld [vmem:[%s10713_s4 + $0x8] sm:$0xff] }
 0x131   : > { %2114 = vmatprep.subr.bf16.mxu0 %v9303_v29  ;;  %v941_v29 = vld [vmem:[%s10713_s4 + $0x28] sm:$0xff] }
 0x134   : > { %2115 = vmatpush1.bf16.msra.mxu0 %v9305_v30  ;;  %v8186_v30 = vcombine.low %v992_v20, %v996_v21  ;;  %v993_v20 = vld [vmem:[%s10713_s4 + $0x1c8] sm:$0xff] }
 0x135   : > { %2116 = vmatprep.subr.bf16.mxu0 %v9306_v31  ;;  %v9354_v31 = vld [vmem:[#allocation5 + $0x1e0] ss:$8 sps:$4 sm:$0xff]  }
 0x136   : > { %v997_v21 = vld [vmem:[%s10713_s4 + $0x1e8] sm:$0xff] }
 0x138   : > { %2117 = vmatpush1.bf16.msra.mxu0 %v9308_v32  ;;  %v8133_v32 = vcombine.high %v937_v28, %v941_v29 }
 0x139   : > { %2118 = vmatprep.subr.bf16.mxu0 %v9309_v33  ;;  %v9359_v33 = vld [vmem:[#allocation5 + $0x1f4] ss:$8 sps:$4 sm:$0xff]  }
 0x13c   : > { %2119 = vmatpush1.bf16.msra.mxu0 %v9311_v34  ;;  %v9357_v34 = vld [vmem:[#allocation5 + $0x1f0] ss:$8 sps:$4 sm:$0xff]  }
 0x13d   : > { %2201 = vmatprep.subr.bf16.mxu0 %v9314_v35  ;;  %v9362_v35 = vld [vmem:[#allocation5 + $0x204] ss:$8 sps:$4 sm:$0xff]  }
 0x13f   : > { %2121 = vmatmul.mubr.bf16.vlgmr.msra.gmra.mrb[0].mxu0 %v8130_v38  ;;  %v8132_v38 = vcombine.low %v937_v28, %v941_v29  ;;  %v938_v28 = vld [vmem:[%s10713_s4 + $0x10] sm:$0xff] }
 0x140   : > { %2202 = vmatpush1.bf16.msra.mxu0 %v9312_v39  ;;  %2130 = vmatprep.mubr.bf16.mxu0 %v8139_v40  ;;  %v9360_v39 = vld [vmem:[#allocation5 + $0x200] ss:$8 sps:$4 sm:$0xff]   ;;  %v8141_v40 = vcombine.high %v945_v36, %v949_v37  ;;  %v942_v29 = vld [vmem:[%s10713_s4 + $0x30] sm:$0xff] }
 0x141   : > { %2203 = vmatprep.subr.bf16.mxu0 %v9317_v41  ;;  %v9365_v41 = vld [vmem:[#allocation5 + $0x214] ss:$8 sps:$4 sm:$0xff]  }
 0x144   : > { %2204 = vmatpush1.bf16.msra.mxu0 %v9315_v42  ;;  %v9363_v42 = vld [vmem:[#allocation5 + $0x210] ss:$8 sps:$4 sm:$0xff]  }
 0x145   : > { %2205 = vmatprep.subr.bf16.mxu0 %v9320_v43  ;;  %v9368_v43 = vld [vmem:[#allocation5 + $0x224] ss:$8 sps:$4 sm:$0xff]  }
 0x147   : > { %2131 = vmatmul.mubr.bf16.gmra.mrb[4].mxu0 %v8138_v46  ;;  %v8140_v46 = vcombine.low %v945_v36, %v949_v37  ;;  %v946_v36 = vld [vmem:[%s10713_s4 + $0x50] sm:$0xff] }
 0x148   : > { %2206 = vmatpush1.bf16.msra.mxu0 %v9318_v47  ;;  %2140 = vmatprep.mubr.bf16.mxu0 %v8147_v48  ;;  %v9366_v47 = vld [vmem:[#allocation5 + $0x220] ss:$8 sps:$4 sm:$0xff]   ;;  %v8149_v48 = vcombine.high %v953_v44, %v957_v45  ;;  %v950_v37 = vld [vmem:[%s10713_s4 + $0x70] sm:$0xff] }
 0x149   : > { %2207 = vmatprep.subr.bf16.mxu0 %v9323_v49  ;;  %v9371_v49 = vld [vmem:[#allocation5 + $0x234] ss:$8 sps:$4 sm:$0xff]  }
 0x14c   : > { %2208 = vmatpush1.bf16.msra.mxu0 %v9321_v50  ;;  %v9369_v50 = vld [vmem:[#allocation5 + $0x230] ss:$8 sps:$4 sm:$0xff]  }
 0x14d   : > { %2209 = vmatprep.subr.bf16.mxu0 %v9326_v51  ;;  %v9374_v51 = vld [vmem:[#allocation5 + $0x244] ss:$8 sps:$4 sm:$0xff]  }
 0x14f   : > { %2141 = vmatmul.mubr.bf16.gmra.mrb[8].mxu0 %v8146_v54  ;;  %v8148_v54 = vcombine.low %v953_v44, %v957_v45  ;;  %v954_v44 = vld [vmem:[%s10713_s4 + $0x90] sm:$0xff] }
 0x150   : > { %2210 = vmatpush1.bf16.msra.mxu0 %v9324_v55  ;;  %2150 = vmatprep.mubr.bf16.mxu0 %v8155_v56  ;;  %v9372_v55 = vld [vmem:[#allocation5 + $0x240] ss:$8 sps:$4 sm:$0xff]   ;;  %v8157_v56 = vcombine.high %v961_v52, %v965_v53  ;;  %v958_v45 = vld [vmem:[%s10713_s4 + $0xb0] sm:$0xff] }
 0x151   : > { %2211 = vmatprep.subr.bf16.mxu0 %v9329_v57  ;;  %v9377_v57 = vld [vmem:[#allocation5 + $0x254] ss:$8 sps:$4 sm:$0xff]  }
 0x154   : > { %2212 = vmatpush1.bf16.msra.mxu0 %v9327_v58  ;;  %v9375_v58 = vld [vmem:[#allocation5 + $0x250] ss:$8 sps:$4 sm:$0xff]  }
 0x155   : > { %2213 = vmatprep.subr.bf16.mxu0 %v9332_v59  ;;  %v9380_v59 = vld [vmem:[#allocation5 + $0x264] ss:$8 sps:$4 sm:$0xff]  }
 0x157   : > { %2151 = vmatmul.mubr.bf16.gmra.mrb[12].mxu0 %v8154_v62  ;;  %v8156_v62 = vcombine.low %v961_v52, %v965_v53  ;;  %v962_v52 = vld [vmem:[%s10713_s4 + $0xd0] sm:$0xff] }
 0x158   : > { %2214 = vmatpush1.bf16.msra.mxu0 %v9330_v63  ;;  %2160 = vmatprep.mubr.bf16.mxu0 %v8163_v0  ;;  %v9378_v63 = vld [vmem:[#allocation5 + $0x260] ss:$8 sps:$4 sm:$0xff]   ;;  %v8165_v0 = vcombine.high %v969_v60, %v973_v61  ;;  %v966_v53 = vld [vmem:[%s10713_s4 + $0xf0] sm:$0xff] }
 0x159   : > { %2215 = vmatprep.subr.bf16.mxu0 %v9335_v1  ;;  %v9383_v1 = vld [vmem:[#allocation5 + $0x274] ss:$8 sps:$4 sm:$0xff]  }
 0x15c   : > { %2216 = vmatpush1.bf16.msra.mxu0 %v9333_v2  ;;  %v9381_v2 = vld [vmem:[#allocation5 + $0x270] ss:$8 sps:$4 sm:$0xff]  }
 0x15d   : > { %2217 = vmatprep.subr.bf16.mxu0 %v9338_v3  ;;  %v9386_v3 = vld [vmem:[#allocation5 + $0x284] ss:$8 sps:$4 sm:$0xff]  }
 0x15f   : > { %2161 = vmatmul.mubr.bf16.gmra.mrb[16].mxu0 %v8162_v6  ;;  %v8164_v6 = vcombine.low %v969_v60, %v973_v61  ;;  %v970_v60 = vld [vmem:[%s10713_s4 + $0x110] sm:$0xff] }
 0x160   : > { %2218 = vmatpush1.bf16.msra.mxu0 %v9336_v7  ;;  %2170 = vmatprep.mubr.bf16.mxu0 %v8171_v8  ;;  %v9384_v7 = vld [vmem:[#allocation5 + $0x280] ss:$8 sps:$4 sm:$0xff]   ;;  %v8173_v8 = vcombine.high %v977_v4, %v981_v5  ;;  %v974_v61 = vld [vmem:[%s10713_s4 + $0x130] sm:$0xff] }
 0x161   : > { %2219 = vmatprep.subr.bf16.mxu0 %v9341_v9  ;;  %v9389_v9 = vld [vmem:[#allocation5 + $0x294] ss:$8 sps:$4 sm:$0xff]  }
 0x164   : > { %2220 = vmatpush1.bf16.msra.mxu0 %v9339_v10  ;;  %v9387_v10 = vld [vmem:[#allocation5 + $0x290] ss:$8 sps:$4 sm:$0xff]  }
 0x165   : > { %2221 = vmatprep.subr.bf16.mxu0 %v9344_v11  ;;  %v9392_v11 = vld [vmem:[#allocation5 + $0x2a4] ss:$8 sps:$4 sm:$0xff]  }
 0x167   : > { %2171 = vmatmul.mubr.bf16.gmra.mrb[20].mxu0 %v8170_v14  ;;  %v8172_v14 = vcombine.low %v977_v4, %v981_v5  ;;  %v978_v4 = vld [vmem:[%s10713_s4 + $0x150] sm:$0xff] }
 0x168   : > { %2222 = vmatpush1.bf16.msra.mxu0 %v9342_v15  ;;  %2180 = vmatprep.mubr.bf16.mxu0 %v8179_v16  ;;  %v9390_v15 = vld [vmem:[#allocation5 + $0x2a0] ss:$8 sps:$4 sm:$0xff]   ;;  %v8181_v16 = vcombine.high %v985_v12, %v989_v13  ;;  %v982_v5 = vld [vmem:[%s10713_s4 + $0x170] sm:$0xff] }
 0x169   : > { %2223 = vmatprep.subr.bf16.mxu0 %v9347_v17  ;;  %v9395_v17 = vld [vmem:[#allocation5 + $0x2b4] ss:$8 sps:$4 sm:$0xff]  }
 0x16c   : > { %2224 = vmatpush1.bf16.msra.mxu0 %v9345_v18  ;;  %v9393_v18 = vld [vmem:[#allocation5 + $0x2b0] ss:$8 sps:$4 sm:$0xff]  }
 0x16d   : > { %2225 = vmatprep.subr.bf16.mxu0 %v9350_v19  ;;  %v9398_v19 = vld [vmem:[#allocation5 + $0x2c4] ss:$8 sps:$4 sm:$0xff]  }
 0x16f   : > { %2181 = vmatmul.mubr.bf16.gmra.mrb[24].mxu0 %v8178_v22  ;;  %v8180_v22 = vcombine.low %v985_v12, %v989_v13  ;;  %v986_v12 = vld [vmem:[%s10713_s4 + $0x190] sm:$0xff] }
 0x170   : > { %2226 = vmatpush1.bf16.msra.mxu0 %v9348_v23  ;;  %2190 = vmatprep.mubr.bf16.mxu0 %v8187_v24  ;;  %v9396_v23 = vld [vmem:[#allocation5 + $0x2c0] ss:$8 sps:$4 sm:$0xff]   ;;  %v8189_v24 = vcombine.high %v993_v20, %v997_v21  ;;  %v990_v13 = vld [vmem:[%s10713_s4 + $0x1b0] sm:$0xff] }
 0x171   : > { %2227 = vmatprep.subr.bf16.mxu0 %v9353_v25  ;;  %v9401_v25 = vld [vmem:[#allocation5 + $0x2d4] ss:$8 sps:$4 sm:$0xff]  }
 0x174   : > { %2228 = vmatpush1.bf16.msra.mxu0 %v9351_v26  ;;  %v9399_v26 = vld [vmem:[#allocation5 + $0x2d0] ss:$8 sps:$4 sm:$0xff]  }
 0x175   : > { %2229 = vmatprep.subr.bf16.mxu0 %v9356_v27  ;;  %v9404_v27 = vld [vmem:[#allocation5 + $0x2e4] ss:$8 sps:$4 sm:$0xff]  }
 0x177   : > { %2191 = vmatmul.mubr.bf16.gmra.mrb[28].mxu0 %v8186_v30  ;;  %v8188_v30 = vcombine.low %v993_v20, %v997_v21  ;;  %v994_v20 = vld [vmem:[%s10713_s4 + $0x1d0] sm:$0xff] }
 0x178   : > { %2230 = vmatpush1.bf16.msra.mxu0 %v9354_v31  ;;  %2233 = vmatprep.mubr.bf16.mxu0 %v8133_v32  ;;  %v9402_v31 = vld [vmem:[#allocation5 + $0x2e0] ss:$8 sps:$4 sm:$0xff]   ;;  %v8135_v32 = vcombine.high %v938_v28, %v942_v29  ;;  %v998_v21 = vld [vmem:[%s10713_s4 + $0x1f0] sm:$0xff] }
 0x179   : > { %2231 = vmatprep.subr.bf16.mxu0 %v9359_v33  ;;  %v9407_v33 = vld [vmem:[#allocation5 + $0x2f4] ss:$8 sps:$4 sm:$0xff]  }
 0x17c   : > { %2232 = vmatpush1.bf16.msra.mxu0 %v9357_v34  ;;  %v9405_v34 = vld [vmem:[#allocation5 + $0x2f0] ss:$8 sps:$4 sm:$0xff]  }
 0x17d   : > { %2314 = vmatprep.subr.bf16.mxu0 %v9362_v35  ;;  %v9410_v35 = vld [vmem:[#allocation5 + $0x304] ss:$8 sps:$4 sm:$0xff]  }
 0x17f   : > { %2234 = vmatmul.mubr.bf16.vlgmr.msra.gmra.mrb[0].mxu0 %v8132_v38  ;;  %v8134_v38 = vcombine.low %v938_v28, %v942_v29  ;;  %v939_v28 = vld [vmem:[%s10713_s4 + $0x18] sm:$0xff] }
 0x180   : > { %2315 = vmatpush1.bf16.msra.mxu0 %v9360_v39  ;;  %2243 = vmatprep.mubr.bf16.mxu0 %v8141_v40  ;;  %v9408_v39 = vld [vmem:[#allocation5 + $0x300] ss:$8 sps:$4 sm:$0xff]   ;;  %v8143_v40 = vcombine.high %v946_v36, %v950_v37  ;;  %v943_v29 = vld [vmem:[%s10713_s4 + $0x38] sm:$0xff] }
 0x181   : > { %2316 = vmatprep.subr.bf16.mxu0 %v9365_v41  ;;  %v9413_v41 = vld [vmem:[#allocation5 + $0x314] ss:$8 sps:$4 sm:$0xff]  }
 0x184   : > { %2317 = vmatpush1.bf16.msra.mxu0 %v9363_v42  ;;  %v9411_v42 = vld [vmem:[#allocation5 + $0x310] ss:$8 sps:$4 sm:$0xff]  }
 0x185   : > { %2318 = vmatprep.subr.bf16.mxu0 %v9368_v43  ;;  %v9416_v43 = vld [vmem:[#allocation5 + $0x324] ss:$8 sps:$4 sm:$0xff]  }
 0x187   : > { %2244 = vmatmul.mubr.bf16.gmra.mrb[4].mxu0 %v8140_v46  ;;  %v8142_v46 = vcombine.low %v946_v36, %v950_v37  ;;  %v951_v36 = vld [vmem:[%s10713_s4 + $0x78] sm:$0xff]  ;;  %v8136_v37 = vcombine.low %v939_v28, %v943_v29 }
 0x188   : > { %2319 = vmatpush1.bf16.msra.mxu0 %v9366_v47  ;;  %2253 = vmatprep.mubr.bf16.mxu0 %v8149_v48  ;;  %v9414_v47 = vld [vmem:[#allocation5 + $0x320] ss:$8 sps:$4 sm:$0xff]   ;;  %v8151_v48 = vcombine.high %v954_v44, %v958_v45 }
 0x189   : > { %2320 = vmatprep.subr.bf16.mxu0 %v9371_v49  ;;  %v9419_v49 = vld [vmem:[#allocation5 + $0x334] ss:$8 sps:$4 sm:$0xff]  }
 0x18c   : > { %2321 = vmatpush1.bf16.msra.mxu0 %v9369_v50  ;;  %v9417_v50 = vld [vmem:[#allocation5 + $0x330] ss:$8 sps:$4 sm:$0xff]  }
 0x18d   : > { %2322 = vmatprep.subr.bf16.mxu0 %v9374_v51  ;;  %v9422_v51 = vld [vmem:[#allocation5 + $0x344] ss:$8 sps:$4 sm:$0xff]  }
 0x18f   : > { %2254 = vmatmul.mubr.bf16.gmra.mrb[8].mxu0 %v8148_v54  ;;  %v8150_v54 = vcombine.low %v954_v44, %v958_v45  ;;  %v967_v44 = vld [vmem:[%s10713_s4 + $0xf8] sm:$0xff] }
 0x190   : > { %2323 = vmatpush1.bf16.msra.mxu0 %v9372_v55  ;;  %2263 = vmatprep.mubr.bf16.mxu0 %v8157_v56  ;;  %v9420_v55 = vld [vmem:[#allocation5 + $0x340] ss:$8 sps:$4 sm:$0xff]   ;;  %v8159_v56 = vcombine.high %v962_v52, %v966_v53 }
 0x191   : > { %2324 = vmatprep.subr.bf16.mxu0 %v9377_v57  ;;  %v9425_v57 = vld [vmem:[#allocation5 + $0x354] ss:$8 sps:$4 sm:$0xff]  }
 0x194   : > { %2325 = vmatpush1.bf16.msra.mxu0 %v9375_v58  ;;  %v9423_v58 = vld [vmem:[#allocation5 + $0x350] ss:$8 sps:$4 sm:$0xff]  }
 0x195   : > { %2326 = vmatprep.subr.bf16.mxu0 %v9380_v59  ;;  %v9428_v59 = vld [vmem:[#allocation5 + $0x364] ss:$8 sps:$4 sm:$0xff]  }
 0x197   : > { %2264 = vmatmul.mubr.bf16.gmra.mrb[12].mxu0 %v8156_v62  ;;  %v8158_v62 = vcombine.low %v962_v52, %v966_v53  ;;  %v983_v52 = vld [vmem:[%s10713_s4 + $0x178] sm:$0xff] }
 0x198   : > { %2327 = vmatpush1.bf16.msra.mxu0 %v9378_v63  ;;  %2273 = vmatprep.mubr.bf16.mxu0 %v8165_v0  ;;  %v9426_v63 = vld [vmem:[#allocation5 + $0x360] ss:$8 sps:$4 sm:$0xff]   ;;  %v8167_v0 = vcombine.high %v970_v60, %v974_v61 }
 0x199   : > { %2328 = vmatprep.subr.bf16.mxu0 %v9383_v1  ;;  %v9431_v1 = vld [vmem:[#allocation5 + $0x374] ss:$8 sps:$4 sm:$0xff]  }
 0x19c   : > { %2329 = vmatpush1.bf16.msra.mxu0 %v9381_v2  ;;  %v9429_v2 = vld [vmem:[#allocation5 + $0x370] ss:$8 sps:$4 sm:$0xff]  }
 0x19d   : > { %2330 = vmatprep.subr.bf16.mxu0 %v9386_v3  ;;  %v9434_v3 = vld [vmem:[#allocation5 + $0x384] ss:$8 sps:$4 sm:$0xff]  }
 0x19f   : > { %2274 = vmatmul.mubr.bf16.gmra.mrb[16].mxu0 %v8164_v6  ;;  %v8166_v6 = vcombine.low %v970_v60, %v974_v61  ;;  %v999_v60 = vld [vmem:[%s10713_s4 + $0x1f8] sm:$0xff] }
 0x1a0   : > { %2331 = vmatpush1.bf16.msra.mxu0 %v9384_v7  ;;  %2283 = vmatprep.mubr.bf16.mxu0 %v8173_v8  ;;  %v9432_v7 = vld [vmem:[#allocation5 + $0x380] ss:$8 sps:$4 sm:$0xff]   ;;  %v8175_v8 = vcombine.high %v978_v4, %v982_v5 }
 0x1a1   : > { %2332 = vmatprep.subr.bf16.mxu0 %v9389_v9  ;;  %v9437_v9 = vld [vmem:[#allocation5 + $0x394] ss:$8 sps:$4 sm:$0xff]  }
 0x1a4   : > { %2333 = vmatpush1.bf16.msra.mxu0 %v9387_v10  ;;  %v9435_v10 = vld [vmem:[#allocation5 + $0x390] ss:$8 sps:$4 sm:$0xff]  }
 0x1a5   : > { %2334 = vmatprep.subr.bf16.mxu0 %v9392_v11  ;;  %v9440_v11 = vld [vmem:[#allocation5 + $0x3a4] ss:$8 sps:$4 sm:$0xff]  }
 0x1a7   : > { %2284 = vmatmul.mubr.bf16.gmra.mrb[20].mxu0 %v8172_v14  ;;  %v8174_v14 = vcombine.low %v978_v4, %v982_v5  ;;  %v9460_v4 = vld [vmem:[%s14247_s30 + $0x50] sm:$0xff]  }
 0x1a8   : > { %2335 = vmatpush1.bf16.msra.mxu0 %v9390_v15  ;;  %2293 = vmatprep.mubr.bf16.mxu0 %v8181_v16  ;;  %v9438_v15 = vld [vmem:[#allocation5 + $0x3a0] ss:$8 sps:$4 sm:$0xff]   ;;  %v8183_v16 = vcombine.high %v986_v12, %v990_v13  ;;  %v9461_v5 = vld [vmem:[%s14247_s30 + $0x10] sm:$0xff]  }
 0x1a9   : > { %2336 = vmatprep.subr.bf16.mxu0 %v9395_v17  ;;  %v9443_v17 = vld [vmem:[#allocation5 + $0x3b4] ss:$8 sps:$4 sm:$0xff]  }
 0x1ac   : > { %2337 = vmatpush1.bf16.msra.mxu0 %v9393_v18  ;;  %v9441_v18 = vld [vmem:[#allocation5 + $0x3b0] ss:$8 sps:$4 sm:$0xff]  }
 0x1ad   : > { %2338 = vmatprep.subr.bf16.mxu0 %v9398_v19  ;;  %v9446_v19 = vld [vmem:[#allocation5 + $0x3c4] ss:$8 sps:$4 sm:$0xff]  }
 0x1af   : > { %2294 = vmatmul.mubr.bf16.gmra.mrb[24].mxu0 %v8180_v22  ;;  %v8182_v22 = vcombine.low %v986_v12, %v990_v13  ;;  %v9468_v12 = vld [vmem:[%s14247_s30 + $0x70] sm:$0xff]  }
 0x1b0   : > { %2339 = vmatpush1.bf16.msra.mxu0 %v9396_v23  ;;  %2303 = vmatprep.mubr.bf16.mxu0 %v8189_v24  ;;  %v9444_v23 = vld [vmem:[#allocation5 + $0x3c0] ss:$8 sps:$4 sm:$0xff]   ;;  %v8191_v24 = vcombine.high %v994_v20, %v998_v21  ;;  %v9469_v13 = vld [vmem:[%s14247_s30 + $0x30] sm:$0xff]  }
 0x1b1   : > { %2340 = vmatprep.subr.bf16.mxu0 %v9401_v25  ;;  %v9449_v25 = vld [vmem:[#allocation5 + $0x3d4] ss:$8 sps:$4 sm:$0xff]  }
 0x1b4   : > { %2341 = vmatpush1.bf16.msra.mxu0 %v9399_v26  ;;  %v9447_v26 = vld [vmem:[#allocation5 + $0x3d0] ss:$8 sps:$4 sm:$0xff]  }
 0x1b5   : > { %2342 = vmatprep.subr.bf16.mxu0 %v9404_v27  ;;  %v9452_v27 = vld [vmem:[#allocation5 + $0x3e4] ss:$8 sps:$4 sm:$0xff]  }
 0x1b7   : > { %2304 = vmatmul.mubr.bf16.gmra.mrb[28].mxu0 %v8188_v30  ;;  %v8190_v30 = vcombine.low %v994_v20, %v998_v21  ;;  %v2540_v20 = vld [vmem:[%s14251_s20] sm:$0x3] }
 0x1b8   : > { %2343 = vmatpush1.bf16.msra.mxu0 %v9402_v31  ;;  %2346 = vmatprep.mubr.bf16.mxu0 %v8135_v32  ;;  %v9450_v31 = vld [vmem:[#allocation5 + $0x3e0] ss:$8 sps:$4 sm:$0xff]   ;;  %v8137_v32 = vcombine.high %v939_v28, %v943_v29 }
 0x1b9   : > { %2344 = vmatprep.subr.bf16.mxu0 %v9407_v33  ;;  %v9455_v33 = vld [vmem:[#allocation5 + $0x3f4] ss:$8 sps:$4 sm:$0xff]  }
 0x1bc   : > { %2345 = vmatpush1.bf16.msra.mxu0 %v9405_v34  ;;  %v9453_v34 = vld [vmem:[#allocation5 + $0x3f0] ss:$8 sps:$4 sm:$0xff]  }
 0x1bd   : > { %2427 = vmatprep.subr.bf16.mxu0 %v9410_v35  ;;  %v947_v35 = vld [vmem:[%s10713_s4 + $0x58] sm:$0xff] }
 0x1bf   : > { %2347 = vmatmul.mubr.bf16.vlgmr.msra.gmra.mrb[0].mxu0 %v8134_v38  ;;  %v8145_v38 = vcombine.high %v947_v35, %v951_v36 }
 0x1c0   : > { %2428 = vmatpush1.bf16.msra.mxu0 %v9408_v39  ;;  %2356 = vmatprep.mubr.bf16.mxu0 %v8143_v40  ;;  %v955_v39 = vld [vmem:[%s10713_s4 + $0x98] sm:$0xff] }
 0x1c1   : > { %2429 = vmatprep.subr.bf16.mxu0 %v9413_v41  ;;  %v959_v40 = vld [vmem:[%s10713_s4 + $0xb8] sm:$0xff]  ;;  %v8144_v41 = vcombine.low %v947_v35, %v951_v36 }
 0x1c2   : > { %v8152_v45 = vcombine.low %v955_v39, %v959_v40 }
 0x1c4   : > { %2430 = vmatpush1.bf16.msra.mxu0 %v9411_v42  ;;  %v8153_v42 = vcombine.high %v955_v39, %v959_v40 }
 0x1c5   : > { %2431 = vmatprep.subr.bf16.mxu0 %v9416_v43  ;;  %v963_v43 = vld [vmem:[%s10713_s4 + $0xd8] sm:$0xff] }
 0x1c7   : > { %2357 = vmatmul.mubr.bf16.gmra.mrb[4].mxu0 %v8142_v46  ;;  %v8161_v46 = vcombine.high %v963_v43, %v967_v44 }
 0x1c8   : > { %2432 = vmatpush1.bf16.msra.mxu0 %v9414_v47  ;;  %2366 = vmatprep.mubr.bf16.mxu0 %v8151_v48  ;;  %v971_v47 = vld [vmem:[%s10713_s4 + $0x118] sm:$0xff] }
 0x1c9   : > { %2433 = vmatprep.subr.bf16.mxu0 %v9419_v49  ;;  %v975_v48 = vld [vmem:[%s10713_s4 + $0x138] sm:$0xff]  ;;  %v8160_v49 = vcombine.low %v963_v43, %v967_v44 }
 0x1ca   : > { %v8168_v53 = vcombine.low %v971_v47, %v975_v48 }
 0x1cc   : > { %2434 = vmatpush1.bf16.msra.mxu0 %v9417_v50  ;;  %v8169_v50 = vcombine.high %v971_v47, %v975_v48 }
 0x1cd   : > { %2435 = vmatprep.subr.bf16.mxu0 %v9422_v51  ;;  %v979_v51 = vld [vmem:[%s10713_s4 + $0x158] sm:$0xff] }
 0x1cf   : > { %2367 = vmatmul.mubr.bf16.gmra.mrb[8].mxu0 %v8150_v54  ;;  %v8177_v54 = vcombine.high %v979_v51, %v983_v52 }
 0x1d0   : > { %2436 = vmatpush1.bf16.msra.mxu0 %v9420_v55  ;;  %2376 = vmatprep.mubr.bf16.mxu0 %v8159_v56  ;;  %v987_v55 = vld [vmem:[%s10713_s4 + $0x198] sm:$0xff] }
 0x1d1   : > { %2437 = vmatprep.subr.bf16.mxu0 %v9425_v57  ;;  %v991_v56 = vld [vmem:[%s10713_s4 + $0x1b8] sm:$0xff]  ;;  %v8176_v57 = vcombine.low %v979_v51, %v983_v52 }
 0x1d2   : > { %v8184_v61 = vcombine.low %v987_v55, %v991_v56 }
 0x1d4   : > { %2438 = vmatpush1.bf16.msra.mxu0 %v9423_v58  ;;  %v8185_v58 = vcombine.high %v987_v55, %v991_v56 }
 0x1d5   : > { %2439 = vmatprep.subr.bf16.mxu0 %v9428_v59  ;;  %v995_v59 = vld [vmem:[%s10713_s4 + $0x1d8] sm:$0xff]  ;;  %s11547_s4 = scalar_lea.vmem %s14255_s2, %s11174_s21  ;;  %s14258_s2 = sld [smem:[#allocation64_spill]] }
 0x1d7   : > { %2377 = vmatmul.mubr.bf16.gmra.mrb[12].mxu0 %v8158_v62  ;;  %v8193_v62 = vcombine.high %v995_v59, %v999_v60 }
 0x1d8   : > { %2440 = vmatpush1.bf16.msra.mxu0 %v9426_v63  ;;  %2386 = vmatprep.mubr.bf16.mxu0 %v8167_v0  ;;  %v8192_v63 = vcombine.low %v995_v59, %v999_v60  ;;  %v9456_v0 = vld [vmem:[%s14247_s30 + $0x40] sm:$0xff]  }
 0x1d9   : > { %2441 = vmatprep.subr.bf16.mxu0 %v9431_v1  ;;  %v9457_v1 = vld [vmem:[%s14247_s30] sm:$0xff]   ;;  %8873 = vmatprep.subr.bf16.mxu1 %v9456_v0 }
 0x1da   : > { %8874 = vmatpush3.bf16.msra.mxu1 %v9457_v1 }
 0x1dc   : > { %2442 = vmatpush1.bf16.msra.mxu0 %v9429_v2  ;;  %v9458_v2 = vld [vmem:[%s14247_s30 + $0x48] sm:$0xff]  }
 0x1dd   : > { %2443 = vmatprep.subr.bf16.mxu0 %v9434_v3  ;;  %v9459_v3 = vld [vmem:[%s14247_s30 + $0x8] sm:$0xff]   ;;  %8875 = vmatprep.subr.bf16.mxu1 %v9458_v2 }
 0x1de   : > { %8876 = vmatpush3.bf16.msra.mxu1 %v9459_v3 }
 0x1df   : > { %2387 = vmatmul.mubr.bf16.gmra.mrb[16].mxu0 %v8166_v6  ;;  %8877 = vmatprep.subr.bf16.mxu1 %v9460_v4  ;;  %v9462_v6 = vld [vmem:[%s14247_s30 + $0x58] sm:$0xff]  }
 0x1e0   : > { %2444 = vmatpush1.bf16.msra.mxu0 %v9432_v7  ;;  %2396 = vmatprep.mubr.bf16.mxu0 %v8175_v8  ;;  %v9463_v7 = vld [vmem:[%s14247_s30 + $0x18] sm:$0xff]   ;;  %v9464_v8 = vld [vmem:[%s14247_s30 + $0x60] sm:$0xff]  }
 0x1e1   : > { %2445 = vmatprep.subr.bf16.mxu0 %v9437_v9  ;;  %v9465_v9 = vld [vmem:[%s14247_s30 + $0x20] sm:$0xff]  }
 0x1e2   : > { %8878 = vmatpush3.bf16.msra.mxu1 %v9461_v5 }
 0x1e3   : > { %8879 = vmatprep.subr.bf16.mxu1 %v9462_v6 }
 0x1e4   : > { %2446 = vmatpush1.bf16.msra.mxu0 %v9435_v10  ;;  %v9466_v10 = vld [vmem:[%s14247_s30 + $0x68] sm:$0xff]  }
 0x1e5   : > { %2447 = vmatprep.subr.bf16.mxu0 %v9440_v11  ;;  %v9467_v11 = vld [vmem:[%s14247_s30 + $0x28] sm:$0xff]  }
 0x1e6   : > { %8880 = vmatpush3.bf16.msra.mxu1 %v9463_v7 }
 0x1e7   : > { %2397 = vmatmul.mubr.bf16.gmra.mrb[20].mxu0 %v8174_v14  ;;  %8881 = vmatprep.subr.bf16.mxu1 %v9464_v8  ;;  %v9470_v14 = vld [vmem:[%s14247_s30 + $0x78] sm:$0xff]  }
 0x1e8   : > { %2448 = vmatpush1.bf16.msra.mxu0 %v9438_v15  ;;  %2406 = vmatprep.mubr.bf16.mxu0 %v8183_v16  ;;  %v9471_v15 = vld [vmem:[%s14247_s30 + $0x38] sm:$0xff]   ;;  %v10846_v16 = vld [vmem:[%s14248_s9] sm:$0xff]  }
 0x1e9   : > { %2449 = vmatprep.subr.bf16.mxu0 %v9443_v17  ;;  %v2542_v17 = vlaneseq }
 0x1ea   : > { %8882 = vmatpush3.bf16.msra.mxu1 %v9465_v9 }
 0x1eb   : > { %8883 = vmatprep.subr.bf16.mxu1 %v9466_v10 }
 0x1ec   : > { %2450 = vmatpush1.bf16.msra.mxu0 %v9441_v18  ;;  %v10849_v18 = vshrl.u32 %v2542_v17, 7 }
 0x1ed   : > { %2451 = vmatprep.subr.bf16.mxu0 %v9446_v19 }
 0x1ee   : > { %8884 = vmatpush3.bf16.msra.mxu1 %v9467_v11  ;;  %14249 = vst [vmem:[#allocation23_spill] sm:$0xff] %v10849_v18  ;;  %v10852_v19 = vsub.s32 0, %v10849_v18  ;;  %v10858_v21 = vsub.s32 1, %v10849_v18 }
 0x1ef   : > { %2407 = vmatmul.mubr.bf16.gmra.mrb[24].mxu0 %v8182_v22  ;;  %8885 = vmatprep.subr.bf16.mxu1 %v9468_v12 }
 0x1f0   : > { %2452 = vmatpush1.bf16.msra.mxu0 %v9444_v23  ;;  %2416 = vmatprep.mubr.bf16.mxu0 %v8191_v24  ;;  %14250 = vst [vmem:[#allocation24_spill] sm:$0xff] %v10852_v19  ;;  %14252 = vst [vmem:[#allocation25_spill] sm:$0xff] %v10858_v21  ;;  %v10861_v22 = vrot.slane %v2540_v20, %v10852_v19  ;;  %v2584_v23 = vld [vmem:[#allocation7] sm:$0x3]  ;;  %v10864_v24 = vrot.slane %v2540_v20, %v10858_v21 }
 0x1f1   : > { %2453 = vmatprep.subr.bf16.mxu0 %v9449_v25  ;;  %v10871_v28 = vrot.slane %v2584_v23, %v10852_v19 }
 0x1f2   : > { %8886 = vmatpush3.bf16.msra.mxu1 %v9469_v13 }
 0x1f3   : > { %8887 = vmatprep.subr.bf16.mxu1 %v9470_v14 }
 0x1f4   : > { %2454 = vmatpush1.bf16.msra.mxu0 %v9447_v26  ;;  %v10867_v26 = vrot.slane %v2584_v23, %v10858_v21 }
 0x1f5   : > { %2455 = vmatprep.subr.bf16.mxu0 %v9452_v27 }
 0x1f6   : > { %8888 = vmatpush3.bf16.msra.mxu1 %v9471_v15 }
 0x1f7   : > { %2417 = vmatmul.mubr.bf16.gmra.mrb[28].mxu0 %v8190_v30  ;;  %8963 = vmatprep.subr.bf16.mxu1 %v10846_v16 }
 0x1f8   : > { %2456 = vmatpush1.bf16.msra.mxu0 %v9450_v31  ;;  %2459 = vmatprep.mubr.bf16.mxu0 %v8137_v32 }
 0x1f9   : > { %2457 = vmatprep.subr.bf16.mxu0 %v9455_v33 }
 0x1fc   : > { %2458 = vmatpush1.bf16.msra.mxu0 %v9453_v34 }
 0x1ff   : > { %2460 = vmatmul.mubr.bf16.vlgmr.msra.gmra.mrb[0].mxu0 %v8136_v37 }
 0x200   : > { %2469 = vmatprep.mubr.bf16.mxu0 %v8145_v38 }
 0x207   : > { %2470 = vmatmul.mubr.bf16.gmra.mrb[4].mxu0 %v8144_v41 }
 0x208   : > { %2479 = vmatprep.mubr.bf16.mxu0 %v8153_v42 }
 0x20f   : > { %2480 = vmatmul.mubr.bf16.gmra.mrb[8].mxu0 %v8152_v45 }
 0x210   : > { %2489 = vmatprep.mubr.bf16.mxu0 %v8161_v46 }
 0x217   : > { %2490 = vmatmul.mubr.bf16.gmra.mrb[12].mxu0 %v8160_v49 }
 0x218   : > { %2499 = vmatprep.mubr.bf16.mxu0 %v8169_v50 }
 0x21f   : > { %2500 = vmatmul.mubr.bf16.gmra.mrb[16].mxu0 %v8168_v53 }
 0x220   : > { %2509 = vmatprep.mubr.bf16.mxu0 %v8177_v54 }
 0x227   : > { %2510 = vmatmul.mubr.bf16.gmra.mrb[20].mxu0 %v8176_v57 }
 0x228   : > { %2519 = vmatprep.mubr.bf16.mxu0 %v8185_v58 }
 0x22f   : > { %2520 = vmatmul.mubr.bf16.gmra.mrb[24].mxu0 %v8184_v61 }
 0x230   : > { %2529 = vmatprep.mubr.bf16.mxu0 %v8193_v62 }
 0x237   : > { %2530 = vmatmul.mubr.bf16.gmra.mrb[28].mxu0 %v8192_v63 }
 0x2d2   : > { %v2461_v25 = vpop.f32.mrb[0].mxu0 }
 0x2d3   : > { %v2552_v27 = vmul.f32 %v10861_v22, %v2461_v25  ;;  %v2463_v29 = vpop.f32.mrb[1].mxu0 }
 0x2d4   : > { %v2553_v30 = vmul.f32 %v10864_v24, %v2463_v29  ;;  %v2465_v31 = vpop.f32.mrb[2].mxu0 }
 0x2d5   : > { %v2554_v32 = vmul.f32 %v10861_v22, %v2465_v31  ;;  %v2467_v33 = vpop.f32.mrb[3].mxu0  ;;  %v10880_v36 = vadd.f32 %v10871_v28, %v2552_v27 }
 0x2d6   : > { %v10876_v34 = vadd.f32 %v10867_v26, %v2553_v30  ;;  %v2555_v35 = vmul.f32 %v10864_v24, %v2467_v33 }
 0x2d7   : > { %v10884_v38 = vadd.f32 %v10871_v28, %v2554_v32  ;;  %v2660_v43 = vmin.f32 %v10880_v36, 0.0  ;;  %vm2628_vm0 = vcmp.gt.f32.partialorder %v10880_v36, 0.0 }
 0x2d8   : > { %v2661_v37 = vmin.f32 %v10876_v34, 0.0  ;;  %v10887_v39 = vadd.f32 %v10867_v26, %v2555_v35  ;;  %vm2629_vm1 = vcmp.gt.f32.partialorder %v10876_v34, 0.0 }
 0x2d9   : > { %v2662_v46 = vmin.f32 %v10884_v38, 0.0  ;;  %v2692_v55 = vmul.f32 1.442695, %v2660_v43  ;;  %vm2630_vm3 = vcmp.gt.f32.partialorder %v10884_v38, 0.0 }
 0x2da   : > { %v2694_v40 = vmul.f32 1.442695, %v2661_v37  ;;  %v2663_v41 = vmin.f32 %v10887_v39, 0.0  ;;  %v2471_v42 = vpop.f32.mrb[4].mxu0  ;;  %vm2631_vm2 = vcmp.gt.f32.partialorder %v10887_v39, 0.0 }
 0x2db   : > { %v2556_v44 = vmul.f32 %v10861_v22, %v2471_v42  ;;  %v2473_v45 = vpop.f32.mrb[5].mxu0  ;;  %v2696_v57 = vmul.f32 1.442695, %v2662_v46 }
 0x2dc   : > { %9506 = vpow2.f32 %v2694_v40  ;;  %v2698_v47 = vmul.f32 1.442695, %v2663_v41  ;;  %v2557_v48 = vmul.f32 %v10864_v24, %v2473_v45  ;;  %v2475_v49 = vpop.f32.mrb[6].mxu0 }
 0x2dd   : > { %v10895_v50 = vadd.f32 %v10871_v28, %v2556_v44  ;;  %v2558_v51 = vmul.f32 %v10861_v22, %v2475_v49  ;;  %v2477_v52 = vpop.f32.mrb[7].mxu0 }
 0x2de   : > { %9508 = vpow2.f32 %v2698_v47  ;;  %v10899_v53 = vadd.f32 %v10867_v26, %v2557_v48  ;;  %v2559_v54 = vmul.f32 %v10864_v24, %v2477_v52 }
 0x2df   : > { %v10903_v56 = vadd.f32 %v10871_v28, %v2558_v51  ;;  %v2664_v58 = vmin.f32 %v10895_v50, 0.0  ;;  %9510 = vpow2.f32 %v2692_v55  ;;  %vm2632_vm6 = vcmp.gt.f32.partialorder %v10895_v50, 0.0 }
 0x2e0   : > { %v10907_v59 = vadd.f32 %v10867_v26, %v2559_v54  ;;  %v2665_v60 = vmin.f32 %v10899_v53, 0.0  ;;  %9512 = vpow2.f32 %v2696_v57  ;;  %vm2633_vm4 = vcmp.gt.f32.partialorder %v10899_v53, 0.0 }
 0x2e1   : > { %v2666_v61 = vmin.f32 %v10903_v56, 0.0  ;;  %v2700_v2 = vmul.f32 1.442695, %v2664_v58  ;;  %vm2634_vm7 = vcmp.gt.f32.partialorder %v10903_v56, 0.0 }
 0x2e2   : > { %v2481_v62 = vpop.f32.mrb[8].mxu0  ;;  %v2667_v63 = vmin.f32 %v10907_v59, 0.0  ;;  %v2702_v5 = vmul.f32 1.442695, %v2665_v60  ;;  %vm2635_vm5 = vcmp.gt.f32.partialorder %v10907_v59, 0.0 }
 0x2e3   : > { %v2560_v0 = vmul.f32 %v10861_v22, %v2481_v62  ;;  %v2483_v1 = vpop.f32.mrb[9].mxu0  ;;  %v2704_v9 = vmul.f32 1.442695, %v2666_v61  ;;  %9514 = vpow2.f32 %v2700_v2 }
 0x2e4   : > { %v2561_v3 = vmul.f32 %v10864_v24, %v2483_v1  ;;  %v2485_v4 = vpop.f32.mrb[10].mxu0  ;;  %v2706_v13 = vmul.f32 1.442695, %v2667_v63  ;;  %9516 = vpow2.f32 %v2702_v5 }
 0x2e5   : > { %v10915_v6 = vadd.f32 %v10871_v28, %v2560_v0  ;;  %v2487_v7 = vpop.f32.mrb[11].mxu0  ;;  %v2562_v11 = vmul.f32 %v10861_v22, %v2485_v4  ;;  %9518 = vpow2.f32 %v2704_v9 }
 0x2e6   : > { %v9507_v8 = vpop.eup %9506  ;;  %v10918_v10 = vadd.f32 %v10867_v26, %v2561_v3  ;;  %v2563_v12 = vmul.f32 %v10864_v24, %v2487_v7  ;;  %9520 = vpow2.f32 %v2706_v13 }
 0x2e7   : > { %v2668_v17 = vmin.f32 %v10915_v6, 0.0  ;;  %v8323_v20 = vadd.f32 -1.0, %v9507_v8  ;;  %v10928_v25 = vadd.f32 %v10871_v28, %v2562_v11  ;;  %vm2636_vm10 = vcmp.gt.f32.partialorder %v10915_v6, 0.0 }
 0x2e8   : > { %v9509_v14 = vpop.eup %9508  ;;  %v10923_v15 = vadd.f32 %v10867_v26, %v2563_v12  ;;  %v2669_v23 = vmin.f32 %v10918_v10, 0.0  ;;  %vm2637_vm8 = vcmp.gt.f32.partialorder %v10918_v10, 0.0 }
 0x2e9   : > { %v8325_v29 = vadd.f32 -1.0, %v9509_v14  ;;  %v9511_v37 = vpop.eup %9510  ;;  %v2708_v40 = vmul.f32 1.442695, %v2668_v17  ;;  %v2789_v43 = vmul.f32 1.6732632, %v8323_v20  ;;  %v2670_v46 = vmin.f32 %v10928_v25, 0.0 }
 0x2ea   : > { %v2491_v27 = vpop.f32.mrb[12].mxu0  ;;  %v2671_v30 = vmin.f32 %v10923_v15, 0.0  ;;  %v9513_v44 = vpop.eup %9512  ;;  %v2710_v45 = vmul.f32 1.442695, %v2669_v23  ;;  %v8322_v52 = vadd.f32 -1.0, %v9511_v37  ;;  %vm2639_vm9 = vcmp.gt.f32.partialorder %v10923_v15, 0.0 }
 0x2eb   : > { %v2564_v31 = vmul.f32 %v10861_v22, %v2491_v27  ;;  %v2493_v32 = vpop.f32.mrb[13].mxu0  ;;  %v2791_v47 = vmul.f32 1.6732632, %v8325_v29  ;;  %v8324_v55 = vadd.f32 -1.0, %v9513_v44  ;;  %9522 = vpow2.f32 %v2708_v40 }
 0x2ec   : > { %v2565_v33 = vmul.f32 %v10864_v24, %v2493_v32  ;;  %v2495_v35 = vpop.f32.mrb[14].mxu0  ;;  %v2714_v48 = vmul.f32 1.442695, %v2671_v30  ;;  %v2821_v58 = vsel %vm2629_vm1, %v10876_v34, %v2789_v43  ;;  %9524 = vpow2.f32 %v2710_v45 }
 0x2ed   : > { %v2566_v41 = vmul.f32 %v10861_v22, %v2495_v35  ;;  %v2497_v42 = vpop.f32.mrb[15].mxu0  ;;  %v10937_v49 = vadd.f32 %v10871_v28, %v2564_v31  ;;  %v9515_v60 = vpop.eup %9514  ;;  %v2712_v61 = vmul.f32 1.442695, %v2670_v46  ;;  %v2823_v63 = vsel %vm2631_vm2, %v10887_v39, %v2791_v47 }
 0x2ee   : > { %v2567_v51 = vmul.f32 %v10864_v24, %v2497_v42  ;;  %v10941_v54 = vadd.f32 %v10867_v26, %v2565_v33  ;;  %v9517_v0 = vpop.eup %9516  ;;  %9526 = vpow2.f32 %v2714_v48  ;;  %v2853_v7 = vmul.f32 1.050701, %v2821_v58 }
 0x2ef   : > { %v10946_v57 = vadd.f32 %v10871_v28, %v2566_v41  ;;  %v2672_v1 = vmin.f32 %v10937_v49, 0.0  ;;  %v9519_v5 = vpop.eup %9518  ;;  %v2855_v8 = vmul.f32 1.050701, %v2823_v63  ;;  %v2788_v14 = vmul.f32 1.6732632, %v8322_v52 }
 0x2f0   : > { %v10953_v2 = vadd.f32 %v10867_v26, %v2567_v51  ;;  %v2673_v34 = vmin.f32 %v10941_v54, 0.0  ;;  %v9521_v12 = vpop.eup %9520  ;;  %v2790_v17 = vmul.f32 1.6732632, %v8324_v55  ;;  %9528 = vpow2.f32 %v2712_v61 }
 0x2f1   : > { %v2674_v39 = vmin.f32 %v10946_v57, 0.0  ;;  %v2917_v23 = vpack.c.bf16 %v2855_v8, %v2853_v7  ;;  %v8326_v29 = vadd.f32 -1.0, %v9515_v60  ;;  %v8327_v30 = vadd.f32 -1.0, %v9517_v0 }
 0x2f2   : > { %v2501_v62 = vpop.f32.mrb[16].mxu0  ;;  %v2675_v31 = vmin.f32 %v10953_v2, 0.0  ;;  %v2820_v32 = vsel %vm2628_vm0, %v10880_v36, %v2788_v14  ;;  %v8328_v33 = vadd.f32 -1.0, %v9519_v5  ;;  %v8329_v35 = vadd.f32 -1.0, %v9521_v12 }
 0x2f3   : > { %v2568_v3 = vmul.f32 %v10861_v22, %v2501_v62  ;;  %v2503_v4 = vpop.f32.mrb[17].mxu0  ;;  %v2716_v37 = vmul.f32 1.442695, %v2672_v1  ;;  %3060 = vmatprep.mubr.bf16.mxu1 %v2917_v23  ;;  %v2822_v40 = vsel %vm2630_vm3, %v10884_v38, %v2790_v17  ;;  %v2718_v41 = vmul.f32 1.442695, %v2673_v34 }
 0x2f4   : > { %v2569_v9 = vmul.f32 %v10864_v24, %v2503_v4  ;;  %v2505_v11 = vpop.f32.mrb[18].mxu0  ;;  %v2720_v42 = vmul.f32 1.442695, %v2674_v39  ;;  %v2852_v46 = vmul.f32 1.050701, %v2820_v32  ;;  %vm2638_vm11 = vcmp.gt.f32.partialorder %v10928_v25, 0.0 }
 0x2f5   : > { %v10961_v13 = vadd.f32 %v10871_v28, %v2568_v3  ;;  %v2507_v20 = vpop.f32.mrb[19].mxu0  ;;  %v2570_v44 = vmul.f32 %v10861_v22, %v2505_v11  ;;  %v2854_v47 = vmul.f32 1.050701, %v2822_v40  ;;  %v10978_v51 = vpop.eup %9522  ;;  %v2722_v52 = vmul.f32 1.442695, %v2675_v31  ;;  %v9473_v3 = vld [vmem:[%s14248_s9 + $0x8] sm:$0xff]  }
 0x2f6   : > { %v10965_v27 = vadd.f32 %v10867_v26, %v2569_v9  ;;  %v2571_v36 = vmul.f32 %v10864_v24, %v2507_v20  ;;  %v2793_v58 = vmul.f32 1.6732632, %v8327_v30  ;;  %v9525_v61 = vpop.eup %9524  ;;  %9530 = vpow2.f32 %v2716_v37 }
 0x2f7   : > { %v2676_v43 = vmin.f32 %v10961_v13, 0.0  ;;  %v10981_v55 = vadd.f32 %v10871_v28, %v2570_v44  ;;  %v2916_v62 = vpack.c.bf16 %v2854_v47, %v2852_v46  ;;  %v2795_v0 = vmul.f32 1.6732632, %v8329_v35 }
 0x2f8   : > { %v2677_v45 = vmin.f32 %v10965_v27, 0.0  ;;  %v10985_v63 = vadd.f32 %v10867_v26, %v2571_v36  ;;  %v9527_v4 = vpop.eup %9526  ;;  %9532 = vpow2.f32 %v2718_v41  ;;  %v2825_v11 = vsel %vm2633_vm4, %v10899_v53, %v2793_v58 }
 0x2f9   : > { %v2724_v5 = vmul.f32 1.442695, %v2676_v43  ;;  %v2678_v34 = vmin.f32 %v10981_v55, 0.0  ;;  %9534 = vpow2.f32 %v2720_v42  ;;  %3061 = vmatmul.mubr.bf16.vlgmr.msra.gmra.mrb[0].mxu1 %v2916_v62  ;;  %v2827_v12 = vsel %vm2635_vm5, %v10907_v59, %v2795_v0  ;;  %v9474_v59 = vld [vmem:[%s14248_s9 + $0x10] sm:$0xff]  }
 0x2fa   : > { %v2511_v48 = vpop.f32.mrb[20].mxu0  ;;  %v2726_v9 = vmul.f32 1.442695, %v2677_v45  ;;  %9536 = vpow2.f32 %v2722_v52  ;;  %v2679_v39 = vmin.f32 %v10985_v63, 0.0  ;;  %8964 = vmatpush3.bf16.msra.mxu1 %v10846_v16  ;;  %v9529_v14 = vpop.eup %9528  ;;  %v8331_v17 = vadd.f32 -1.0, %v9525_v61 }
 0x2fb   : > { %v2572_v38 = vmul.f32 %v10861_v22, %v2511_v48  ;;  %v2513_v60 = vpop.f32.mrb[21].mxu0  ;;  %v8333_v20 = vadd.f32 -1.0, %v9527_v4  ;;  %8965 = vmatprep.subr.bf16.mxu1 %v9473_v3  ;;  %9538 = vpow2.f32 %v2724_v5  ;;  %v2728_v30 = vmul.f32 1.442695, %v2678_v34 }
 0x2fc   : > { %v2515_v1 = vpop.f32.mrb[22].mxu0  ;;  %v2573_v23 = vmul.f32 %v10864_v24, %v2513_v60  ;;  %v2857_v31 = vmul.f32 1.050701, %v2825_v11  ;;  %v2859_v32 = vmul.f32 1.050701, %v2827_v12  ;;  %9540 = vpow2.f32 %v2726_v9 }
 0x2fd   : > { %v10992_v7 = vadd.f32 %v10871_v28, %v2572_v38  ;;  %v2517_v8 = vpop.f32.mrb[23].mxu0  ;;  %v2792_v35 = vmul.f32 1.6732632, %v8326_v29  ;;  %v2794_v37 = vmul.f32 1.6732632, %v8328_v33  ;;  %v2574_v43 = vmul.f32 %v10861_v22, %v2515_v1 }
 0x2fe   : > { %v11012_v16 = vadd.f32 %v10867_v26, %v2573_v23  ;;  %v2730_v41 = vmul.f32 1.442695, %v2679_v39  ;;  %v2919_v42 = vpack.c.bf16 %v2859_v32, %v2857_v31  ;;  %v2575_v44 = vmul.f32 %v10864_v24, %v2517_v8  ;;  %8966 = vmatpush3.bf16.msra.mxu1 %v9473_v3 }
 0x2ff   : > { %v2680_v53 = vmin.f32 %v10992_v7, 0.0  ;;  %v2824_v36 = vsel %vm2632_vm6, %v10895_v50, %v2792_v35  ;;  %v2826_v29 = vsel %vm2634_vm7, %v10903_v56, %v2794_v37  ;;  %8967 = vmatprep.subr.bf16.mxu1 %v9474_v59  ;;  %v11025_v38 = vadd.f32 %v10871_v28, %v2574_v43 }
 0x300   : > { %v2681_v47 = vmin.f32 %v11012_v16, 0.0  ;;  %3068 = vmatprep.mubr.bf16.mxu1 %v2919_v42  ;;  %v2856_v48 = vmul.f32 1.050701, %v2824_v36  ;;  %v2858_v52 = vmul.f32 1.050701, %v2826_v29  ;;  %v11028_v58 = vadd.f32 %v10867_v26, %v2575_v44  ;;  %v9531_v61 = vpop.eup %9530 }
 0x301   : > { %v2732_v46 = vmul.f32 1.442695, %v2680_v53  ;;  %9542 = vpow2.f32 %v2728_v30  ;;  %v2797_v62 = vmul.f32 1.6732632, %v8331_v17  ;;  %v8330_v1 = vadd.f32 -1.0, %v10978_v51 }
 0x302   : > { %v2521_v40 = vpop.f32.mrb[24].mxu0  ;;  %v2734_v50 = vmul.f32 1.442695, %v2681_v47  ;;  %v9533_v0 = vpop.eup %9532  ;;  %9544 = vpow2.f32 %v2730_v41  ;;  %v2918_v3 = vpack.c.bf16 %v2858_v52, %v2856_v48  ;;  %v2682_v4 = vmin.f32 %v11025_v38, 0.0  ;;  %8968 = vmatpush3.bf16.msra.mxu1 %v9474_v59 }
 0x303   : > { %v2523_v45 = vpop.f32.mrb[25].mxu0  ;;  %v2576_v56 = vmul.f32 %v10861_v22, %v2521_v40  ;;  %v9535_v5 = vpop.eup %9534  ;;  %v8332_v34 = vadd.f32 -1.0, %v9529_v14  ;;  %9546 = vpow2.f32 %v2732_v46  ;;  %v2683_v8 = vmin.f32 %v11028_v58, 0.0 }
 0x304   : > { %v2525_v33 = vpop.f32.mrb[26].mxu0  ;;  %v9537_v11 = vpop.eup %9536  ;;  %vm2641_vm12 = vcmp.gt.f32.partialorder %v10941_v54, 0.0  ;;  %3069 = vmatmul.mubr.bf16.gmra.mrb[4].mxu1 %v2918_v3  ;;  %v2736_v12 = vmul.f32 1.442695, %v2682_v4  ;;  %v2799_v39 = vmul.f32 1.6732632, %v8333_v20  ;;  %v2829_v51 = vsel %vm2637_vm8, %v10918_v10, %v2797_v62 }
 0x305   : > { %v2527_v60 = vpop.f32.mrb[27].mxu0  ;;  %v11036_v9 = vadd.f32 %v10871_v28, %v2576_v56  ;;  %v2577_v17 = vmul.f32 %v10864_v24, %v2523_v45  ;;  %vm2643_vm13 = vcmp.gt.f32.partialorder %v10953_v2, 0.0  ;;  %9548 = vpow2.f32 %v2734_v50  ;;  %v9539_v23 = vpop.eup %9538 }
 0x306   : > { %v2738_v14 = vmul.f32 1.442695, %v2683_v8  ;;  %v2831_v59 = vsel %vm2639_vm9, %v10923_v15, %v2799_v39  ;;  %v2861_v30 = vmul.f32 1.050701, %v2829_v51  ;;  %v2796_v31 = vmul.f32 1.6732632, %v8330_v1  ;;  %v9541_v10 = vpop.eup %9540 }
 0x307   : > { %v2684_v53 = vmin.f32 %v11036_v9, 0.0  ;;  %v11049_v20 = vadd.f32 %v10867_v26, %v2577_v17  ;;  %v8335_v35 = vadd.f32 -1.0, %v9533_v0  ;;  %9550 = vpow2.f32 %v2736_v12 }
 0x308   : > { %v2863_v40 = vmul.f32 1.050701, %v2831_v59  ;;  %v8337_v42 = vadd.f32 -1.0, %v9537_v11  ;;  %9552 = vpow2.f32 %v2738_v14  ;;  %v2798_v44 = vmul.f32 1.6732632, %v8332_v34 }
 0x309   : > { %v2740_v37 = vmul.f32 1.442695, %v2684_v53  ;;  %v2685_v43 = vmin.f32 %v11049_v20, 0.0  ;;  %v8334_v46 = vadd.f32 -1.0, %v9531_v61  ;;  %v2828_v47 = vsel %vm2636_vm10, %v10915_v6, %v2796_v31 }
 0x30a   : > { %v2531_v32 = vpop.f32.mrb[28].mxu0  ;;  %v2921_v15 = vpack.c.bf16 %v2863_v40, %v2861_v30  ;;  %v2830_v48 = vsel %vm2638_vm11, %v10928_v25, %v2798_v44  ;;  %v2860_v52 = vmul.f32 1.050701, %v2828_v47  ;;  %v2578_v50 = vmul.f32 %v10861_v22, %v2525_v33 }
 0x30b   : > { %v2533_v41 = vpop.f32.mrb[29].mxu0  ;;  %9554 = vpow2.f32 %v2740_v37  ;;  %v2742_v29 = vmul.f32 1.442695, %v2685_v43  ;;  %v9543_v56 = vpop.eup %9542  ;;  %v2862_v62 = vmul.f32 1.050701, %v2830_v48  ;;  %v2579_v61 = vmul.f32 %v10864_v24, %v2527_v60 }
 0x30c   : > { %v2535_v45 = vpop.f32.mrb[30].mxu0  ;;  %3076 = vmatprep.mubr.bf16.mxu1 %v2921_v15  ;;  %v2580_v0 = vmul.f32 %v10861_v22, %v2531_v32  ;;  %v2801_v1 = vmul.f32 1.6732632, %v8335_v35  ;;  %v9545_v3 = vpop.eup %9544  ;;  %vm2640_vm14 = vcmp.gt.f32.partialorder %v10937_v49, 0.0  ;;  %vm2642_vm15 = vcmp.gt.f32.partialorder %v10946_v57, 0.0 }
 0x30d   : > { %v2537_v36 = vpop.f32.mrb[31].mxu0  ;;  %9556 = vpow2.f32 %v2742_v29  ;;  %v11064_v6 = vadd.f32 %v10871_v28, %v2578_v50  ;;  %v2803_v25 = vmul.f32 1.6732632, %v8337_v42  ;;  %v2581_v33 = vmul.f32 %v10864_v24, %v2533_v41  ;;  %v9547_v4 = vpop.eup %9546 }
 0x30e   : > { %v2920_v34 = vpack.c.bf16 %v2862_v62, %v2860_v52  ;;  %v11068_v8 = vadd.f32 %v10867_v26, %v2579_v61  ;;  %v11071_v60 = vadd.f32 %v10871_v28, %v2580_v0  ;;  %v2833_v11 = vsel %vm2641_vm12, %v10941_v54, %v2801_v1 }
 0x30f   : > { %v8336_v12 = vadd.f32 -1.0, %v9535_v5  ;;  %v8338_v39 = vadd.f32 -1.0, %v9539_v23  ;;  %v2686_v51 = vmin.f32 %v11064_v6, 0.0  ;;  %v2835_v17 = vsel %vm2643_vm13, %v10953_v2, %v2803_v25  ;;  %v9549_v14 = vpop.eup %9548 }
 0x310   : > { %vm2645_vm0 = vcmp.gt.f32.partialorder %v10965_v27, 0.0  ;;  %v8339_v53 = vadd.f32 -1.0, %v9541_v10  ;;  %v8340_v59 = vadd.f32 -1.0, %v9543_v56  ;;  %3077 = vmatmul.mubr.bf16.gmra.mrb[8].mxu1 %v2920_v34  ;;  %v2687_v30 = vmin.f32 %v11068_v8, 0.0 }
 0x311   : > { %v2688_v31 = vmin.f32 %v11071_v60, 0.0  ;;  %vm2647_vm1 = vcmp.gt.f32.partialorder %v10985_v63, 0.0  ;;  %v2744_v54 = vmul.f32 1.442695, %v2686_v51  ;;  %v2865_v5 = vmul.f32 1.050701, %v2833_v11  ;;  %v9551_v35 = vpop.eup %9550 }
 0x312   : > { %v2867_v23 = vmul.f32 1.050701, %v2835_v17  ;;  %v11085_v32 = vadd.f32 %v10867_v26, %v2581_v33  ;;  %vm2644_vm2 = vcmp.gt.f32.partialorder %v10961_v13, 0.0  ;;  %v8341_v2 = vadd.f32 -1.0, %v9545_v3  ;;  %v9553_v41 = vpop.eup %9552 }
 0x313   : > { %v2746_v37 = vmul.f32 1.442695, %v2687_v30  ;;  %v2748_v10 = vmul.f32 1.442695, %v2688_v31  ;;  %v2582_v40 = vmul.f32 %v10861_v22, %v2535_v45  ;;  %v8342_v42 = vadd.f32 -1.0, %v9547_v4 }
 0x314   : > { %v8343_v43 = vadd.f32 -1.0, %v9549_v14  ;;  %9558 = vpow2.f32 %v2744_v54  ;;  %v2923_v44 = vpack.c.bf16 %v2867_v23, %v2865_v5  ;;  %vm2646_vm3 = vcmp.gt.f32.partialorder %v10981_v55, 0.0 }
 0x315   : > { %v9555_v15 = vpop.eup %9554  ;;  %9560 = vpow2.f32 %v2746_v37  ;;  %v2689_v47 = vmin.f32 %v11085_v32, 0.0  ;;  %v2800_v29 = vmul.f32 1.6732632, %v8334_v46  ;;  %v2802_v48 = vmul.f32 1.6732632, %v8336_v12 }
 0x316   : > { %vm2649_vm4 = vcmp.gt.f32.partialorder %v11012_v16, 0.0  ;;  %v8344_v52 = vadd.f32 -1.0, %v9551_v35  ;;  %9562 = vpow2.f32 %v2748_v10  ;;  %3084 = vmatprep.mubr.bf16.mxu1 %v2923_v44  ;;  %v11093_v22 = vadd.f32 %v10871_v28, %v2582_v40 }
 0x317   : > { %v2583_v45 = vmul.f32 %v10864_v24, %v2537_v36  ;;  %vm2651_vm5 = vcmp.gt.f32.partialorder %v11028_v58, 0.0  ;;  %v2750_v50 = vmul.f32 1.442695, %v2689_v47  ;;  %v2832_v56 = vsel %vm2640_vm14, %v10937_v49, %v2800_v29  ;;  %v9557_v61 = vpop.eup %9556 }
 0x318   : > { %v2834_v46 = vsel %vm2642_vm15, %v10946_v57, %v2802_v48  ;;  %v2805_v62 = vmul.f32 1.6732632, %v8339_v53  ;;  %vm2648_vm6 = vcmp.gt.f32.partialorder %v10992_v7, 0.0  ;;  %v8345_v0 = vadd.f32 -1.0, %v9553_v41 }
 0x319   : > { %v2864_v28 = vmul.f32 1.050701, %v2832_v56  ;;  %v2866_v1 = vmul.f32 1.050701, %v2834_v46  ;;  %v2690_v24 = vmin.f32 %v11093_v22, 0.0  ;;  %vm2650_vm7 = vcmp.gt.f32.partialorder %v11025_v38, 0.0 }
 0x31a   : > { %v8346_v36 = vadd.f32 -1.0, %v9555_v15  ;;  %9564 = vpow2.f32 %v2750_v50  ;;  %v11107_v3 = vadd.f32 %v10867_v26, %v2583_v45  ;;  %v2807_v49 = vmul.f32 1.6732632, %v8341_v2 }
 0x31b   : > { %v2922_v25 = vpack.c.bf16 %v2866_v1, %v2864_v28  ;;  %v2752_v33 = vmul.f32 1.442695, %v2690_v24  ;;  %v2837_v57 = vsel %vm2645_vm0, %v10965_v27, %v2805_v62  ;;  %v2804_v4 = vmul.f32 1.6732632, %v8338_v39 }
 0x31c   : > { %vm2653_vm8 = vcmp.gt.f32.partialorder %v11049_v20, 0.0  ;;  %v8347_v34 = vadd.f32 -1.0, %v9557_v61  ;;  %vm2655_vm9 = vcmp.gt.f32.partialorder %v11068_v8, 0.0  ;;  %v2691_v11 = vmin.f32 %v11107_v3, 0.0 }
 0x31d   : > { %v2839_v26 = vsel %vm2647_vm1, %v10985_v63, %v2807_v49  ;;  %v2869_v12 = vmul.f32 1.050701, %v2837_v57  ;;  %vm2652_vm10 = vcmp.gt.f32.partialorder %v11036_v9, 0.0  ;;  %3085 = vmatmul.mubr.bf16.gmra.mrb[12].mxu1 %v2922_v25  ;;  %9566 = vpow2.f32 %v2752_v33 }
 0x31e   : > { %v2871_v51 = vmul.f32 1.050701, %v2839_v26  ;;  %v2806_v17 = vmul.f32 1.6732632, %v8340_v59  ;;  %v2836_v27 = vsel %vm2644_vm2, %v10961_v13, %v2804_v4  ;;  %vm2654_vm11 = vcmp.gt.f32.partialorder %v11064_v6, 0.0  ;;  %v9559_v30 = vpop.eup %9558 }
 0x31f   : > { %v2754_v39 = vmul.f32 1.442695, %v2691_v11  ;;  %v2868_v14 = vmul.f32 1.050701, %v2836_v27  ;;  %v2809_v53 = vmul.f32 1.6732632, %v8343_v43  ;;  %v9561_v23 = vpop.eup %9560 }
 0x320   : > { %v2925_v31 = vpack.c.bf16 %v2871_v51, %v2869_v12  ;;  %v2838_v63 = vsel %vm2646_vm3, %v10981_v55, %v2806_v17  ;;  %v2811_v54 = vmul.f32 1.6732632, %v8345_v0  ;;  %v2808_v5 = vmul.f32 1.6732632, %v8342_v42  ;;  %v9563_v2 = vpop.eup %9562 }
 0x321   : > { %v8348_v35 = vadd.f32 -1.0, %v9559_v30  ;;  %9568 = vpow2.f32 %v2754_v39  ;;  %v2870_v59 = vmul.f32 1.050701, %v2838_v63  ;;  %v2841_v13 = vsel %vm2649_vm4, %v11012_v16, %v2809_v53  ;;  %v9478_v53 = vld [vmem:[%s14248_s9 + $0x30] sm:$0xff]   ;;  %v9479_v30 = vld [vmem:[%s14248_s9 + $0x38] sm:$0xff]   ;;  %v3539_v63 = vld [vmem:[%s11180_s12] sm:$0xff] }
 0x322   : > { %v8349_v37 = vadd.f32 -1.0, %v9561_v23  ;;  %3092 = vmatprep.mubr.bf16.mxu1 %v2925_v31  ;;  %v2843_v10 = vsel %vm2651_vm5, %v11028_v58, %v2811_v54  ;;  %v2873_v40 = vmul.f32 1.050701, %v2841_v13  ;;  %v2810_v41 = vmul.f32 1.6732632, %v8344_v52  ;;  %v3541_v31 = vld [vmem:[%s11180_s12 + $0x10] sm:$0xff]  ;;  %3571 = vrot.lane.b32.xlu0 %v3539_v63, %s10309_s7 }
 0x323   : > { %v8350_v55 = vadd.f32 -1.0, %v9563_v2  ;;  %v2924_v43 = vpack.c.bf16 %v2870_v59, %v2868_v14  ;;  %v2875_v42 = vmul.f32 1.050701, %v2843_v10  ;;  %v2840_v44 = vsel %vm2648_vm6, %v10992_v7, %v2808_v5  ;;  %3575 = vrot.lane.b32.xlu1 %v3541_v31, %s10309_s7  ;;  %v3542_v54 = vld [vmem:[%s11180_s12 + $0x18] sm:$0xff]  ;;  %v3540_v5 = vld [vmem:[%s11180_s12 + $0x8] sm:$0xff]  ;;  %v3543_v23 = vld [vmem:[%s11180_s12 + $0x20] sm:$0xff] }
 0x324   : > { %v2842_v16 = vsel %vm2650_vm7, %v11025_v38, %v2810_v41  ;;  %v2872_v15 = vmul.f32 1.050701, %v2840_v44  ;;  %v2813_v47 = vmul.f32 1.6732632, %v8347_v34  ;;  %v2815_v29 = vmul.f32 1.6732632, %v8349_v37  ;;  %v9565_v48 = vpop.eup %9564 }
 0x325   : > { %v2927_v45 = vpack.c.bf16 %v2875_v42, %v2873_v40  ;;  %v2874_v50 = vmul.f32 1.050701, %v2842_v16  ;;  %v2812_v58 = vmul.f32 1.6732632, %v8346_v36  ;;  %v2814_v56 = vmul.f32 1.6732632, %v8348_v35  ;;  %3093 = vmatmul.mubr.bf16.gmra.mrb[16].mxu1 %v2924_v43 }
 0x326   : > { %v8351_v52 = vadd.f32 -1.0, %v9565_v48  ;;  %v2845_v46 = vsel %vm2653_vm8, %v11049_v20, %v2813_v47  ;;  %v2847_v7 = vsel %vm2655_vm9, %v11068_v8, %v2815_v29  ;;  %v2816_v62 = vmul.f32 1.6732632, %v8350_v55  ;;  %3573 = vrot.lane.b32.xlu0 %v3540_v5, %s10309_s7  ;;  %v3544_v35 = vld [vmem:[%s11180_s12 + $0x28] sm:$0xff]  ;;  %v3545_v59 = vld [vmem:[%s11180_s12 + $0x30] sm:$0xff]  ;;  %v3546_v13 = vld [vmem:[%s11180_s12 + $0x38] sm:$0xff] }
 0x327   : > { %3100 = vmatprep.mubr.bf16.mxu1 %v2927_v45  ;;  %v2926_v38 = vpack.c.bf16 %v2874_v50, %v2872_v15  ;;  %v2877_v61 = vmul.f32 1.050701, %v2845_v46  ;;  %v2879_v0 = vmul.f32 1.050701, %v2847_v7  ;;  %v2844_v28 = vsel %vm2652_vm10, %v11036_v9, %v2812_v58  ;;  %v9567_v1 = vpop.eup %9566  ;;  %3577 = vrot.lane.b32.xlu1 %v3542_v54, %s10309_s7  ;;  %v3547_v2 = vld [vmem:[%s11180_s12 + $0x40] sm:$0xff]  ;;  %v3548_v37 = vld [vmem:[%s11180_s12 + $0x48] sm:$0xff] }
 0x328   : > { %v2846_v24 = vsel %vm2654_vm11, %v11064_v6, %v2814_v56  ;;  %v8352_v36 = vadd.f32 -1.0, %v9567_v1  ;;  %v2876_v49 = vmul.f32 1.050701, %v2844_v28  ;;  %vm2656_vm12 = vcmp.gt.f32.partialorder %v11071_v60, 0.0  ;;  %v3549_v10 = vld [vmem:[%s11180_s12 + $0x50] sm:$0xff]  ;;  %v3550_v40 = vld [vmem:[%s11180_s12 + $0x58] sm:$0xff] }
 0x329   : > { %v2929_v20 = vpack.c.bf16 %v2879_v0, %v2877_v61  ;;  %v2878_v25 = vmul.f32 1.050701, %v2846_v24  ;;  %v2817_v8 = vmul.f32 1.6732632, %v8351_v52  ;;  %v2848_v34 = vsel %vm2656_vm12, %v11071_v60, %v2816_v62  ;;  %v3551_v55 = vld [vmem:[%s11180_s12 + $0x60] sm:$0xff]  ;;  %v3552_v43 = vld [vmem:[%s11180_s12 + $0x68] sm:$0xff] }
 0x32a   : > { %v2818_v4 = vmul.f32 1.6732632, %v8352_v36  ;;  %vm2658_vm13 = vcmp.gt.f32.partialorder %v11093_v22, 0.0  ;;  %vm2657_vm14 = vcmp.gt.f32.partialorder %v11085_v32, 0.0  ;;  %v2880_v12 = vmul.f32 1.050701, %v2848_v34  ;;  %3579 = vrot.lane.b32.xlu0 %v3543_v23, %s10309_s7 }
 0x32b   : > { %v9569_v33 = vpop.eup %9568  ;;  %v2928_v57 = vpack.c.bf16 %v2878_v25, %v2876_v49  ;;  %v2849_v26 = vsel %vm2657_vm14, %v11085_v32, %v2817_v8  ;;  %vm2659_vm15 = vcmp.gt.f32.partialorder %v11107_v3, 0.0  ;;  %v9476_v32 = vld [vmem:[%s14248_s9 + $0x20] sm:$0xff]   ;;  %3581 = vrot.lane.b32.xlu1 %v3544_v35, %s10309_s7  ;;  %v3553_v50 = vld [vmem:[%s11180_s12 + $0x70] sm:$0xff]  ;;  %v3554_v58 = vld [vmem:[%s11180_s12 + $0x78] sm:$0xff]  ;;  %s11310_s12 = scalar_lea.vmem %s14135_s23, %s11174_s21 }
 0x32c   : > { %v8353_v9 = vadd.f32 -1.0, %v9569_v33  ;;  %v2850_v11 = vsel %vm2658_vm13, %v11093_v22, %v2818_v4  ;;  %v2881_v60 = vmul.f32 1.050701, %v2849_v26  ;;  %v9475_v22 = vld [vmem:[%s14248_s9 + $0x18] sm:$0xff]   ;;  %v11208_v44 = vld [vmem:[#allocation8] ss:$0 sm:$0xff] }
 0x32d   : > { %3101 = vmatmul.mubr.bf16.gmra.mrb[20].mxu1 %v2926_v38  ;;  %v2882_v51 = vmul.f32 1.050701, %v2850_v11  ;;  %8969 = vmatprep.subr.bf16.mxu1 %v9475_v22  ;;  %v11210_v47 = vld [vmem:[#allocation10] ss:$0 sm:$0xff] }
 0x32e   : > { %v2819_v6 = vmul.f32 1.6732632, %v8353_v9  ;;  %3108 = vmatprep.mubr.bf16.mxu1 %v2929_v20  ;;  %8970 = vmatpush3.bf16.msra.mxu1 %v9475_v22 }
 0x32f   : > { %v2930_v27 = vpack.c.bf16 %v2882_v51, %v2880_v12  ;;  %8971 = vmatprep.subr.bf16.mxu1 %v9476_v32  ;;  %3583 = vrot.lane.b32.xlu0 %v3545_v59, %s10309_s7 }
 0x330   : > { %v2851_v17 = vsel %vm2659_vm15, %v11107_v3, %v2819_v6  ;;  %v9477_v3 = vld [vmem:[%s14248_s9 + $0x28] sm:$0xff]   ;;  %3585 = vrot.lane.b32.xlu1 %v3546_v13, %s10309_s7 }
 0x331   : > { %v2883_v39 = vmul.f32 1.050701, %v2851_v17 }
 0x332   : > { %8972 = vmatpush3.bf16.msra.mxu1 %v9476_v32 }
 0x333   : > { %v2931_v14 = vpack.c.bf16 %v2883_v39, %v2881_v60  ;;  %8973 = vmatprep.subr.bf16.mxu1 %v9477_v3  ;;  %3587 = vrot.lane.b32.xlu0 %v3547_v2, %s10309_s7 }
 0x334   : > { %3589 = vrot.lane.b32.xlu1 %v3548_v37, %s10309_s7 }
 0x335   : > { %3109 = vmatmul.mubr.bf16.gmra.mrb[24].mxu1 %v2928_v57 }
 0x336   : > { %3116 = vmatprep.mubr.bf16.mxu1 %v2931_v14  ;;  %8974 = vmatpush3.bf16.msra.mxu1 %v9477_v3 }
 0x337   : > { %8975 = vmatprep.subr.bf16.mxu1 %v9478_v53  ;;  %3591 = vrot.lane.b32.xlu0 %v3549_v10, %s10309_s7 }
 0x338   : > { %3593 = vrot.lane.b32.xlu1 %v3550_v40, %s10309_s7 }
 0x33a   : > { %8976 = vmatpush3.bf16.msra.mxu1 %v9478_v53 }
 0x33b   : > { %8977 = vmatprep.subr.bf16.mxu1 %v9479_v30  ;;  %3595 = vrot.lane.b32.xlu0 %v3551_v55, %s10309_s7 }
 0x33c   : > { %3597 = vrot.lane.b32.xlu1 %v3552_v43, %s10309_s7 }
 0x33d   : > { %3117 = vmatmul.mubr.bf16.gmra.mrb[28].mxu1 %v2930_v27 }
 0x33e   : > { %8978 = vmatpush3.bf16.msra.mxu1 %v9479_v30 }
 0x33f   : > { %3599 = vrot.lane.b32.xlu0 %v3553_v50, %s10309_s7 }
 0x340   : > { %3601 = vrot.lane.b32.xlu1 %v3554_v58, %s10309_s7  ;;  %s10310_s7 = smov 96  }
 0x3cc   : > { %v8889_v41 = vpop.f32.mrb[0].mxu1 }
 0x3cd   : > { %v8890_v42 = vpop.f32.mrb[1].mxu1 }
 0x3ce   : > { %v8891_v16 = vadd.f32 %v8890_v42, %v8889_v41  ;;  %v8892_v15 = vpop.f32.mrb[2].mxu1 }
 0x3cf   : > { %v8893_v29 = vpop.f32.mrb[3].mxu1 }
 0x3d0   : > { %v3132_v48 = vmul.f32 %v8891_v16, %v11208_v44  ;;  %v8894_v45 = vadd.f32 %v8893_v29, %v8892_v15 }
 0x3d2   : > { %v3155_v56 = vadd.f32 %v11210_v47, %v3132_v48  ;;  %v3133_v52 = vmul.f32 %v8894_v45, %v11208_v44 }
 0x3d4   : > { %v3187_v46 = vmin.f32 %v3155_v56, 0.0  ;;  %v3156_v7 = vadd.f32 %v11210_v47, %v3133_v52  ;;  %vm3171_vm0 = vcmp.gt.f32.partialorder %v3155_v56, 0.0 }
 0x3d6   : > { %v3203_v62 = vmul.f32 1.442695, %v3187_v46  ;;  %v3188_v38 = vmin.f32 %v3156_v7, 0.0  ;;  %vm3172_vm1 = vcmp.gt.f32.partialorder %v3156_v7, 0.0 }
 0x3d7   : > { %v8895_v61 = vpop.f32.mrb[4].mxu1 }
 0x3d8   : > { %9570 = vpow2.f32 %v3203_v62  ;;  %v3205_v0 = vmul.f32 1.442695, %v3188_v38  ;;  %v8896_v28 = vpop.f32.mrb[5].mxu1 }
 0x3d9   : > { %v8897_v1 = vadd.f32 %v8896_v28, %v8895_v61  ;;  %v8898_v24 = vpop.f32.mrb[6].mxu1 }
 0x3da   : > { %9572 = vpow2.f32 %v3205_v0  ;;  %v8899_v36 = vpop.f32.mrb[7].mxu1 }
 0x3db   : > { %v3134_v20 = vmul.f32 %v8897_v1, %v11208_v44  ;;  %v8900_v49 = vadd.f32 %v8899_v36, %v8898_v24 }
 0x3dd   : > { %v3157_v25 = vadd.f32 %v11210_v47, %v3134_v20  ;;  %v3135_v8 = vmul.f32 %v8900_v49, %v11208_v44 }
 0x3df   : > { %v3189_v33 = vmin.f32 %v3157_v25, 0.0  ;;  %v3158_v57 = vadd.f32 %v11210_v47, %v3135_v8  ;;  %vm3173_vm2 = vcmp.gt.f32.partialorder %v3157_v25, 0.0 }
 0x3e1   : > { %v3207_v4 = vmul.f32 1.442695, %v3189_v33  ;;  %v3190_v34 = vmin.f32 %v3158_v57, 0.0  ;;  %vm3174_vm3 = vcmp.gt.f32.partialorder %v3158_v57, 0.0 }
 0x3e2   : > { %v9571_v9 = vpop.eup %9570 }
 0x3e3   : > { %v8901_v11 = vpop.f32.mrb[8].mxu1  ;;  %9574 = vpow2.f32 %v3207_v4  ;;  %v3209_v6 = vmul.f32 1.442695, %v3190_v34  ;;  %v8372_v12 = vadd.f32 -1.0, %v9571_v9 }
 0x3e4   : > { %v8902_v26 = vpop.f32.mrb[9].mxu1  ;;  %v9573_v51 = vpop.eup %9572 }
 0x3e5   : > { %v8903_v17 = vadd.f32 %v8902_v26, %v8901_v11  ;;  %v8904_v27 = vpop.f32.mrb[10].mxu1  ;;  %9576 = vpow2.f32 %v3209_v6  ;;  %v8373_v39 = vadd.f32 -1.0, %v9573_v51  ;;  %v3251_v14 = vmul.f32 1.6732632, %v8372_v12 }
 0x3e6   : > { %v8905_v60 = vpop.f32.mrb[11].mxu1 }
 0x3e7   : > { %v3136_v22 = vmul.f32 %v8903_v17, %v11208_v44  ;;  %v8906_v32 = vadd.f32 %v8905_v60, %v8904_v27  ;;  %v3252_v3 = vmul.f32 1.6732632, %v8373_v39  ;;  %v3267_v53 = vsel %vm3171_vm0, %v3155_v56, %v3251_v14 }
 0x3e8   : > { %v3283_v23 = vmul.f32 1.050701, %v3267_v53  ;;  %vm3755_vm0 = vcmask 261120  }
 0x3e9   : > { %v11228_v30 = vadd.f32 %v11210_v47, %v3136_v22  ;;  %v3137_v31 = vmul.f32 %v8906_v32, %v11208_v44  ;;  %v3268_v63 = vsel %vm3172_vm1, %v3156_v7, %v3252_v3 }
 0x3ea   : > { %v3284_v35 = vmul.f32 1.050701, %v3268_v63 }
 0x3eb   : > { %v3191_v54 = vmin.f32 %v11228_v30, 0.0  ;;  %v11233_v5 = vadd.f32 %v11210_v47, %v3137_v31  ;;  %vm3175_vm4 = vcmp.gt.f32.partialorder %v11228_v30, 0.0 }
 0x3ec   : > { %v3315_v2 = vpack.c.bf16 %v3284_v35, %v3283_v23 }
 0x3ed   : > { %v3211_v59 = vmul.f32 1.442695, %v3191_v54  ;;  %v3192_v13 = vmin.f32 %v11233_v5, 0.0  ;;  %v9575_v37 = vpop.eup %9574  ;;  %vm3176_vm5 = vcmp.gt.f32.partialorder %v11233_v5, 0.0 }
 0x3ee   : > { %v8374_v40 = vadd.f32 -1.0, %v9575_v37  ;;  %8979 = vmatprep.mubr.bf16.mxu1 %v3315_v2 }
 0x3ef   : > { %9578 = vpow2.f32 %v3211_v59  ;;  %v3213_v41 = vmul.f32 1.442695, %v3192_v13  ;;  %v9577_v43 = vpop.eup %9576 }
 0x3f0   : > { %v8907_v10 = vpop.f32.mrb[12].mxu1  ;;  %v3253_v15 = vmul.f32 1.6732632, %v8374_v40  ;;  %v8375_v29 = vadd.f32 -1.0, %v9577_v43 }
 0x3f1   : > { %v8908_v55 = vpop.f32.mrb[13].mxu1  ;;  %9580 = vpow2.f32 %v3213_v41 }
 0x3f2   : > { %v8909_v42 = vadd.f32 %v8908_v55, %v8907_v10  ;;  %v8910_v16 = vpop.f32.mrb[14].mxu1  ;;  %v3269_v58 = vsel %vm3173_vm2, %v3157_v25, %v3253_v15  ;;  %v3254_v56 = vmul.f32 1.6732632, %v8375_v29 }
 0x3f3   : > { %v8911_v48 = vpop.f32.mrb[15].mxu1  ;;  %v3285_v62 = vmul.f32 1.050701, %v3269_v58 }
 0x3f4   : > { %v3138_v45 = vmul.f32 %v8909_v42, %v11208_v44  ;;  %v8912_v50 = vadd.f32 %v8911_v48, %v8910_v16  ;;  %v3270_v7 = vsel %vm3174_vm3, %v3158_v57, %v3254_v56 }
 0x3f5   : > { %v3286_v38 = vmul.f32 1.050701, %v3270_v7 }
 0x3f6   : > { %v11238_v52 = vadd.f32 %v11210_v47, %v3138_v45  ;;  %v3139_v46 = vmul.f32 %v8912_v50, %v11208_v44 }
 0x3f7   : > { %v3316_v24 = vpack.c.bf16 %v3286_v38, %v3285_v62 }
 0x3f8   : > { %v3193_v61 = vmin.f32 %v11238_v52, 0.0  ;;  %v11243_v0 = vadd.f32 %v11210_v47, %v3139_v46  ;;  %v8913_v28 = vpop.f32.mrb[16].mxu1  ;;  %vm3177_vm6 = vcmp.gt.f32.partialorder %v11238_v52, 0.0 }
 0x3f9   : > { %v8914_v1 = vpop.f32.mrb[17].mxu1  ;;  %v9579_v8 = vpop.eup %9578  ;;  %8980 = vmatmul.mubr.bf16.vlgmr.msra.gmra.mrb[32].mxu1 %v3316_v24 }
 0x3fa   : > { %v3215_v36 = vmul.f32 1.442695, %v3193_v61  ;;  %v3194_v20 = vmin.f32 %v11243_v0, 0.0  ;;  %v8915_v49 = vadd.f32 %v8914_v1, %v8913_v28  ;;  %v8916_v25 = vpop.f32.mrb[18].mxu1  ;;  %v8376_v11 = vadd.f32 -1.0, %v9579_v8 }
 0x3fb   : > { %v8917_v33 = vpop.f32.mrb[19].mxu1  ;;  %v9581_v9 = vpop.eup %9580  ;;  %vm3178_vm7 = vcmp.gt.f32.partialorder %v11243_v0, 0.0 }
 0x3fc   : > { %9582 = vpow2.f32 %v3215_v36  ;;  %v3217_v4 = vmul.f32 1.442695, %v3194_v20  ;;  %v3140_v57 = vmul.f32 %v8915_v49, %v11208_v44  ;;  %v8918_v34 = vadd.f32 %v8917_v33, %v8916_v25 }
 0x3fd   : > { %v8377_v12 = vadd.f32 -1.0, %v9581_v9  ;;  %v3255_v51 = vmul.f32 1.6732632, %v8376_v11 }
 0x3fe   : > { %9584 = vpow2.f32 %v3217_v4  ;;  %v11248_v6 = vadd.f32 %v11210_v47, %v3140_v57  ;;  %v3141_v26 = vmul.f32 %v8918_v34, %v11208_v44 }
 0x3ff   : > { %v3256_v39 = vmul.f32 1.6732632, %v8377_v12  ;;  %v3271_v22 = vsel %vm3175_vm4, %v11228_v30, %v3255_v51 }
 0x400   : > { %v3195_v17 = vmin.f32 %v11248_v6, 0.0  ;;  %v11253_v27 = vadd.f32 %v11210_v47, %v3141_v26  ;;  %v8919_v60 = vpop.f32.mrb[20].mxu1  ;;  %v3287_v23 = vmul.f32 1.050701, %v3271_v22  ;;  %vm3179_vm8 = vcmp.gt.f32.partialorder %v11248_v6, 0.0 }
 0x401   : > { %v8920_v14 = vpop.f32.mrb[21].mxu1  ;;  %v3272_v63 = vsel %vm3176_vm5, %v11233_v5, %v3256_v39 }
 0x402   : > { %v3219_v32 = vmul.f32 1.442695, %v3195_v17  ;;  %v3196_v3 = vmin.f32 %v11253_v27, 0.0  ;;  %v8921_v53 = vadd.f32 %v8920_v14, %v8919_v60  ;;  %v8922_v31 = vpop.f32.mrb[22].mxu1  ;;  %v3288_v35 = vmul.f32 1.050701, %v3272_v63 }
 0x403   : > { %v8923_v54 = vpop.f32.mrb[23].mxu1  ;;  %vm3180_vm9 = vcmp.gt.f32.partialorder %v11253_v27, 0.0 }
 0x404   : > { %9586 = vpow2.f32 %v3219_v32  ;;  %v3221_v59 = vmul.f32 1.442695, %v3196_v3  ;;  %v3142_v13 = vmul.f32 %v8921_v53, %v11208_v44  ;;  %v8924_v2 = vadd.f32 %v8923_v54, %v8922_v31 }
 0x405   : > { %v3317_v37 = vpack.c.bf16 %v3288_v35, %v3287_v23 }
 0x406   : > { %v9583_v10 = vpop.eup %9582  ;;  %9588 = vpow2.f32 %v3221_v59  ;;  %v11262_v30 = vadd.f32 %v11210_v47, %v3142_v13  ;;  %v3143_v40 = vmul.f32 %v8924_v2, %v11208_v44 }
 0x407   : > { %8983 = vmatprep.mubr.bf16.mxu1 %v3317_v37  ;;  %v8378_v41 = vadd.f32 -1.0, %v9583_v10 }
 0x408   : > { %v9585_v55 = vpop.eup %9584  ;;  %v3197_v5 = vmin.f32 %v11262_v30, 0.0  ;;  %v11267_v43 = vadd.f32 %v11210_v47, %v3143_v40  ;;  %v8925_v42 = vpop.f32.mrb[24].mxu1  ;;  %vm3181_vm10 = vcmp.gt.f32.partialorder %v11262_v30, 0.0 }
 0x409   : > { %v8926_v16 = vpop.f32.mrb[25].mxu1  ;;  %v8379_v15 = vadd.f32 -1.0, %v9585_v55  ;;  %v3257_v29 = vmul.f32 1.6732632, %v8378_v41 }
 0x40a   : > { %v3223_v48 = vmul.f32 1.442695, %v3197_v5  ;;  %v3198_v45 = vmin.f32 %v11267_v43, 0.0  ;;  %v8927_v50 = vadd.f32 %v8926_v16, %v8925_v42  ;;  %v8928_v58 = vpop.f32.mrb[26].mxu1  ;;  %vm3182_vm11 = vcmp.gt.f32.partialorder %v11267_v43, 0.0 }
 0x40b   : > { %v8929_v56 = vpop.f32.mrb[27].mxu1  ;;  %v3258_v46 = vmul.f32 1.6732632, %v8379_v15  ;;  %v3273_v7 = vsel %vm3177_vm6, %v11238_v52, %v3257_v29 }
 0x40c   : > { %9590 = vpow2.f32 %v3223_v48  ;;  %v3225_v62 = vmul.f32 1.442695, %v3198_v45  ;;  %v3144_v38 = vmul.f32 %v8927_v50, %v11208_v44  ;;  %v8930_v61 = vadd.f32 %v8929_v56, %v8928_v58 }
 0x40d   : > { %v3274_v28 = vsel %vm3178_vm7, %v11243_v0, %v3258_v46  ;;  %v3289_v1 = vmul.f32 1.050701, %v3273_v7 }
 0x40e   : > { %v9587_v24 = vpop.eup %9586  ;;  %9592 = vpow2.f32 %v3225_v62  ;;  %v11276_v36 = vadd.f32 %v11210_v47, %v3144_v38  ;;  %v3145_v20 = vmul.f32 %v8930_v61, %v11208_v44  ;;  %v3290_v49 = vmul.f32 1.050701, %v3274_v28 }
 0x40f   : > { %v8380_v25 = vadd.f32 -1.0, %v9587_v24 }
 0x410   : > { %v9589_v8 = vpop.eup %9588  ;;  %v3199_v52 = vmin.f32 %v11276_v36, 0.0  ;;  %v3168_v33 = vadd.f32 %v11210_v47, %v3145_v20  ;;  %v8931_v4 = vpop.f32.mrb[28].mxu1  ;;  %v3318_v57 = vpack.c.bf16 %v3290_v49, %v3289_v1  ;;  %vm3183_vm12 = vcmp.gt.f32.partialorder %v11276_v36, 0.0 }
 0x411   : > { %v8932_v34 = vpop.f32.mrb[29].mxu1  ;;  %v8381_v9 = vadd.f32 -1.0, %v9589_v8  ;;  %v3259_v0 = vmul.f32 1.6732632, %v8380_v25 }
 0x412   : > { %v3227_v11 = vmul.f32 1.442695, %v3199_v52  ;;  %v3200_v26 = vmin.f32 %v3168_v33, 0.0  ;;  %v8933_v12 = vadd.f32 %v8932_v34, %v8931_v4  ;;  %v8934_v51 = vpop.f32.mrb[30].mxu1  ;;  %8984 = vmatmul.mubr.bf16.gmra.mrb[36].mxu1 %v3318_v57  ;;  %vm3184_vm13 = vcmp.gt.f32.partialorder %v3168_v33, 0.0  ;;  %v9480_v52 = vld [vmem:[%s14123_s11] sm:$0xff]  }
 0x413   : > { %v8935_v17 = vpop.f32.mrb[31].mxu1  ;;  %v3260_v60 = vmul.f32 1.6732632, %v8381_v9  ;;  %v3275_v39 = vsel %vm3179_vm8, %v11248_v6, %v3259_v0  ;;  %8995 = vmatprep.subr.bf16.mxu1 %v9480_v52  ;;  %v11304_v4 = vld [vmem:[%s14254_s10] ss:$0 sm:$0xff] }
 0x414   : > { %9594 = vpow2.f32 %v3227_v11  ;;  %v3229_v14 = vmul.f32 1.442695, %v3200_v26  ;;  %v3146_v22 = vmul.f32 %v8933_v12, %v11208_v44  ;;  %v8936_v32 = vadd.f32 %v8935_v17, %v8934_v51  ;;  %8996 = vmatpush3.bf16.msra.mxu1 %v9480_v52 }
 0x415   : > { %v3276_v3 = vsel %vm3180_vm9, %v11253_v27, %v3260_v60  ;;  %v3291_v53 = vmul.f32 1.050701, %v3275_v39 }
 0x416   : > { %v9591_v31 = vpop.eup %9590  ;;  %9596 = vpow2.f32 %v3229_v14  ;;  %v3169_v63 = vadd.f32 %v11210_v47, %v3146_v22  ;;  %v3147_v54 = vmul.f32 %v8936_v32, %v11208_v44  ;;  %v3292_v23 = vmul.f32 1.050701, %v3276_v3 }
 0x417   : > { %v8382_v35 = vadd.f32 -1.0, %v9591_v31  ;;  %v3572_v31 = vpop.permute.xlu0 %3571 }
 0x418   : > { %v9593_v59 = vpop.eup %9592  ;;  %v3201_v13 = vmin.f32 %v3169_v63, 0.0  ;;  %v3170_v6 = vadd.f32 %v11210_v47, %v3147_v54  ;;  %v3319_v2 = vpack.c.bf16 %v3292_v23, %v3291_v53  ;;  %vm3185_vm14 = vcmp.gt.f32.partialorder %v3169_v63, 0.0  ;;  %v3576_v23 = vpop.permute.xlu1 %3575 }
 0x419   : > { %v8383_v37 = vadd.f32 -1.0, %v9593_v59  ;;  %v3261_v10 = vmul.f32 1.6732632, %v8382_v35 }
 0x41a   : > { %v3231_v40 = vmul.f32 1.442695, %v3201_v13  ;;  %v3202_v41 = vmin.f32 %v3170_v6, 0.0  ;;  %8987 = vmatprep.mubr.bf16.mxu1 %v3319_v2  ;;  %vm3186_vm15 = vcmp.gt.f32.partialorder %v3170_v6, 0.0 }
 0x41b   : > { %v3262_v27 = vmul.f32 1.6732632, %v8383_v37  ;;  %v3277_v55 = vsel %vm3181_vm10, %v11262_v30, %v3261_v10 }
 0x41c   : > { %9598 = vpow2.f32 %v3231_v40  ;;  %v3233_v5 = vmul.f32 1.442695, %v3202_v41  ;;  %v3293_v47 = vmul.f32 1.050701, %v3277_v55 }
 0x41d   : > { %v3278_v44 = vsel %vm3182_vm11, %v11267_v43, %v3262_v27 }
 0x41e   : > { %v9595_v42 = vpop.eup %9594  ;;  %9600 = vpow2.f32 %v3233_v5  ;;  %v3294_v16 = vmul.f32 1.050701, %v3278_v44 }
 0x41f   : > { %v8384_v15 = vadd.f32 -1.0, %v9595_v42 }
 0x420   : > { %v9597_v29 = vpop.eup %9596  ;;  %v3320_v48 = vpack.c.bf16 %v3294_v16, %v3293_v47  ;;  %v3578_v47 = vpop.permute.xlu1 %3577 }
 0x421   : > { %v8385_v45 = vadd.f32 -1.0, %v9597_v29  ;;  %v3263_v50 = vmul.f32 1.6732632, %v8384_v15 }
 0x422   : > { %8988 = vmatmul.mubr.bf16.gmra.mrb[40].mxu1 %v3320_v48 }
 0x423   : > { %v3264_v58 = vmul.f32 1.6732632, %v8385_v45  ;;  %v3279_v30 = vsel %vm3183_vm12, %v11276_v36, %v3263_v50 }
 0x424   : > { %v3295_v7 = vmul.f32 1.050701, %v3279_v30 }
 0x425   : > { %v3280_v56 = vsel %vm3184_vm13, %v3168_v33, %v3264_v58  ;;  %v9481_v33 = vld [vmem:[%s14123_s11 + $0x8] sm:$0xff]  }
 0x426   : > { %v9599_v46 = vpop.eup %9598  ;;  %v3296_v43 = vmul.f32 1.050701, %v3280_v56  ;;  %8997 = vmatprep.subr.bf16.mxu1 %v9481_v33 }
 0x427   : > { %v8386_v62 = vadd.f32 -1.0, %v9599_v46  ;;  %8998 = vmatpush3.bf16.msra.mxu1 %v9481_v33 }
 0x428   : > { %v9601_v38 = vpop.eup %9600  ;;  %v3321_v61 = vpack.c.bf16 %v3296_v43, %v3295_v7 }
 0x429   : > { %v8387_v28 = vadd.f32 -1.0, %v9601_v38  ;;  %v3265_v1 = vmul.f32 1.6732632, %v8386_v62 }
 0x42a   : > { %8991 = vmatprep.mubr.bf16.mxu1 %v3321_v61 }
 0x42b   : > { %v3266_v24 = vmul.f32 1.6732632, %v8387_v28  ;;  %v3281_v20 = vsel %vm3185_vm14, %v3169_v63, %v3265_v1 }
 0x42c   : > { %v3297_v25 = vmul.f32 1.050701, %v3281_v20 }
 0x42d   : > { %v3282_v49 = vsel %vm3186_vm15, %v3170_v6, %v3266_v24  ;;  %v3574_v6 = vpop.permute.xlu0 %3573 }
 0x42e   : > { %v3298_v8 = vmul.f32 1.050701, %v3282_v49  ;;  %v3582_v49 = vpop.permute.xlu1 %3581 }
 0x430   : > { %v3322_v36 = vpack.c.bf16 %v3298_v8, %v3297_v25 }
 0x431   : > { %v3580_v38 = vpop.permute.xlu0 %3579 }
 0x432   : > { %8992 = vmatmul.mubr.bf16.gmra.mrb[44].mxu1 %v3322_v36 }
 0x4cc   : > { %v8981_v57 = vpop.f32.mrb[32].mxu1 }
 0x4cd   : > { %v11313_v34 = vadd.f32 %v8981_v57, %v11304_v4  ;;  %v3412_v9 = vpop.f32.mrb[33].mxu1 }
 0x4ce   : > { %v11316_v0 = vadd.f32 %v11304_v4, %v3412_v9  ;;  %v8982_v11 = vpop.f32.mrb[34].mxu1 }
 0x4cf   : > { %v3477_v26 = vmul.f32 0.5, %v11313_v34  ;;  %7678 = vst.msk [vmem:[%s11310_s12 + $0x10] sm:$0xff] %vm3755_vm0, %v11313_v34  ;;  %v11323_v12 = vadd.f32 %v8982_v11, %v11304_v4  ;;  %v3415_v51 = vpop.f32.mrb[35].mxu1 }
 0x4d0   : > { %v3475_v17 = vmul.f32 0.5, %v11316_v0  ;;  %7676 = vst.msk [vmem:[%s11310_s12] sm:$0xff] %vm3755_vm0, %v11316_v0  ;;  %v11330_v60 = vadd.f32 %v11304_v4, %v3415_v51 }
 0x4d1   : > { %v3495_v39 = vmul.f32 1.442695, %v3477_v26  ;;  %v3478_v14 = vmul.f32 0.5, %v11323_v12  ;;  %7679 = vst.msk [vmem:[%s11310_s12 + $0x18] sm:$0xff] %vm3755_vm0, %v11323_v12 }
 0x4d2   : > { %v3491_v22 = vmul.f32 1.442695, %v3475_v17  ;;  %v3476_v32 = vmul.f32 0.5, %v11330_v60  ;;  %7677 = vst.msk [vmem:[%s11310_s12 + $0x8] sm:$0xff] %vm3755_vm0, %v11330_v60 }
 0x4d3   : > { %v3497_v3 = vmul.f32 1.442695, %v3478_v14  ;;  %9602 = vpow2.f32 %v3495_v39 }
 0x4d4   : > { %v3493_v53 = vmul.f32 1.442695, %v3476_v32  ;;  %9604 = vpow2.f32 %v3491_v22 }
 0x4d5   : > { %9606 = vpow2.f32 %v3497_v3 }
 0x4d6   : > { %9608 = vpow2.f32 %v3493_v53  ;;  %v3584_v53 = vpop.permute.xlu0 %3583 }
 0x4dd   : > { %v9603_v63 = vpop.eup %9602 }
 0x4de   : > { %v9605_v54 = vpop.eup %9604  ;;  %v11342_v2 = vadd.f32 0.0001, %v9603_v63 }
 0x4df   : > { %v9607_v35 = vpop.eup %9606  ;;  %v11340_v59 = vadd.f32 0.0001, %v9605_v54 }
 0x4e0   : > { %v9609_v13 = vpop.eup %9608  ;;  %v11350_v55 = vadd.f32 0.0001, %v9607_v35  ;;  %v3621_v15 = vmul.f32 %v3576_v23, %v11342_v2 }
 0x4e1   : > { %v3619_v37 = vmul.f32 %v3572_v31, %v11340_v59  ;;  %v11345_v10 = vadd.f32 0.0001, %v9609_v13  ;;  %v3586_v13 = vpop.permute.xlu1 %3585 }
 0x4e2   : > { %v3622_v56 = vmul.f32 %v3578_v47, %v11350_v55 }
 0x4e3   : > { %v3620_v5 = vmul.f32 %v3574_v6, %v11345_v10  ;;  %3651 = vrot.lane.b32.xlu0 %v3619_v37, %s10310_s7 }
 0x4e5   : > { %v8985_v40 = vpop.f32.mrb[36].mxu1  ;;  %3653 = vrot.lane.b32.xlu1 %v3620_v5, %s10310_s7 }
 0x4e6   : > { %v11348_v41 = vadd.f32 %v8985_v40, %v11304_v4  ;;  %v3428_v27 = vpop.f32.mrb[37].mxu1  ;;  %v3588_v40 = vpop.permute.xlu0 %3587 }
 0x4e7   : > { %v11355_v44 = vadd.f32 %v11304_v4, %v3428_v27  ;;  %v8986_v42 = vpop.f32.mrb[38].mxu1  ;;  %3655 = vrot.lane.b32.xlu0 %v3621_v15, %s10310_s7  ;;  %v3590_v15 = vpop.permute.xlu1 %3589 }
 0x4e8   : > { %v3481_v16 = vmul.f32 0.5, %v11348_v41  ;;  %7682 = vst.msk [vmem:[%s11310_s12 + $0x30] sm:$0xff] %vm3755_vm0, %v11348_v41  ;;  %v11363_v29 = vadd.f32 %v8986_v42, %v11304_v4  ;;  %v3431_v48 = vpop.f32.mrb[39].mxu1 }
 0x4e9   : > { %v3479_v45 = vmul.f32 0.5, %v11355_v44  ;;  %7680 = vst.msk [vmem:[%s11310_s12 + $0x20] sm:$0xff] %vm3755_vm0, %v11355_v44  ;;  %v11371_v50 = vadd.f32 %v11304_v4, %v3431_v48  ;;  %3657 = vrot.lane.b32.xlu1 %v3622_v56, %s10310_s7 }
 0x4ea   : > { %v3503_v58 = vmul.f32 1.442695, %v3481_v16  ;;  %v3482_v30 = vmul.f32 0.5, %v11363_v29  ;;  %7683 = vst.msk [vmem:[%s11310_s12 + $0x38] sm:$0xff] %vm3755_vm0, %v11363_v29 }
 0x4eb   : > { %v3499_v46 = vmul.f32 1.442695, %v3479_v45  ;;  %v3480_v7 = vmul.f32 0.5, %v11371_v50  ;;  %7681 = vst.msk [vmem:[%s11310_s12 + $0x28] sm:$0xff] %vm3755_vm0, %v11371_v50 }
 0x4ec   : > { %v3505_v43 = vmul.f32 1.442695, %v3482_v30  ;;  %9610 = vpow2.f32 %v3503_v58 }
 0x4ed   : > { %v3501_v62 = vmul.f32 1.442695, %v3480_v7  ;;  %9612 = vpow2.f32 %v3499_v46 }
 0x4ee   : > { %9614 = vpow2.f32 %v3505_v43 }
 0x4ef   : > { %9616 = vpow2.f32 %v3501_v62 }
 0x4f5   : > { %v8989_v61 = vpop.f32.mrb[40].mxu1 }
 0x4f6   : > { %v9611_v28 = vpop.eup %9610  ;;  %v11385_v1 = vadd.f32 %v8989_v61, %v11304_v4  ;;  %v3444_v24 = vpop.f32.mrb[41].mxu1 }
 0x4f7   : > { %v9613_v20 = vpop.eup %9612  ;;  %v11388_v25 = vadd.f32 %v11304_v4, %v3444_v24  ;;  %v8990_v8 = vpop.f32.mrb[42].mxu1  ;;  %v11403_v51 = vadd.f32 0.0001, %v9611_v28 }
 0x4f8   : > { %v9615_v36 = vpop.eup %9614  ;;  %v11390_v52 = vadd.f32 0.0001, %v9613_v20  ;;  %v3485_v33 = vmul.f32 0.5, %v11385_v1  ;;  %7686 = vst.msk [vmem:[%s11310_s12 + $0x50] sm:$0xff] %vm3755_vm0, %v11385_v1  ;;  %v11397_v57 = vadd.f32 %v8990_v8, %v11304_v4  ;;  %v3447_v9 = vpop.f32.mrb[43].mxu1 }
 0x4f9   : > { %v9617_v11 = vpop.eup %9616  ;;  %v3483_v26 = vmul.f32 0.5, %v11388_v25  ;;  %7684 = vst.msk [vmem:[%s11310_s12 + $0x40] sm:$0xff] %vm3755_vm0, %v11388_v25  ;;  %v11406_v17 = vadd.f32 %v11304_v4, %v3447_v9  ;;  %v11420_v23 = vadd.f32 0.0001, %v9615_v36  ;;  %v3625_v6 = vmul.f32 %v3584_v53, %v11403_v51  ;;  %v3592_v36 = vpop.permute.xlu0 %3591 }
 0x4fa   : > { %v3623_v39 = vmul.f32 %v3580_v38, %v11390_v52  ;;  %v3511_v14 = vmul.f32 1.442695, %v3485_v33  ;;  %v11409_v22 = vadd.f32 0.0001, %v9617_v11  ;;  %v3486_v32 = vmul.f32 0.5, %v11397_v57  ;;  %7687 = vst.msk [vmem:[%s11310_s12 + $0x58] sm:$0xff] %vm3755_vm0, %v11397_v57 }
 0x4fb   : > { %v3507_v3 = vmul.f32 1.442695, %v3483_v26  ;;  %v3484_v31 = vmul.f32 0.5, %v11406_v17  ;;  %7685 = vst.msk [vmem:[%s11310_s12 + $0x48] sm:$0xff] %vm3755_vm0, %v11406_v17  ;;  %v3626_v37 = vmul.f32 %v3586_v13, %v11420_v23 }
 0x4fc   : > { %v3624_v63 = vmul.f32 %v3582_v49, %v11409_v22  ;;  %v3513_v54 = vmul.f32 1.442695, %v3486_v32  ;;  %3659 = vrot.lane.b32.xlu0 %v3623_v39, %s10310_s7  ;;  %9618 = vpow2.f32 %v3511_v14  ;;  %v3594_v39 = vpop.permute.xlu1 %3593 }
 0x4fd   : > { %v3509_v35 = vmul.f32 1.442695, %v3484_v31  ;;  %9620 = vpow2.f32 %v3507_v3  ;;  %v3596_v3 = vpop.permute.xlu0 %3595 }
 0x4fe   : > { %3661 = vrot.lane.b32.xlu1 %v3624_v63, %s10310_s7  ;;  %9622 = vpow2.f32 %v3513_v54 }
 0x4ff   : > { %9624 = vpow2.f32 %v3509_v35 }
 0x500   : > { %3663 = vrot.lane.b32.xlu0 %v3625_v6, %s10310_s7  ;;  %v3598_v63 = vpop.permute.xlu1 %3597 }
 0x502   : > { %3665 = vrot.lane.b32.xlu1 %v3626_v37, %s10310_s7 }
 0x505   : > { %v8993_v27 = vpop.f32.mrb[44].mxu1 }
 0x506   : > { %v9619_v5 = vpop.eup %9618  ;;  %v11429_v42 = vadd.f32 %v8993_v27, %v11304_v4  ;;  %v3460_v47 = vpop.f32.mrb[45].mxu1 }
 0x507   : > { %v9621_v16 = vpop.eup %9620  ;;  %v11432_v48 = vadd.f32 %v11304_v4, %v3460_v47  ;;  %v8994_v45 = vpop.f32.mrb[46].mxu1  ;;  %v3533_v38 = vadd.f32 0.0001, %v9619_v5 }
 0x508   : > { %v9623_v58 = vpop.eup %9622  ;;  %v3531_v30 = vadd.f32 0.0001, %v9621_v16  ;;  %v3489_v56 = vmul.f32 0.5, %v11429_v42  ;;  %7690 = vst.msk [vmem:[%s11310_s12 + $0x70] sm:$0xff] %vm3755_vm0, %v11429_v42  ;;  %v11439_v46 = vadd.f32 %v8994_v45, %v11304_v4  ;;  %v3463_v7 = vpop.f32.mrb[47].mxu1 }
 0x509   : > { %v9625_v43 = vpop.eup %9624  ;;  %v3487_v62 = vmul.f32 0.5, %v11432_v48  ;;  %7688 = vst.msk [vmem:[%s11310_s12 + $0x60] sm:$0xff] %vm3755_vm0, %v11432_v48  ;;  %v11446_v61 = vadd.f32 %v11304_v4, %v3463_v7  ;;  %v3534_v26 = vadd.f32 0.0001, %v9623_v58  ;;  %v3629_v14 = vmul.f32 %v3592_v36, %v3533_v38  ;;  %v3600_v27 = vpop.permute.xlu0 %3599 }
 0x50a   : > { %v3627_v28 = vmul.f32 %v3588_v40, %v3531_v30  ;;  %v3519_v24 = vmul.f32 1.442695, %v3489_v56  ;;  %v3532_v20 = vadd.f32 0.0001, %v9625_v43  ;;  %v3490_v49 = vmul.f32 0.5, %v11439_v46  ;;  %7691 = vst.msk [vmem:[%s11310_s12 + $0x78] sm:$0xff] %vm3755_vm0, %v11439_v46  ;;  %v3602_v16 = vpop.permute.xlu1 %3601 }
 0x50b   : > { %v3515_v8 = vmul.f32 1.442695, %v3487_v62  ;;  %v3488_v33 = vmul.f32 0.5, %v11446_v61  ;;  %7689 = vst.msk [vmem:[%s11310_s12 + $0x68] sm:$0xff] %vm3755_vm0, %v11446_v61  ;;  %v3630_v32 = vmul.f32 %v3594_v39, %v3534_v26  ;;  %s14261_s12 = sld [smem:[#allocation65_spill]] }
 0x50c   : > { %v3628_v9 = vmul.f32 %v3590_v15, %v3532_v20  ;;  %v3521_v11 = vmul.f32 1.442695, %v3490_v49  ;;  %3667 = vrot.lane.b32.xlu0 %v3627_v28, %s10310_s7  ;;  %9626 = vpow2.f32 %v3519_v24 }
 0x50d   : > { %v3517_v4 = vmul.f32 1.442695, %v3488_v33  ;;  %9628 = vpow2.f32 %v3515_v8 }
 0x50e   : > { %3669 = vrot.lane.b32.xlu1 %v3628_v9, %s10310_s7  ;;  %9630 = vpow2.f32 %v3521_v11 }
 0x50f   : > { %9632 = vpow2.f32 %v3517_v4 }
 0x510   : > { %3671 = vrot.lane.b32.xlu0 %v3629_v14, %s10310_s7 }
 0x512   : > { %3673 = vrot.lane.b32.xlu1 %v3630_v32, %s10310_s7 }
 0x516   : > { %v9627_v53 = vpop.eup %9626 }
 0x517   : > { %v9629_v31 = vpop.eup %9628  ;;  %v3537_v40 = vadd.f32 0.0001, %v9627_v53 }
 0x518   : > { %v9631_v54 = vpop.eup %9630  ;;  %v3535_v35 = vadd.f32 0.0001, %v9629_v31 }
 0x519   : > { %v9633_v13 = vpop.eup %9632  ;;  %v3538_v47 = vadd.f32 0.0001, %v9631_v54  ;;  %v3633_v15 = vmul.f32 %v3600_v27, %v3537_v40 }
 0x51a   : > { %v3631_v6 = vmul.f32 %v3596_v3, %v3535_v35  ;;  %v3536_v37 = vadd.f32 0.0001, %v9633_v13 }
 0x51b   : > { %v3634_v45 = vmul.f32 %v3602_v16, %v3538_v47  ;;  %v9487_v16 = vld [vmem:[#allocation11 + $0x14] ss:$8 sps:$4 sm:$0xff]  }
 0x51c   : > { %v3632_v5 = vmul.f32 %v3598_v63, %v3536_v37  ;;  %3675 = vrot.lane.b32.xlu0 %v3631_v6, %s10310_s7 }
 0x51e   : > { %3677 = vrot.lane.b32.xlu1 %v3632_v5, %s10310_s7  ;;  %v9484_v5 = vld [vmem:[#allocation11 + $0x4] ss:$8 sps:$4 sm:$0xff]  }
 0x51f   : > { %4155 = vmatprep.subr.bf16.mxu1 %v9484_v5  ;;  %v11615_v5 = vld [vmem:[%s14258_s2] ss:$0 sm:$0xff] }
 0x520   : > { %3679 = vrot.lane.b32.xlu0 %v3633_v15, %s10310_s7  ;;  %v9485_v15 = vld [vmem:[#allocation11 + $0x10] ss:$8 sps:$4 sm:$0xff]  }
 0x522   : > { %3681 = vrot.lane.b32.xlu1 %v3634_v45, %s10310_s7  ;;  %v9490_v45 = vld [vmem:[#allocation11 + $0x24] ss:$8 sps:$4 sm:$0xff]  }
 0x524   : > { %7708 = vrot.lane.b32.xlu0 %v11340_v59, %s10310_s7 }
 0x526   : > { %7710 = vrot.lane.b32.xlu1 %v11345_v10, %s10310_s7 }
 0x528   : > { %7712 = vrot.lane.b32.xlu0 %v11342_v2, %s10310_s7 }
 0x52a   : > { %7714 = vrot.lane.b32.xlu1 %v11350_v55, %s10310_s7 }
 0x52c   : > { %7716 = vrot.lane.b32.xlu0 %v11390_v52, %s10310_s7 }
 0x52e   : > { %7718 = vrot.lane.b32.xlu1 %v11409_v22, %s10310_s7 }
 0x530   : > { %7720 = vrot.lane.b32.xlu0 %v11403_v51, %s10310_s7 }
 0x532   : > { %7722 = vrot.lane.b32.xlu1 %v11420_v23, %s10310_s7 }
 0x534   : > { %7724 = vrot.lane.b32.xlu0 %v3531_v30, %s10310_s7 }
 0x536   : > { %7726 = vrot.lane.b32.xlu1 %v3532_v20, %s10310_s7 }
 0x538   : > { %7728 = vrot.lane.b32.xlu0 %v3533_v38, %s10310_s7 }
 0x53a   : > { %7730 = vrot.lane.b32.xlu1 %v3534_v26, %s10310_s7 }
 0x53c   : > { %7732 = vrot.lane.b32.xlu0 %v3535_v35, %s10310_s7 }
 0x53e   : > { %7734 = vrot.lane.b32.xlu1 %v3536_v37, %s10310_s7 }
 0x540   : > { %7736 = vrot.lane.b32.xlu0 %v3537_v40, %s10310_s7 }
 0x542   : > { %7738 = vrot.lane.b32.xlu1 %v3538_v47, %s10310_s7  ;;  %v9482_v47 = vld [vmem:[#allocation11] ss:$8 sps:$4 sm:$0xff]   ;;  %s14256_s7 = sld [smem:[#allocation54_spill]] }
 0x548   : > { %s11601_s20 = scalar_lea.vmem %s14256_s7, %s11174_s21  ;;  %s14341_s21 = sld [smem:[#allocation67_spill]] }
 0x549   : > { %s12616_s7 = scalar_lea.vmem [#allocation15], %s8118_s0 }
 0x555   : > { %v3652_v59 = vpop.permute.xlu0 %3651 }
 0x556   : > { %v3699_v2 = vadd.f32 %v3652_v59, %v11316_v0  ;;  %v9488_v59 = vld [vmem:[#allocation11 + $0x20] ss:$8 sps:$4 sm:$0xff]  }
 0x557   : > { %v3654_v10 = vpop.permute.xlu1 %3653 }
 0x558   : > { %7660 = vst.msk [vmem:[%s11492_s13] sm:$0xff] %vm3755_vm0, %v3699_v2  ;;  %v3700_v55 = vadd.f32 %v3654_v10, %v11330_v60  ;;  %v9491_v10 = vld [vmem:[#allocation11 + $0x30] ss:$8 sps:$4 sm:$0xff]  }
 0x559   : > { %v3656_v52 = vpop.permute.xlu0 %3655 }
 0x55a   : > { %v3719_v51 = vpack.c.bf16 %v3700_v55, %v3699_v2  ;;  %7661 = vst.msk [vmem:[%s11492_s13 + $0x8] sm:$0xff] %vm3755_vm0, %v3700_v55  ;;  %v3701_v22 = vadd.f32 %v3656_v52, %v11313_v34  ;;  %v9493_v2 = vld [vmem:[#allocation11 + $0x34] ss:$8 sps:$4 sm:$0xff]   ;;  %v9496_v55 = vld [vmem:[#allocation11 + $0x44] ss:$8 sps:$4 sm:$0xff]  }
 0x55b   : > { %v3658_v23 = vpop.permute.xlu1 %3657  ;;  %v9494_v52 = vld [vmem:[#allocation11 + $0x40] ss:$8 sps:$4 sm:$0xff]  }
 0x55c   : > { %7662 = vst.msk [vmem:[%s11492_s13 + $0x10] sm:$0xff] %vm3755_vm0, %v3701_v22  ;;  %v3702_v58 = vadd.f32 %v3658_v23, %v11323_v12  ;;  %8999 = vmatprep.mubr.msk.bf16.mxu1 %vm3755_vm0, %v3719_v51  ;;  %v9499_v51 = vld [vmem:[#allocation11 + $0x54] ss:$8 sps:$4 sm:$0xff]   ;;  %v9502_v23 = vld [vmem:[#allocation11 + $0x64] ss:$8 sps:$4 sm:$0xff]  }
 0x55e   : > { %v3720_v0 = vpack.c.bf16 %v3702_v58, %v3701_v22  ;;  %7663 = vst.msk [vmem:[%s11492_s13 + $0x18] sm:$0xff] %vm3755_vm0, %v3702_v58  ;;  %v9497_v22 = vld [vmem:[#allocation11 + $0x50] ss:$8 sps:$4 sm:$0xff]   ;;  %v9500_v58 = vld [vmem:[#allocation11 + $0x60] ss:$8 sps:$4 sm:$0xff]  }
 0x560   : > { %9000 = vmatmul.mubr.msk.bf16.vlgmr.msra.gmra.mrb[48].mxu1 %vm3755_vm0, %v3720_v0  ;;  %v9505_v0 = vld [vmem:[#allocation11 + $0x74] ss:$8 sps:$4 sm:$0xff]  }
 0x561   : > { %4156 = vmatpush1.bf16.msra.mxu1 %v9482_v47 }
 0x562   : > { %4157 = vmatprep.subr.bf16.mxu1 %v9487_v16 }
 0x565   : > { %4158 = vmatpush1.bf16.msra.mxu1 %v9485_v15 }
 0x566   : > { %4159 = vmatprep.subr.bf16.mxu1 %v9490_v45 }
 0x569   : > { %4160 = vmatpush1.bf16.msra.mxu1 %v9488_v59 }
 0x56a   : > { %4161 = vmatprep.subr.bf16.mxu1 %v9493_v2 }
 0x56d   : > { %4162 = vmatpush1.bf16.msra.mxu1 %v9491_v10 }
 0x56e   : > { %v3660_v60 = vpop.permute.xlu0 %3659  ;;  %4163 = vmatprep.subr.bf16.mxu1 %v9496_v55 }
 0x56f   : > { %v3703_v30 = vadd.f32 %v3660_v60, %v11355_v44  ;;  %v9503_v60 = vld [vmem:[#allocation11 + $0x70] ss:$8 sps:$4 sm:$0xff]  }
 0x570   : > { %v3662_v56 = vpop.permute.xlu1 %3661 }
 0x571   : > { %7664 = vst.msk [vmem:[%s11492_s13 + $0x20] sm:$0xff] %vm3755_vm0, %v3703_v30  ;;  %v3704_v34 = vadd.f32 %v3662_v56, %v11371_v50  ;;  %4164 = vmatpush1.bf16.msra.mxu1 %v9494_v52  ;;  %v11589_v56 = vld [vmem:[#allocation13] sm:$0xff] }
 0x572   : > { %v3664_v7 = vpop.permute.xlu0 %3663  ;;  %4165 = vmatprep.subr.bf16.mxu1 %v9499_v51 }
 0x573   : > { %v3721_v43 = vpack.c.bf16 %v3704_v34, %v3703_v30  ;;  %7665 = vst.msk [vmem:[%s11492_s13 + $0x28] sm:$0xff] %vm3755_vm0, %v3704_v34  ;;  %v3705_v12 = vadd.f32 %v3664_v7, %v11348_v41  ;;  %v10311_v30 = vmov 0   ;;  %v11591_v34 = vld [vmem:[#allocation13 + $0x20] sm:$0xff]  ;;  %v4614_v7 = vld [vmem:[#allocation13 + $0x10] sm:$0xff] }
 0x574   : > { %v3666_v62 = vpop.permute.xlu1 %3665 }
 0x575   : > { %7666 = vst.msk [vmem:[%s11492_s13 + $0x30] sm:$0xff] %vm3755_vm0, %v3705_v12  ;;  %v3706_v38 = vadd.f32 %v3666_v62, %v11363_v29  ;;  %9003 = vmatprep.mubr.msk.bf16.mxu1 %vm3755_vm0, %v3721_v43  ;;  %4166 = vmatpush1.bf16.msra.mxu1 %v9497_v22  ;;  %v8473_v43 = vcombine.low %v11589_v56, %v11591_v34  ;;  %v4618_v62 = vld [vmem:[#allocation13 + $0x30] sm:$0xff] }
 0x576   : > { %4167 = vmatprep.subr.bf16.mxu1 %v9502_v23 }
 0x577   : > { %v3722_v44 = vpack.c.bf16 %v3706_v38, %v3705_v12  ;;  %7667 = vst.msk [vmem:[%s11492_s13 + $0x38] sm:$0xff] %vm3755_vm0, %v3706_v38  ;;  %v8474_v12 = vcombine.high %v11589_v56, %v11591_v34  ;;  %v8477_v38 = vcombine.low %v4614_v7, %v4618_v62  ;;  %v11665_v34 = vld [vmem:[#allocation13 + $0x140] sm:$0xff] }
 0x579   : > { %9004 = vmatmul.mubr.msk.bf16.gmra.mrb[52].mxu1 %vm3755_vm0, %v3722_v44  ;;  %v8478_v44 = vcombine.high %v4614_v7, %v4618_v62 }
 0x57a   : > { %4168 = vmatpush1.bf16.msra.mxu1 %v9500_v58 }
 0x57b   : > { %4169 = vmatprep.subr.bf16.mxu1 %v9505_v0  ;;  %5622 = vmatprep.subr.bf16.mxu0 %v8478_v44 }
 0x57c   : > { %5623 = vmatpush1.bf16.msra.mxu0 %v8477_v38 }
 0x57e   : > { %v3668_v50 = vpop.permute.xlu0 %3667  ;;  %4170 = vmatpush1.bf16.msra.mxu1 %v9503_v60 }
 0x57f   : > { %v3707_v28 = vadd.f32 %v3668_v50, %v11388_v25  ;;  %v4622_v50 = vld [vmem:[#allocation13 + $0x50] sm:$0xff]  ;;  %5396 = vmatprep.subr.bf16.mxu1 %v8474_v12 }
 0x580   : > { %v3670_v24 = vpop.permute.xlu1 %3669 }
 0x581   : > { %7668 = vst.msk [vmem:[%s11492_s13 + $0x40] sm:$0xff] %vm3755_vm0, %v3707_v28  ;;  %v3708_v41 = vadd.f32 %v3670_v24, %v11406_v17 }
 0x582   : > { %v3672_v20 = vpop.permute.xlu0 %3671 }
 0x583   : > { %v3723_v49 = vpack.c.bf16 %v3708_v41, %v3707_v28  ;;  %7669 = vst.msk [vmem:[%s11492_s13 + $0x48] sm:$0xff] %vm3755_vm0, %v3708_v41  ;;  %v3709_v29 = vadd.f32 %v3672_v20, %v11385_v1  ;;  %v4626_v28 = vld [vmem:[#allocation13 + $0x70] sm:$0xff] }
 0x584   : > { %v3674_v8 = vpop.permute.xlu1 %3673  ;;  %v8486_v24 = vcombine.high %v4622_v50, %v4626_v28  ;;  %v4630_v41 = vld [vmem:[#allocation13 + $0x90] sm:$0xff] }
 0x585   : > { %7670 = vst.msk [vmem:[%s11492_s13 + $0x50] sm:$0xff] %vm3755_vm0, %v3709_v29  ;;  %v3710_v36 = vadd.f32 %v3674_v8, %v11397_v57  ;;  %9007 = vmatprep.mubr.msk.bf16.mxu1 %vm3755_vm0, %v3723_v49  ;;  %v4634_v20 = vld [vmem:[#allocation13 + $0xb0] sm:$0xff]  ;;  %v8485_v49 = vcombine.low %v4622_v50, %v4626_v28 }
 0x586   : > { %5624 = vmatprep.subr.bf16.mxu0 %v8486_v24  ;;  %v4638_v8 = vld [vmem:[#allocation13 + $0xd0] sm:$0xff] }
 0x587   : > { %v3724_v25 = vpack.c.bf16 %v3710_v36, %v3709_v29  ;;  %7671 = vst.msk [vmem:[%s11492_s13 + $0x58] sm:$0xff] %vm3755_vm0, %v3710_v36  ;;  %v8494_v29 = vcombine.high %v4630_v41, %v4634_v20  ;;  %v4642_v36 = vld [vmem:[#allocation13 + $0xf0] sm:$0xff]  ;;  %5625 = vmatpush1.bf16.msra.mxu0 %v8485_v49 }
 0x588   : > { %v3733_v28 = vld [vmem:[%s11601_s20 + $0x30] sm:$0xff] }
 0x589   : > { %9008 = vmatmul.mubr.msk.bf16.gmra.mrb[56].mxu1 %vm3755_vm0, %v3724_v25  ;;  %v8493_v25 = vcombine.low %v4630_v41, %v4634_v20  ;;  %5626 = vmatprep.subr.bf16.mxu0 %v8494_v29  ;;  %v3731_v41 = vld [vmem:[%s11601_s20 + $0x20] sm:$0xff]  ;;  %v3734_v29 = vld [vmem:[%s11601_s20 + $0x38] sm:$0xff] }
 0x58b   : > { %5627 = vmatpush1.bf16.msra.mxu0 %v8493_v25 }
 0x58e   : > { %v3676_v17 = vpop.permute.xlu0 %3675 }
 0x58f   : > { %v3711_v33 = vadd.f32 %v3676_v17, %v11432_v48  ;;  %v8502_v17 = vcombine.high %v4638_v8, %v4642_v36 }
 0x590   : > { %v3678_v9 = vpop.permute.xlu1 %3677 }
 0x591   : > { %7672 = vst.msk [vmem:[%s11492_s13 + $0x60] sm:$0xff] %vm3755_vm0, %v3711_v33  ;;  %v3712_v1 = vadd.f32 %v3678_v9, %v11446_v61  ;;  %v4650_v9 = vld [vmem:[#allocation13 + $0x130] sm:$0xff]  ;;  %5628 = vmatprep.subr.bf16.mxu0 %v8502_v17 }
 0x592   : > { %v3680_v11 = vpop.permute.xlu0 %3679 }
 0x593   : > { %v3725_v26 = vpack.c.bf16 %v3712_v1, %v3711_v33  ;;  %7673 = vst.msk [vmem:[%s11492_s13 + $0x68] sm:$0xff] %vm3755_vm0, %v3712_v1  ;;  %v3713_v57 = vadd.f32 %v3680_v11, %v11429_v42  ;;  %v4646_v33 = vld [vmem:[#allocation13 + $0x110] sm:$0xff]  ;;  %v8501_v1 = vcombine.low %v4638_v8, %v4642_v36 }
 0x594   : > { %v3682_v4 = vpop.permute.xlu1 %3681  ;;  %v8510_v11 = vcombine.high %v4646_v33, %v4650_v9 }
 0x595   : > { %7674 = vst.msk [vmem:[%s11492_s13 + $0x70] sm:$0xff] %vm3755_vm0, %v3713_v57  ;;  %v3714_v48 = vadd.f32 %v3682_v4, %v11439_v46  ;;  %9011 = vmatprep.mubr.msk.bf16.mxu1 %vm3755_vm0, %v3725_v26  ;;  %v4654_v26 = vld [vmem:[#allocation13 + $0x150] sm:$0xff]  ;;  %5629 = vmatpush1.bf16.msra.mxu0 %v8501_v1  ;;  %v8509_v4 = vcombine.low %v4646_v33, %v4650_v9  ;;  %v3732_v9 = vld [vmem:[%s11601_s20 + $0x28] sm:$0xff] }
 0x596   : > { %v7709_v61 = vpop.permute.xlu0 %7708  ;;  %5630 = vmatprep.subr.bf16.mxu0 %v8510_v11 }
 0x597   : > { %v3726_v42 = vpack.c.bf16 %v3714_v48, %v3713_v57  ;;  %7675 = vst.msk [vmem:[%s11492_s13 + $0x78] sm:$0xff] %vm3755_vm0, %v3714_v48  ;;  %7756 = vst.msk [vmem:[%s11547_s4] sm:$0xff] %vm3755_vm0, %v7709_v61  ;;  %v4658_v57 = vld [vmem:[#allocation13 + $0x170] sm:$0xff] }
 0x598   : > { %v7711_v39 = vpop.permute.xlu1 %7710  ;;  %v8518_v48 = vcombine.high %v4654_v26, %v4658_v57  ;;  %v4662_v61 = vld [vmem:[#allocation13 + $0x190] sm:$0xff] }
 0x599   : > { %7757 = vst.msk [vmem:[%s11547_s4 + $0x8] sm:$0xff] %vm3755_vm0, %v7711_v39  ;;  %9012 = vmatmul.mubr.msk.bf16.gmra.mrb[60].mxu1 %vm3755_vm0, %v3726_v42  ;;  %v4666_v42 = vld [vmem:[#allocation13 + $0x1b0] sm:$0xff]  ;;  %5631 = vmatpush1.bf16.msra.mxu0 %v8509_v4  ;;  %v8517_v39 = vcombine.low %v4654_v26, %v4658_v57 }
 0x59a   : > { %v7713_v14 = vpop.permute.xlu0 %7712  ;;  %4187 = vmatprep.mubr.bf16.mxu1 %v10311_v30  ;;  %5632 = vmatprep.subr.bf16.mxu0 %v8518_v48 }
 0x59b   : > { %7758 = vst.msk [vmem:[%s11547_s4 + $0x10] sm:$0xff] %vm3755_vm0, %v7713_v14  ;;  %v8526_v14 = vcombine.high %v4662_v61, %v4666_v42 }
 0x59c   : > { %v7715_v46 = vpop.permute.xlu1 %7714 }
 0x59d   : > { %7759 = vst.msk [vmem:[%s11547_s4 + $0x18] sm:$0xff] %vm3755_vm0, %v7715_v46  ;;  %v4670_v46 = vld [vmem:[#allocation13 + $0x1d0] sm:$0xff]  ;;  %5633 = vmatpush1.bf16.msra.mxu0 %v8517_v39 }
 0x59e   : > { %v7717_v32 = vpop.permute.xlu0 %7716  ;;  %5634 = vmatprep.subr.bf16.mxu0 %v8526_v14 }
 0x59f   : > { %7760 = vst.msk [vmem:[%s11547_s4 + $0x20] sm:$0xff] %vm3755_vm0, %v7717_v32  ;;  %v4674_v32 = vld [vmem:[#allocation13 + $0x1f0] sm:$0xff] }
 0x5a0   : > { %v7719_v3 = vpop.permute.xlu1 %7718 }
 0x5a1   : > { %7761 = vst.msk [vmem:[%s11547_s4 + $0x28] sm:$0xff] %vm3755_vm0, %v7719_v3  ;;  %v8525_v3 = vcombine.low %v4662_v61, %v4666_v42 }
 0x5a2   : > { %v7721_v53 = vpop.permute.xlu0 %7720 }
 0x5a3   : > { %7762 = vst.msk [vmem:[%s11547_s4 + $0x30] sm:$0xff] %vm3755_vm0, %v7721_v53  ;;  %v8534_v53 = vcombine.high %v4670_v46, %v4674_v32  ;;  %5635 = vmatpush1.bf16.msra.mxu0 %v8525_v3 }
 0x5a4   : > { %v7723_v31 = vpop.permute.xlu1 %7722 }
 0x5a5   : > { %7763 = vst.msk [vmem:[%s11547_s4 + $0x38] sm:$0xff] %vm3755_vm0, %v7723_v31  ;;  %v8533_v31 = vcombine.low %v4670_v46, %v4674_v32  ;;  %5636 = vmatprep.subr.bf16.mxu0 %v8534_v53 }
 0x5a6   : > { %v7725_v63 = vpop.permute.xlu0 %7724 }
 0x5a7   : > { %7764 = vst.msk [vmem:[%s11547_s4 + $0x40] sm:$0xff] %vm3755_vm0, %v7725_v63  ;;  %v3729_v63 = vld [vmem:[%s11601_s20 + $0x10] sm:$0xff]  ;;  %5637 = vmatpush1.bf16.msra.mxu0 %v8533_v31 }
 0x5a8   : > { %v7727_v54 = vpop.permute.xlu1 %7726 }
 0x5a9   : > { %7765 = vst.msk [vmem:[%s11547_s4 + $0x48] sm:$0xff] %vm3755_vm0, %v7727_v54  ;;  %v3727_v54 = vld [vmem:[%s11601_s20] sm:$0xff] }
 0x5aa   : > { %v7729_v35 = vpop.permute.xlu0 %7728 }
 0x5ab   : > { %7766 = vst.msk [vmem:[%s11547_s4 + $0x50] sm:$0xff] %vm3755_vm0, %v7729_v35 }
 0x5ac   : > { %v7731_v13 = vpop.permute.xlu1 %7730 }
 0x5ad   : > { %7767 = vst.msk [vmem:[%s11547_s4 + $0x58] sm:$0xff] %vm3755_vm0, %v7731_v13  ;;  %v11608_v13 = vld [vmem:[%s14257_s24] ss:$0 sm:$0xff] }
 0x5ae   : > { %v7733_v6 = vpop.permute.xlu0 %7732 }
 0x5af   : > { %7768 = vst.msk [vmem:[%s11547_s4 + $0x60] sm:$0xff] %vm3755_vm0, %v7733_v6  ;;  %v3730_v6 = vld [vmem:[%s11601_s20 + $0x18] sm:$0xff] }
 0x5b0   : > { %v7735_v37 = vpop.permute.xlu1 %7734 }
 0x5b1   : > { %7769 = vst.msk [vmem:[%s11547_s4 + $0x68] sm:$0xff] %vm3755_vm0, %v7735_v37 }
 0x5b2   : > { %v7737_v40 = vpop.permute.xlu0 %7736 }
 0x5b3   : > { %7770 = vst.msk [vmem:[%s11547_s4 + $0x70] sm:$0xff] %vm3755_vm0, %v7737_v40 }
 0x5b4   : > { %v7739_v27 = vpop.permute.xlu1 %7738 }
 0x5b5   : > { %7771 = vst.msk [vmem:[%s11547_s4 + $0x78] sm:$0xff] %vm3755_vm0, %v7739_v27  ;;  %v3728_v27 = vld [vmem:[%s11601_s20 + $0x8] sm:$0xff]  ;;  %s14342_s4 = sld [smem:[#allocation68_spill]] }
 0x633   : > { %v9001_v35 = vpop.f32.mrb[48].mxu1 }
 0x634   : > { %v3823_v37 = vadd.f32 %v9001_v35, %v3729_v63  ;;  %v3814_v40 = vpop.f32.mrb[49].mxu1 }
 0x635   : > { %v3815_v47 = vadd.f32 %v3814_v40, %v3727_v54  ;;  %v9002_v16 = vpop.f32.mrb[50].mxu1 }
 0x636   : > { %v3886_v15 = vmul.f32 %v11608_v13, %v3823_v37  ;;  %v3826_v45 = vadd.f32 %v9002_v16, %v3730_v6  ;;  %v3817_v59 = vpop.f32.mrb[51].mxu1  ;;  %v4624_v16 = vld [vmem:[#allocation13 + $0x60] sm:$0xff] }
 0x637   : > { %v3884_v2 = vmul.f32 %v11608_v13, %v3815_v47  ;;  %v3818_v10 = vadd.f32 %v3817_v59, %v3728_v27  ;;  %v4620_v47 = vld [vmem:[#allocation13 + $0x40] sm:$0xff] }
 0x638   : > { %v3909_v55 = vadd.f32 %v11615_v5, %v3886_v15  ;;  %v3887_v52 = vmul.f32 %v11608_v13, %v3826_v45 }
 0x639   : > { %v3907_v51 = vadd.f32 %v11615_v5, %v3884_v2  ;;  %v3885_v22 = vmul.f32 %v11608_v13, %v3818_v10 }
 0x63a   : > { %v3941_v23 = vmin.f32 %v3909_v55, 0.0  ;;  %v3910_v58 = vadd.f32 %v11615_v5, %v3887_v52  ;;  %vm3925_vm1 = vcmp.gt.f32.partialorder %v3909_v55, 0.0 }
 0x63b   : > { %v3939_v0 = vmin.f32 %v3907_v51, 0.0  ;;  %v3908_v60 = vadd.f32 %v11615_v5, %v3885_v22  ;;  %vm3923_vm2 = vcmp.gt.f32.partialorder %v3907_v51, 0.0 }
 0x63c   : > { %v3959_v7 = vmul.f32 1.442695, %v3941_v23  ;;  %v3942_v12 = vmin.f32 %v3910_v58, 0.0  ;;  %vm3926_vm3 = vcmp.gt.f32.partialorder %v3910_v58, 0.0 }
 0x63d   : > { %v3955_v62 = vmul.f32 1.442695, %v3939_v0  ;;  %v3940_v38 = vmin.f32 %v3908_v60, 0.0  ;;  %vm3924_vm4 = vcmp.gt.f32.partialorder %v3908_v60, 0.0 }
 0x63e   : > { %9634 = vpow2.f32 %v3959_v7  ;;  %v3961_v44 = vmul.f32 1.442695, %v3942_v12 }
 0x63f   : > { %9636 = vpow2.f32 %v3955_v62  ;;  %v3957_v50 = vmul.f32 1.442695, %v3940_v38  ;;  %v4628_v38 = vld [vmem:[#allocation13 + $0x80] sm:$0xff] }
 0x640   : > { %9638 = vpow2.f32 %v3961_v44  ;;  %v4632_v44 = vld [vmem:[#allocation13 + $0xa0] sm:$0xff] }
 0x641   : > { %9640 = vpow2.f32 %v3957_v50  ;;  %v8489_v56 = vcombine.low %v4628_v38, %v4632_v44 }
 0x648   : > { %v9635_v24 = vpop.eup %9634 }
 0x649   : > { %v9637_v20 = vpop.eup %9636  ;;  %v8411_v8 = vadd.f32 -1.0, %v9635_v24  ;;  %v3737_v24 = vld [vmem:[%s11601_s20 + $0x50] sm:$0xff] }
 0x64a   : > { %v9639_v36 = vpop.eup %9638  ;;  %v8409_v25 = vadd.f32 -1.0, %v9637_v20  ;;  %v3735_v20 = vld [vmem:[%s11601_s20 + $0x40] sm:$0xff] }
 0x64b   : > { %v9641_v1 = vpop.eup %9640  ;;  %v8412_v57 = vadd.f32 -1.0, %v9639_v36  ;;  %v4005_v4 = vmul.f32 1.6732632, %v8411_v8  ;;  %v3738_v36 = vld [vmem:[%s11601_s20 + $0x58] sm:$0xff] }
 0x64c   : > { %v9005_v49 = vpop.f32.mrb[52].mxu1  ;;  %v4003_v48 = vmul.f32 1.6732632, %v8409_v25  ;;  %v8410_v61 = vadd.f32 -1.0, %v9641_v1  ;;  %v11660_v25 = vld [vmem:[#allocation13 + $0x100] sm:$0xff] }
 0x64d   : > { %v3839_v17 = vadd.f32 %v9005_v49, %v3733_v28  ;;  %v3830_v33 = vpop.f32.mrb[53].mxu1  ;;  %v4006_v3 = vmul.f32 1.6732632, %v8412_v57  ;;  %v4021_v53 = vsel %vm3925_vm1, %v3909_v55, %v4005_v4  ;;  %v8481_v28 = vcombine.low %v4620_v47, %v4624_v16  ;;  %v4636_v49 = vld [vmem:[#allocation13 + $0xc0] sm:$0xff] }
 0x64e   : > { %v3831_v11 = vadd.f32 %v3830_v33, %v3731_v41  ;;  %v9006_v26 = vpop.f32.mrb[54].mxu1  ;;  %v4019_v31 = vsel %vm3923_vm2, %v3907_v51, %v4003_v48  ;;  %v4004_v63 = vmul.f32 1.6732632, %v8410_v61  ;;  %v4037_v2 = vmul.f32 1.050701, %v4021_v53  ;;  %v3736_v1 = vld [vmem:[%s11601_s20 + $0x48] sm:$0xff] }
 0x64f   : > { %v3890_v42 = vmul.f32 %v11608_v13, %v3839_v17  ;;  %v3842_v39 = vadd.f32 %v9006_v26, %v3734_v29  ;;  %v3833_v14 = vpop.f32.mrb[55].mxu1  ;;  %v4035_v6 = vmul.f32 1.050701, %v4019_v31  ;;  %v4022_v27 = vsel %vm3926_vm3, %v3910_v58, %v4006_v3  ;;  %v4640_v29 = vld [vmem:[#allocation13 + $0xe0] sm:$0xff] }
 0x650   : > { %v3888_v46 = vmul.f32 %v11608_v13, %v3831_v11  ;;  %v3834_v32 = vadd.f32 %v3833_v14, %v3732_v9  ;;  %v4020_v15 = vsel %vm3924_vm4, %v3908_v60, %v4004_v63  ;;  %v4038_v51 = vmul.f32 1.050701, %v4022_v27  ;;  %v11662_v17 = vld [vmem:[#allocation13 + $0x120] sm:$0xff] }
 0x651   : > { %v11634_v54 = vadd.f32 %v11615_v5, %v3890_v42  ;;  %v3891_v35 = vmul.f32 %v11608_v13, %v3842_v39  ;;  %v4036_v10 = vmul.f32 1.050701, %v4020_v15  ;;  %v8482_v58 = vcombine.high %v4620_v47, %v4624_v16 }
 0x652   : > { %v11638_v37 = vadd.f32 %v11615_v5, %v3888_v46  ;;  %v3889_v40 = vmul.f32 %v11608_v13, %v3834_v32  ;;  %v4068_v12 = vpack.c.bf16 %v4038_v51, %v4037_v2  ;;  %v8490_v41 = vcombine.high %v4628_v38, %v4632_v44 }
 0x653   : > { %v3945_v45 = vmin.f32 %v11634_v54, 0.0  ;;  %v11645_v59 = vadd.f32 %v11615_v5, %v3891_v35  ;;  %v4067_v0 = vpack.c.bf16 %v4036_v10, %v4035_v6  ;;  %v8498_v57 = vcombine.high %v4636_v49, %v4640_v29 }
 0x654   : > { %v3943_v55 = vmin.f32 %v11638_v37, 0.0  ;;  %v11649_v52 = vadd.f32 %v11615_v5, %v3889_v40  ;;  %v8497_v42 = vcombine.low %v4636_v49, %v4640_v29  ;;  %v8505_v39 = vcombine.low %v11660_v25, %v11662_v17 }
 0x655   : > { %v3967_v22 = vmul.f32 1.442695, %v3945_v45  ;;  %v3946_v23 = vmin.f32 %v11645_v59, 0.0  ;;  %4188 = vmatmul.mubr.bf16.vlgmr.msra.gmra.mrb[64].mxu1 %v4067_v0  ;;  %v8506_v32 = vcombine.high %v11660_v25, %v11662_v17  ;;  %vm3927_vm5 = vcmp.gt.f32.partialorder %v11638_v37, 0.0 }
 0x656   : > { %v3963_v60 = vmul.f32 1.442695, %v3943_v55  ;;  %v3944_v7 = vmin.f32 %v11649_v52, 0.0  ;;  %4197 = vmatprep.mubr.bf16.mxu1 %v10311_v30  ;;  %5397 = vmatpush1.bf16.msra.mxu1 %v8473_v43  ;;  %v11667_v43 = vld [vmem:[#allocation13 + $0x160] sm:$0xff]  ;;  %vm3929_vm6 = vcmp.gt.f32.partialorder %v11634_v54, 0.0  ;;  %vm3930_vm7 = vcmp.gt.f32.partialorder %v11645_v59, 0.0 }
 0x657   : > { %9642 = vpow2.f32 %v3967_v22  ;;  %v3969_v62 = vmul.f32 1.442695, %v3946_v23  ;;  %5398 = vmatprep.subr.bf16.mxu1 %v8482_v58  ;;  %v8513_v3 = vcombine.low %v11665_v34, %v11667_v43  ;;  %v8514_v35 = vcombine.high %v11665_v34, %v11667_v43 }
 0x658   : > { %9644 = vpow2.f32 %v3963_v60  ;;  %v3965_v50 = vmul.f32 1.442695, %v3944_v7  ;;  %vm3928_vm8 = vcmp.gt.f32.partialorder %v11649_v52, 0.0 }
 0x659   : > { %9646 = vpow2.f32 %v3969_v62 }
 0x65a   : > { %9648 = vpow2.f32 %v3965_v50  ;;  %5399 = vmatpush1.bf16.msra.mxu1 %v8481_v28 }
 0x65b   : > { %5400 = vmatprep.subr.bf16.mxu1 %v8490_v41  ;;  %v4660_v41 = vld [vmem:[#allocation13 + $0x180] sm:$0xff] }
 0x65c   : > { %v9009_v8 = vpop.f32.mrb[56].mxu1 }
 0x65d   : > { %v3855_v33 = vadd.f32 %v9009_v8, %v3737_v24  ;;  %v3846_v9 = vpop.f32.mrb[57].mxu1  ;;  %4198 = vmatmul.mubr.bf16.gmra.mrb[68].mxu1 %v4068_v12 }
 0x65e   : > { %v3847_v11 = vadd.f32 %v3846_v9, %v3735_v20  ;;  %v9010_v26 = vpop.f32.mrb[58].mxu1  ;;  %4207 = vmatprep.mubr.bf16.mxu1 %v10311_v30  ;;  %5401 = vmatpush1.bf16.msra.mxu1 %v8489_v56  ;;  %v4664_v20 = vld [vmem:[#allocation13 + $0x1a0] sm:$0xff] }
 0x65f   : > { %v3894_v4 = vmul.f32 %v11608_v13, %v3855_v33  ;;  %v3858_v48 = vadd.f32 %v9010_v26, %v3738_v36  ;;  %v3849_v61 = vpop.f32.mrb[59].mxu1  ;;  %5402 = vmatprep.subr.bf16.mxu1 %v8498_v57  ;;  %v8522_v33 = vcombine.high %v4660_v41, %v4664_v20  ;;  %v3739_v9 = vld [vmem:[%s11601_s20 + $0x60] sm:$0xff] }
 0x660   : > { %v3892_v14 = vmul.f32 %v11608_v13, %v3847_v11  ;;  %v3850_v46 = vadd.f32 %v3849_v61, %v3736_v1  ;;  %v4668_v56 = vld [vmem:[#allocation13 + $0x1c0] sm:$0xff]  ;;  %v8521_v61 = vcombine.low %v4660_v41, %v4664_v20 }
 0x661   : > { %v9643_v53 = vpop.eup %9642  ;;  %v11678_v31 = vadd.f32 %v11615_v5, %v3894_v4  ;;  %v3895_v63 = vmul.f32 %v11608_v13, %v3858_v48  ;;  %v4672_v11 = vld [vmem:[#allocation13 + $0x1e0] sm:$0xff] }
 0x662   : > { %v9645_v6 = vpop.eup %9644  ;;  %v11686_v40 = vadd.f32 %v11615_v5, %v3892_v14  ;;  %v3893_v27 = vmul.f32 %v11608_v13, %v3850_v46  ;;  %v8415_v47 = vadd.f32 -1.0, %v9643_v53  ;;  %5403 = vmatpush1.bf16.msra.mxu1 %v8497_v42  ;;  %v8530_v14 = vcombine.high %v4668_v56, %v4672_v11 }
 0x663   : > { %v9647_v16 = vpop.eup %9646  ;;  %v3949_v15 = vmin.f32 %v11678_v31, 0.0  ;;  %v11692_v45 = vadd.f32 %v11615_v5, %v3895_v63  ;;  %v8413_v2 = vadd.f32 -1.0, %v9645_v6  ;;  %5404 = vmatprep.subr.bf16.mxu1 %v8506_v32  ;;  %vm3933_vm9 = vcmp.gt.f32.partialorder %v11678_v31, 0.0 }
 0x664   : > { %v9649_v10 = vpop.eup %9648  ;;  %v3947_v55 = vmin.f32 %v11686_v40, 0.0  ;;  %v11697_v51 = vadd.f32 %v11615_v5, %v3893_v27  ;;  %v8416_v22 = vadd.f32 -1.0, %v9647_v16  ;;  %v4009_v23 = vmul.f32 1.6732632, %v8415_v47 }
 0x665   : > { %v3975_v58 = vmul.f32 1.442695, %v3949_v15  ;;  %v3950_v0 = vmin.f32 %v11692_v45, 0.0  ;;  %v8414_v60 = vadd.f32 -1.0, %v9649_v10  ;;  %v4007_v7 = vmul.f32 1.6732632, %v8413_v2 }
 0x666   : > { %v3971_v12 = vmul.f32 1.442695, %v3947_v55  ;;  %v3948_v62 = vmin.f32 %v11697_v51, 0.0  ;;  %v4010_v38 = vmul.f32 1.6732632, %v8416_v22  ;;  %v4025_v44 = vsel %vm3929_vm6, %v11634_v54, %v4009_v23  ;;  %5405 = vmatpush1.bf16.msra.mxu1 %v8505_v39 }
 0x667   : > { %9650 = vpow2.f32 %v3975_v58  ;;  %v3977_v50 = vmul.f32 1.442695, %v3950_v0  ;;  %v4008_v28 = vmul.f32 1.6732632, %v8414_v60  ;;  %v4023_v24 = vsel %vm3927_vm5, %v11638_v37, %v4007_v7  ;;  %v3741_v37 = vld [vmem:[%s11601_s20 + $0x70] sm:$0xff]  ;;  %5406 = vmatprep.subr.bf16.mxu1 %v8514_v35 }
 0x668   : > { %9652 = vpow2.f32 %v3971_v12  ;;  %v3973_v49 = vmul.f32 1.442695, %v3948_v62  ;;  %v4026_v54 = vsel %vm3930_vm7, %v11645_v59, %v4010_v38  ;;  %v4041_v8 = vmul.f32 1.050701, %v4025_v44  ;;  %v3742_v59 = vld [vmem:[%s11601_s20 + $0x78] sm:$0xff] }
 0x669   : > { %9654 = vpow2.f32 %v3977_v50  ;;  %v4024_v29 = vsel %vm3928_vm8, %v11649_v52, %v4008_v28  ;;  %v4042_v36 = vmul.f32 1.050701, %v4026_v54  ;;  %v4039_v25 = vmul.f32 1.050701, %v4023_v24  ;;  %v3740_v52 = vld [vmem:[%s11601_s20 + $0x68] sm:$0xff]  ;;  %s10312_s20 = smov [#allocation14]  }
 0x66a   : > { %9656 = vpow2.f32 %v3973_v49  ;;  %v4040_v17 = vmul.f32 1.050701, %v4024_v29  ;;  %5407 = vmatpush1.bf16.msra.mxu1 %v8513_v3  ;;  %v8529_v43 = vcombine.low %v4668_v56, %v4672_v11  ;;  %vm3931_vm10 = vcmp.gt.f32.partialorder %v11686_v40, 0.0 }
 0x66b   : > { %v4070_v1 = vpack.c.bf16 %v4042_v36, %v4041_v8  ;;  %5408 = vmatprep.subr.bf16.mxu1 %v8522_v33  ;;  %vm3934_vm11 = vcmp.gt.f32.partialorder %v11692_v45, 0.0  ;;  %vm3932_vm12 = vcmp.gt.f32.partialorder %v11697_v51, 0.0 }
 0x66c   : > { %v9013_v26 = vpop.f32.mrb[60].mxu1  ;;  %v4069_v57 = vpack.c.bf16 %v4040_v17, %v4039_v25 }
 0x66d   : > { %v3871_v4 = vadd.f32 %v9013_v26, %v3741_v37  ;;  %v3862_v48 = vpop.f32.mrb[61].mxu1 }
 0x66e   : > { %v3863_v42 = vadd.f32 %v3862_v48, %v3739_v9  ;;  %v9014_v39 = vpop.f32.mrb[62].mxu1  ;;  %4208 = vmatmul.mubr.bf16.gmra.mrb[72].mxu1 %v4069_v57 }
 0x66f   : > { %v3898_v46 = vmul.f32 %v11608_v13, %v3871_v4  ;;  %v3874_v32 = vadd.f32 %v9014_v39, %v3742_v59  ;;  %v3865_v53 = vpop.f32.mrb[63].mxu1  ;;  %4217 = vmatprep.mubr.bf16.mxu1 %v10311_v30  ;;  %5409 = vmatpush1.bf16.msra.mxu1 %v8521_v61 }
 0x670   : > { %v3896_v63 = vmul.f32 %v11608_v13, %v3863_v42  ;;  %v3866_v35 = vadd.f32 %v3865_v53, %v3740_v52  ;;  %5410 = vmatprep.subr.bf16.mxu1 %v8530_v14 }
 0x671   : > { %v9651_v6 = vpop.eup %9650  ;;  %v11723_v27 = vadd.f32 %v11615_v5, %v3898_v46  ;;  %v3899_v34 = vmul.f32 %v11608_v13, %v3874_v32 }
 0x672   : > { %v9653_v3 = vpop.eup %9652  ;;  %v11728_v47 = vadd.f32 %v11615_v5, %v3896_v63  ;;  %v3897_v16 = vmul.f32 %v11608_v13, %v3866_v35  ;;  %v8419_v15 = vadd.f32 -1.0, %v9651_v6  ;;  %v4676_v35 = vld [vmem:[#allocation13 + $0x200] sm:$0xff] }
 0x673   : > { %v9655_v2 = vpop.eup %9654  ;;  %v3953_v10 = vmin.f32 %v11723_v27, 0.0  ;;  %v3922_v55 = vadd.f32 %v11615_v5, %v3899_v34  ;;  %v8417_v22 = vadd.f32 -1.0, %v9653_v3  ;;  %5411 = vmatpush1.bf16.msra.mxu1 %v8529_v43  ;;  %vm3937_vm13 = vcmp.gt.f32.partialorder %v11723_v27, 0.0  ;;  %v4680_v6 = vld [vmem:[#allocation13 + $0x220] sm:$0xff]  ;;  %v4682_v43 = vld [vmem:[#allocation13 + $0x230] sm:$0xff] }
 0x674   : > { %v9657_v23 = vpop.eup %9656  ;;  %v3951_v58 = vmin.f32 %v11728_v47, 0.0  ;;  %v3920_v0 = vadd.f32 %v11615_v5, %v3897_v16  ;;  %v8420_v60 = vadd.f32 -1.0, %v9655_v2  ;;  %v4013_v7 = vmul.f32 1.6732632, %v8419_v15  ;;  %v4684_v15 = vld [vmem:[#allocation13 + $0x240] sm:$0xff] }
 0x675   : > { %v3983_v13 = vmul.f32 1.442695, %v3953_v10  ;;  %v3954_v12 = vmin.f32 %v3922_v55, 0.0  ;;  %v8418_v62 = vadd.f32 -1.0, %v9657_v23  ;;  %v4011_v38 = vmul.f32 1.6732632, %v8417_v22 }
 0x676   : > { %v3979_v44 = vmul.f32 1.442695, %v3951_v58  ;;  %v3952_v50 = vmin.f32 %v3920_v0, 0.0  ;;  %4218 = vmatmul.mubr.bf16.gmra.mrb[76].mxu1 %v4070_v1  ;;  %v4014_v28 = vmul.f32 1.6732632, %v8420_v60  ;;  %v4029_v24 = vsel %vm3933_vm9, %v11678_v31, %v4013_v7  ;;  %v4688_v2 = vld [vmem:[#allocation13 + $0x260] sm:$0xff] }
 0x677   : > { %9658 = vpow2.f32 %v3983_v13  ;;  %v3985_v41 = vmul.f32 1.442695, %v3954_v12  ;;  %4227 = vmatprep.mubr.bf16.mxu1 %v10311_v30  ;;  %v4012_v5 = vmul.f32 1.6732632, %v8418_v62  ;;  %v4027_v20 = vsel %vm3931_vm10, %v11686_v40, %v4011_v38  ;;  %v4686_v10 = vld [vmem:[#allocation13 + $0x250] sm:$0xff]  ;;  %v4696_v60 = vld [vmem:[#allocation13 + $0x2a0] sm:$0xff] }
 0x678   : > { %9660 = vpow2.f32 %v3979_v44  ;;  %v3981_v49 = vmul.f32 1.442695, %v3952_v50  ;;  %v4030_v54 = vsel %vm3934_vm11, %v11692_v45, %v4014_v28  ;;  %v4045_v29 = vmul.f32 1.050701, %v4029_v24  ;;  %v4690_v22 = vld [vmem:[#allocation13 + $0x270] sm:$0xff]  ;;  %v4700_v50 = vld [vmem:[#allocation13 + $0x2c0] sm:$0xff] }
 0x679   : > { %9662 = vpow2.f32 %v3985_v41  ;;  %v4028_v31 = vsel %vm3932_vm12, %v11697_v51, %v4012_v5  ;;  %v4046_v8 = vmul.f32 1.050701, %v4030_v54  ;;  %v4043_v36 = vmul.f32 1.050701, %v4027_v20  ;;  %v4694_v7 = vld [vmem:[#allocation13 + $0x290] sm:$0xff]  ;;  %v4704_v28 = vld [vmem:[#allocation13 + $0x2e0] sm:$0xff] }
 0x67a   : > { %9664 = vpow2.f32 %v3981_v49  ;;  %v4044_v37 = vmul.f32 1.050701, %v4028_v31  ;;  %vm3935_vm14 = vcmp.gt.f32.partialorder %v11728_v47, 0.0  ;;  %vm3938_vm15 = vcmp.gt.f32.partialorder %v3922_v55, 0.0  ;;  %v4698_v12 = vld [vmem:[#allocation13 + $0x2b0] sm:$0xff]  ;;  %v4708_v31 = vld [vmem:[#allocation13 + $0x300] sm:$0xff] }
 0x67b   : > { %v4072_v25 = vpack.c.bf16 %v4046_v8, %v4045_v29  ;;  %vm3936_vm0 = vcmp.gt.f32.partialorder %v3920_v0, 0.0  ;;  %v8538_v34 = vcombine.high %v4676_v35, %v4680_v6  ;;  %v8537_v3 = vcombine.low %v4676_v35, %v4680_v6  ;;  %v4702_v24 = vld [vmem:[#allocation13 + $0x2d0] sm:$0xff]  ;;  %v4712_v29 = vld [vmem:[#allocation13 + $0x320] sm:$0xff] }
 0x67c   : > { %v4071_v17 = vpack.c.bf16 %v4044_v37, %v4043_v36  ;;  %v8545_v23 = vcombine.low %v4684_v15, %v4688_v2  ;;  %v8550_v58 = vcombine.high %v4686_v10, %v4690_v22  ;;  %v8557_v38 = vcombine.low %v4694_v7, %v4698_v12  ;;  %v4706_v5 = vld [vmem:[#allocation13 + $0x2f0] sm:$0xff] }
 0x67d   : > { %5412 = vmatprep.subr.bf16.mxu1 %v8538_v34  ;;  %v8558_v44 = vcombine.high %v4694_v7, %v4698_v12  ;;  %v8562_v41 = vcombine.high %v4700_v50, %v4704_v28  ;;  %v8561_v20 = vcombine.low %v4700_v50, %v4704_v28  ;;  %v8565_v49 = vcombine.low %v4702_v24, %v4706_v5  ;;  %v4710_v8 = vld [vmem:[#allocation13 + $0x310] sm:$0xff]  ;;  %v11756_v34 = vld [vmem:[#allocation13 + $0x8] sm:$0xff] }
 0x67e   : > { %4228 = vmatmul.mubr.bf16.gmra.mrb[80].mxu1 %v4071_v17  ;;  %v8566_v54 = vcombine.high %v4702_v24, %v4706_v5  ;;  %v8570_v36 = vcombine.high %v4708_v31, %v4712_v29  ;;  %v4714_v37 = vld [vmem:[#allocation13 + $0x330] sm:$0xff]  ;;  %v4627_v5 = vld [vmem:[#allocation13 + $0x78] sm:$0xff] }
 0x67f   : > { %4237 = vmatprep.mubr.bf16.mxu1 %v10311_v30  ;;  %5413 = vmatpush1.bf16.msra.mxu1 %v8537_v3  ;;  %v8573_v17 = vcombine.low %v4710_v8, %v4714_v37  ;;  %v4615_v3 = vld [vmem:[#allocation13 + $0x18] sm:$0xff] }
 0x681   : > { %v9659_v40 = vpop.eup %9658 }
 0x682   : > { %v9661_v33 = vpop.eup %9660  ;;  %v8423_v9 = vadd.f32 -1.0, %v9659_v40  ;;  %v8574_v40 = vcombine.high %v4710_v8, %v4714_v37 }
 0x683   : > { %v9663_v1 = vpop.eup %9662  ;;  %v8421_v56 = vadd.f32 -1.0, %v9661_v33  ;;  %v4716_v33 = vld [vmem:[#allocation13 + $0x340] sm:$0xff] }
 0x684   : > { %v9665_v11 = vpop.eup %9664  ;;  %v8424_v45 = vadd.f32 -1.0, %v9663_v1  ;;  %v4017_v26 = vmul.f32 1.6732632, %v8423_v9  ;;  %v4720_v9 = vld [vmem:[#allocation13 + $0x360] sm:$0xff]  ;;  %v4718_v1 = vld [vmem:[#allocation13 + $0x350] sm:$0xff] }
 0x685   : > { %v8422_v59 = vadd.f32 -1.0, %v9665_v11  ;;  %v4015_v51 = vmul.f32 1.6732632, %v8421_v56  ;;  %v8578_v56 = vcombine.high %v4716_v33, %v4720_v9  ;;  %v4722_v11 = vld [vmem:[#allocation13 + $0x370] sm:$0xff] }
 0x686   : > { %4238 = vmatmul.mubr.bf16.gmra.mrb[84].mxu1 %v4072_v25  ;;  %v4018_v57 = vmul.f32 1.6732632, %v8424_v45  ;;  %v4033_v4 = vsel %vm3937_vm13, %v11723_v27, %v4017_v26  ;;  %v4678_v27 = vld [vmem:[#allocation13 + $0x210] sm:$0xff]  ;;  %v8569_v25 = vcombine.low %v4708_v31, %v4712_v29  ;;  %v8577_v45 = vcombine.low %v4716_v33, %v4720_v9  ;;  %v11803_v31 = vld [vmem:[#allocation13 + $0xa8] sm:$0xff] }
 0x687   : > { %4247 = vmatprep.mubr.bf16.mxu1 %v10311_v30  ;;  %v4016_v48 = vmul.f32 1.6732632, %v8422_v59  ;;  %v4031_v52 = vsel %vm3935_vm14, %v11728_v47, %v4015_v51  ;;  %v4049_v39 = vmul.f32 1.050701, %v4033_v4  ;;  %v8541_v47 = vcombine.low %v4678_v27, %v4682_v43  ;;  %v4724_v51 = vld [vmem:[#allocation13 + $0x380] sm:$0xff]  ;;  %v4726_v4 = vld [vmem:[#allocation13 + $0x390] sm:$0xff] }
 0x688   : > { %v4034_v61 = vsel %vm3938_vm15, %v3922_v55, %v4018_v57  ;;  %v4047_v46 = vmul.f32 1.050701, %v4031_v52  ;;  %v8542_v16 = vcombine.high %v4678_v27, %v4682_v43  ;;  %v8546_v55 = vcombine.high %v4684_v15, %v4688_v2  ;;  %v4728_v57 = vld [vmem:[#allocation13 + $0x3a0] sm:$0xff]  ;;  %v4730_v52 = vld [vmem:[#allocation13 + $0x3b0] sm:$0xff]  ;;  %v11758_v43 = vld [vmem:[#allocation13 + $0x28] sm:$0xff] }
 0x689   : > { %v4032_v42 = vsel %vm3936_vm0, %v3920_v0, %v4016_v48  ;;  %v4050_v14 = vmul.f32 1.050701, %v4034_v61  ;;  %v4692_v0 = vld [vmem:[#allocation13 + $0x280] sm:$0xff]  ;;  %v8581_v26 = vcombine.low %v4718_v1, %v4722_v11  ;;  %v8582_v59 = vcombine.high %v4718_v1, %v4722_v11  ;;  %v11823_v11 = vld [vmem:[#allocation13 + $0xe8] sm:$0xff] }
 0x68a   : > { %v4048_v32 = vmul.f32 1.050701, %v4032_v42  ;;  %5638 = vmatprep.subr.bf16.mxu0 %v8542_v16  ;;  %5414 = vmatprep.subr.bf16.mxu1 %v8546_v55  ;;  %v8554_v13 = vcombine.high %v4692_v0, %v4696_v60  ;;  %v8553_v62 = vcombine.low %v4692_v0, %v4696_v60  ;;  %v8586_v48 = vcombine.high %v4724_v51, %v4728_v57  ;;  %v4619_v16 = vld [vmem:[#allocation13 + $0x38] sm:$0xff]  ;;  %v11915_v15 = vld [vmem:[#allocation13 + $0x248] sm:$0xff] }
 0x68b   : > { %v4074_v53 = vpack.c.bf16 %v4050_v14, %v4049_v39  ;;  %5639 = vmatpush1.bf16.msra.mxu0 %v8541_v47  ;;  %5415 = vmatpush1.bf16.msra.mxu1 %v8545_v23  ;;  %v8585_v61 = vcombine.low %v4724_v51, %v4728_v57  ;;  %v8589_v42 = vcombine.low %v4726_v4, %v4730_v52  ;;  %v4732_v14 = vld [vmem:[#allocation13 + $0x3c0] sm:$0xff]  ;;  %v4268_v55 = vld [vmem:[%s14261_s12] sm:$0x3]  ;;  %s12604_s12 = scalar_lea.vmem [#allocation14], %s8118_s0 }
 0x68c   : > { %v4073_v63 = vpack.c.bf16 %v4048_v32, %v4047_v46  ;;  %5640 = vmatprep.subr.bf16.mxu0 %v8550_v58  ;;  %5416 = vmatprep.subr.bf16.mxu1 %v8554_v13  ;;  %v8590_v39 = vcombine.high %v4726_v4, %v4730_v52  ;;  %v4736_v46 = vld [vmem:[#allocation13 + $0x3e0] sm:$0xff]  ;;  %v4734_v32 = vld [vmem:[#allocation13 + $0x3d0] sm:$0xff]  ;;  %v8476_v47 = vcombine.high %v11756_v34, %v11758_v43  ;;  %s7807_s2 = sshll.u32 %s12604_s12, 4  ;;  %s13850_s2 = int_to_ptr.vmem [resolvable:$true] %s7807_s2 }
 0x68d   : > { %v8593_v35 = vcombine.low %v4732_v14, %v4736_v46  ;;  %v11764_v2 = vcombine.low %v4615_v3, %v4619_v16  ;;  %v11776_v23 = vrot.slane %v4268_v55, %v10852_v19  ;;  %14274 = vst [vmem:[#allocation39_spill] sm:$0xff] %v11915_v15  ;;  %s10186_s0 = scalar_lea.vmem %s13850_s2, 4096 }
 0x68e   : > { %4248 = vmatmul.mubr.bf16.gmra.mrb[88].mxu1 %v4073_v63  ;;  %v4738_v63 = vld [vmem:[#allocation13 + $0x3f0] sm:$0xff]  ;;  %p10187_p9 = scmp.ne.s32.totalorder %s13850_s2, %s10186_s0 }
 0x68f   : > { %4257 = vmatprep.mubr.bf16.mxu1 %v10311_v30  ;;  %v8549_v30 = vcombine.low %v4686_v10, %v4690_v22  ;;  %5417 = vmatpush1.bf16.msra.mxu1 %v8553_v62  ;;  %v8597_v6 = vcombine.low %v4734_v32, %v4738_v63  ;;  %v8598_v27 = vcombine.high %v4734_v32, %v4738_v63  ;;  %v4312_v22 = vld [vmem:[%s14262_s18] sm:$0x3]  ;;  %s14404_s18 = sld [smem:[#allocation69_spill]] }
 0x690   : > { %5418 = vmatprep.subr.bf16.mxu1 %v8562_v41  ;;  %14259 = vst [vmem:[#allocation26_spill] sm:$0xff] %v11764_v2  ;;  %v11766_v10 = vcombine.high %v4615_v3, %v4619_v16  ;;  %v11782_v58 = vrot.slane %v4312_v22, %v10852_v19  ;;  %v11785_v60 = vrot.slane %v4312_v22, %v10858_v21  ;;  %v4623_v41 = vld [vmem:[#allocation13 + $0x58] sm:$0xff]  ;;  %v11841_v3 = vld [vmem:[#allocation13 + $0x108] sm:$0xff]  ;;  %p10188_p13 = pnand %p10187_p9, %p14406_p12 }
 0x691   : > { %5641 = vmatpush1.bf16.msra.mxu0 %v8549_v30  ;;  %v11779_v30 = vrot.slane %v4268_v55, %v10858_v21  ;;  %v11817_v9 = vcombine.low %v4623_v41, %v4627_v5  ;;  %v11819_v1 = vcombine.high %v4623_v41, %v4627_v5  ;;  %v11859_v41 = vld [vmem:[#allocation13 + $0x168] sm:$0xff]  ;;  %v4691_v21 = vld [vmem:[#allocation13 + $0x278] sm:$0xff] }
 0x692   : > { %5642 = vmatprep.subr.bf16.mxu0 %v8558_v44  ;;  %14260 = vst [vmem:[#allocation27_spill] sm:$0xff] %v11766_v10  ;;  %v11791_v44 = vld [vmem:[#allocation13 + $0x68] sm:$0xff]  ;;  %p10189_p1 = pneg %p10188_p13 }
 0x693   : > { %5419 = vmatpush1.bf16.msra.mxu1 %v8561_v20  ;;  %14263 = vst [vmem:[#allocation28_spill] sm:$0xff] %v11817_v9  ;;  %14264 = vst [vmem:[#allocation29_spill] sm:$0xff] %v11819_v1 }
 0x694   : > { %5420 = vmatprep.subr.bf16.mxu1 %v8570_v36 }
 0x695   : > { %5643 = vmatpush1.bf16.msra.mxu0 %v8557_v38  ;;  %v11789_v38 = vld [vmem:[#allocation13 + $0x48] sm:$0xff]  ;;  %s13848_s13 = scalar_lea.hbm %s14404_s18, %s14200_s15  ;;  %s10190_s15 = sshll.u32 %s10312_s20, 4  ;;  %s10191_s15 = int_to_ptr.vmem [resolvable:$false] %s10190_s15 }
 0x696   : > { %4258 = vmatmul.mubr.bf16.gmra.mrb[92].mxu1 %v4074_v53  ;;  %5644 = vmatprep.subr.bf16.mxu0 %v8566_v54  ;;  %v8594_v53 = vcombine.high %v4732_v14, %v4736_v46  ;;  %v11801_v54 = vld [vmem:[#allocation13 + $0x88] sm:$0xff]  ;;  %p10193_p3 = scmp.lt.s32.totalorder %s13850_s2, %s10191_s15 }
 0x697   : > { %5421 = vmatpush1.bf16.msra.mxu1 %v8569_v25  ;;  %v4631_v25 = vld [vmem:[#allocation13 + $0x98] sm:$0xff] }
 0x698   : > { %5422 = vmatprep.subr.bf16.mxu1 %v8578_v56  ;;  %v11821_v56 = vld [vmem:[#allocation13 + $0xc8] sm:$0xff] }
 0x699   : > { %5645 = vmatpush1.bf16.msra.mxu0 %v8565_v49 }
 0x69a   : > { %5646 = vmatprep.subr.bf16.mxu0 %v8574_v40 }
 0x69b   : > { %5423 = vmatpush1.bf16.msra.mxu1 %v8577_v45 }
 0x69c   : > { %5424 = vmatprep.subr.bf16.mxu1 %v8586_v48 }
 0x69d   : > { %5647 = vmatpush1.bf16.msra.mxu0 %v8573_v17  ;;  %v4635_v17 = vld [vmem:[#allocation13 + $0xb8] sm:$0xff] }
 0x69e   : > { %5648 = vmatprep.subr.bf16.mxu0 %v8582_v59  ;;  %v11831_v52 = vcombine.low %v4631_v25, %v4635_v17 }
 0x69f   : > { %5425 = vmatpush1.bf16.msra.mxu1 %v8585_v61  ;;  %v11833_v61 = vcombine.high %v4631_v25, %v4635_v17  ;;  %v4655_v17 = vld [vmem:[#allocation13 + $0x158] sm:$0xff] }
 0x6a0   : > { %5426 = vmatprep.subr.bf16.mxu1 %v8594_v53  ;;  %v11901_v53 = vld [vmem:[#allocation13 + $0x208] sm:$0xff] }
 0x6a1   : > { %5649 = vmatpush1.bf16.msra.mxu0 %v8581_v26  ;;  %14265 = vst [vmem:[#allocation30_spill] sm:$0xff] %v11833_v61  ;;  %14270 = vst [vmem:[#allocation35_spill] sm:$0xff] %v11901_v53 }
 0x6a2   : > { %5650 = vmatprep.subr.bf16.mxu0 %v8590_v39  ;;  %v4643_v39 = vld [vmem:[#allocation13 + $0xf8] sm:$0xff] }
 0x6a3   : > { %5427 = vmatpush1.bf16.msra.mxu1 %v8593_v35 }
 0x6a4   : > { %5509 = vmatprep.subr.bf16.mxu1 %v8476_v47  ;;  %v11843_v47 = vld [vmem:[#allocation13 + $0x128] sm:$0xff] }
 0x6a5   : > { %5651 = vmatpush1.bf16.msra.mxu0 %v8589_v42  ;;  %v4639_v42 = vld [vmem:[#allocation13 + $0xd8] sm:$0xff] }
 0x6a6   : > { %5652 = vmatprep.subr.bf16.mxu0 %v8598_v27 }
 0x6a9   : > { %5653 = vmatpush1.bf16.msra.mxu0 %v8597_v6 }
 0x6aa   : > { %5735 = vmatprep.subr.bf16.mxu0 %v11766_v10 }
 0x728   : > { %v4189_v0 = vpop.f32.mrb[64].mxu1 }
 0x729   : > { %v4280_v7 = vmul.f32 %v11776_v23, %v4189_v0  ;;  %v4191_v13 = vpop.f32.mrb[65].mxu1  ;;  %v11849_v0 = vcombine.low %v4639_v42, %v4643_v39 }
 0x72a   : > { %v4281_v12 = vmul.f32 %v11779_v30, %v4191_v13  ;;  %v4193_v62 = vpop.f32.mrb[66].mxu1  ;;  %v4651_v13 = vld [vmem:[#allocation13 + $0x138] sm:$0xff] }
 0x72b   : > { %v11794_v50 = vadd.f32 %v11782_v58, %v4280_v7  ;;  %v4282_v28 = vmul.f32 %v11776_v23, %v4193_v62  ;;  %v4195_v24 = vpop.f32.mrb[67].mxu1  ;;  %14266 = vst [vmem:[#allocation31_spill] sm:$0xff] %v11849_v0  ;;  %v4647_v7 = vld [vmem:[#allocation13 + $0x118] sm:$0xff] }
 0x72c   : > { %v11798_v20 = vadd.f32 %v11785_v60, %v4281_v12  ;;  %v4283_v49 = vmul.f32 %v11779_v30, %v4195_v24  ;;  %v11857_v24 = vld [vmem:[#allocation13 + $0x148] sm:$0xff] }
 0x72d   : > { %v4388_v29 = vmin.f32 %v11794_v50, 0.0  ;;  %v11807_v8 = vadd.f32 %v11782_v58, %v4282_v28  ;;  %v11855_v28 = vcombine.high %v4639_v42, %v4643_v39  ;;  %v11879_v42 = vld [vmem:[#allocation13 + $0x1a8] sm:$0xff]  ;;  %v4663_v39 = vld [vmem:[#allocation13 + $0x198] sm:$0xff]  ;;  %vm4356_vm1 = vcmp.gt.f32.partialorder %v11794_v50, 0.0 }
 0x72e   : > { %v4389_v40 = vmin.f32 %v11798_v20, 0.0  ;;  %v11815_v33 = vadd.f32 %v11785_v60, %v4283_v49  ;;  %vm4357_vm3 = vcmp.gt.f32.partialorder %v11798_v20, 0.0 }
 0x72f   : > { %v4420_v45 = vmul.f32 1.442695, %v4388_v29  ;;  %v4390_v26 = vmin.f32 %v11807_v8, 0.0  ;;  %v4675_v29 = vld [vmem:[#allocation13 + $0x1f8] sm:$0xff]  ;;  %vm4358_vm2 = vcmp.gt.f32.partialorder %v11807_v8, 0.0 }
 0x730   : > { %v4422_v57 = vmul.f32 1.442695, %v4389_v40  ;;  %v4391_v4 = vmin.f32 %v11815_v33, 0.0  ;;  %v4199_v48 = vpop.f32.mrb[68].mxu1  ;;  %v4659_v40 = vld [vmem:[#allocation13 + $0x178] sm:$0xff]  ;;  %vm4359_vm4 = vcmp.gt.f32.partialorder %v11815_v33, 0.0 }
 0x731   : > { %9666 = vpow2.f32 %v4420_v45  ;;  %v4424_v14 = vmul.f32 1.442695, %v4390_v26  ;;  %v4284_v46 = vmul.f32 %v11776_v23, %v4199_v48  ;;  %v4201_v32 = vpop.f32.mrb[69].mxu1  ;;  %v11869_v45 = vld [vmem:[#allocation13 + $0x188] sm:$0xff]  ;;  %v11877_v48 = vcombine.high %v4647_v7, %v4651_v13 }
 0x732   : > { %9668 = vpow2.f32 %v4422_v57  ;;  %v4426_v63 = vmul.f32 1.442695, %v4391_v4  ;;  %v4285_v35 = vmul.f32 %v11779_v30, %v4201_v32  ;;  %v4203_v6 = vpop.f32.mrb[70].mxu1  ;;  %v11875_v4 = vcombine.low %v4647_v7, %v4651_v13 }
 0x733   : > { %9670 = vpow2.f32 %v4424_v14  ;;  %v11846_v16 = vadd.f32 %v11782_v58, %v4284_v46  ;;  %v4286_v55 = vmul.f32 %v11776_v23, %v4203_v6  ;;  %v4205_v22 = vpop.f32.mrb[71].mxu1  ;;  %14267 = vst [vmem:[#allocation32_spill] sm:$0xff] %v11877_v48  ;;  %v4667_v14 = vld [vmem:[#allocation13 + $0x1b8] sm:$0xff]  ;;  %v11886_v6 = vld [vmem:[#allocation13 + $0x1c8] sm:$0xff]  ;;  %v11891_v13 = vcombine.low %v4655_v17, %v4659_v40 }
 0x734   : > { %9672 = vpow2.f32 %v4426_v63  ;;  %v11852_v12 = vadd.f32 %v11785_v60, %v4285_v35  ;;  %v4287_v62 = vmul.f32 %v11779_v30, %v4205_v22  ;;  %14268 = vst [vmem:[#allocation33_spill] sm:$0xff] %v11886_v6  ;;  %v11899_v27 = vcombine.low %v4663_v39, %v4667_v14 }
 0x735   : > { %v4392_v5 = vmin.f32 %v11846_v16, 0.0  ;;  %v11863_v49 = vadd.f32 %v11782_v58, %v4286_v55  ;;  %v11888_v55 = vld [vmem:[#allocation13 + $0x1e8] sm:$0xff]  ;;  %v11905_v51 = vcombine.high %v4663_v39, %v4667_v14  ;;  %vm4360_vm7 = vcmp.gt.f32.partialorder %v11846_v16, 0.0 }
 0x736   : > { %v4393_v26 = vmin.f32 %v11852_v12, 0.0  ;;  %v11873_v57 = vadd.f32 %v11785_v60, %v4287_v62  ;;  %14269 = vst [vmem:[#allocation34_spill] sm:$0xff] %v11888_v55  ;;  %v11893_v62 = vcombine.high %v4655_v17, %v4659_v40  ;;  %v4679_v40 = vld [vmem:[#allocation13 + $0x218] sm:$0xff]  ;;  %vm4361_vm5 = vcmp.gt.f32.partialorder %v11852_v12, 0.0 }
 0x737   : > { %v4428_v46 = vmul.f32 1.442695, %v4392_v5  ;;  %v4394_v32 = vmin.f32 %v11863_v49, 0.0  ;;  %v4671_v5 = vld [vmem:[#allocation13 + $0x1d8] sm:$0xff]  ;;  %vm4362_vm8 = vcmp.gt.f32.partialorder %v11863_v49, 0.0 }
 0x738   : > { %v4430_v22 = vmul.f32 1.442695, %v4393_v26  ;;  %v4395_v7 = vmin.f32 %v11873_v57, 0.0  ;;  %v11903_v26 = vld [vmem:[#allocation13 + $0x228] sm:$0xff]  ;;  %v11911_v35 = vcombine.low %v4671_v5, %v4675_v29  ;;  %v11913_v37 = vcombine.high %v4671_v5, %v4675_v29  ;;  %v4687_v17 = vld [vmem:[#allocation13 + $0x258] sm:$0xff] }
 0x739   : > { %v4432_v25 = vmul.f32 1.442695, %v4394_v32  ;;  %14271 = vst [vmem:[#allocation36_spill] sm:$0xff] %v11903_v26  ;;  %v4683_v32 = vld [vmem:[#allocation13 + $0x238] sm:$0xff]  ;;  %v11933_v26 = vcombine.low %v4687_v17, %v4691_v21  ;;  %vm4363_vm6 = vcmp.gt.f32.partialorder %v11873_v57, 0.0 }
 0x73a   : > { %9674 = vpow2.f32 %v4430_v22  ;;  %v4434_v59 = vmul.f32 1.442695, %v4395_v7  ;;  %14272 = vst [vmem:[#allocation37_spill] sm:$0xff] %v11911_v35  ;;  %14273 = vst [vmem:[#allocation38_spill] sm:$0xff] %v11913_v37  ;;  %v11917_v22 = vld [vmem:[#allocation13 + $0x268] sm:$0xff]  ;;  %v11923_v29 = vcombine.low %v4679_v40, %v4683_v32  ;;  %v11925_v5 = vcombine.high %v4679_v40, %v4683_v32 }
 0x73b   : > { %v9667_v36 = vpop.eup %9666  ;;  %9676 = vpow2.f32 %v4428_v46  ;;  %14275 = vst [vmem:[#allocation40_spill] sm:$0xff] %v11917_v22  ;;  %14278 = vst [vmem:[#allocation43_spill] sm:$0xff] %v11933_v26  ;;  %v11935_v40 = vld [vmem:[#allocation13 + $0x288] sm:$0xff]  ;;  %v11945_v22 = vcombine.high %v4687_v17, %v4691_v21 }
 0x73c   : > { %v9669_v39 = vpop.eup %9668  ;;  %v8441_v14 = vadd.f32 -1.0, %v9667_v36  ;;  %9678 = vpow2.f32 %v4434_v59  ;;  %14276 = vst [vmem:[#allocation41_spill] sm:$0xff] %v11923_v29  ;;  %14277 = vst [vmem:[#allocation42_spill] sm:$0xff] %v11925_v5  ;;  %v11937_v32 = vld [vmem:[#allocation13 + $0x2a8] sm:$0xff] }
 0x73d   : > { %v9671_v63 = vpop.eup %9670  ;;  %v8442_v19 = vadd.f32 -1.0, %v9669_v39  ;;  %9680 = vpow2.f32 %v4432_v25  ;;  %14279 = vst [vmem:[#allocation44_spill] sm:$0xff] %v11935_v40  ;;  %14280 = vst [vmem:[#allocation45_spill] sm:$0xff] %v11937_v32 }
 0x73e   : > { %v9673_v18 = vpop.eup %9672  ;;  %v4516_v10 = vmul.f32 1.6732632, %v8441_v14  ;;  %v8443_v35 = vadd.f32 -1.0, %v9671_v63  ;;  %14281 = vst [vmem:[#allocation46_spill] sm:$0xff] %v11945_v22 }
 0x73f   : > { %v8444_v46 = vadd.f32 -1.0, %v9673_v18  ;;  %v4517_v14 = vmul.f32 1.6732632, %v8442_v19 }
 0x740   : > { %v4548_v63 = vsel %vm4356_vm1, %v11794_v50, %v4516_v10  ;;  %v4518_v29 = vmul.f32 1.6732632, %v8443_v35 }
 0x741   : > { %v4209_v36 = vpop.f32.mrb[72].mxu1  ;;  %v4519_v7 = vmul.f32 1.6732632, %v8444_v46  ;;  %v4580_v50 = vmul.f32 1.050701, %v4548_v63  ;;  %v4549_v21 = vsel %vm4357_vm3, %v11798_v20, %v4517_v14 }
 0x742   : > { %v4288_v39 = vmul.f32 %v11776_v23, %v4209_v36  ;;  %v4211_v25 = vpop.f32.mrb[73].mxu1  ;;  %v4550_v26 = vsel %vm4358_vm2, %v11807_v8, %v4518_v29  ;;  %v4695_v29 = vld [vmem:[#allocation13 + $0x298] sm:$0xff] }
 0x743   : > { %v4289_v59 = vmul.f32 %v11779_v30, %v4211_v25  ;;  %v4213_v5 = vpop.f32.mrb[74].mxu1  ;;  %v4582_v35 = vmul.f32 1.050701, %v4550_v26  ;;  %v4551_v63 = vsel %vm4359_vm4, %v11815_v33, %v4519_v7  ;;  %v4581_v33 = vmul.f32 1.050701, %v4549_v21 }
 0x744   : > { %v11943_v18 = vadd.f32 %v11782_v58, %v4288_v39  ;;  %v4215_v36 = vpop.f32.mrb[75].mxu1  ;;  %v4290_v19 = vmul.f32 %v11776_v23, %v4213_v5  ;;  %v9675_v39 = vpop.eup %9674  ;;  %v4699_v5 = vld [vmem:[#allocation13 + $0x2b8] sm:$0xff]  ;;  %v4583_v7 = vmul.f32 1.050701, %v4551_v63 }
 0x745   : > { %v11949_v15 = vadd.f32 %v11785_v60, %v4289_v59  ;;  %v9677_v59 = vpop.eup %9676  ;;  %v11961_v25 = vpack.c.bf16 %v4582_v35, %v4580_v50  ;;  %v8446_v26 = vadd.f32 -1.0, %v9675_v39  ;;  %v4291_v14 = vmul.f32 %v11779_v30, %v4215_v36 }
 0x746   : > { %v4396_v46 = vmin.f32 %v11943_v18, 0.0  ;;  %v11965_v10 = vadd.f32 %v11782_v58, %v4290_v19  ;;  %v9679_v22 = vpop.eup %9678  ;;  %v11970_v37 = vcombine.low %v4695_v29, %v4699_v5  ;;  %v11973_v55 = vcombine.high %v4695_v29, %v4699_v5 }
 0x747   : > { %v4397_v8 = vmin.f32 %v11949_v15, 0.0  ;;  %14282 = vst [vmem:[#allocation47_spill] sm:$0xff] %v11961_v25  ;;  %v9681_v32 = vpop.eup %9680  ;;  %v4521_v40 = vmul.f32 1.6732632, %v8446_v26  ;;  %v8448_v53 = vadd.f32 -1.0, %v9679_v22  ;;  %v8445_v6 = vadd.f32 -1.0, %v9677_v59 }
 0x748   : > { %v4436_v20 = vmul.f32 1.442695, %v4396_v46  ;;  %14283 = vst [vmem:[#allocation48_spill] sm:$0xff] %v11970_v37  ;;  %v4398_v19 = vmin.f32 %v11965_v10, 0.0  ;;  %v11979_v26 = vadd.f32 %v11785_v60, %v4291_v14  ;;  %vm4364_vm9 = vcmp.gt.f32.partialorder %v11943_v18, 0.0 }
 0x749   : > { %v4219_v17 = vpop.f32.mrb[76].mxu1  ;;  %v4438_v50 = vmul.f32 1.442695, %v4397_v8  ;;  %v4553_v36 = vsel %vm4361_vm5, %v11852_v12, %v4521_v40  ;;  %v4523_v46 = vmul.f32 1.6732632, %v8448_v53  ;;  %v8447_v8 = vadd.f32 -1.0, %v9681_v32 }
 0x74a   : > { %v4221_v35 = vpop.f32.mrb[77].mxu1  ;;  %9682 = vpow2.f32 %v4436_v20  ;;  %v4440_v37 = vmul.f32 1.442695, %v4398_v19  ;;  %v4292_v21 = vmul.f32 %v11776_v23, %v4219_v17  ;;  %v4585_v63 = vmul.f32 1.050701, %v4553_v36  ;;  %v12000_v36 = vld [vmem:[#allocation13 + $0x2c8] sm:$0xff] }
 0x74b   : > { %v4223_v39 = vpop.f32.mrb[78].mxu1  ;;  %v4555_v29 = vsel %vm4363_vm6, %v11873_v57, %v4523_v46  ;;  %9684 = vpow2.f32 %v4438_v50  ;;  %v4399_v5 = vmin.f32 %v11979_v26, 0.0  ;;  %v4293_v12 = vmul.f32 %v11779_v30, %v4221_v35  ;;  %v12002_v46 = vld [vmem:[#allocation13 + $0x2e8] sm:$0xff] }
 0x74c   : > { %v4225_v22 = vpop.f32.mrb[79].mxu1  ;;  %v4587_v59 = vmul.f32 1.050701, %v4555_v29  ;;  %9686 = vpow2.f32 %v4440_v37  ;;  %v11987_v53 = vadd.f32 %v11782_v58, %v4292_v21  ;;  %v4294_v32 = vmul.f32 %v11776_v23, %v4223_v39  ;;  %14286 = vst [vmem:[#allocation51_spill] sm:$0xff] %v12002_v46 }
 0x74d   : > { %v4442_v40 = vmul.f32 1.442695, %v4399_v5  ;;  %v4295_v17 = vmul.f32 %v11779_v30, %v4225_v22  ;;  %v11992_v20 = vpack.c.bf16 %v4583_v7, %v4581_v33  ;;  %v4520_v14 = vmul.f32 1.6732632, %v8445_v6 }
 0x74e   : > { %v4400_v57 = vmin.f32 %v11987_v53, 0.0  ;;  %v11996_v50 = vadd.f32 %v11785_v60, %v4293_v12  ;;  %v11998_v37 = vpack.c.bf16 %v4587_v59, %v4585_v63  ;;  %v12005_v35 = vadd.f32 %v11782_v58, %v4294_v32 }
 0x74f   : > { %14284 = vst [vmem:[#allocation49_spill] sm:$0xff] %v11992_v20  ;;  %9688 = vpow2.f32 %v4442_v40  ;;  %v12008_v33 = vadd.f32 %v11785_v60, %v4295_v17  ;;  %5428 = vmatprep.mubr.bf16.mxu1 %v11992_v20  ;;  %5654 = vmatprep.mubr.bf16.mxu0 %v11992_v20  ;;  %v4522_v39 = vmul.f32 1.6732632, %v8447_v8  ;;  %v14287_v12 = vcombine.low %v11756_v34, %v11758_v43  ;;  %v4703_v17 = vld [vmem:[#allocation13 + $0x2d8] sm:$0xff] }
 0x750   : > { %14285 = vst [vmem:[#allocation50_spill] sm:$0xff] %v11998_v37  ;;  %v4444_v22 = vmul.f32 1.442695, %v4400_v57  ;;  %v4401_v21 = vmin.f32 %v11996_v50, 0.0  ;;  %5429 = vmatmul.mubr.bf16.vlgmr.msra.gmra.mrb[96].mxu1 %v11961_v25  ;;  %5655 = vmatmul.mubr.bf16.vlgmr.msra.gmra.mrb[32].mxu0 %v11961_v25  ;;  %v4402_v5 = vmin.f32 %v12005_v35, 0.0  ;;  %v14288_v34 = vcombine.high %v11789_v38, %v11791_v44  ;;  %v4707_v43 = vld [vmem:[#allocation13 + $0x2f8] sm:$0xff] }
 0x751   : > { %v4229_v19 = vpop.f32.mrb[80].mxu1  ;;  %v4403_v59 = vmin.f32 %v12008_v33, 0.0  ;;  %5510 = vmatpush1.bf16.msra.mxu1 %v14287_v12  ;;  %5736 = vmatpush1.bf16.msra.mxu0 %v11764_v2  ;;  %v12037_v12 = vld [vmem:[#allocation13 + $0x328] sm:$0xff]  ;;  %v12050_v2 = vld [vmem:[#allocation13 + $0x318] sm:$0xff]  ;;  %v12059_v25 = vcombine.low %v4703_v17, %v4707_v43  ;;  %v14290_v46 = vcombine.high %v11801_v54, %v11803_v31  ;;  %vm4365_vm10 = vcmp.gt.f32.partialorder %v11949_v15, 0.0 }
 0x752   : > { %v4296_v6 = vmul.f32 %v11776_v23, %v4229_v19  ;;  %v4231_v7 = vpop.f32.mrb[81].mxu1  ;;  %9690 = vpow2.f32 %v4444_v22  ;;  %v4446_v57 = vmul.f32 1.442695, %v4401_v21  ;;  %5511 = vmatprep.subr.bf16.mxu1 %v14288_v34  ;;  %5737 = vmatprep.subr.bf16.mxu0 %v11819_v1  ;;  %v4448_v40 = vmul.f32 1.442695, %v4402_v5  ;;  %v12052_v5 = vld [vmem:[#allocation13 + $0x338] sm:$0xff] }
 0x753   : > { %v4297_v63 = vmul.f32 %v11779_v30, %v4231_v7  ;;  %v4233_v29 = vpop.f32.mrb[82].mxu1  ;;  %v12035_v7 = vld [vmem:[#allocation13 + $0x308] sm:$0xff]  ;;  %v4450_v32 = vmul.f32 1.442695, %v4403_v59  ;;  %5438 = vmatprep.mubr.bf16.mxu1 %v11998_v37  ;;  %5664 = vmatprep.mubr.bf16.mxu0 %v11998_v37  ;;  %v4552_v21 = vsel %vm4360_vm7, %v11846_v16, %v4520_v14  ;;  %v4554_v34 = vsel %vm4362_vm8, %v11863_v49, %v4522_v39 }
 0x754   : > { %v4235_v8 = vpop.f32.mrb[83].mxu1  ;;  %v12029_v19 = vadd.f32 %v11782_v58, %v4296_v6  ;;  %v9683_v6 = vpop.eup %9682  ;;  %9692 = vpow2.f32 %v4446_v57  ;;  %v14289_v37 = vcombine.low %v11789_v38, %v11791_v44  ;;  %v12061_v16 = vcombine.high %v4703_v17, %v4707_v43 }
 0x755   : > { %v12041_v22 = vadd.f32 %v11785_v60, %v4297_v63  ;;  %v9685_v63 = vpop.eup %9684  ;;  %5738 = vmatpush1.bf16.msra.mxu0 %v11817_v9  ;;  %9694 = vpow2.f32 %v4450_v32  ;;  %v4298_v57 = vmul.f32 %v11776_v23, %v4233_v29  ;;  %v4584_v44 = vmul.f32 1.050701, %v4552_v21 }
 0x756   : > { %v4404_v1 = vmin.f32 %v12029_v19, 0.0  ;;  %5512 = vmatpush1.bf16.msra.mxu1 %v14289_v37  ;;  %v9687_v14 = vpop.eup %9686  ;;  %5739 = vmatprep.subr.bf16.mxu0 %v11833_v61  ;;  %v4586_v37 = vmul.f32 1.050701, %v4554_v34  ;;  %9696 = vpow2.f32 %v4448_v40  ;;  %v12074_v32 = vcombine.high %v12050_v2, %v12052_v5 }
 0x757   : > { %v4405_v59 = vmin.f32 %v12041_v22, 0.0  ;;  %5513 = vmatprep.subr.bf16.mxu1 %v14290_v46  ;;  %v12078_v43 = vadd.f32 %v11782_v58, %v4298_v57  ;;  %v4299_v46 = vmul.f32 %v11779_v30, %v4235_v8  ;;  %v8450_v21 = vadd.f32 -1.0, %v9685_v63 }
 0x758   : > { %v4452_v39 = vmul.f32 1.442695, %v4404_v1  ;;  %v8449_v1 = vadd.f32 -1.0, %v9683_v6  ;;  %v14291_v38 = vcombine.low %v11801_v54, %v11803_v31  ;;  %vm4366_vm11 = vcmp.gt.f32.partialorder %v11965_v10, 0.0 }
 0x759   : > { %v4239_v20 = vpop.f32.mrb[84].mxu1  ;;  %v4454_v29 = vmul.f32 1.442695, %v4405_v59  ;;  %v9689_v61 = vpop.eup %9688  ;;  %5740 = vmatpush1.bf16.msra.mxu0 %v11831_v52  ;;  %v8451_v59 = vadd.f32 -1.0, %v9687_v14  ;;  %v4406_v57 = vmin.f32 %v12078_v43, 0.0  ;;  %v12092_v9 = vadd.f32 %v11785_v60, %v4299_v46 }
 0x75a   : > { %v4241_v17 = vpop.f32.mrb[85].mxu1  ;;  %9698 = vpow2.f32 %v4452_v39  ;;  %v4300_v40 = vmul.f32 %v11776_v23, %v4239_v20  ;;  %5514 = vmatpush1.bf16.msra.mxu1 %v14291_v38  ;;  %v8452_v8 = vadd.f32 -1.0, %v9689_v61  ;;  %v14292_v20 = vcombine.high %v11821_v56, %v11823_v11  ;;  %5741 = vmatprep.subr.bf16.mxu0 %v11855_v28 }
 0x75b   : > { %v4243_v49 = vpop.f32.mrb[86].mxu1  ;;  %v4301_v34 = vmul.f32 %v11779_v30, %v4241_v17  ;;  %v12105_v61 = vpack.c.bf16 %v4586_v37, %v4584_v44  ;;  %vm4367_vm12 = vcmp.gt.f32.partialorder %v11979_v26, 0.0  ;;  %9700 = vpow2.f32 %v4454_v29 }
 0x75c   : > { %v12088_v6 = vpop.f32.mrb[87].mxu1  ;;  %5515 = vmatprep.subr.bf16.mxu1 %v14292_v20  ;;  %v12100_v54 = vadd.f32 %v11782_v58, %v4300_v40  ;;  %v9691_v63 = vpop.eup %9690  ;;  %v4527_v14 = vmul.f32 1.6732632, %v8452_v8  ;;  %v4456_v39 = vmul.f32 1.442695, %v4406_v57  ;;  %v4407_v46 = vmin.f32 %v12092_v9, 0.0 }
 0x75d   : > { %v12103_v31 = vadd.f32 %v11785_v60, %v4301_v34  ;;  %v4524_v38 = vmul.f32 1.6732632, %v8449_v1  ;;  %v8453_v17 = vadd.f32 -1.0, %v9691_v63  ;;  %5439 = vmatmul.mubr.bf16.gmra.mrb[100].mxu1 %v12105_v61  ;;  %5665 = vmatmul.mubr.bf16.gmra.mrb[36].mxu0 %v12105_v61  ;;  %v4302_v40 = vmul.f32 %v11776_v23, %v4243_v49 }
 0x75e   : > { %v9693_v34 = vpop.eup %9692  ;;  %v4525_v20 = vmul.f32 1.6732632, %v8450_v21  ;;  %v4526_v44 = vmul.f32 1.6732632, %v8451_v59  ;;  %9702 = vpow2.f32 %v4456_v39  ;;  %v4408_v37 = vmin.f32 %v12100_v54, 0.0  ;;  %5742 = vmatpush1.bf16.msra.mxu0 %v11849_v0 }
 0x75f   : > { %v14293_v29 = vcombine.low %v11821_v56, %v11823_v11  ;;  %vm4368_vm13 = vcmp.gt.f32.partialorder %v11987_v53, 0.0  ;;  %v4528_v8 = vmul.f32 1.6732632, %v8453_v17  ;;  %v8454_v57 = vadd.f32 -1.0, %v9693_v34  ;;  %5743 = vmatprep.subr.bf16.mxu0 %v11877_v48  ;;  %v9695_v21 = vpop.eup %9694 }
 0x760   : > { %v4409_v63 = vmin.f32 %v12103_v31, 0.0  ;;  %v14294_v49 = vcombine.high %v11841_v3, %v11843_v47  ;;  %v4559_v56 = vsel %vm4367_vm12, %v11979_v26, %v4527_v14  ;;  %vm4369_vm14 = vcmp.gt.f32.partialorder %v11996_v50, 0.0  ;;  %v9697_v17 = vpop.eup %9696 }
 0x761   : > { %5516 = vmatpush1.bf16.msra.mxu1 %v14293_v29  ;;  %v4249_v1 = vpop.f32.mrb[88].mxu1  ;;  %v4458_v11 = vmul.f32 1.442695, %v4407_v46  ;;  %v4460_v59 = vmul.f32 1.442695, %v4408_v37  ;;  %v4556_v34 = vsel %vm4364_vm9, %v11943_v18, %v4524_v38  ;;  %v8456_v29 = vadd.f32 -1.0, %v9695_v21 }
 0x762   : > { %5517 = vmatprep.subr.bf16.mxu1 %v14294_v49  ;;  %v4251_v39 = vpop.f32.mrb[89].mxu1  ;;  %v4462_v0 = vmul.f32 1.442695, %v4409_v63  ;;  %v12131_v49 = vadd.f32 %v11782_v58, %v4302_v40  ;;  %v4557_v26 = vsel %vm4365_vm10, %v11949_v15, %v4525_v20  ;;  %v4558_v14 = vsel %vm4366_vm11, %v11965_v10, %v4526_v44  ;;  %5744 = vmatpush1.bf16.msra.mxu0 %v11875_v4 }
 0x763   : > { %v12133_v48 = vpop.f32.mrb[90].mxu1  ;;  %vm4371_vm15 = vcmp.gt.f32.partialorder %v12008_v33, 0.0  ;;  %9704 = vpow2.f32 %v4458_v11  ;;  %v14295_v18 = vcombine.low %v11841_v3, %v11843_v47  ;;  %v4591_v40 = vmul.f32 1.050701, %v4559_v56  ;;  %5745 = vmatprep.subr.bf16.mxu0 %v11893_v62 }
 0x764   : > { %v12146_v38 = vpop.f32.mrb[91].mxu1  ;;  %v9699_v46 = vpop.eup %9698  ;;  %v4560_v15 = vsel %vm4368_vm13, %v11987_v53, %v4528_v8  ;;  %v4529_v20 = vmul.f32 1.6732632, %v8454_v57  ;;  %9706 = vpow2.f32 %v4460_v59  ;;  %v14296_v10 = vcombine.high %v11857_v24, %v11859_v41 }
 0x765   : > { %5518 = vmatpush1.bf16.msra.mxu1 %v14295_v18  ;;  %v4588_v3 = vmul.f32 1.050701, %v4556_v34  ;;  %vm4370_vm0 = vcmp.gt.f32.partialorder %v12005_v35, 0.0  ;;  %v8455_v47 = vadd.f32 -1.0, %v9697_v17  ;;  %v4531_v44 = vmul.f32 1.6732632, %v8456_v29  ;;  %v9701_v8 = vpop.eup %9700 }
 0x766   : > { %5519 = vmatprep.subr.bf16.mxu1 %v14296_v10  ;;  %9708 = vpow2.f32 %v4462_v0  ;;  %v4589_v37 = vmul.f32 1.050701, %v4557_v26  ;;  %v4590_v63 = vmul.f32 1.050701, %v4558_v14  ;;  %vm4372_vm1 = vcmp.gt.f32.partialorder %v12029_v19, 0.0  ;;  %5746 = vmatpush1.bf16.msra.mxu0 %v11891_v13 }
 0x767   : > { %v4410_v53 = vmin.f32 %v12131_v49, 0.0  ;;  %v12158_v57 = vmul.f32 1.050701, %v4560_v15  ;;  %v8457_v21 = vadd.f32 -1.0, %v9699_v46  ;;  %v4303_v56 = vmul.f32 %v11779_v30, %v12088_v6  ;;  %5747 = vmatprep.subr.bf16.mxu0 %v11905_v51 }
 0x768   : > { %v4304_v11 = vmul.f32 %v11776_v23, %v4249_v1  ;;  %v14297_v59 = vcombine.low %v11857_v24, %v11859_v41  ;;  %v4561_v17 = vsel %vm4369_vm14, %v11996_v50, %v4529_v20  ;;  %vm4374_vm2 = vcmp.gt.f32.partialorder %v12078_v43, 0.0  ;;  %v9703_v41 = vpop.eup %9702 }
 0x769   : > { %v4259_v0 = vpop.f32.mrb[92].mxu1  ;;  %v4464_v34 = vmul.f32 1.442695, %v4410_v53  ;;  %v12171_v29 = vpack.c.bf16 %v4591_v40, %v4589_v37  ;;  %v4305_v6 = vmul.f32 %v11779_v30, %v4251_v39  ;;  %v14298_v24 = vcombine.high %v11869_v45, %v11879_v42 }
 0x76a   : > { %5520 = vmatpush1.bf16.msra.mxu1 %v14297_v59  ;;  %v12174_v26 = vpop.f32.mrb[93].mxu1  ;;  %v4530_v1 = vmul.f32 1.6732632, %v8455_v47  ;;  %v4563_v50 = vsel %vm4371_vm15, %v12008_v33, %v4531_v44  ;;  %vm4373_vm3 = vcmp.gt.f32.partialorder %v12041_v22, 0.0  ;;  %vm4375_vm4 = vcmp.gt.f32.partialorder %v12092_v9, 0.0  ;;  %5748 = vmatpush1.bf16.msra.mxu0 %v11899_v27  ;;  %v14300_v59 = vld [vmem:[#allocation33_spill] sm:$0xff] }
 0x76b   : > { %5521 = vmatprep.subr.bf16.mxu1 %v14298_v24  ;;  %v12186_v39 = vadd.f32 %v11785_v60, %v4303_v56  ;;  %v12189_v14 = vadd.f32 %v11782_v58, %v4304_v11  ;;  %v12191_v18 = vpop.f32.mrb[94].mxu1  ;;  %v8458_v46 = vadd.f32 -1.0, %v9701_v8  ;;  %v8459_v40 = vadd.f32 -1.0, %v9703_v41  ;;  %5448 = vmatprep.mubr.bf16.mxu1 %v12171_v29 }
 0x76c   : > { %9710 = vpow2.f32 %v4464_v34  ;;  %5674 = vmatprep.mubr.bf16.mxu0 %v12171_v29  ;;  %v12196_v33 = vadd.f32 %v11785_v60, %v4305_v6  ;;  %v12198_v15 = vpop.f32.mrb[95].mxu1  ;;  %v4593_v20 = vmul.f32 1.050701, %v4561_v17  ;;  %v4532_v10 = vmul.f32 1.6732632, %v8457_v21  ;;  %v14301_v34 = vld [vmem:[#allocation34_spill] sm:$0xff] }
 0x76d   : > { %v4411_v47 = vmin.f32 %v12186_v39, 0.0  ;;  %v4412_v44 = vmin.f32 %v12189_v14, 0.0  ;;  %v14299_v37 = vcombine.low %v11869_v45, %v11879_v42  ;;  %v4595_v53 = vmul.f32 1.050701, %v4563_v50  ;;  %v14303_v21 = vld [vmem:[#allocation38_spill] sm:$0xff]  ;;  %v9705_v6 = vpop.eup %9704 }
 0x76e   : > { %v4534_v8 = vmul.f32 1.6732632, %v8459_v40  ;;  %v4413_v56 = vmin.f32 %v12196_v33, 0.0  ;;  %v12207_v11 = vpack.c.bf16 %v4590_v63, %v4588_v3  ;;  %v14302_v17 = vcombine.high %v14300_v59, %v14301_v34  ;;  %5749 = vmatprep.subr.bf16.mxu0 %v14303_v21  ;;  %v9707_v50 = vpop.eup %9706 }
 0x76f   : > { %5522 = vmatpush1.bf16.msra.mxu1 %v14299_v37  ;;  %v4466_v24 = vmul.f32 1.442695, %v4411_v47  ;;  %v4468_v41 = vmul.f32 1.442695, %v4412_v44  ;;  %v4306_v45 = vmul.f32 %v11776_v23, %v12133_v48  ;;  %v4307_v42 = vmul.f32 %v11779_v30, %v12146_v38 }
 0x770   : > { %5523 = vmatprep.subr.bf16.mxu1 %v14302_v17  ;;  %v4562_v3 = vsel %vm4370_vm0, %v12005_v35, %v4530_v1  ;;  %v4533_v63 = vmul.f32 1.6732632, %v8458_v46  ;;  %v8460_v40 = vadd.f32 -1.0, %v9705_v6  ;;  %v4470_v37 = vmul.f32 1.442695, %v4413_v56  ;;  %5449 = vmatmul.mubr.bf16.gmra.mrb[104].mxu1 %v12207_v11  ;;  %v9709_v47 = vpop.eup %9708  ;;  %v14305_v46 = vld [vmem:[#allocation37_spill] sm:$0xff] }
 0x771   : > { %5675 = vmatmul.mubr.bf16.gmra.mrb[40].mxu0 %v12207_v11  ;;  %v4564_v48 = vsel %vm4372_vm1, %v12029_v19, %v4532_v10  ;;  %vm4376_vm5 = vcmp.gt.f32.partialorder %v12100_v54, 0.0  ;;  %9712 = vpow2.f32 %v4466_v24  ;;  %v12227_v38 = vadd.f32 %v11782_v58, %v4306_v45  ;;  %v14306_v10 = vld [vmem:[#allocation35_spill] sm:$0xff]  ;;  %v14307_v17 = vld [vmem:[#allocation36_spill] sm:$0xff]  ;;  %v14309_v24 = vld [vmem:[#allocation42_spill] sm:$0xff] }
 0x772   : > { %v4308_v35 = vmul.f32 %v11776_v23, %v4259_v0  ;;  %v14304_v1 = vcombine.low %v14300_v59, %v14301_v34  ;;  %5750 = vmatpush1.bf16.msra.mxu0 %v14305_v46  ;;  %v4535_v44 = vmul.f32 1.6732632, %v8460_v40  ;;  %v8461_v56 = vadd.f32 -1.0, %v9707_v50 }
 0x773   : > { %vm4378_vm6 = vcmp.gt.f32.partialorder %v12131_v49, 0.0  ;;  %9714 = vpow2.f32 %v4468_v41  ;;  %v12236_v19 = vadd.f32 %v11785_v60, %v4307_v42  ;;  %v14308_v6 = vcombine.high %v14306_v10, %v14307_v17  ;;  %5751 = vmatprep.subr.bf16.mxu0 %v14309_v24 }
 0x774   : > { %5524 = vmatpush1.bf16.msra.mxu1 %v14304_v1  ;;  %v4566_v0 = vsel %vm4374_vm2, %v12078_v43, %v4534_v8  ;;  %v8462_v59 = vadd.f32 -1.0, %v9709_v47  ;;  %9716 = vpow2.f32 %v4470_v37  ;;  %v4414_v34 = vmin.f32 %v12227_v38, 0.0 }
 0x775   : > { %5525 = vmatprep.subr.bf16.mxu1 %v14308_v6  ;;  %v4594_v45 = vmul.f32 1.050701, %v4562_v3  ;;  %v4565_v41 = vsel %vm4373_vm3, %v12041_v22, %v4533_v63  ;;  %v4567_v42 = vsel %vm4375_vm4, %v12092_v9, %v4535_v44  ;;  %v4415_v50 = vmin.f32 %v12236_v19, 0.0  ;;  %v14311_v3 = vld [vmem:[#allocation41_spill] sm:$0xff]  ;;  %v14312_v9 = vld [vmem:[#allocation39_spill] sm:$0xff]  ;;  %v14313_v44 = vld [vmem:[#allocation40_spill] sm:$0xff] }
 0x776   : > { %v4596_v40 = vmul.f32 1.050701, %v4564_v48  ;;  %v4599_v1 = vmul.f32 1.050701, %v4567_v42  ;;  %v4472_v6 = vmul.f32 1.442695, %v4414_v34  ;;  %v12254_v43 = vadd.f32 %v11782_v58, %v4308_v35  ;;  %5752 = vmatpush1.bf16.msra.mxu0 %v14311_v3  ;;  %v9711_v37 = vpop.eup %9710 }
 0x777   : > { %v14310_v8 = vcombine.low %v14306_v10, %v14307_v17  ;;  %v4598_v22 = vmul.f32 1.050701, %v4566_v0  ;;  %v4536_v63 = vmul.f32 1.6732632, %v8461_v56  ;;  %v4474_v47 = vmul.f32 1.442695, %v4415_v50 }
 0x778   : > { %v12260_v24 = vpack.c.bf16 %v4595_v53, %v4593_v20  ;;  %v14314_v48 = vcombine.high %v14312_v9, %v14313_v44  ;;  %v14315_v34 = vld [vmem:[#allocation46_spill] sm:$0xff]  ;;  %v4597_v35 = vmul.f32 1.050701, %v4565_v41  ;;  %v4537_v42 = vmul.f32 1.6732632, %v8462_v59  ;;  %v14317_v50 = vld [vmem:[#allocation43_spill] sm:$0xff] }
 0x779   : > { %5526 = vmatpush1.bf16.msra.mxu1 %v14310_v8  ;;  %5753 = vmatprep.subr.bf16.mxu0 %v14315_v34  ;;  %v8463_v46 = vadd.f32 -1.0, %v9711_v37  ;;  %9718 = vpow2.f32 %v4472_v6  ;;  %v4416_v10 = vmin.f32 %v12254_v43, 0.0  ;;  %v4309_v20 = vmul.f32 %v11779_v30, %v12174_v26  ;;  %v14318_v6 = vld [vmem:[#allocation44_spill] sm:$0xff]  ;;  %v14319_v8 = vld [vmem:[#allocation45_spill] sm:$0xff] }
 0x77a   : > { %5527 = vmatprep.subr.bf16.mxu1 %v14314_v48  ;;  %9720 = vpow2.f32 %v4474_v47  ;;  %5458 = vmatprep.mubr.bf16.mxu1 %v12260_v24  ;;  %v12272_v53 = vpack.c.bf16 %v4594_v45, %v12158_v57  ;;  %v4310_v17 = vmul.f32 %v11776_v23, %v12191_v18  ;;  %v4311_v0 = vmul.f32 %v11779_v30, %v12198_v15 }
 0x77b   : > { %5684 = vmatprep.mubr.bf16.mxu0 %v12260_v24  ;;  %v4538_v56 = vmul.f32 1.6732632, %v8463_v46  ;;  %v12278_v59 = vpack.c.bf16 %v4599_v1, %v4597_v35  ;;  %v14316_v41 = vcombine.low %v14312_v9, %v14313_v44  ;;  %5754 = vmatpush1.bf16.msra.mxu0 %v14317_v50  ;;  %v4568_v57 = vsel %vm4376_vm5, %v12100_v54, %v4536_v63  ;;  %v9713_v30 = vpop.eup %9712  ;;  %v14322_v9 = vld [vmem:[#allocation48_spill] sm:$0xff] }
 0x77c   : > { %v4476_v26 = vmul.f32 1.442695, %v4416_v10  ;;  %v12288_v46 = vadd.f32 %v11785_v60, %v4309_v20  ;;  %5459 = vmatmul.mubr.bf16.gmra.mrb[108].mxu1 %v12272_v53  ;;  %5685 = vmatmul.mubr.bf16.gmra.mrb[44].mxu0 %v12272_v53  ;;  %v12292_v23 = vpack.c.bf16 %v4598_v22, %v4596_v40  ;;  %v12298_v15 = vadd.f32 %v11782_v58, %v4310_v17  ;;  %v12316_v44 = vld [vmem:[#allocation13 + $0x348] sm:$0xff] }
 0x77d   : > { %5528 = vmatpush1.bf16.msra.mxu1 %v14316_v41  ;;  %v4570_v18 = vsel %vm4378_vm6, %v12131_v49, %v4538_v56  ;;  %v12301_v54 = vadd.f32 %v11785_v60, %v4311_v0  ;;  %5468 = vmatprep.mubr.bf16.mxu1 %v12278_v59  ;;  %v9715_v45 = vpop.eup %9714  ;;  %vm4377_vm7 = vcmp.gt.f32.partialorder %v12103_v31, 0.0  ;;  %v8464_v1 = vadd.f32 -1.0, %v9713_v30  ;;  %v14323_v56 = vld [vmem:[#allocation51_spill] sm:$0xff]  ;;  %v12324_v0 = vld [vmem:[#allocation13 + $0x368] sm:$0xff]  ;;  %v4719_v41 = vld [vmem:[#allocation13 + $0x358] sm:$0xff] }
 0x77e   : > { %5694 = vmatprep.mubr.bf16.mxu0 %v12278_v59  ;;  %v4602_v40 = vmul.f32 1.050701, %v4570_v18  ;;  %9722 = vpow2.f32 %v4476_v26  ;;  %v14320_v37 = vcombine.high %v14318_v6, %v14319_v8  ;;  %5755 = vmatprep.subr.bf16.mxu0 %v11973_v55  ;;  %v9717_v58 = vpop.eup %9716  ;;  %v4600_v49 = vmul.f32 1.050701, %v4568_v57 }
 0x77f   : > { %v8465_v60 = vadd.f32 -1.0, %v9715_v45  ;;  %v4417_v22 = vmin.f32 %v12288_v46, 0.0  ;;  %v4418_v63 = vmin.f32 %v12298_v15, 0.0  ;;  %v14321_v47 = vcombine.low %v14318_v6, %v14319_v8  ;;  %5756 = vmatpush1.bf16.msra.mxu0 %v14322_v9 }
 0x780   : > { %5529 = vmatprep.subr.bf16.mxu1 %v14320_v37  ;;  %v4569_v48 = vsel %vm4377_vm7, %v12103_v31, %v4537_v42  ;;  %v4539_v35 = vmul.f32 1.6732632, %v8464_v1  ;;  %v8466_v10 = vadd.f32 -1.0, %v9717_v58  ;;  %v4419_v20 = vmin.f32 %v12301_v54, 0.0  ;;  %5757 = vmatprep.subr.bf16.mxu0 %v12061_v16  ;;  %v4723_v31 = vld [vmem:[#allocation13 + $0x378] sm:$0xff] }
 0x781   : > { %5530 = vmatpush1.bf16.msra.mxu1 %v14321_v47  ;;  %v14324_v17 = vcombine.high %v12000_v36, %v14323_v56  ;;  %vm4379_vm8 = vcmp.gt.f32.partialorder %v12186_v39, 0.0  ;;  %v4478_v57 = vmul.f32 1.442695, %v4417_v22  ;;  %v4480_v26 = vmul.f32 1.442695, %v4418_v63 }
 0x782   : > { %v12327_v30 = vpack.c.bf16 %v4602_v40, %v4600_v49  ;;  %v4571_v42 = vsel %vm4379_vm8, %v12186_v39, %v4539_v35  ;;  %v4540_v18 = vmul.f32 1.6732632, %v8465_v60  ;;  %v4482_v45 = vmul.f32 1.442695, %v4419_v20 }
 0x783   : > { %5531 = vmatprep.subr.bf16.mxu1 %v14324_v17  ;;  %v12332_v1 = vcombine.low %v12050_v2, %v12052_v5  ;;  %v9719_v6 = vpop.eup %9718  ;;  %v4601_v8 = vmul.f32 1.050701, %v4569_v48  ;;  %v4603_v37 = vmul.f32 1.050701, %v4571_v42  ;;  %v4541_v58 = vmul.f32 1.6732632, %v8466_v10  ;;  %5758 = vmatpush1.bf16.msra.mxu0 %v12059_v25 }
 0x784   : > { %9724 = vpow2.f32 %v4478_v57  ;;  %v14325_v22 = vcombine.low %v12000_v36, %v14323_v56  ;;  %v9721_v40 = vpop.eup %9720  ;;  %v8467_v49 = vadd.f32 -1.0, %v9719_v6  ;;  %5469 = vmatmul.mubr.bf16.gmra.mrb[112].mxu1 %v12292_v23  ;;  %5695 = vmatmul.mubr.bf16.gmra.mrb[48].mxu0 %v12292_v23  ;;  %v8580_v2 = vcombine.high %v12316_v44, %v12324_v0  ;;  %v4725_v10 = vld [vmem:[#allocation13 + $0x388] sm:$0xff]  ;;  %v4731_v42 = vld [vmem:[#allocation13 + $0x3b8] sm:$0xff] }
 0x785   : > { %9726 = vpow2.f32 %v4480_v26  ;;  %v12342_v5 = vcombine.high %v4719_v41, %v4723_v31  ;;  %vm4380_vm9 = vcmp.gt.f32.partialorder %v12189_v14, 0.0  ;;  %v8468_v39 = vadd.f32 -1.0, %v9721_v40  ;;  %5759 = vmatprep.subr.bf16.mxu0 %v12074_v32  ;;  %v4729_v57 = vld [vmem:[#allocation13 + $0x3a8] sm:$0xff]  ;;  %v4727_v26 = vld [vmem:[#allocation13 + $0x398] sm:$0xff] }
 0x786   : > { %5532 = vmatpush1.bf16.msra.mxu1 %v14325_v22  ;;  %9728 = vpow2.f32 %v4482_v45  ;;  %v12345_v36 = vpack.c.bf16 %v4603_v37, %v4601_v8  ;;  %v14326_v60 = vcombine.high %v12035_v7, %v12037_v12  ;;  %v4572_v63 = vsel %vm4380_vm9, %v12189_v14, %v4540_v18  ;;  %v4733_v8 = vld [vmem:[#allocation13 + $0x3c8] sm:$0xff] }
 0x787   : > { %vm4381_vm10 = vcmp.gt.f32.partialorder %v12196_v33, 0.0  ;;  %v4542_v47 = vmul.f32 1.6732632, %v8467_v49  ;;  %vm4382_vm11 = vcmp.gt.f32.partialorder %v12227_v38, 0.0  ;;  %v4543_v35 = vmul.f32 1.6732632, %v8468_v39  ;;  %5760 = vmatpush1.bf16.msra.mxu0 %v12332_v1 }
 0x788   : > { %5533 = vmatprep.subr.bf16.mxu1 %v14326_v60  ;;  %v4573_v48 = vsel %vm4381_vm10, %v12196_v33, %v4541_v58  ;;  %5478 = vmatprep.mubr.bf16.mxu1 %v12345_v36  ;;  %v9723_v20 = vpop.eup %9722  ;;  %vm4383_vm12 = vcmp.gt.f32.partialorder %v12236_v19, 0.0  ;;  %v14327_v14 = vcombine.low %v12035_v7, %v12037_v12  ;;  %v8579_v33 = vcombine.low %v12316_v44, %v12324_v0  ;;  %v4737_v0 = vld [vmem:[#allocation13 + $0x3e8] sm:$0xff] }
 0x789   : > { %5704 = vmatprep.mubr.bf16.mxu0 %v12345_v36  ;;  %v4574_v56 = vsel %vm4382_vm11, %v12227_v38, %v4542_v47  ;;  %v12365_v17 = vcombine.low %v4719_v41, %v4723_v31  ;;  %v4604_v18 = vmul.f32 1.050701, %v4572_v63  ;;  %v4575_v38 = vsel %vm4383_vm12, %v12236_v19, %v4543_v35  ;;  %5761 = vmatprep.subr.bf16.mxu0 %v12342_v5  ;;  %v4735_v41 = vld [vmem:[#allocation13 + $0x3d8] sm:$0xff] }
 0x78a   : > { %5534 = vmatpush1.bf16.msra.mxu1 %v14327_v14  ;;  %v4606_v45 = vmul.f32 1.050701, %v4574_v56  ;;  %v8469_v6 = vadd.f32 -1.0, %v9723_v20  ;;  %v4605_v7 = vmul.f32 1.050701, %v4573_v48  ;;  %v8588_v58 = vcombine.high %v4725_v10, %v4729_v57  ;;  %v4739_v31 = vld [vmem:[#allocation13 + $0x3f8] sm:$0xff] }
 0x78b   : > { %5535 = vmatprep.subr.bf16.mxu1 %v8580_v2  ;;  %v4607_v12 = vmul.f32 1.050701, %v4575_v38  ;;  %v12371_v44 = vcombine.high %v4727_v26, %v4731_v42  ;;  %5762 = vmatpush1.bf16.msra.mxu0 %v12365_v17  ;;  %v8587_v49 = vcombine.low %v4725_v10, %v4729_v57  ;;  %v12378_v2 = vcombine.low %v4727_v26, %v4731_v42 }
 0x78c   : > { %v12369_v37 = vpack.c.bf16 %v4606_v45, %v4604_v18  ;;  %5479 = vmatmul.mubr.bf16.gmra.mrb[116].mxu1 %v12327_v30  ;;  %5705 = vmatmul.mubr.bf16.gmra.mrb[52].mxu0 %v12327_v30  ;;  %v4544_v40 = vmul.f32 1.6732632, %v8469_v6  ;;  %v8596_v63 = vcombine.high %v4733_v8, %v4737_v0  ;;  %v12382_v47 = vcombine.high %v4735_v41, %v4739_v31 }
 0x78d   : > { %v12375_v19 = vpack.c.bf16 %v4607_v12, %v4605_v7  ;;  %5763 = vmatprep.subr.bf16.mxu0 %v12371_v44  ;;  %vm4384_vm13 = vcmp.gt.f32.partialorder %v12254_v43, 0.0  ;;  %v8595_v56 = vcombine.low %v4733_v8, %v4737_v0  ;;  %vm4385_vm14 = vcmp.gt.f32.partialorder %v12288_v46, 0.0  ;;  %v14328_v12 = vld [vmem:[#allocation27_spill] sm:$0xff]  ;;  %v14332_v0 = vld [vmem:[#allocation26_spill] sm:$0xff] }
 0x78e   : > { %v9725_v22 = vpop.eup %9724  ;;  %5536 = vmatpush1.bf16.msra.mxu1 %v8579_v33  ;;  %v4576_v14 = vsel %vm4384_vm13, %v12254_v43, %v4544_v40  ;;  %v12389_v57 = vcombine.low %v4735_v41, %v4739_v31  ;;  %vm4386_vm15 = vcmp.gt.f32.partialorder %v12298_v15, 0.0  ;;  %vm4387_vm0 = vcmp.gt.f32.partialorder %v12301_v54, 0.0  ;;  %v14330_v8 = vld [vmem:[#allocation47_spill] sm:$0xff]  ;;  %v14333_v41 = vld [vmem:[#allocation29_spill] sm:$0xff]  ;;  %v14334_v31 = vld [vmem:[#allocation28_spill] sm:$0xff] }
 0x78f   : > { %v9727_v39 = vpop.eup %9726  ;;  %v8470_v60 = vadd.f32 -1.0, %v9725_v22  ;;  %5488 = vmatprep.mubr.bf16.mxu1 %v12375_v19  ;;  %5714 = vmatprep.mubr.bf16.mxu0 %v12375_v19  ;;  %v4608_v43 = vmul.f32 1.050701, %v4576_v14  ;;  %v14335_v22 = vld [vmem:[#allocation30_spill] sm:$0xff]  ;;  %v14336_v40 = vld [vmem:[#allocation31_spill] sm:$0xff] }
 0x790   : > { %v9729_v48 = vpop.eup %9728  ;;  %v8471_v35 = vadd.f32 -1.0, %v9727_v39  ;;  %5537 = vmatprep.subr.bf16.mxu1 %v8588_v58  ;;  %5764 = vmatpush1.bf16.msra.mxu0 %v12378_v2  ;;  %v14331_v58 = vld [vmem:[#allocation50_spill] sm:$0xff] }
 0x791   : > { %v4545_v20 = vmul.f32 1.6732632, %v8470_v60  ;;  %v8472_v10 = vadd.f32 -1.0, %v9729_v48  ;;  %5765 = vmatprep.subr.bf16.mxu0 %v12382_v47 }
 0x792   : > { %v4546_v33 = vmul.f32 1.6732632, %v8471_v35  ;;  %5538 = vmatpush1.bf16.msra.mxu1 %v8587_v49  ;;  %v14337_v49 = vld [vmem:[#allocation32_spill] sm:$0xff] }
 0x793   : > { %v4577_v26 = vsel %vm4385_vm14, %v12288_v46, %v4545_v20  ;;  %v4547_v42 = vmul.f32 1.6732632, %v8472_v10  ;;  %5539 = vmatprep.subr.bf16.mxu1 %v8596_v63 }
 0x794   : > { %v4578_v18 = vsel %vm4386_vm15, %v12298_v15, %v4546_v33  ;;  %5489 = vmatmul.mubr.bf16.gmra.mrb[120].mxu1 %v12369_v37  ;;  %5715 = vmatmul.mubr.bf16.gmra.mrb[56].mxu0 %v12369_v37  ;;  %v4609_v6 = vmul.f32 1.050701, %v4577_v26 }
 0x795   : > { %v4610_v45 = vmul.f32 1.050701, %v4578_v18  ;;  %v4579_v38 = vsel %vm4387_vm0, %v12301_v54, %v4547_v42  ;;  %5766 = vmatpush1.bf16.msra.mxu0 %v12389_v57  ;;  %v14329_v54 = vld [vmem:[#allocation49_spill] sm:$0xff] }
 0x796   : > { %v4611_v46 = vmul.f32 1.050701, %v4579_v38  ;;  %5540 = vmatpush1.bf16.msra.mxu1 %v8595_v56 }
 0x797   : > { %v12400_v7 = vpack.c.bf16 %v4610_v45, %v4608_v43  ;;  %9015 = vmatprep.subr.bf16.mxu1 %v14328_v12 }
 0x798   : > { %v12403_v15 = vpack.c.bf16 %v4611_v46, %v4609_v6 }
 0x79a   : > { %5498 = vmatprep.mubr.bf16.mxu1 %v12403_v15  ;;  %5724 = vmatprep.mubr.bf16.mxu0 %v12403_v15 }
 0x79c   : > { %5499 = vmatmul.mubr.bf16.gmra.mrb[124].mxu1 %v12400_v7  ;;  %5725 = vmatmul.mubr.bf16.gmra.mrb[60].mxu0 %v12400_v7 }
 0x79d   : > { %5541 = vmatprep.mubr.bf16.mxu1 %v14329_v54  ;;  %5767 = vmatprep.mubr.bf16.mxu0 %v14329_v54 }
 0x7a4   : > { %5542 = vmatmul.mubr.bf16.vlgmr.msra.gmra.mrb[128].mxu1 %v14330_v8  ;;  %5768 = vmatmul.mubr.bf16.vlgmr.msra.gmra.mrb[64].mxu0 %v14330_v8 }
 0x7a5   : > { %5551 = vmatprep.mubr.bf16.mxu1 %v14331_v58  ;;  %9031 = vmatpush1.bf16.msra.mxu1 %v14332_v0 }
 0x7a6   : > { %5777 = vmatprep.mubr.bf16.mxu0 %v14331_v58  ;;  %9016 = vmatprep.subr.bf16.mxu1 %v14333_v41 }
 0x7a9   : > { %9032 = vmatpush1.bf16.msra.mxu1 %v14334_v31 }
 0x7aa   : > { %9017 = vmatprep.subr.bf16.mxu1 %v14335_v22 }
 0x7ac   : > { %5552 = vmatmul.mubr.bf16.gmra.mrb[132].mxu1 %v12105_v61  ;;  %5778 = vmatmul.mubr.bf16.gmra.mrb[68].mxu0 %v12105_v61 }
 0x7ad   : > { %5561 = vmatprep.mubr.bf16.mxu1 %v12171_v29  ;;  %9033 = vmatpush1.bf16.msra.mxu1 %v11831_v52  ;;  %v14338_v52 = vld [vmem:[#allocation37_spill] sm:$0xff] }
 0x7ae   : > { %9018 = vmatprep.subr.bf16.mxu1 %v11855_v28  ;;  %v14339_v28 = vld [vmem:[#allocation42_spill] sm:$0xff] }
 0x7b1   : > { %9034 = vmatpush1.bf16.msra.mxu1 %v14336_v40 }
 0x7b2   : > { %9019 = vmatprep.subr.bf16.mxu1 %v14337_v49 }
 0x7b4   : > { %5562 = vmatmul.mubr.bf16.gmra.mrb[136].mxu1 %v12207_v11 }
 0x7b5   : > { %5571 = vmatprep.mubr.bf16.mxu1 %v12260_v24  ;;  %9035 = vmatpush1.bf16.msra.mxu1 %v11875_v4  ;;  %v5848_v4 = vld [vmem:[%s14341_s21] sm:$0xff] }
 0x7b6   : > { %9020 = vmatprep.subr.bf16.mxu1 %v11893_v62  ;;  %v14343_v62 = vld [vmem:[#allocation24_spill] sm:$0xff] }
 0x7b9   : > { %9036 = vmatpush1.bf16.msra.mxu1 %v11891_v13  ;;  %v6018_v13 = vld [vmem:[%s14342_s4] sm:$0xff] }
 0x7ba   : > { %9021 = vmatprep.subr.bf16.mxu1 %v11905_v51  ;;  %v14340_v51 = vld [vmem:[#allocation23_spill] sm:$0xff] }
 0x7bc   : > { %5572 = vmatmul.mubr.bf16.gmra.mrb[140].mxu1 %v12272_v53 }
 0x7bd   : > { %5581 = vmatprep.mubr.bf16.mxu1 %v12278_v59  ;;  %9037 = vmatpush1.bf16.msra.mxu1 %v11899_v27  ;;  %v5868_v27 = vsub.s32 4, %v14340_v51 }
 0x7be   : > { %9022 = vmatprep.subr.bf16.mxu1 %v14303_v21 }
 0x7bf   : > { %v12493_v21 = vrot.slane %v6018_v13, %v5868_v27 }
 0x7c1   : > { %9038 = vmatpush1.bf16.msra.mxu1 %v14338_v52 }
 0x7c2   : > { %9023 = vmatprep.subr.bf16.mxu1 %v14339_v28 }
 0x7c4   : > { %5582 = vmatmul.mubr.bf16.gmra.mrb[144].mxu1 %v12292_v23 }
 0x7c5   : > { %5591 = vmatprep.mubr.bf16.mxu1 %v12345_v36  ;;  %9039 = vmatpush1.bf16.msra.mxu1 %v14311_v3 }
 0x7c6   : > { %9024 = vmatprep.subr.bf16.mxu1 %v14315_v34 }
 0x7c9   : > { %9040 = vmatpush1.bf16.msra.mxu1 %v14317_v50 }
 0x7ca   : > { %9025 = vmatprep.subr.bf16.mxu1 %v11973_v55  ;;  %v5872_v55 = vsub.s32 5, %v14340_v51 }
 0x7cc   : > { %5592 = vmatmul.mubr.bf16.gmra.mrb[148].mxu1 %v12327_v30 }
 0x7cd   : > { %5601 = vmatprep.mubr.bf16.mxu1 %v12375_v19  ;;  %9041 = vmatpush1.bf16.msra.mxu1 %v14322_v9 }
 0x7ce   : > { %9026 = vmatprep.subr.bf16.mxu1 %v12061_v16  ;;  %v12483_v16 = vrot.slane %v5848_v4, %v5868_v27 }
 0x7d1   : > { %9042 = vmatpush1.bf16.msra.mxu1 %v12059_v25  ;;  %v12481_v25 = vrot.slane %v5848_v4, %v14343_v62 }
 0x7d2   : > { %9027 = vmatprep.subr.bf16.mxu1 %v12074_v32  ;;  %v14344_v32 = vld [vmem:[#allocation25_spill] sm:$0xff] }
 0x7d3   : > { %v12486_v61 = vrot.slane %v5848_v4, %v14344_v32  ;;  %v12496_v34 = vrot.slane %v6018_v13, %v14344_v32 }
 0x7d4   : > { %5602 = vmatmul.mubr.bf16.gmra.mrb[152].mxu1 %v12369_v37 }
 0x7d5   : > { %5611 = vmatprep.mubr.bf16.mxu1 %v12403_v15  ;;  %9043 = vmatpush1.bf16.msra.mxu1 %v12332_v1 }
 0x7d6   : > { %9028 = vmatprep.subr.bf16.mxu1 %v12342_v5 }
 0x7d9   : > { %9044 = vmatpush1.bf16.msra.mxu1 %v12365_v17 }
 0x7da   : > { %9029 = vmatprep.subr.bf16.mxu1 %v12371_v44 }
 0x7dc   : > { %5612 = vmatmul.mubr.bf16.gmra.mrb[156].mxu1 %v12400_v7 }
 0x7dd   : > { %9045 = vmatpush1.bf16.msra.mxu1 %v12378_v2  ;;  %5787 = vmatprep.mubr.bf16.mxu1 %v12171_v29  ;;  %v12488_v29 = vrot.slane %v5848_v4, %v5872_v55 }
 0x7de   : > { %9030 = vmatprep.subr.bf16.mxu1 %v12382_v47 }
 0x7e1   : > { %9046 = vmatpush1.bf16.msra.mxu1 %v12389_v57 }
 0x7e4   : > { %5788 = vmatmul.mubr.bf16.vlgmr.msra.gmra.mrb[160].mxu1 %v12207_v11  ;;  %v12491_v11 = vrot.slane %v6018_v13, %v14343_v62 }
 0x7e5   : > { %5797 = vmatprep.mubr.bf16.mxu1 %v12260_v24 }
 0x7ec   : > { %5798 = vmatmul.mubr.bf16.gmra.mrb[164].mxu1 %v12272_v53  ;;  %v12498_v53 = vrot.slane %v6018_v13, %v5872_v55 }
 0x7ed   : > { %5807 = vmatprep.mubr.bf16.mxu1 %v12278_v59 }
 0x7f4   : > { %5808 = vmatmul.mubr.bf16.gmra.mrb[168].mxu1 %v12292_v23 }
 0x7f5   : > { %5817 = vmatprep.mubr.bf16.mxu1 %v12345_v36 }
 0x7fc   : > { %5818 = vmatmul.mubr.bf16.gmra.mrb[172].mxu1 %v12327_v30 }
 0x7fd   : > { %5827 = vmatprep.mubr.bf16.mxu1 %v12375_v19 }
 0x804   : > { %5828 = vmatmul.mubr.bf16.gmra.mrb[176].mxu1 %v12369_v37 }
 0x805   : > { %5837 = vmatprep.mubr.bf16.mxu1 %v12403_v15 }
 0x80c   : > { %5838 = vmatmul.mubr.bf16.gmra.mrb[180].mxu1 %v12400_v7 }
 0x823   : > { %v5430_v24 = vpop.f32.mrb[96].mxu1  ;;  %v5656_v3 = vpop.f32.mrb[32].mxu0 }
 0x824   : > { %v5890_v59 = vmul.f32 %v12481_v25, %v5430_v24  ;;  %v5894_v50 = vmul.f32 %v12483_v16, %v5656_v3  ;;  %v5432_v23 = vpop.f32.mrb[97].mxu1  ;;  %v5658_v9 = vpop.f32.mrb[33].mxu0 }
 0x825   : > { %v5891_v30 = vmul.f32 %v12486_v61, %v5432_v23  ;;  %v5895_v1 = vmul.f32 %v12488_v29, %v5658_v9  ;;  %v5434_v5 = vpop.f32.mrb[98].mxu1  ;;  %v5660_v36 = vpop.f32.mrb[34].mxu0 }
 0x826   : > { %v12505_v17 = vadd.f32 %v12491_v11, %v5890_v59  ;;  %v12508_v37 = vadd.f32 %v12493_v21, %v5894_v50  ;;  %v5898_v44 = vmul.f32 %v12481_v25, %v5434_v5  ;;  %v5902_v19 = vmul.f32 %v12483_v16, %v5660_v36  ;;  %v5436_v2 = vpop.f32.mrb[99].mxu1  ;;  %v5662_v39 = vpop.f32.mrb[35].mxu0 }
 0x827   : > { %v12513_v60 = vadd.f32 %v12496_v34, %v5891_v30  ;;  %v12516_v63 = vadd.f32 %v12498_v53, %v5895_v1  ;;  %v5899_v47 = vmul.f32 %v12486_v61, %v5436_v2  ;;  %v5903_v48 = vmul.f32 %v12488_v29, %v5662_v39 }
 0x828   : > { %v6316_v35 = vmin.f32 %v12505_v17, 0.0  ;;  %v6320_v20 = vmin.f32 %v12508_v37, 0.0  ;;  %v12525_v57 = vadd.f32 %v12491_v11, %v5898_v44  ;;  %v12528_v26 = vadd.f32 %v12493_v21, %v5902_v19 }
 0x829   : > { %v6317_v10 = vmin.f32 %v12513_v60, 0.0  ;;  %v6321_v56 = vmin.f32 %v12516_v63, 0.0  ;;  %v12531_v43 = vadd.f32 %v12496_v34, %v5899_v47  ;;  %v12534_v45 = vadd.f32 %v12498_v53, %v5903_v48 }
 0x82a   : > { %v6444_v14 = vmul.f32 1.442695, %v6316_v35  ;;  %v6452_v33 = vmul.f32 1.442695, %v6320_v20  ;;  %v6324_v38 = vmin.f32 %v12525_v57, 0.0  ;;  %v6328_v6 = vmin.f32 %v12528_v26, 0.0 }
 0x82b   : > { %v6446_v42 = vmul.f32 1.442695, %v6317_v10  ;;  %v6454_v18 = vmul.f32 1.442695, %v6321_v56  ;;  %v6325_v46 = vmin.f32 %v12531_v43, 0.0  ;;  %v6329_v12 = vmin.f32 %v12534_v45, 0.0 }
 0x82c   : > { %9730 = vpow2.f32 %v6444_v14  ;;  %v6460_v7 = vmul.f32 1.442695, %v6324_v38  ;;  %v6468_v15 = vmul.f32 1.442695, %v6328_v6  ;;  %vm6188_vm1 = vcmp.gt.f32.partialorder %v12505_v17, 0.0 }
 0x82d   : > { %9732 = vpow2.f32 %v6452_v33  ;;  %v6462_v54 = vmul.f32 1.442695, %v6325_v46  ;;  %v6470_v8 = vmul.f32 1.442695, %v6329_v12  ;;  %vm6192_vm2 = vcmp.gt.f32.partialorder %v12508_v37, 0.0 }
 0x82e   : > { %9734 = vpow2.f32 %v6446_v42  ;;  %vm6189_vm3 = vcmp.gt.f32.partialorder %v12513_v60, 0.0  ;;  %vm6193_vm4 = vcmp.gt.f32.partialorder %v12516_v63, 0.0  ;;  %vm6196_vm5 = vcmp.gt.f32.partialorder %v12525_v57, 0.0 }
 0x82f   : > { %9736 = vpow2.f32 %v6454_v18  ;;  %vm6200_vm6 = vcmp.gt.f32.partialorder %v12528_v26, 0.0  ;;  %vm6197_vm7 = vcmp.gt.f32.partialorder %v12531_v43, 0.0  ;;  %vm6201_vm8 = vcmp.gt.f32.partialorder %v12534_v45, 0.0 }
 0x830   : > { %9738 = vpow2.f32 %v6460_v7  ;;  %v5440_v58 = vpop.f32.mrb[100].mxu1  ;;  %v5666_v0 = vpop.f32.mrb[36].mxu0 }
 0x831   : > { %9740 = vpow2.f32 %v6468_v15  ;;  %v5906_v41 = vmul.f32 %v12481_v25, %v5440_v58  ;;  %v5910_v31 = vmul.f32 %v12483_v16, %v5666_v0  ;;  %v5442_v22 = vpop.f32.mrb[101].mxu1  ;;  %v5668_v40 = vpop.f32.mrb[37].mxu0 }
 0x832   : > { %9742 = vpow2.f32 %v6462_v54  ;;  %v5907_v49 = vmul.f32 %v12486_v61, %v5442_v22  ;;  %v5911_v52 = vmul.f32 %v12488_v29, %v5668_v40  ;;  %v5444_v28 = vpop.f32.mrb[102].mxu1  ;;  %v5670_v27 = vpop.f32.mrb[38].mxu0 }
 0x833   : > { %9744 = vpow2.f32 %v6470_v8  ;;  %v12545_v4 = vadd.f32 %v12491_v11, %v5906_v41  ;;  %v12548_v55 = vadd.f32 %v12493_v21, %v5910_v31  ;;  %v5914_v13 = vmul.f32 %v12481_v25, %v5444_v28  ;;  %v5446_v62 = vpop.f32.mrb[103].mxu1  ;;  %v12551_v32 = vpop.f32.mrb[39].mxu0 }
 0x834   : > { %v12556_v24 = vadd.f32 %v12496_v34, %v5907_v49  ;;  %v12559_v3 = vadd.f32 %v12498_v53, %v5911_v52  ;;  %v5918_v23 = vmul.f32 %v12483_v16, %v5670_v27  ;;  %v5915_v20 = vmul.f32 %v12486_v61, %v5446_v62 }
 0x835   : > { %v6332_v59 = vmin.f32 %v12545_v4, 0.0  ;;  %v6336_v50 = vmin.f32 %v12548_v55, 0.0  ;;  %v12571_v2 = vadd.f32 %v12491_v11, %v5914_v13  ;;  %vm6204_vm9 = vcmp.gt.f32.partialorder %v12545_v4, 0.0 }
 0x836   : > { %v9731_v9 = vpop.eup %9730  ;;  %v6333_v30 = vmin.f32 %v12556_v24, 0.0  ;;  %v6337_v1 = vmin.f32 %v12559_v3, 0.0  ;;  %v12577_v33 = vadd.f32 %v12493_v21, %v5918_v23  ;;  %vm6208_vm10 = vcmp.gt.f32.partialorder %v12548_v55, 0.0 }
 0x837   : > { %v9733_v5 = vpop.eup %9732  ;;  %v8601_v36 = vadd.f32 -1.0, %v9731_v9  ;;  %v6476_v44 = vmul.f32 1.442695, %v6332_v59  ;;  %v6484_v19 = vmul.f32 1.442695, %v6336_v50  ;;  %v6340_v6 = vmin.f32 %v12571_v2, 0.0 }
 0x838   : > { %v9735_v39 = vpop.eup %9734  ;;  %v8605_v47 = vadd.f32 -1.0, %v9733_v5  ;;  %v6478_v48 = vmul.f32 1.442695, %v6333_v30  ;;  %v6486_v35 = vmul.f32 1.442695, %v6337_v1  ;;  %vm6205_vm11 = vcmp.gt.f32.partialorder %v12556_v24, 0.0 }
 0x839   : > { %v9737_v10 = vpop.eup %9736  ;;  %v6828_v56 = vmul.f32 1.6732632, %v8601_v36  ;;  %v8602_v14 = vadd.f32 -1.0, %v9735_v39  ;;  %9746 = vpow2.f32 %v6476_v44  ;;  %v6492_v44 = vmul.f32 1.442695, %v6340_v6 }
 0x83a   : > { %v9739_v42 = vpop.eup %9738  ;;  %v6832_v18 = vmul.f32 1.6732632, %v8605_v47  ;;  %v8606_v38 = vadd.f32 -1.0, %v9737_v10  ;;  %9748 = vpow2.f32 %v6484_v19  ;;  %v6344_v47 = vmin.f32 %v12577_v33, 0.0 }
 0x83b   : > { %v9741_v46 = vpop.eup %9740  ;;  %v6956_v7 = vsel %vm6188_vm1, %v12505_v17, %v6828_v56  ;;  %v6829_v12 = vmul.f32 1.6732632, %v8602_v14  ;;  %v8609_v15 = vadd.f32 -1.0, %v9739_v42  ;;  %9750 = vpow2.f32 %v6478_v48 }
 0x83c   : > { %v9743_v54 = vpop.eup %9742  ;;  %v7084_v8 = vmul.f32 1.050701, %v6956_v7  ;;  %v6960_v58 = vsel %vm6192_vm2, %v12508_v37, %v6832_v18  ;;  %v6833_v0 = vmul.f32 1.6732632, %v8606_v38  ;;  %v8613_v41 = vadd.f32 -1.0, %v9741_v46 }
 0x83d   : > { %v9745_v31 = vpop.eup %9744  ;;  %v7088_v22 = vmul.f32 1.050701, %v6960_v58  ;;  %v6957_v40 = vsel %vm6189_vm3, %v12513_v60, %v6829_v12  ;;  %v6836_v49 = vmul.f32 1.6732632, %v8609_v15  ;;  %v8610_v17 = vadd.f32 -1.0, %v9743_v54 }
 0x83e   : > { %v7085_v52 = vmul.f32 1.050701, %v6957_v40  ;;  %v6961_v28 = vsel %vm6193_vm4, %v12516_v63, %v6833_v0  ;;  %v6840_v27 = vmul.f32 1.6732632, %v8613_v41  ;;  %v8614_v13 = vadd.f32 -1.0, %v9745_v31 }
 0x83f   : > { %v7089_v62 = vmul.f32 1.050701, %v6961_v28  ;;  %v6964_v37 = vsel %vm6196_vm5, %v12525_v57, %v6836_v49  ;;  %v6837_v59 = vmul.f32 1.6732632, %v8610_v17  ;;  %9752 = vpow2.f32 %v6486_v35 }
 0x840   : > { %v8805_v50 = vpack.c.bf16 %v7085_v52, %v7084_v8  ;;  %v7092_v23 = vmul.f32 1.050701, %v6964_v37  ;;  %v6968_v60 = vsel %vm6200_vm6, %v12528_v26, %v6840_v27  ;;  %v6841_v9 = vmul.f32 1.6732632, %v8614_v13 }
 0x841   : > { %v8837_v63 = vpack.c.bf16 %v7089_v62, %v7088_v22  ;;  %v7096_v5 = vmul.f32 1.050701, %v6968_v60  ;;  %v6965_v36 = vsel %vm6197_vm7, %v12531_v43, %v6837_v59  ;;  %9754 = vpow2.f32 %v6492_v44 }
 0x842   : > { %7404 = vst [vmem:[%s12604_s12] sm:$0xff] %v8805_v50  ;;  %v7093_v39 = vmul.f32 1.050701, %v6965_v36  ;;  %v6969_v26 = vsel %vm6201_vm8, %v12534_v45, %v6841_v9  ;;  %v12620_v56 = vadd.f32 %v12496_v34, %v5915_v20  ;;  %v5919_v45 = vmul.f32 %v12488_v29, %v12551_v32 }
 0x843   : > { %v5450_v30 = vpop.f32.mrb[104].mxu1  ;;  %v9747_v43 = vpop.eup %9746  ;;  %7628 = vst [vmem:[%s12616_s7] sm:$0xff] %v8837_v63  ;;  %v7097_v10 = vmul.f32 1.050701, %v6969_v26  ;;  %v6500_v46 = vmul.f32 1.442695, %v6344_v47  ;;  %vm6209_vm12 = vcmp.gt.f32.partialorder %v12559_v3, 0.0 }
 0x844   : > { %v5676_v1 = vpop.f32.mrb[40].mxu0  ;;  %v5452_v57 = vpop.f32.mrb[105].mxu1  ;;  %v8807_v38 = vpack.c.bf16 %v7093_v39, %v7092_v23  ;;  %v8617_v6 = vadd.f32 -1.0, %v9747_v43  ;;  %v5922_v7 = vmul.f32 %v12481_v25, %v5450_v30  ;;  %v6341_v54 = vmin.f32 %v12620_v56, 0.0 }
 0x845   : > { %v5678_v19 = vpop.f32.mrb[41].mxu0  ;;  %v5454_v48 = vpop.f32.mrb[106].mxu1  ;;  %v8839_v15 = vpack.c.bf16 %v7097_v10, %v7096_v5  ;;  %9756 = vpow2.f32 %v6500_v46  ;;  %v12633_v58 = vadd.f32 %v12498_v53, %v5919_v45  ;;  %v5926_v22 = vmul.f32 %v12483_v16, %v5676_v1 }
 0x846   : > { %v12612_v35 = vpop.f32.mrb[42].mxu0  ;;  %v12624_v14 = vpop.f32.mrb[107].mxu1  ;;  %7406 = vst [vmem:[%s12604_s12 + $0x10] sm:$0xff] %v8807_v38  ;;  %v6844_v32 = vmul.f32 1.6732632, %v8617_v6  ;;  %v12637_v31 = vadd.f32 %v12491_v11, %v5922_v7  ;;  %v5923_v9 = vmul.f32 %v12486_v61, %v5452_v57  ;;  %v5930_v63 = vmul.f32 %v12481_v25, %v5454_v48 }
 0x847   : > { %v12626_v42 = vpop.f32.mrb[43].mxu0  ;;  %v9749_v18 = vpop.eup %9748  ;;  %7630 = vst [vmem:[%s12616_s7 + $0x10] sm:$0xff] %v8839_v15  ;;  %v6494_v41 = vmul.f32 1.442695, %v6341_v54  ;;  %v6345_v17 = vmin.f32 %v12633_v58, 0.0  ;;  %v12654_v60 = vadd.f32 %v12493_v21, %v5926_v22  ;;  %vm6212_vm13 = vcmp.gt.f32.partialorder %v12571_v2, 0.0 }
 0x848   : > { %v9751_v12 = vpop.eup %9750  ;;  %v8621_v20 = vadd.f32 -1.0, %v9749_v18  ;;  %v6972_v40 = vsel %vm6204_vm9, %v12545_v4, %v6844_v32  ;;  %v6348_v23 = vmin.f32 %v12637_v31, 0.0  ;;  %v12677_v10 = vadd.f32 %v12496_v34, %v5923_v9 }
 0x849   : > { %v8618_v8 = vadd.f32 -1.0, %v9751_v12  ;;  %v9753_v52 = vpop.eup %9752  ;;  %v7100_v28 = vmul.f32 1.050701, %v6972_v40  ;;  %9758 = vpow2.f32 %v6494_v41  ;;  %v6502_v59 = vmul.f32 1.442695, %v6345_v17 }
 0x84a   : > { %v6848_v0 = vmul.f32 1.6732632, %v8621_v20  ;;  %v8622_v37 = vadd.f32 -1.0, %v9753_v52  ;;  %v6508_v57 = vmul.f32 1.442695, %v6348_v23  ;;  %v6352_v26 = vmin.f32 %v12654_v60, 0.0 }
 0x84b   : > { %v6845_v49 = vmul.f32 1.6732632, %v8618_v8  ;;  %9760 = vpow2.f32 %v6502_v59  ;;  %v9755_v44 = vpop.eup %9754  ;;  %v12686_v46 = vadd.f32 %v12491_v11, %v5930_v63  ;;  %vm6216_vm14 = vcmp.gt.f32.partialorder %v12577_v33, 0.0 }
 0x84c   : > { %v6976_v27 = vsel %vm6208_vm10, %v12548_v55, %v6848_v0  ;;  %v6849_v1 = vmul.f32 1.6732632, %v8622_v37  ;;  %v8625_v48 = vadd.f32 -1.0, %v9755_v44  ;;  %9762 = vpow2.f32 %v6508_v57 }
 0x84d   : > { %v7104_v13 = vmul.f32 1.050701, %v6976_v27  ;;  %v6973_v62 = vsel %vm6205_vm11, %v12556_v24, %v6845_v49  ;;  %v5927_v24 = vmul.f32 %v12488_v29, %v5678_v19  ;;  %v6516_v6 = vmul.f32 1.442695, %v6352_v26 }
 0x84e   : > { %v7101_v50 = vmul.f32 1.050701, %v6973_v62  ;;  %v6977_v19 = vsel %vm6209_vm12, %v12559_v3, %v6849_v1  ;;  %v6852_v12 = vmul.f32 1.6732632, %v8625_v48  ;;  %vm6213_vm15 = vcmp.gt.f32.partialorder %v12620_v56, 0.0 }
 0x84f   : > { %v12650_v4 = vpop.f32.mrb[108].mxu1  ;;  %v12657_v30 = vpop.f32.mrb[44].mxu0  ;;  %v12680_v45 = vadd.f32 %v12498_v53, %v5927_v24  ;;  %v7105_v38 = vmul.f32 1.050701, %v6977_v19  ;;  %v6349_v3 = vmin.f32 %v12677_v10, 0.0  ;;  %9764 = vpow2.f32 %v6516_v6 }
 0x850   : > { %v12659_v55 = vpop.f32.mrb[109].mxu1  ;;  %v12663_v5 = vpop.f32.mrb[45].mxu0  ;;  %v8809_v39 = vpack.c.bf16 %v7101_v50, %v7100_v28  ;;  %vm6217_vm0 = vcmp.gt.f32.partialorder %v12633_v58, 0.0  ;;  %v6356_v8 = vmin.f32 %v12686_v46, 0.0  ;;  %v6980_v40 = vsel %vm6212_vm13, %v12571_v2, %v6852_v12 }
 0x851   : > { %v12665_v36 = vpop.f32.mrb[110].mxu1  ;;  %v12669_v47 = vpop.f32.mrb[46].mxu0  ;;  %v8841_v15 = vpack.c.bf16 %v7105_v38, %v7104_v13  ;;  %v6353_v54 = vmin.f32 %v12680_v45, 0.0  ;;  %v6510_v32 = vmul.f32 1.442695, %v6349_v3  ;;  %v5934_v52 = vmul.f32 %v12483_v16, %v12612_v35 }
 0x852   : > { %v12671_v43 = vpop.f32.mrb[111].mxu1  ;;  %v12682_v18 = vpop.f32.mrb[47].mxu0  ;;  %7408 = vst [vmem:[%s12604_s12 + $0x20] sm:$0xff] %v8809_v39  ;;  %v6524_v27 = vmul.f32 1.442695, %v6356_v8  ;;  %v5931_v13 = vmul.f32 %v12486_v61, %v12624_v14  ;;  %v5935_v35 = vmul.f32 %v12488_v29, %v12626_v42  ;;  %vm6220_vm1 = vcmp.gt.f32.partialorder %v12637_v31, 0.0 }
 0x853   : > { %v9757_v7 = vpop.eup %9756  ;;  %7632 = vst [vmem:[%s12616_s7 + $0x20] sm:$0xff] %v8841_v15  ;;  %v6518_v17 = vmul.f32 1.442695, %v6353_v54  ;;  %9766 = vpow2.f32 %v6510_v32  ;;  %v12714_v2 = vadd.f32 %v12493_v21, %v5934_v52  ;;  %v7108_v63 = vmul.f32 1.050701, %v6980_v40 }
 0x854   : > { %v8629_v20 = vadd.f32 -1.0, %v9757_v7  ;;  %v9759_v22 = vpop.eup %9758  ;;  %v12724_v1 = vadd.f32 %v12496_v34, %v5931_v13  ;;  %v12732_v39 = vadd.f32 %v12498_v53, %v5935_v35  ;;  %v5938_v48 = vmul.f32 %v12481_v25, %v12650_v4 }
 0x855   : > { %v8626_v28 = vadd.f32 -1.0, %v9759_v22  ;;  %9768 = vpow2.f32 %v6518_v17  ;;  %v9761_v14 = vpop.eup %9760  ;;  %v6360_v42 = vmin.f32 %v12714_v2, 0.0  ;;  %v5942_v3 = vmul.f32 %v12483_v16, %v12657_v30 }
 0x856   : > { %v6856_v49 = vmul.f32 1.6732632, %v8629_v20  ;;  %9770 = vpow2.f32 %v6524_v27  ;;  %v8630_v44 = vadd.f32 -1.0, %v9761_v14  ;;  %v6357_v19 = vmin.f32 %v12724_v1, 0.0  ;;  %v9763_v38 = vpop.eup %9762 }
 0x857   : > { %v12694_v0 = vpop.f32.mrb[112].mxu1  ;;  %v12696_v41 = vpop.f32.mrb[48].mxu0  ;;  %v6853_v9 = vmul.f32 1.6732632, %v8626_v28  ;;  %v6532_v12 = vmul.f32 1.442695, %v6360_v42  ;;  %v12750_v22 = vadd.f32 %v12491_v11, %v5938_v48  ;;  %v12762_v13 = vadd.f32 %v12493_v21, %v5942_v3 }
 0x858   : > { %v12706_v62 = vpop.f32.mrb[113].mxu1  ;;  %v12708_v37 = vpop.f32.mrb[49].mxu0  ;;  %v6984_v59 = vsel %vm6216_vm14, %v12577_v33, %v6856_v49  ;;  %v6857_v7 = vmul.f32 1.6732632, %v8630_v44  ;;  %v8633_v15 = vadd.f32 -1.0, %v9763_v38  ;;  %vm6224_vm2 = vcmp.gt.f32.partialorder %v12654_v60, 0.0 }
 0x859   : > { %v12718_v50 = vpop.f32.mrb[114].mxu1  ;;  %v12720_v23 = vpop.f32.mrb[50].mxu0  ;;  %v7112_v57 = vmul.f32 1.050701, %v6984_v59  ;;  %v6981_v26 = vsel %vm6213_vm15, %v12620_v56, %v6853_v9  ;;  %v6526_v20 = vmul.f32 1.442695, %v6357_v19  ;;  %9772 = vpow2.f32 %v6532_v12 }
 0x85a   : > { %v12726_v33 = vpop.f32.mrb[115].mxu1  ;;  %v12728_v24 = vpop.f32.mrb[51].mxu0  ;;  %v7109_v6 = vmul.f32 1.050701, %v6981_v26  ;;  %v6361_v54 = vmin.f32 %v12732_v39, 0.0  ;;  %v6985_v4 = vsel %vm6217_vm0, %v12633_v58, %v6857_v7  ;;  %vm6221_vm3 = vcmp.gt.f32.partialorder %v12677_v10, 0.0 }
 0x85b   : > { %v9765_v32 = vpop.eup %9764  ;;  %v7113_v49 = vmul.f32 1.050701, %v6985_v4  ;;  %v6860_v17 = vmul.f32 1.6732632, %v8633_v15  ;;  %9774 = vpow2.f32 %v6526_v20  ;;  %v6364_v58 = vmin.f32 %v12750_v22, 0.0 }
 0x85c   : > { %v8811_v8 = vpack.c.bf16 %v7109_v6, %v7108_v63  ;;  %v8637_v52 = vadd.f32 -1.0, %v9765_v32  ;;  %v6534_v27 = vmul.f32 1.442695, %v6361_v54  ;;  %v5939_v42 = vmul.f32 %v12486_v61, %v12659_v55 }
 0x85d   : > { %v9767_v14 = vpop.eup %9766  ;;  %v8843_v9 = vpack.c.bf16 %v7113_v49, %v7112_v57  ;;  %v6988_v63 = vsel %vm6220_vm1, %v12637_v31, %v6860_v17  ;;  %vm6225_vm4 = vcmp.gt.f32.partialorder %v12680_v45, 0.0  ;;  %v6540_v6 = vmul.f32 1.442695, %v6364_v58 }
 0x85e   : > { %7410 = vst [vmem:[%s12604_s12 + $0x30] sm:$0xff] %v8811_v8  ;;  %v6864_v44 = vmul.f32 1.6732632, %v8637_v52  ;;  %v8634_v38 = vadd.f32 -1.0, %v9767_v14  ;;  %9776 = vpow2.f32 %v6534_v27  ;;  %vm6228_vm5 = vcmp.gt.f32.partialorder %v12686_v46, 0.0 }
 0x85f   : > { %v12744_v56 = vpop.f32.mrb[116].mxu1  ;;  %v12752_v30 = vpop.f32.mrb[52].mxu0  ;;  %7634 = vst [vmem:[%s12616_s7 + $0x30] sm:$0xff] %v8843_v9  ;;  %v6368_v55 = vmin.f32 %v12762_v13, 0.0  ;;  %v7116_v12 = vmul.f32 1.050701, %v6988_v63  ;;  %9778 = vpow2.f32 %v6540_v6  ;;  %v12785_v32 = vadd.f32 %v12496_v34, %v5939_v42 }
 0x860   : > { %v12754_v40 = vpop.f32.mrb[117].mxu1  ;;  %v12756_v28 = vpop.f32.mrb[53].mxu0  ;;  %v6992_v31 = vsel %vm6224_vm2, %v12654_v60, %v6864_v44  ;;  %v6861_v3 = vmul.f32 1.6732632, %v8634_v38  ;;  %v5943_v8 = vmul.f32 %v12488_v29, %v12663_v5  ;;  %v5946_v27 = vmul.f32 %v12481_v25, %v12665_v36 }
 0x861   : > { %v12764_v59 = vpop.f32.mrb[118].mxu1  ;;  %v12766_v35 = vpop.f32.mrb[54].mxu0  ;;  %v6548_v54 = vmul.f32 1.442695, %v6368_v55  ;;  %v7120_v49 = vmul.f32 1.050701, %v6992_v31  ;;  %v5950_v63 = vmul.f32 %v12483_v16, %v12669_v47 }
 0x862   : > { %v12773_v26 = vpop.f32.mrb[119].mxu1  ;;  %v12775_v19 = vpop.f32.mrb[55].mxu0  ;;  %v6989_v17 = vsel %vm6221_vm3, %v12677_v10, %v6861_v3  ;;  %v6365_v38 = vmin.f32 %v12785_v32, 0.0  ;;  %v12816_v6 = vadd.f32 %v12498_v53, %v5943_v8  ;;  %vm6232_vm6 = vcmp.gt.f32.partialorder %v12714_v2, 0.0 }
 0x863   : > { %v9769_v48 = vpop.eup %9768  ;;  %v7117_v9 = vmul.f32 1.050701, %v6989_v17  ;;  %9780 = vpow2.f32 %v6548_v54  ;;  %v12824_v55 = vadd.f32 %v12491_v11, %v5946_v27  ;;  %vm6229_vm7 = vcmp.gt.f32.partialorder %v12724_v1, 0.0 }
 0x864   : > { %v9771_v7 = vpop.eup %9770  ;;  %v8638_v57 = vadd.f32 -1.0, %v9769_v48  ;;  %v6369_v8 = vmin.f32 %v12816_v6, 0.0  ;;  %vm6233_vm8 = vcmp.gt.f32.partialorder %v12732_v39, 0.0  ;;  %vm6236_vm9 = vcmp.gt.f32.partialorder %v12750_v22, 0.0 }
 0x865   : > { %v8641_v15 = vadd.f32 -1.0, %v9771_v7  ;;  %v9773_v42 = vpop.eup %9772  ;;  %v8813_v31 = vpack.c.bf16 %v7117_v9, %v7116_v12  ;;  %v6372_v17 = vmin.f32 %v12824_v55, 0.0  ;;  %v12832_v9 = vadd.f32 %v12493_v21, %v5950_v63 }
 0x866   : > { %v6865_v20 = vmul.f32 1.6732632, %v8638_v57  ;;  %v9775_v47 = vpop.eup %9774  ;;  %v8645_v57 = vadd.f32 -1.0, %v9773_v42  ;;  %v6550_v42 = vmul.f32 1.442695, %v6369_v8  ;;  %vm6240_vm10 = vcmp.gt.f32.partialorder %v12762_v13, 0.0 }
 0x867   : > { %v12789_v4 = vpop.f32.mrb[120].mxu1  ;;  %v12791_v60 = vpop.f32.mrb[56].mxu0  ;;  %v6868_v52 = vmul.f32 1.6732632, %v8641_v15  ;;  %v6542_v15 = vmul.f32 1.442695, %v6365_v38 }
 0x868   : > { %v12798_v58 = vpop.f32.mrb[121].mxu1  ;;  %v12800_v14 = vpop.f32.mrb[57].mxu0  ;;  %v6993_v5 = vsel %vm6225_vm4, %v12680_v45, %v6865_v20  ;;  %7412 = vst [vmem:[%s12604_s12 + $0x40] sm:$0xff] %v8813_v31  ;;  %v6872_v54 = vmul.f32 1.6732632, %v8645_v57  ;;  %v6376_v63 = vmin.f32 %v12832_v9, 0.0 }
 0x869   : > { %v12807_v44 = vpop.f32.mrb[122].mxu1  ;;  %v12809_v10 = vpop.f32.mrb[58].mxu0  ;;  %v7121_v36 = vmul.f32 1.050701, %v6993_v5  ;;  %v6996_v48 = vsel %vm6228_vm5, %v12686_v46, %v6868_v52  ;;  %v8642_v46 = vadd.f32 -1.0, %v9775_v47  ;;  %9782 = vpow2.f32 %v6542_v15 }
 0x86a   : > { %v12818_v45 = vpop.f32.mrb[123].mxu1  ;;  %v12820_v7 = vpop.f32.mrb[59].mxu0  ;;  %v7124_v20 = vmul.f32 1.050701, %v6996_v48  ;;  %v7000_v27 = vsel %vm6232_vm6, %v12714_v2, %v6872_v54  ;;  %9784 = vpow2.f32 %v6550_v42  ;;  %v6564_v54 = vmul.f32 1.442695, %v6376_v63 }
 0x86b   : > { %v8845_v3 = vpack.c.bf16 %v7121_v36, %v7120_v49  ;;  %v9777_v52 = vpop.eup %9776  ;;  %v6869_v12 = vmul.f32 1.6732632, %v8642_v46  ;;  %v5947_v49 = vmul.f32 %v12486_v61, %v12671_v43  ;;  %v6556_v36 = vmul.f32 1.442695, %v6372_v17 }
 0x86c   : > { %v8646_v5 = vadd.f32 -1.0, %v9777_v52  ;;  %v9779_v38 = vpop.eup %9778  ;;  %v7128_v47 = vmul.f32 1.050701, %v7000_v27  ;;  %vm6237_vm11 = vcmp.gt.f32.partialorder %v12785_v32, 0.0  ;;  %vm6241_vm12 = vcmp.gt.f32.partialorder %v12816_v6, 0.0 }
 0x86d   : > { %7636 = vst [vmem:[%s12616_s7 + $0x40] sm:$0xff] %v8845_v3  ;;  %v6997_v31 = vsel %vm6229_vm7, %v12724_v1, %v6869_v12  ;;  %v8649_v46 = vadd.f32 -1.0, %v9779_v38  ;;  %9786 = vpow2.f32 %v6556_v36  ;;  %v12853_v8 = vadd.f32 %v12496_v34, %v5947_v49  ;;  %v9781_v12 = vpop.eup %9780 }
 0x86e   : > { %v7125_v2 = vmul.f32 1.050701, %v6997_v31  ;;  %v6873_v3 = vmul.f32 1.6732632, %v8646_v5  ;;  %v5951_v1 = vmul.f32 %v12488_v29, %v12682_v18  ;;  %v5954_v36 = vmul.f32 %v12481_v25, %v12694_v0 }
 0x86f   : > { %v12839_v48 = vpop.f32.mrb[124].mxu1  ;;  %v12846_v43 = vpop.f32.mrb[60].mxu0  ;;  %v6876_v42 = vmul.f32 1.6732632, %v8649_v46  ;;  %v8653_v18 = vadd.f32 -1.0, %v9781_v12  ;;  %9788 = vpow2.f32 %v6564_v54  ;;  %v6373_v63 = vmin.f32 %v12853_v8, 0.0 }
 0x870   : > { %v12848_v57 = vpop.f32.mrb[125].mxu1  ;;  %v12850_v15 = vpop.f32.mrb[61].mxu0  ;;  %v8815_v27 = vpack.c.bf16 %v7125_v2, %v7124_v20  ;;  %v7001_v5 = vsel %vm6233_vm8, %v12732_v39, %v6873_v3  ;;  %v12875_v39 = vadd.f32 %v12498_v53, %v5951_v1  ;;  %v12878_v0 = vadd.f32 %v12491_v11, %v5954_v36 }
 0x871   : > { %v12857_v17 = vpop.f32.mrb[126].mxu1  ;;  %v12859_v52 = vpop.f32.mrb[62].mxu0  ;;  %v7129_v31 = vmul.f32 1.050701, %v7001_v5  ;;  %v7004_v20 = vsel %vm6236_vm9, %v12750_v22, %v6876_v42  ;;  %v6880_v3 = vmul.f32 1.6732632, %v8653_v18  ;;  %v5958_v46 = vmul.f32 %v12483_v16, %v12696_v41 }
 0x872   : > { %v12866_v38 = vpop.f32.mrb[127].mxu1  ;;  %v12868_v49 = vpop.f32.mrb[63].mxu0  ;;  %7414 = vst [vmem:[%s12604_s12 + $0x50] sm:$0xff] %v8815_v27  ;;  %v6558_v22 = vmul.f32 1.442695, %v6373_v63  ;;  %v6377_v54 = vmin.f32 %v12875_v39, 0.0  ;;  %v5955_v41 = vmul.f32 %v12486_v61, %v12706_v62 }
 0x873   : > { %v8847_v2 = vpack.c.bf16 %v7129_v31, %v7128_v47  ;;  %v9783_v1 = vpop.eup %9782  ;;  %v7132_v27 = vmul.f32 1.050701, %v7004_v20  ;;  %v6380_v47 = vmin.f32 %v12878_v0, 0.0  ;;  %v12891_v5 = vadd.f32 %v12493_v21, %v5958_v46 }
 0x874   : > { %v7008_v31 = vsel %vm6240_vm10, %v12762_v13, %v6880_v3  ;;  %v8650_v18 = vadd.f32 -1.0, %v9783_v1  ;;  %9790 = vpow2.f32 %v6558_v22  ;;  %v6566_v63 = vmul.f32 1.442695, %v6377_v54 }
 0x875   : > { %7638 = vst [vmem:[%s12616_s7 + $0x50] sm:$0xff] %v8847_v2  ;;  %vm6244_vm13 = vcmp.gt.f32.partialorder %v12824_v55, 0.0  ;;  %v6572_v2 = vmul.f32 1.442695, %v6380_v47  ;;  %v6384_v46 = vmin.f32 %v12891_v5, 0.0  ;;  %v12907_v62 = vadd.f32 %v12496_v34, %v5955_v41 }
 0x876   : > { %v6877_v51 = vmul.f32 1.6732632, %v8650_v18  ;;  %9792 = vpow2.f32 %v6566_v63  ;;  %v5959_v13 = vmul.f32 %v12488_v29, %v12708_v37  ;;  %v5962_v3 = vmul.f32 %v12481_v25, %v12718_v50 }
 0x877   : > { %v12886_v12 = vpop.f32.mrb[128].mxu1  ;;  %v12895_v42 = vpop.f32.mrb[64].mxu0  ;;  %v7136_v47 = vmul.f32 1.050701, %v7008_v31  ;;  %9794 = vpow2.f32 %v6572_v2  ;;  %vm6248_vm14 = vcmp.gt.f32.partialorder %v12832_v9, 0.0  ;;  %vm6245_vm15 = vcmp.gt.f32.partialorder %v12853_v8, 0.0 }
 0x878   : > { %14345 = vst [vmem:[#allocation33_spill] sm:$0xff] %v12886_v12  ;;  %14346 = vst [vmem:[#allocation34_spill] sm:$0xff] %v12895_v42  ;;  %v12897_v36 = vpop.f32.mrb[129].mxu1  ;;  %v12902_v20 = vpop.f32.mrb[65].mxu0  ;;  %v7005_v18 = vsel %vm6237_vm11, %v12785_v32, %v6877_v51  ;;  %v12926_v37 = vadd.f32 %v12498_v53, %v5959_v13  ;;  %vm6249_vm0 = vcmp.gt.f32.partialorder %v12875_v39, 0.0  ;;  %vm6252_vm1 = vcmp.gt.f32.partialorder %v12878_v0, 0.0 }
 0x879   : > { %14347 = vst [vmem:[#allocation38_spill] sm:$0xff] %v12897_v36  ;;  %14348 = vst [vmem:[#allocation35_spill] sm:$0xff] %v12902_v20  ;;  %v12909_v42 = vpop.f32.mrb[130].mxu1  ;;  %v12911_v36 = vpop.f32.mrb[66].mxu0  ;;  %v6580_v20 = vmul.f32 1.442695, %v6384_v46 }
 0x87a   : > { %14349 = vst [vmem:[#allocation36_spill] sm:$0xff] %v12909_v42  ;;  %14350 = vst [vmem:[#allocation41_spill] sm:$0xff] %v12911_v36  ;;  %v9785_v12 = vpop.eup %9784  ;;  %v12917_v22 = vpop.f32.mrb[131].mxu1  ;;  %v6381_v36 = vmin.f32 %v12907_v62, 0.0  ;;  %v7133_v42 = vmul.f32 1.050701, %v7005_v18 }
 0x87b   : > { %14351 = vst [vmem:[#allocation39_spill] sm:$0xff] %v12917_v22  ;;  %v12919_v54 = vpop.f32.mrb[67].mxu0  ;;  %v9787_v1 = vpop.eup %9786  ;;  %v8654_v41 = vadd.f32 -1.0, %v9785_v12  ;;  %9796 = vpow2.f32 %v6580_v20  ;;  %v6385_v46 = vmin.f32 %v12926_v37, 0.0  ;;  %vm6256_vm2 = vcmp.gt.f32.partialorder %v12891_v5, 0.0 }
 0x87c   : > { %14352 = vst [vmem:[#allocation40_spill] sm:$0xff] %v12919_v54  ;;  %v8657_v63 = vadd.f32 -1.0, %v9787_v1  ;;  %v9789_v50 = vpop.eup %9788  ;;  %v12929_v54 = vadd.f32 %v12491_v11, %v5962_v3  ;;  %v6574_v2 = vmul.f32 1.442695, %v6381_v36  ;;  %v8817_v51 = vpack.c.bf16 %v7133_v42, %v7132_v27 }
 0x87d   : > { %v6881_v22 = vmul.f32 1.6732632, %v8654_v41  ;;  %v8661_v31 = vadd.f32 -1.0, %v9789_v50  ;;  %v6582_v42 = vmul.f32 1.442695, %v6385_v46  ;;  %vm6253_vm3 = vcmp.gt.f32.partialorder %v12907_v62, 0.0 }
 0x87e   : > { %v6884_v12 = vmul.f32 1.6732632, %v8657_v63  ;;  %9798 = vpow2.f32 %v6574_v2  ;;  %7416 = vst [vmem:[%s12604_s12 + $0x60] sm:$0xff] %v8817_v51  ;;  %v6388_v36 = vmin.f32 %v12929_v54, 0.0  ;;  %v9791_v63 = vpop.eup %9790  ;;  %v5967_v2 = vmul.f32 %v12488_v29, %v12728_v24 }
 0x87f   : > { %v7009_v32 = vsel %vm6241_vm12, %v12816_v6, %v6881_v22  ;;  %v12937_v13 = vpop.f32.mrb[132].mxu1  ;;  %v12939_v20 = vpop.f32.mrb[68].mxu0  ;;  %v6888_v1 = vmul.f32 1.6732632, %v8661_v31  ;;  %v5966_v22 = vmul.f32 %v12483_v16, %v12720_v23  ;;  %v5963_v31 = vmul.f32 %v12486_v61, %v12726_v33 }
 0x880   : > { %v7137_v3 = vmul.f32 1.050701, %v7009_v32  ;;  %v12942_v41 = vpop.f32.mrb[133].mxu1  ;;  %v12944_v27 = vpop.f32.mrb[69].mxu0  ;;  %v7012_v6 = vsel %vm6244_vm13, %v12824_v55, %v6884_v12  ;;  %v8658_v51 = vadd.f32 -1.0, %v9791_v63  ;;  %9800 = vpow2.f32 %v6582_v42 }
 0x881   : > { %14353 = vst [vmem:[#allocation46_spill] sm:$0xff] %v12944_v27  ;;  %v12953_v18 = vpop.f32.mrb[134].mxu1  ;;  %v12960_v55 = vpop.f32.mrb[70].mxu0  ;;  %v7016_v23 = vsel %vm6248_vm14, %v12832_v9, %v6888_v1  ;;  %v6588_v32 = vmul.f32 1.442695, %v6388_v36  ;;  %v12971_v33 = vadd.f32 %v12493_v21, %v5966_v22  ;;  %v12974_v24 = vadd.f32 %v12496_v34, %v5963_v31 }
 0x882   : > { %14354 = vst [vmem:[#allocation43_spill] sm:$0xff] %v12953_v18  ;;  %v8849_v50 = vpack.c.bf16 %v7137_v3, %v7136_v47  ;;  %14355 = vst [vmem:[#allocation44_spill] sm:$0xff] %v12960_v55  ;;  %v12962_v12 = vpop.f32.mrb[135].mxu1  ;;  %v12967_v47 = vpop.f32.mrb[71].mxu0  ;;  %v7140_v3 = vmul.f32 1.050701, %v7012_v6  ;;  %v5970_v1 = vmul.f32 %v12481_v25, %v12744_v56 }
 0x883   : > { %14356 = vst [vmem:[#allocation45_spill] sm:$0xff] %v12962_v12  ;;  %14357 = vst [vmem:[#allocation48_spill] sm:$0xff] %v12967_v47  ;;  %v9793_v46 = vpop.eup %9792  ;;  %v12977_v12 = vadd.f32 %v12498_v53, %v5967_v2  ;;  %v6885_v18 = vmul.f32 1.6732632, %v8658_v51  ;;  %9802 = vpow2.f32 %v6588_v32  ;;  %v7144_v42 = vmul.f32 1.050701, %v7016_v23 }
 0x884   : > { %7640 = vst [vmem:[%s12616_s7 + $0x60] sm:$0xff] %v8849_v50  ;;  %v9795_v55 = vpop.eup %9794  ;;  %v8662_v9 = vadd.f32 -1.0, %v9793_v46  ;;  %v6392_v6 = vmin.f32 %v12971_v33, 0.0  ;;  %v6389_v2 = vmin.f32 %v12974_v24, 0.0  ;;  %v5974_v51 = vmul.f32 %v12483_v16, %v12752_v30 }
 0x885   : > { %v8665_v36 = vadd.f32 -1.0, %v9795_v55  ;;  %v9797_v63 = vpop.eup %9796  ;;  %v7013_v50 = vsel %vm6245_vm15, %v12853_v8, %v6885_v18  ;;  %v6393_v46 = vmin.f32 %v12977_v12, 0.0  ;;  %v12998_v18 = vadd.f32 %v12491_v11, %v5970_v1 }
 0x886   : > { %v6889_v31 = vmul.f32 1.6732632, %v8662_v9  ;;  %v7141_v55 = vmul.f32 1.050701, %v7013_v50  ;;  %v8669_v32 = vadd.f32 -1.0, %v9797_v63  ;;  %vm6257_vm4 = vcmp.gt.f32.partialorder %v12926_v37, 0.0 }
 0x887   : > { %v12983_v22 = vpop.f32.mrb[136].mxu1  ;;  %v6892_v23 = vmul.f32 1.6732632, %v8665_v36  ;;  %v6596_v47 = vmul.f32 1.442695, %v6392_v6  ;;  %vm6260_vm5 = vcmp.gt.f32.partialorder %v12929_v54, 0.0 }
 0x888   : > { %14358 = vst [vmem:[#allocation51_spill] sm:$0xff] %v12983_v22  ;;  %v12991_v56 = vpop.f32.mrb[137].mxu1  ;;  %v7017_v22 = vsel %vm6249_vm0, %v12875_v39, %v6889_v31  ;;  %v6590_v8 = vmul.f32 1.442695, %v6389_v2  ;;  %v9799_v30 = vpop.eup %9798  ;;  %v8819_v27 = vpack.c.bf16 %v7141_v55, %v7140_v3  ;;  %v6896_v63 = vmul.f32 1.6732632, %v8669_v32 }
 0x889   : > { %14359 = vst [vmem:[#allocation27_spill] sm:$0xff] %v12991_v56  ;;  %v13000_v9 = vpop.f32.mrb[138].mxu1  ;;  %v7145_v56 = vmul.f32 1.050701, %v7017_v22  ;;  %v7020_v36 = vsel %vm6252_vm1, %v12878_v0, %v6892_v23  ;;  %v8666_v39 = vadd.f32 -1.0, %v9799_v30  ;;  %9804 = vpow2.f32 %v6596_v47 }
 0x88a   : > { %v13005_v50 = vpop.f32.mrb[139].mxu1  ;;  %v6598_v6 = vmul.f32 1.442695, %v6393_v46  ;;  %7418 = vst [vmem:[%s12604_s12 + $0x70] sm:$0xff] %v8819_v27  ;;  %v7024_v3 = vsel %vm6256_vm2, %v12891_v5, %v6896_v63  ;;  %9806 = vpow2.f32 %v6590_v8  ;;  %v9801_v22 = vpop.eup %9800  ;;  %v7148_v0 = vmul.f32 1.050701, %v7020_v36 }
 0x88b   : > { %v8851_v1 = vpack.c.bf16 %v7145_v56, %v7144_v42  ;;  %v6893_v31 = vmul.f32 1.6732632, %v8666_v39  ;;  %v6396_v2 = vmin.f32 %v12998_v18, 0.0  ;;  %v8670_v55 = vadd.f32 -1.0, %v9801_v22 }
 0x88c   : > { %9808 = vpow2.f32 %v6598_v6  ;;  %v13016_v47 = vadd.f32 %v12493_v21, %v5974_v51  ;;  %v5971_v27 = vmul.f32 %v12486_v61, %v12754_v40  ;;  %v5975_v5 = vmul.f32 %v12488_v29, %v12756_v28 }
 0x88d   : > { %7642 = vst [vmem:[%s12616_s7 + $0x70] sm:$0xff] %v8851_v1  ;;  %v9803_v56 = vpop.eup %9802  ;;  %v7152_v23 = vmul.f32 1.050701, %v7024_v3  ;;  %v7021_v32 = vsel %vm6253_vm3, %v12907_v62, %v6893_v31  ;;  %v6604_v46 = vmul.f32 1.442695, %v6396_v2  ;;  %v5978_v8 = vmul.f32 %v12481_v25, %v12764_v59 }
 0x88e   : > { %v7149_v30 = vmul.f32 1.050701, %v7021_v32  ;;  %v6897_v36 = vmul.f32 1.6732632, %v8670_v55  ;;  %v8673_v40 = vadd.f32 -1.0, %v9803_v56  ;;  %v5982_v28 = vmul.f32 %v12483_v16, %v12766_v35 }
 0x88f   : > { %v13022_v42 = vpop.f32.mrb[140].mxu1  ;;  %9810 = vpow2.f32 %v6604_v46  ;;  %v6400_v63 = vmin.f32 %v13016_v47, 0.0  ;;  %v13035_v39 = vadd.f32 %v12496_v34, %v5971_v27  ;;  %v13038_v62 = vadd.f32 %v12498_v53, %v5975_v5 }
 0x890   : > { %v13029_v51 = vpop.f32.mrb[141].mxu1  ;;  %v8821_v59 = vpack.c.bf16 %v7149_v30, %v7148_v0  ;;  %v7025_v1 = vsel %vm6257_vm4, %v12926_v37, %v6897_v36  ;;  %v6900_v3 = vmul.f32 1.6732632, %v8673_v40  ;;  %v13046_v22 = vadd.f32 %v12491_v11, %v5978_v8 }
 0x891   : > { %v13040_v6 = vpop.f32.mrb[142].mxu1  ;;  %v7153_v31 = vmul.f32 1.050701, %v7025_v1  ;;  %v6612_v2 = vmul.f32 1.442695, %v6400_v63  ;;  %v6397_v55 = vmin.f32 %v13035_v39, 0.0  ;;  %v13060_v36 = vadd.f32 %v12493_v21, %v5982_v28 }
 0x892   : > { %v13048_v35 = vpop.f32.mrb[143].mxu1  ;;  %7420 = vst [vmem:[%s12604_s12 + $0x80] sm:$0xff] %v8821_v59  ;;  %vm6264_vm6 = vcmp.gt.f32.partialorder %v12971_v33, 0.0  ;;  %vm6261_vm7 = vcmp.gt.f32.partialorder %v12974_v24, 0.0  ;;  %vm6265_vm8 = vcmp.gt.f32.partialorder %v12977_v12, 0.0  ;;  %v6401_v37 = vmin.f32 %v13038_v62, 0.0 }
 0x893   : > { %v9805_v0 = vpop.eup %9804  ;;  %v8853_v27 = vpack.c.bf16 %v7153_v31, %v7152_v23  ;;  %v7028_v5 = vsel %vm6260_vm5, %v12929_v54, %v6900_v3  ;;  %9812 = vpow2.f32 %v6612_v2  ;;  %v6606_v56 = vmul.f32 1.442695, %v6397_v55 }
 0x894   : > { %v9807_v32 = vpop.eup %9806  ;;  %v8677_v46 = vadd.f32 -1.0, %v9805_v0  ;;  %v6614_v8 = vmul.f32 1.442695, %v6401_v37  ;;  %v6404_v30 = vmin.f32 %v13046_v22, 0.0  ;;  %v5979_v23 = vmul.f32 %v12486_v61, %v12773_v26 }
 0x895   : > { %7644 = vst [vmem:[%s12616_s7 + $0x80] sm:$0xff] %v8853_v27  ;;  %v8674_v59 = vadd.f32 -1.0, %v9807_v32  ;;  %9814 = vpow2.f32 %v6606_v56  ;;  %v5983_v54 = vmul.f32 %v12488_v29, %v12775_v19  ;;  %v7156_v55 = vmul.f32 1.050701, %v7028_v5 }
 0x896   : > { %v9809_v63 = vpop.eup %9808  ;;  %v6904_v3 = vmul.f32 1.6732632, %v8677_v46  ;;  %9816 = vpow2.f32 %v6614_v8  ;;  %v6620_v2 = vmul.f32 1.442695, %v6404_v30  ;;  %v6408_v0 = vmin.f32 %v13060_v36, 0.0 }
 0x897   : > { %v13062_v40 = vpop.f32.mrb[144].mxu1  ;;  %v8678_v31 = vadd.f32 -1.0, %v9809_v63  ;;  %v6901_v37 = vmul.f32 1.6732632, %v8674_v59  ;;  %v13075_v27 = vadd.f32 %v12496_v34, %v5979_v23  ;;  %v13083_v32 = vadd.f32 %v12498_v53, %v5983_v54 }
 0x898   : > { %v13069_v1 = vpop.f32.mrb[145].mxu1  ;;  %v7032_v26 = vsel %vm6264_vm6, %v12971_v33, %v6904_v3  ;;  %9818 = vpow2.f32 %v6620_v2  ;;  %vm6268_vm9 = vcmp.gt.f32.partialorder %v12998_v18, 0.0  ;;  %v6628_v30 = vmul.f32 1.442695, %v6408_v0 }
 0x899   : > { %v13071_v28 = vpop.f32.mrb[146].mxu1  ;;  %v6905_v19 = vmul.f32 1.6732632, %v8678_v31  ;;  %v9811_v46 = vpop.eup %9810  ;;  %v7160_v8 = vmul.f32 1.050701, %v7032_v26  ;;  %v7029_v5 = vsel %vm6261_vm7, %v12974_v24, %v6901_v37  ;;  %v6405_v23 = vmin.f32 %v13075_v27, 0.0 }
 0x89a   : > { %v13077_v56 = vpop.f32.mrb[147].mxu1  ;;  %v7157_v63 = vmul.f32 1.050701, %v7029_v5  ;;  %v8681_v33 = vadd.f32 -1.0, %v9811_v46  ;;  %vm6272_vm10 = vcmp.gt.f32.partialorder %v13016_v47, 0.0  ;;  %9820 = vpow2.f32 %v6628_v30 }
 0x89b   : > { %v7033_v59 = vsel %vm6265_vm8, %v12977_v12, %v6905_v19  ;;  %v6409_v3 = vmin.f32 %v13083_v32, 0.0  ;;  %v6622_v2 = vmul.f32 1.442695, %v6405_v23  ;;  %v5986_v37 = vmul.f32 %v12481_v25, %v12789_v4 }
 0x89c   : > { %v7161_v54 = vmul.f32 1.050701, %v7033_v59  ;;  %v8823_v31 = vpack.c.bf16 %v7157_v63, %v7156_v55  ;;  %v6908_v24 = vmul.f32 1.6732632, %v8681_v33  ;;  %v5990_v46 = vmul.f32 %v12483_v16, %v12791_v60 }
 0x89d   : > { %v9813_v12 = vpop.eup %9812  ;;  %v6630_v19 = vmul.f32 1.442695, %v6409_v3  ;;  %v5987_v5 = vmul.f32 %v12486_v61, %v12798_v58  ;;  %9822 = vpow2.f32 %v6622_v2  ;;  %v13110_v4 = vadd.f32 %v12491_v11, %v5986_v37 }
 0x89e   : > { %v8855_v26 = vpack.c.bf16 %v7161_v54, %v7160_v8  ;;  %7422 = vst [vmem:[%s12604_s12 + $0x90] sm:$0xff] %v8823_v31  ;;  %v7036_v55 = vsel %vm6268_vm9, %v12998_v18, %v6908_v24  ;;  %v8685_v63 = vadd.f32 -1.0, %v9813_v12  ;;  %vm6269_vm11 = vcmp.gt.f32.partialorder %v13035_v39, 0.0 }
 0x89f   : > { %v13097_v0 = vpop.f32.mrb[148].mxu1  ;;  %v9815_v59 = vpop.eup %9814  ;;  %9824 = vpow2.f32 %v6630_v19  ;;  %v13117_v60 = vadd.f32 %v12493_v21, %v5990_v46  ;;  %v13120_v58 = vadd.f32 %v12496_v34, %v5987_v5  ;;  %vm6273_vm12 = vcmp.gt.f32.partialorder %v13038_v62, 0.0 }
 0x8a0   : > { %v13103_v30 = vpop.f32.mrb[149].mxu1  ;;  %7646 = vst [vmem:[%s12616_s7 + $0x90] sm:$0xff] %v8855_v26  ;;  %v9817_v18 = vpop.eup %9816  ;;  %v6912_v23 = vmul.f32 1.6732632, %v8685_v63  ;;  %v8682_v54 = vadd.f32 -1.0, %v9815_v59  ;;  %v6412_v3 = vmin.f32 %v13110_v4, 0.0 }
 0x8a1   : > { %14360 = vst [vmem:[#allocation49_spill] sm:$0xff] %v13103_v30  ;;  %v13112_v8 = vpop.f32.mrb[150].mxu1  ;;  %v7164_v31 = vmul.f32 1.050701, %v7036_v55  ;;  %v8686_v24 = vadd.f32 -1.0, %v9817_v18  ;;  %vm6276_vm13 = vcmp.gt.f32.partialorder %v13046_v22, 0.0  ;;  %v5991_v55 = vmul.f32 %v12488_v29, %v12800_v14 }
 0x8a2   : > { %14361 = vst [vmem:[#allocation47_spill] sm:$0xff] %v13112_v8  ;;  %v13122_v33 = vpop.f32.mrb[151].mxu1  ;;  %v6416_v2 = vmin.f32 %v13117_v60, 0.0  ;;  %v9819_v37 = vpop.eup %9818  ;;  %v7040_v12 = vsel %vm6272_vm10, %v13016_v47, %v6912_v23  ;;  %v6909_v26 = vmul.f32 1.6732632, %v8682_v54  ;;  %v6413_v46 = vmin.f32 %v13120_v58, 0.0 }
 0x8a3   : > { %14362 = vst [vmem:[#allocation50_spill] sm:$0xff] %v13122_v33  ;;  %v6636_v19 = vmul.f32 1.442695, %v6412_v3  ;;  %v7168_v5 = vmul.f32 1.050701, %v7040_v12  ;;  %v8689_v59 = vadd.f32 -1.0, %v9819_v37 }
 0x8a4   : > { %v6913_v63 = vmul.f32 1.6732632, %v8686_v24  ;;  %v7037_v18 = vsel %vm6269_vm11, %v13035_v39, %v6909_v26  ;;  %v6644_v33 = vmul.f32 1.442695, %v6416_v2  ;;  %v6638_v8 = vmul.f32 1.442695, %v6413_v46  ;;  %v9821_v47 = vpop.eup %9820 }
 0x8a5   : > { %9826 = vpow2.f32 %v6636_v19  ;;  %v7165_v23 = vmul.f32 1.050701, %v7037_v18  ;;  %v6916_v3 = vmul.f32 1.6732632, %v8689_v59  ;;  %v13143_v24 = vadd.f32 %v12498_v53, %v5991_v55 }
 0x8a6   : > { %v7041_v54 = vsel %vm6273_vm12, %v13038_v62, %v6913_v63  ;;  %v8693_v39 = vadd.f32 -1.0, %v9821_v47  ;;  %9828 = vpow2.f32 %v6644_v33  ;;  %v5994_v2 = vmul.f32 %v12481_v25, %v12807_v44 }
 0x8a7   : > { %v13137_v30 = vpop.f32.mrb[152].mxu1  ;;  %v7169_v37 = vmul.f32 1.050701, %v7041_v54  ;;  %v8825_v26 = vpack.c.bf16 %v7165_v23, %v7164_v31  ;;  %vm6280_vm14 = vcmp.gt.f32.partialorder %v13060_v36, 0.0  ;;  %vm6277_vm15 = vcmp.gt.f32.partialorder %v13075_v27, 0.0  ;;  %v9823_v19 = vpop.eup %9822 }
 0x8a8   : > { %v13145_v14 = vpop.f32.mrb[153].mxu1  ;;  %9830 = vpow2.f32 %v6638_v8  ;;  %v7044_v33 = vsel %vm6276_vm13, %v13046_v22, %v6916_v3  ;;  %v6920_v63 = vmul.f32 1.6732632, %v8693_v39  ;;  %v6417_v44 = vmin.f32 %v13143_v24, 0.0 }
 0x8a9   : > { %v13149_v12 = vpop.f32.mrb[154].mxu1  ;;  %v8857_v46 = vpack.c.bf16 %v7169_v37, %v7168_v5  ;;  %v9825_v59 = vpop.eup %9824  ;;  %7424 = vst [vmem:[%s12604_s12 + $0xa0] sm:$0xff] %v8825_v26  ;;  %v8690_v31 = vadd.f32 -1.0, %v9823_v19  ;;  %v13161_v55 = vadd.f32 %v12491_v11, %v5994_v2  ;;  %v5998_v8 = vmul.f32 %v12483_v16, %v12809_v10 }
 0x8aa   : > { %v13153_v62 = vpop.f32.mrb[155].mxu1  ;;  %v5995_v18 = vmul.f32 %v12486_v61, %v12818_v45  ;;  %v7048_v22 = vsel %vm6280_vm14, %v13060_v36, %v6920_v63  ;;  %v8694_v5 = vadd.f32 -1.0, %v9825_v59  ;;  %v6646_v47 = vmul.f32 1.442695, %v6417_v44 }
 0x8ab   : > { %7648 = vst [vmem:[%s12616_s7 + $0xa0] sm:$0xff] %v8857_v46  ;;  %v5999_v23 = vmul.f32 %v12488_v29, %v12820_v7  ;;  %v7172_v54 = vmul.f32 1.050701, %v7044_v33  ;;  %v6917_v3 = vmul.f32 1.6732632, %v8690_v31  ;;  %vm6281_vm0 = vcmp.gt.f32.partialorder %v13083_v32, 0.0 }
 0x8ac   : > { %v6420_v37 = vmin.f32 %v13161_v55, 0.0  ;;  %v6921_v10 = vmul.f32 1.6732632, %v8694_v5  ;;  %9832 = vpow2.f32 %v6646_v47  ;;  %v13176_v45 = vadd.f32 %v12493_v21, %v5998_v8 }
 0x8ad   : > { %v13179_v39 = vadd.f32 %v12496_v34, %v5995_v18  ;;  %v7176_v2 = vmul.f32 1.050701, %v7048_v22  ;;  %v7045_v7 = vsel %vm6277_vm15, %v13075_v27, %v6917_v3  ;;  %v13187_v19 = vadd.f32 %v12498_v53, %v5999_v23 }
 0x8ae   : > { %v6652_v26 = vmul.f32 1.442695, %v6420_v37  ;;  %v7173_v63 = vmul.f32 1.050701, %v7045_v7  ;;  %v7049_v44 = vsel %vm6281_vm0, %v13083_v32, %v6921_v10  ;;  %v6424_v59 = vmin.f32 %v13176_v45, 0.0 }
 0x8af   : > { %v13181_v36 = vpop.f32.mrb[156].mxu1  ;;  %v9827_v33 = vpop.eup %9826  ;;  %v6002_v31 = vmul.f32 %v12481_v25, %v12839_v48  ;;  %v7177_v18 = vmul.f32 1.050701, %v7049_v44  ;;  %vm6284_vm1 = vcmp.gt.f32.partialorder %v13110_v4, 0.0  ;;  %vm6288_vm2 = vcmp.gt.f32.partialorder %v13117_v60, 0.0 }
 0x8b0   : > { %v13189_v46 = vpop.f32.mrb[157].mxu1  ;;  %v8697_v27 = vadd.f32 -1.0, %v9827_v33  ;;  %9834 = vpow2.f32 %v6652_v26  ;;  %v9829_v5 = vpop.eup %9828  ;;  %v8827_v47 = vpack.c.bf16 %v7173_v63, %v7172_v54  ;;  %v6660_v32 = vmul.f32 1.442695, %v6424_v59 }
 0x8b1   : > { %v13195_v8 = vpop.f32.mrb[158].mxu1  ;;  %v6421_v23 = vmin.f32 %v13179_v39, 0.0  ;;  %v8859_v48 = vpack.c.bf16 %v7177_v18, %v7176_v2  ;;  %v8701_v10 = vadd.f32 -1.0, %v9829_v5  ;;  %v6425_v7 = vmin.f32 %v13187_v19, 0.0 }
 0x8b2   : > { %v13198_v22 = vpop.f32.mrb[159].mxu1  ;;  %v9831_v3 = vpop.eup %9830  ;;  %v6924_v37 = vmul.f32 1.6732632, %v8697_v27  ;;  %7426 = vst [vmem:[%s12604_s12 + $0xb0] sm:$0xff] %v8827_v47  ;;  %9836 = vpow2.f32 %v6660_v32  ;;  %v13205_v33 = vadd.f32 %v12491_v11, %v6002_v31  ;;  %v6006_v2 = vmul.f32 %v12483_v16, %v12846_v43 }
 0x8b3   : > { %v8698_v44 = vadd.f32 -1.0, %v9831_v3  ;;  %v6654_v26 = vmul.f32 1.442695, %v6421_v23  ;;  %7650 = vst [vmem:[%s12616_s7 + $0xb0] sm:$0xff] %v8859_v48  ;;  %v6928_v63 = vmul.f32 1.6732632, %v8701_v10  ;;  %v6003_v3 = vmul.f32 %v12486_v61, %v12848_v57 }
 0x8b4   : > { %v7052_v54 = vsel %vm6284_vm1, %v13110_v4, %v6924_v37  ;;  %v6662_v59 = vmul.f32 1.442695, %v6425_v7  ;;  %vm6285_vm3 = vcmp.gt.f32.partialorder %v13120_v58, 0.0  ;;  %vm6289_vm4 = vcmp.gt.f32.partialorder %v13143_v24, 0.0 }
 0x8b5   : > { %v6925_v18 = vmul.f32 1.6732632, %v8698_v44  ;;  %9838 = vpow2.f32 %v6654_v26  ;;  %v7180_v31 = vmul.f32 1.050701, %v7052_v54  ;;  %v6428_v5 = vmin.f32 %v13205_v33, 0.0 }
 0x8b6   : > { %9840 = vpow2.f32 %v6662_v59  ;;  %v13219_v47 = vadd.f32 %v12493_v21, %v6006_v2  ;;  %v9833_v32 = vpop.eup %9832  ;;  %v7056_v43 = vsel %vm6288_vm2, %v13117_v60, %v6928_v63  ;;  %v6007_v48 = vmul.f32 %v12488_v29, %v12850_v15 }
 0x8b7   : > { %v13215_v27 = vpop.f32.mrb[160].mxu1  ;;  %v7053_v23 = vsel %vm6285_vm3, %v13120_v58, %v6925_v18  ;;  %v8702_v7 = vadd.f32 -1.0, %v9833_v32  ;;  %vm6292_vm5 = vcmp.gt.f32.partialorder %v13161_v55, 0.0  ;;  %v6668_v44 = vmul.f32 1.442695, %v6428_v5 }
 0x8b8   : > { %v13221_v4 = vpop.f32.mrb[161].mxu1  ;;  %v7181_v10 = vmul.f32 1.050701, %v7053_v23  ;;  %vm6296_vm6 = vcmp.gt.f32.partialorder %v13176_v45, 0.0  ;;  %v6432_v60 = vmin.f32 %v13219_v47, 0.0  ;;  %v13237_v58 = vadd.f32 %v12496_v34, %v6003_v3 }
 0x8b9   : > { %v13231_v37 = vpop.f32.mrb[162].mxu1  ;;  %v13240_v57 = vadd.f32 %v12498_v53, %v6007_v48  ;;  %v6010_v15 = vmul.f32 %v12481_v25, %v12857_v17  ;;  %v7184_v63 = vmul.f32 1.050701, %v7056_v43  ;;  %v6929_v2 = vmul.f32 1.6732632, %v8702_v7 }
 0x8ba   : > { %v13244_v26 = vpop.f32.mrb[163].mxu1  ;;  %v9835_v54 = vpop.eup %9834  ;;  %v8829_v59 = vpack.c.bf16 %v7181_v10, %v7180_v31  ;;  %9842 = vpow2.f32 %v6668_v44  ;;  %v6676_v5 = vmul.f32 1.442695, %v6432_v60  ;;  %v6429_v32 = vmin.f32 %v13237_v58, 0.0 }
 0x8bb   : > { %v8705_v18 = vadd.f32 -1.0, %v9835_v54  ;;  %v6014_v23 = vmul.f32 %v12483_v16, %v12859_v52  ;;  %v7057_v3 = vsel %vm6289_vm4, %v13143_v24, %v6929_v2  ;;  %vm6293_vm7 = vcmp.gt.f32.partialorder %v13179_v39, 0.0 }
 0x8bc   : > { %7428 = vst [vmem:[%s12604_s12 + $0xc0] sm:$0xff] %v8829_v59  ;;  %v6433_v25 = vmin.f32 %v13240_v57, 0.0  ;;  %v13256_v17 = vadd.f32 %v12491_v11, %v6010_v15  ;;  %v9837_v31 = vpop.eup %9836  ;;  %v7185_v43 = vmul.f32 1.050701, %v7057_v3  ;;  %9844 = vpow2.f32 %v6676_v5 }
 0x8bd   : > { %v6932_v48 = vmul.f32 1.6732632, %v8705_v18  ;;  %v6670_v10 = vmul.f32 1.442695, %v6429_v32  ;;  %v8709_v7 = vadd.f32 -1.0, %v9837_v31  ;;  %vm6297_vm8 = vcmp.gt.f32.partialorder %v13187_v19, 0.0 }
 0x8be   : > { %v6678_v16 = vmul.f32 1.442695, %v6433_v25  ;;  %v6436_v52 = vmin.f32 %v13256_v17, 0.0  ;;  %v8861_v60 = vpack.c.bf16 %v7185_v43, %v7184_v63  ;;  %v13266_v15 = vadd.f32 %v12493_v21, %v6014_v23 }
 0x8bf   : > { %v13260_v24 = vpop.f32.mrb[164].mxu1  ;;  %v9839_v44 = vpop.eup %9838  ;;  %v7060_v11 = vsel %vm6292_vm5, %v13161_v55, %v6932_v48  ;;  %9846 = vpow2.f32 %v6670_v10  ;;  %v6936_v2 = vmul.f32 1.6732632, %v8709_v7  ;;  %vm6300_vm9 = vcmp.gt.f32.partialorder %v13205_v33, 0.0 }
 0x8c0   : > { %v13268_v54 = vpop.f32.mrb[165].mxu1  ;;  %v9841_v59 = vpop.eup %9840  ;;  %v8706_v18 = vadd.f32 -1.0, %v9839_v44  ;;  %9848 = vpow2.f32 %v6678_v16  ;;  %7652 = vst [vmem:[%s12616_s7 + $0xc0] sm:$0xff] %v8861_v60  ;;  %v7188_v5 = vmul.f32 1.050701, %v7060_v11  ;;  %v6440_v3 = vmin.f32 %v13266_v15, 0.0 }
 0x8c1   : > { %14363 = vst [vmem:[#allocation26_spill] sm:$0xff] %v13268_v54  ;;  %v8710_v32 = vadd.f32 -1.0, %v9841_v59  ;;  %v6684_v63 = vmul.f32 1.442695, %v6436_v52  ;;  %v7064_v55 = vsel %vm6296_vm6, %v13176_v45, %v6936_v2  ;;  %v6011_v23 = vmul.f32 %v12486_v61, %v12866_v38  ;;  %v13280_v31 = vpop.f32.mrb[166].mxu1 }
 0x8c2   : > { %v6933_v21 = vmul.f32 1.6732632, %v8706_v18  ;;  %v6015_v25 = vmul.f32 %v12488_v29, %v12868_v49  ;;  %14364 = vst [vmem:[#allocation29_spill] sm:$0xff] %v13280_v31  ;;  %v7192_v43 = vmul.f32 1.050701, %v7064_v55  ;;  %vm6304_vm10 = vcmp.gt.f32.partialorder %v13219_v47, 0.0 }
 0x8c3   : > { %v6937_v48 = vmul.f32 1.6732632, %v8710_v32  ;;  %9850 = vpow2.f32 %v6684_v63  ;;  %v6692_v10 = vmul.f32 1.442695, %v6440_v3  ;;  %v13287_v16 = vadd.f32 %v12496_v34, %v6011_v23  ;;  %v14365_v29 = vld [vmem:[#allocation23_spill] sm:$0xff]  ;;  %v13293_v49 = vpop.f32.mrb[167].mxu1 }
 0x8c4   : > { %v9843_v7 = vpop.eup %9842  ;;  %v7061_v45 = vsel %vm6293_vm7, %v13179_v39, %v6933_v21  ;;  %v13290_v61 = vadd.f32 %v12498_v53, %v6015_v25  ;;  %v5860_v38 = vsub.s32 2, %v14365_v29  ;;  %14366 = vst [vmem:[#allocation28_spill] sm:$0xff] %v13293_v49  ;;  %vm6301_vm11 = vcmp.gt.f32.partialorder %v13237_v58, 0.0  ;;  %v9987_v55 = vld [vmem:[%s14342_s4] sm:$0xff] }
 0x8c5   : > { %v7189_v52 = vmul.f32 1.050701, %v7061_v45  ;;  %v7065_v44 = vsel %vm6297_vm8, %v13187_v19, %v6937_v48  ;;  %v8713_v60 = vadd.f32 -1.0, %v9843_v7  ;;  %9852 = vpow2.f32 %v6692_v10  ;;  %v9986_v19 = vld [vmem:[%s14341_s21] sm:$0xff]  ;;  %v14367_v48 = vld [vmem:[#allocation33_spill] sm:$0xff] }
 0x8c6   : > { %v7193_v11 = vmul.f32 1.050701, %v7065_v44  ;;  %vm6305_vm12 = vcmp.gt.f32.partialorder %v13240_v57, 0.0  ;;  %v6437_v34 = vmin.f32 %v13287_v16, 0.0  ;;  %v9845_v53 = vpop.eup %9844  ;;  %v6441_v2 = vmin.f32 %v13290_v61, 0.0 }
 0x8c7   : > { %v8831_v39 = vpack.c.bf16 %v7189_v52, %v7188_v5  ;;  %v6940_v59 = vmul.f32 1.6732632, %v8713_v60  ;;  %v13305_v18 = vrot.slane %v9986_v19, %v5860_v38  ;;  %v8717_v63 = vadd.f32 -1.0, %v9845_v53  ;;  %v13319_v7 = vpop.f32.mrb[168].mxu1 }
 0x8c8   : > { %v8863_v32 = vpack.c.bf16 %v7193_v11, %v7192_v43  ;;  %v6686_v3 = vmul.f32 1.442695, %v6437_v34  ;;  %v13310_v21 = vrot.slane %v9987_v55, %v5860_v38  ;;  %v6694_v25 = vmul.f32 1.442695, %v6441_v2  ;;  %14368 = vst [vmem:[#allocation30_spill] sm:$0xff] %v13319_v7  ;;  %v13322_v60 = vpop.f32.mrb[169].mxu1 }
 0x8c9   : > { %v9847_v5 = vpop.eup %9846  ;;  %7430 = vst [vmem:[%s12604_s12 + $0xd0] sm:$0xff] %v8831_v39  ;;  %v7068_v23 = vsel %vm6300_vm9, %v13205_v33, %v6940_v59  ;;  %v5892_v10 = vmul.f32 %v13305_v18, %v14367_v48  ;;  %v5876_v43 = vsub.s32 6, %v14365_v29  ;;  %v6944_v44 = vmul.f32 1.6732632, %v8717_v63  ;;  %14369 = vst [vmem:[#allocation31_spill] sm:$0xff] %v13322_v60  ;;  %v13329_v53 = vpop.f32.mrb[170].mxu1 }
 0x8ca   : > { %v9849_v45 = vpop.eup %9848  ;;  %7654 = vst [vmem:[%s12616_s7 + $0xd0] sm:$0xff] %v8863_v32  ;;  %v7196_v52 = vmul.f32 1.050701, %v7068_v23  ;;  %v8714_v38 = vadd.f32 -1.0, %v9847_v5  ;;  %9854 = vpow2.f32 %v6686_v3  ;;  %14370 = vst [vmem:[#allocation32_spill] sm:$0xff] %v13329_v53  ;;  %v5864_v32 = vsub.s32 3, %v14365_v29 }
 0x8cb   : > { %v8718_v11 = vadd.f32 -1.0, %v9849_v45  ;;  %9856 = vpow2.f32 %v6694_v25  ;;  %v13325_v33 = vadd.f32 %v13310_v21, %v5892_v10  ;;  %v13327_v34 = vrot.slane %v9986_v19, %v5876_v43  ;;  %v13337_v63 = vpop.f32.mrb[171].mxu1 }
 0x8cc   : > { %v7072_v39 = vsel %vm6304_vm10, %v13219_v47, %v6944_v44  ;;  %v6941_v59 = vmul.f32 1.6732632, %v8714_v38  ;;  %v13334_v2 = vrot.slane %v9987_v55, %v5876_v43  ;;  %14371 = vst [vmem:[#allocation37_spill] sm:$0xff] %v13337_v63  ;;  %vm6308_vm13 = vcmp.gt.f32.partialorder %v13256_v17, 0.0  ;;  %v14372_v47 = vld [vmem:[#allocation34_spill] sm:$0xff] }
 0x8cd   : > { %v9851_v3 = vpop.eup %9850  ;;  %v7200_v5 = vmul.f32 1.050701, %v7072_v39  ;;  %v6945_v23 = vmul.f32 1.6732632, %v8718_v11  ;;  %v6318_v25 = vmin.f32 %v13325_v33, 0.0  ;;  %v5896_v43 = vmul.f32 %v13327_v34, %v14372_v47  ;;  %v14373_v47 = vld [vmem:[#allocation38_spill] sm:$0xff] }
 0x8ce   : > { %v7069_v48 = vsel %vm6301_vm11, %v13237_v58, %v6941_v59  ;;  %v8721_v10 = vadd.f32 -1.0, %v9851_v3  ;;  %v13346_v45 = vrot.slane %v9986_v19, %v5864_v32  ;;  %v13351_v63 = vrot.slane %v9987_v55, %v5864_v32 }
 0x8cf   : > { %v9853_v44 = vpop.eup %9852  ;;  %v7197_v38 = vmul.f32 1.050701, %v7069_v48  ;;  %v7073_v11 = vsel %vm6305_vm12, %v13240_v57, %v6945_v23  ;;  %v6448_v39 = vmul.f32 1.442695, %v6318_v25  ;;  %v13354_v59 = vadd.f32 %v13334_v2, %v5896_v43 }
 0x8d0   : > { %v7201_v53 = vmul.f32 1.050701, %v7073_v11  ;;  %v6948_v60 = vmul.f32 1.6732632, %v8721_v10  ;;  %v8725_v58 = vadd.f32 -1.0, %v9853_v44  ;;  %v5893_v7 = vmul.f32 %v13346_v45, %v14373_v47 }
 0x8d1   : > { %v8833_v3 = vpack.c.bf16 %v7197_v38, %v7196_v52  ;;  %9858 = vpow2.f32 %v6448_v39  ;;  %v5880_v48 = vsub.s32 7, %v14365_v29  ;;  %vm6312_vm14 = vcmp.gt.f32.partialorder %v13266_v15, 0.0 }
 0x8d2   : > { %v8865_v49 = vpack.c.bf16 %v7201_v53, %v7200_v5  ;;  %v7076_v57 = vsel %vm6308_vm13, %v13256_v17, %v6948_v60  ;;  %v6952_v32 = vmul.f32 1.6732632, %v8725_v58  ;;  %v6322_v23 = vmin.f32 %v13354_v59, 0.0  ;;  %v14374_v53 = vld [vmem:[#allocation36_spill] sm:$0xff]  ;;  %v14375_v60 = vld [vmem:[#allocation41_spill] sm:$0xff] }
 0x8d3   : > { %7432 = vst [vmem:[%s12604_s12 + $0xe0] sm:$0xff] %v8833_v3  ;;  %v13366_v25 = vadd.f32 %v13351_v63, %v5893_v7  ;;  %v13368_v52 = vrot.slane %v9986_v19, %v5880_v48  ;;  %vm6309_vm15 = vcmp.gt.f32.partialorder %v13287_v16, 0.0  ;;  %v13372_v29 = vrot.slane %v9987_v55, %v5880_v48  ;;  %v13385_v3 = vpop.f32.mrb[172].mxu1 }
 0x8d4   : > { %v9855_v10 = vpop.eup %9854  ;;  %7656 = vst [vmem:[%s12616_s7 + $0xe0] sm:$0xff] %v8865_v49  ;;  %v5900_v17 = vmul.f32 %v13305_v18, %v14374_v53  ;;  %v5904_v5 = vmul.f32 %v13327_v34, %v14375_v60  ;;  %v7204_v44 = vmul.f32 1.050701, %v7076_v57  ;;  %v7080_v38 = vsel %vm6312_vm14, %v13266_v15, %v6952_v32  ;;  %v14376_v49 = vld [vmem:[#allocation35_spill] sm:$0xff]  ;;  %14377 = vst [vmem:[#allocation42_spill] sm:$0xff] %v13385_v3  ;;  %v13392_v32 = vpop.f32.mrb[173].mxu1 }
 0x8d5   : > { %v9857_v43 = vpop.eup %9856  ;;  %v8722_v7 = vadd.f32 -1.0, %v9855_v10  ;;  %v6456_v11 = vmul.f32 1.442695, %v6322_v23  ;;  %v6319_v39 = vmin.f32 %v13366_v25, 0.0  ;;  %v5897_v58 = vmul.f32 %v13368_v52, %v14376_v49  ;;  %v14378_v57 = vld [vmem:[#allocation39_spill] sm:$0xff]  ;;  %14379 = vst [vmem:[#allocation24_spill] sm:$0xff] %v13392_v32 }
 0x8d6   : > { %v8726_v19 = vadd.f32 -1.0, %v9857_v43  ;;  %v13383_v55 = vadd.f32 %v13310_v21, %v5900_v17  ;;  %v13388_v48 = vadd.f32 %v13334_v2, %v5904_v5  ;;  %v5901_v15 = vmul.f32 %v13346_v45, %v14378_v57  ;;  %v13398_v17 = vpop.f32.mrb[174].mxu1  ;;  %v14382_v3 = vld [vmem:[#allocation40_spill] sm:$0xff] }
 0x8d7   : > { %v6949_v47 = vmul.f32 1.6732632, %v8722_v7  ;;  %9860 = vpow2.f32 %v6456_v11  ;;  %vm6313_vm0 = vcmp.gt.f32.partialorder %v13290_v61, 0.0  ;;  %v6450_v10 = vmul.f32 1.442695, %v6319_v39  ;;  %14380 = vst [vmem:[#allocation25_spill] sm:$0xff] %v13398_v17 }
 0x8d8   : > { %v6953_v23 = vmul.f32 1.6732632, %v8726_v19  ;;  %v13396_v53 = vadd.f32 %v13372_v29, %v5897_v58  ;;  %v7208_v60 = vmul.f32 1.050701, %v7080_v38  ;;  %v6326_v43 = vmin.f32 %v13383_v55, 0.0  ;;  %v13405_v11 = vpop.f32.mrb[175].mxu1 }
 0x8d9   : > { %v7077_v5 = vsel %vm6309_vm15, %v13287_v16, %v6949_v47  ;;  %v6330_v7 = vmin.f32 %v13388_v48, 0.0  ;;  %14381 = vst [vmem:[#allocation23_spill] sm:$0xff] %v13405_v11  ;;  %9862 = vpow2.f32 %v6450_v10  ;;  %v13410_v17 = vadd.f32 %v13351_v63, %v5901_v15 }
 0x8da   : > { %v7205_v49 = vmul.f32 1.050701, %v7077_v5  ;;  %v7081_v19 = vsel %vm6313_vm0, %v13290_v61, %v6953_v23  ;;  %v6323_v57 = vmin.f32 %v13396_v53, 0.0  ;;  %v6464_v38 = vmul.f32 1.442695, %v6326_v43  ;;  %v13419_v43 = vpop.f32.mrb[176].mxu1 }
 0x8db   : > { %v9859_v39 = vpop.eup %9858  ;;  %v7209_v58 = vmul.f32 1.050701, %v7081_v19  ;;  %v6472_v32 = vmul.f32 1.442695, %v6330_v7  ;;  %v5905_v11 = vmul.f32 %v13368_v52, %v14382_v3  ;;  %v6327_v23 = vmin.f32 %v13410_v17, 0.0  ;;  %14383 = vst [vmem:[#allocation33_spill] sm:$0xff] %v13419_v43 }
 0x8dc   : > { %v8835_v16 = vpack.c.bf16 %v7205_v49, %v7204_v44  ;;  %v8603_v47 = vadd.f32 -1.0, %v9859_v39  ;;  %v6458_v5 = vmul.f32 1.442695, %v6323_v57  ;;  %9864 = vpow2.f32 %v6464_v38  ;;  %v14387_v57 = vld [vmem:[#allocation46_spill] sm:$0xff] }
 0x8dd   : > { %v8867_v31 = vpack.c.bf16 %v7209_v58, %v7208_v60  ;;  %9866 = vpow2.f32 %v6472_v32  ;;  %v13417_v10 = vadd.f32 %v13372_v29, %v5905_v11  ;;  %v5908_v44 = vmul.f32 %v13305_v18, %v12937_v13  ;;  %v13428_v60 = vpop.f32.mrb[177].mxu1 }
 0x8de   : > { %7434 = vst [vmem:[%s12604_s12 + $0xf0] sm:$0xff] %v8835_v16  ;;  %v6830_v61 = vmul.f32 1.6732632, %v8603_v47  ;;  %9868 = vpow2.f32 %v6458_v5  ;;  %v5912_v3 = vmul.f32 %v13327_v34, %v12939_v20  ;;  %v5909_v15 = vmul.f32 %v13346_v45, %v12942_v41  ;;  %14384 = vst [vmem:[#allocation34_spill] sm:$0xff] %v13428_v60 }
 0x8df   : > { %7658 = vst [vmem:[%s12616_s7 + $0xf0] sm:$0xff] %v8867_v31  ;;  %vm6190_vm1 = vcmp.gt.f32.partialorder %v13325_v33, 0.0  ;;  %vm6194_vm2 = vcmp.gt.f32.partialorder %v13354_v59, 0.0  ;;  %v6466_v32 = vmul.f32 1.442695, %v6327_v23  ;;  %v6331_v7 = vmin.f32 %v13417_v10, 0.0 }
 0x8e0   : > { %v13433_v31 = vpop.f32.mrb[178].mxu1  ;;  %v6958_v13 = vsel %vm6190_vm1, %v13325_v33, %v6830_v61  ;;  %v13437_v49 = vadd.f32 %v13310_v21, %v5908_v44  ;;  %v13440_v20 = vadd.f32 %v13334_v2, %v5912_v3  ;;  %v13443_v41 = vadd.f32 %v13351_v63, %v5909_v15 }
 0x8e1   : > { %14385 = vst [vmem:[#allocation38_spill] sm:$0xff] %v13433_v31  ;;  %v9861_v11 = vpop.eup %9860  ;;  %v13445_v19 = vpop.f32.mrb[179].mxu1  ;;  %9870 = vpow2.f32 %v6466_v32  ;;  %v6474_v58 = vmul.f32 1.442695, %v6331_v7  ;;  %v5913_v38 = vmul.f32 %v13368_v52, %v14387_v57  ;;  %vm6191_vm3 = vcmp.gt.f32.partialorder %v13366_v25, 0.0  ;;  %v14388_v57 = vld [vmem:[#allocation43_spill] sm:$0xff] }
 0x8e2   : > { %14386 = vst [vmem:[#allocation36_spill] sm:$0xff] %v13445_v19  ;;  %v8607_v39 = vadd.f32 -1.0, %v9861_v11  ;;  %vm6198_vm4 = vcmp.gt.f32.partialorder %v13383_v55, 0.0  ;;  %v6334_v33 = vmin.f32 %v13437_v49, 0.0  ;;  %v6338_v16 = vmin.f32 %v13440_v20, 0.0 }
 0x8e3   : > { %v9863_v47 = vpop.eup %9862  ;;  %v7086_v5 = vmul.f32 1.050701, %v6958_v13  ;;  %vm6202_vm5 = vcmp.gt.f32.partialorder %v13388_v48, 0.0  ;;  %9872 = vpow2.f32 %v6474_v58  ;;  %v6335_v23 = vmin.f32 %v13443_v41, 0.0 }
 0x8e4   : > { %v6834_v61 = vmul.f32 1.6732632, %v8607_v39  ;;  %v8604_v44 = vadd.f32 -1.0, %v9863_v47  ;;  %v6480_v3 = vmul.f32 1.442695, %v6334_v33  ;;  %v13456_v32 = vadd.f32 %v13372_v29, %v5913_v38  ;;  %v14389_v39 = vld [vmem:[#allocation44_spill] sm:$0xff] }
 0x8e5   : > { %v6488_v15 = vmul.f32 1.442695, %v6338_v16  ;;  %v6482_v11 = vmul.f32 1.442695, %v6335_v23  ;;  %v5916_v13 = vmul.f32 %v13305_v18, %v14388_v57  ;;  %v5920_v19 = vmul.f32 %v13327_v34, %v14389_v39  ;;  %v13466_v33 = vpop.f32.mrb[180].mxu1 }
 0x8e6   : > { %v6962_v7 = vsel %vm6194_vm2, %v13354_v59, %v6834_v61  ;;  %v9865_v58 = vpop.eup %9864  ;;  %v6831_v60 = vmul.f32 1.6732632, %v8604_v44  ;;  %vm6195_vm6 = vcmp.gt.f32.partialorder %v13396_v53, 0.0  ;;  %9874 = vpow2.f32 %v6480_v3  ;;  %14390 = vst [vmem:[#allocation41_spill] sm:$0xff] %v13466_v33  ;;  %v13472_v61 = vpop.f32.mrb[181].mxu1 }
 0x8e7   : > { %v7090_v31 = vmul.f32 1.050701, %v6962_v7  ;;  %v9867_v38 = vpop.eup %9866  ;;  %v8611_v16 = vadd.f32 -1.0, %v9865_v58  ;;  %9876 = vpow2.f32 %v6488_v15  ;;  %v6339_v59 = vmin.f32 %v13456_v32, 0.0  ;;  %14391 = vst [vmem:[#allocation35_spill] sm:$0xff] %v13472_v61 }
 0x8e8   : > { %v13470_v47 = vadd.f32 %v13310_v21, %v5916_v13  ;;  %v9869_v23 = vpop.eup %9868  ;;  %v6959_v44 = vsel %vm6191_vm3, %v13366_v25, %v6831_v60  ;;  %v8615_v7 = vadd.f32 -1.0, %v9867_v38  ;;  %9878 = vpow2.f32 %v6482_v11  ;;  %v13487_v11 = vpop.f32.mrb[182].mxu1 }
 0x8e9   : > { %v13478_v3 = vadd.f32 %v13334_v2, %v5920_v19  ;;  %v7087_v57 = vmul.f32 1.050701, %v6959_v44  ;;  %v8608_v39 = vadd.f32 -1.0, %v9869_v23  ;;  %v6838_v15 = vmul.f32 1.6732632, %v8611_v16  ;;  %14392 = vst [vmem:[#allocation39_spill] sm:$0xff] %v13487_v11 }
 0x8ea   : > { %vm6199_vm7 = vcmp.gt.f32.partialorder %v13410_v17, 0.0  ;;  %v6842_v58 = vmul.f32 1.6732632, %v8615_v7  ;;  %vm6203_vm8 = vcmp.gt.f32.partialorder %v13417_v10, 0.0  ;;  %v6490_v13 = vmul.f32 1.442695, %v6339_v59 }
 0x8eb   : > { %v6342_v61 = vmin.f32 %v13470_v47, 0.0  ;;  %v9871_v33 = vpop.eup %9870  ;;  %v8806_v43 = vpack.c.bf16 %v7087_v57, %v7086_v5  ;;  %v6835_v25 = vmul.f32 1.6732632, %v8608_v39  ;;  %v6966_v60 = vsel %vm6198_vm4, %v13383_v55, %v6838_v15  ;;  %v13492_v59 = vpop.f32.mrb[183].mxu1  ;;  %v14393_v11 = vld [vmem:[#allocation45_spill] sm:$0xff] }
 0x8ec   : > { %v6346_v19 = vmin.f32 %v13478_v3, 0.0  ;;  %v7094_v38 = vmul.f32 1.050701, %v6966_v60  ;;  %v6970_v16 = vsel %vm6202_vm5, %v13388_v48, %v6842_v58  ;;  %v8612_v23 = vadd.f32 -1.0, %v9871_v33  ;;  %v14394_v48 = vld [vmem:[#allocation48_spill] sm:$0xff]  ;;  %v14395_v58 = vld [vmem:[#allocation51_spill] sm:$0xff] }
 0x8ed   : > { %9880 = vpow2.f32 %v6490_v13  ;;  %v9873_v44 = vpop.eup %9872  ;;  %7405 = vst [vmem:[%s12604_s12 + $0x8] sm:$0xff] %v8806_v43  ;;  %v6963_v5 = vsel %vm6195_vm6, %v13396_v53, %v6835_v25  ;;  %v7098_v55 = vmul.f32 1.050701, %v6970_v16  ;;  %v6496_v7 = vmul.f32 1.442695, %v6342_v61  ;;  %v14396_v13 = vld [vmem:[#allocation27_spill] sm:$0xff] }
 0x8ee   : > { %v6504_v57 = vmul.f32 1.442695, %v6346_v19  ;;  %v7091_v39 = vmul.f32 1.050701, %v6963_v5  ;;  %v6839_v15 = vmul.f32 1.6732632, %v8612_v23  ;;  %v5917_v54 = vmul.f32 %v13346_v45, %v14393_v11 }
 0x8ef   : > { %v8616_v60 = vadd.f32 -1.0, %v9873_v44  ;;  %9882 = vpow2.f32 %v6496_v7  ;;  %v5921_v33 = vmul.f32 %v13368_v52, %v14394_v48  ;;  %v5924_v43 = vmul.f32 %v13305_v18, %v14395_v58 }
 0x8f0   : > { %v5925_v53 = vmul.f32 %v13346_v45, %v14396_v13  ;;  %v9875_v25 = vpop.eup %9874  ;;  %v8838_v61 = vpack.c.bf16 %v7091_v39, %v7090_v31  ;;  %v6967_v19 = vsel %vm6199_vm7, %v13410_v17, %v6839_v15  ;;  %9884 = vpow2.f32 %v6504_v57 }
 0x8f1   : > { %v6843_v16 = vmul.f32 1.6732632, %v8616_v60  ;;  %v9877_v11 = vpop.eup %9876  ;;  %v7095_v23 = vmul.f32 1.050701, %v6967_v19  ;;  %v8619_v44 = vadd.f32 -1.0, %v9875_v25  ;;  %v13510_v5 = vadd.f32 %v13351_v63, %v5917_v54 }
 0x8f2   : > { %v13513_v7 = vadd.f32 %v13372_v29, %v5921_v33  ;;  %v9879_v48 = vpop.eup %9878  ;;  %7629 = vst [vmem:[%s12616_s7 + $0x8] sm:$0xff] %v8838_v61  ;;  %vm6206_vm9 = vcmp.gt.f32.partialorder %v13437_v49, 0.0  ;;  %vm6210_vm10 = vcmp.gt.f32.partialorder %v13440_v20, 0.0  ;;  %v8623_v17 = vadd.f32 -1.0, %v9877_v11 }
 0x8f3   : > { %v6971_v31 = vsel %vm6203_vm8, %v13417_v10, %v6843_v16  ;;  %v8808_v57 = vpack.c.bf16 %v7095_v23, %v7094_v38  ;;  %v6846_v15 = vmul.f32 1.6732632, %v8619_v44  ;;  %v8620_v54 = vadd.f32 -1.0, %v9879_v48 }
 0x8f4   : > { %v7099_v39 = vmul.f32 1.050701, %v6971_v31  ;;  %v6850_v60 = vmul.f32 1.6732632, %v8623_v17  ;;  %v6343_v33 = vmin.f32 %v13510_v5, 0.0  ;;  %v13523_v58 = vadd.f32 %v13310_v21, %v5924_v43 }
 0x8f5   : > { %v13526_v13 = vadd.f32 %v13351_v63, %v5925_v53  ;;  %7407 = vst [vmem:[%s12604_s12 + $0x18] sm:$0xff] %v8808_v57  ;;  %v6974_v25 = vsel %vm6206_vm9, %v13437_v49, %v6846_v15  ;;  %v6847_v61 = vmul.f32 1.6732632, %v8620_v54  ;;  %v6347_v38 = vmin.f32 %v13513_v7, 0.0 }
 0x8f6   : > { %v8840_v10 = vpack.c.bf16 %v7099_v39, %v7098_v55  ;;  %v7102_v16 = vmul.f32 1.050701, %v6974_v25  ;;  %v6978_v11 = vsel %vm6210_vm10, %v13440_v20, %v6850_v60  ;;  %vm6207_vm11 = vcmp.gt.f32.partialorder %v13443_v41, 0.0 }
 0x8f7   : > { %v9881_v19 = vpop.eup %9880  ;;  %v6498_v43 = vmul.f32 1.442695, %v6343_v33  ;;  %v6975_v53 = vsel %vm6207_vm11, %v13443_v41, %v6847_v61  ;;  %vm6211_vm12 = vcmp.gt.f32.partialorder %v13456_v32, 0.0  ;;  %v6506_v23 = vmul.f32 1.442695, %v6347_v38 }
 0x8f8   : > { %7631 = vst [vmem:[%s12616_s7 + $0x18] sm:$0xff] %v8840_v10  ;;  %v8624_v55 = vadd.f32 -1.0, %v9881_v19  ;;  %v7106_v49 = vmul.f32 1.050701, %v6978_v11  ;;  %v7103_v44 = vmul.f32 1.050701, %v6975_v53  ;;  %v5932_v57 = vmul.f32 %v13305_v18, %v13000_v9 }
 0x8f9   : > { %9886 = vpow2.f32 %v6498_v43  ;;  %v6350_v48 = vmin.f32 %v13523_v58, 0.0  ;;  %v9883_v31 = vpop.eup %9882  ;;  %v6351_v20 = vmin.f32 %v13526_v13, 0.0  ;;  %v5933_v60 = vmul.f32 %v13346_v45, %v13005_v50 }
 0x8fa   : > { %v6851_v17 = vmul.f32 1.6732632, %v8624_v55  ;;  %9888 = vpow2.f32 %v6506_v23  ;;  %v9885_v39 = vpop.eup %9884  ;;  %v8810_v41 = vpack.c.bf16 %v7103_v44, %v7102_v16  ;;  %v8627_v15 = vadd.f32 -1.0, %v9883_v31 }
 0x8fb   : > { %v6512_v54 = vmul.f32 1.442695, %v6350_v48  ;;  %v8631_v10 = vadd.f32 -1.0, %v9885_v39  ;;  %v6514_v25 = vmul.f32 1.442695, %v6351_v20  ;;  %v13548_v61 = vadd.f32 %v13310_v21, %v5932_v57 }
 0x8fc   : > { %v6979_v33 = vsel %vm6211_vm12, %v13456_v32, %v6851_v17  ;;  %7409 = vst [vmem:[%s12604_s12 + $0x28] sm:$0xff] %v8810_v41  ;;  %v6854_v9 = vmul.f32 1.6732632, %v8627_v15  ;;  %v13552_v19 = vadd.f32 %v13351_v63, %v5933_v60  ;;  %vm6214_vm13 = vcmp.gt.f32.partialorder %v13470_v47, 0.0 }
 0x8fd   : > { %v7107_v38 = vmul.f32 1.050701, %v6979_v33  ;;  %9890 = vpow2.f32 %v6512_v54  ;;  %v6858_v16 = vmul.f32 1.6732632, %v8631_v10  ;;  %v6358_v50 = vmin.f32 %v13548_v61, 0.0 }
 0x8fe   : > { %9892 = vpow2.f32 %v6514_v25  ;;  %vm6218_vm14 = vcmp.gt.f32.partialorder %v13478_v3, 0.0  ;;  %v6359_v32 = vmin.f32 %v13552_v19, 0.0  ;;  %vm6215_vm15 = vcmp.gt.f32.partialorder %v13510_v5, 0.0 }
 0x8ff   : > { %v8842_v11 = vpack.c.bf16 %v7107_v38, %v7106_v49  ;;  %vm6219_vm0 = vcmp.gt.f32.partialorder %v13513_v7, 0.0  ;;  %v6528_v43 = vmul.f32 1.442695, %v6358_v50  ;;  %v5940_v53 = vmul.f32 %v13305_v18, %v13022_v42 }
 0x900   : > { %v6982_v55 = vsel %vm6214_vm13, %v13470_v47, %v6854_v9  ;;  %v6530_v23 = vmul.f32 1.442695, %v6359_v32  ;;  %v5941_v49 = vmul.f32 %v13346_v45, %v13029_v51  ;;  %v5948_v44 = vmul.f32 %v13305_v18, %v13040_v6 }
 0x901   : > { %7633 = vst [vmem:[%s12616_s7 + $0x28] sm:$0xff] %v8842_v11  ;;  %v6986_v48 = vsel %vm6218_vm14, %v13478_v3, %v6858_v16  ;;  %9894 = vpow2.f32 %v6528_v43  ;;  %v13570_v31 = vadd.f32 %v13310_v21, %v5940_v53  ;;  %v5949_v17 = vmul.f32 %v13346_v45, %v13048_v35 }
 0x902   : > { %vm6222_vm1 = vcmp.gt.f32.partialorder %v13523_v58, 0.0  ;;  %9896 = vpow2.f32 %v6530_v23  ;;  %v13576_v47 = vadd.f32 %v13351_v63, %v5941_v49  ;;  %v13579_v51 = vadd.f32 %v13310_v21, %v5948_v44 }
 0x903   : > { %v9887_v42 = vpop.eup %9886  ;;  %v5956_v6 = vmul.f32 %v13305_v18, %v13062_v40  ;;  %vm6223_vm2 = vcmp.gt.f32.partialorder %v13526_v13, 0.0  ;;  %v6366_v57 = vmin.f32 %v13570_v31, 0.0  ;;  %v13586_v35 = vadd.f32 %v13351_v63, %v5949_v17 }
 0x904   : > { %v9889_v3 = vpop.eup %9888  ;;  %v8628_v20 = vadd.f32 -1.0, %v9887_v42  ;;  %v7110_v39 = vmul.f32 1.050701, %v6982_v55  ;;  %v7114_v41 = vmul.f32 1.050701, %v6986_v48  ;;  %v6367_v54 = vmin.f32 %v13576_v47, 0.0 }
 0x905   : > { %v8632_v15 = vadd.f32 -1.0, %v9889_v3  ;;  %v6544_v33 = vmul.f32 1.442695, %v6366_v57  ;;  %v6374_v10 = vmin.f32 %v13579_v51, 0.0  ;;  %v5957_v40 = vmul.f32 %v13346_v45, %v13069_v1 }
 0x906   : > { %v6855_v60 = vmul.f32 1.6732632, %v8628_v20  ;;  %v6546_v9 = vmul.f32 1.442695, %v6367_v54  ;;  %v6375_v16 = vmin.f32 %v13586_v35, 0.0  ;;  %v13594_v50 = vadd.f32 %v13310_v21, %v5956_v6 }
 0x907   : > { %v9891_v25 = vpop.eup %9890  ;;  %v6859_v38 = vmul.f32 1.6732632, %v8632_v15  ;;  %vm6230_vm3 = vcmp.gt.f32.partialorder %v13548_v61, 0.0  ;;  %9898 = vpow2.f32 %v6544_v33  ;;  %v6560_v53 = vmul.f32 1.442695, %v6374_v10 }
 0x908   : > { %v9893_v11 = vpop.eup %9892  ;;  %v6983_v32 = vsel %vm6215_vm15, %v13510_v5, %v6855_v60  ;;  %v8635_v43 = vadd.f32 -1.0, %v9891_v25  ;;  %9900 = vpow2.f32 %v6546_v9  ;;  %v6562_v48 = vmul.f32 1.442695, %v6375_v16 }
 0x909   : > { %v7111_v55 = vmul.f32 1.050701, %v6983_v32  ;;  %v6987_v1 = vsel %vm6219_vm0, %v13513_v7, %v6859_v38  ;;  %v8636_v23 = vadd.f32 -1.0, %v9893_v11  ;;  %9902 = vpow2.f32 %v6560_v53 }
 0x90a   : > { %v7115_v49 = vmul.f32 1.050701, %v6987_v1  ;;  %v6862_v44 = vmul.f32 1.6732632, %v8635_v43  ;;  %vm6231_vm4 = vcmp.gt.f32.partialorder %v13552_v19, 0.0  ;;  %v6382_v42 = vmin.f32 %v13594_v50, 0.0 }
 0x90b   : > { %v8812_v17 = vpack.c.bf16 %v7111_v55, %v7110_v39  ;;  %v6863_v5 = vmul.f32 1.6732632, %v8636_v23  ;;  %v9895_v6 = vpop.eup %9894  ;;  %9904 = vpow2.f32 %v6562_v48  ;;  %v13609_v20 = vadd.f32 %v13351_v63, %v5957_v40 }
 0x90c   : > { %v8844_v3 = vpack.c.bf16 %v7115_v49, %v7114_v41  ;;  %v6990_v7 = vsel %vm6222_vm1, %v13523_v58, %v6862_v44  ;;  %v9897_v57 = vpop.eup %9896  ;;  %v8643_v54 = vadd.f32 -1.0, %v9895_v6  ;;  %v6576_v60 = vmul.f32 1.442695, %v6382_v42 }
 0x90d   : > { %7411 = vst [vmem:[%s12604_s12 + $0x38] sm:$0xff] %v8812_v17  ;;  %v7118_v15 = vmul.f32 1.050701, %v6990_v7  ;;  %v6991_v39 = vsel %vm6223_vm2, %v13526_v13, %v6863_v5  ;;  %v8644_v41 = vadd.f32 -1.0, %v9897_v57  ;;  %vm6238_vm5 = vcmp.gt.f32.partialorder %v13570_v31, 0.0 }
 0x90e   : > { %7635 = vst [vmem:[%s12616_s7 + $0x38] sm:$0xff] %v8844_v3  ;;  %v7119_v33 = vmul.f32 1.050701, %v6991_v39  ;;  %v6383_v58 = vmin.f32 %v13609_v20, 0.0  ;;  %v6870_v10 = vmul.f32 1.6732632, %v8643_v54  ;;  %9906 = vpow2.f32 %v6576_v60 }
 0x90f   : > { %v5964_v40 = vmul.f32 %v13305_v18, %v13071_v28  ;;  %v5965_v25 = vmul.f32 %v13346_v45, %v13077_v56  ;;  %v6871_v13 = vmul.f32 1.6732632, %v8644_v41  ;;  %v5972_v16 = vmul.f32 %v13305_v18, %v13097_v0  ;;  %v14397_v28 = vld [vmem:[#allocation49_spill] sm:$0xff] }
 0x910   : > { %v8814_v38 = vpack.c.bf16 %v7119_v33, %v7118_v15  ;;  %v6578_v9 = vmul.f32 1.442695, %v6383_v58  ;;  %v6998_v11 = vsel %vm6230_vm3, %v13548_v61, %v6870_v10  ;;  %v5973_v53 = vmul.f32 %v13346_v45, %v14397_v28 }
 0x911   : > { %v13628_v32 = vadd.f32 %v13310_v21, %v5964_v40  ;;  %v13631_v43 = vadd.f32 %v13351_v63, %v5965_v25  ;;  %v9899_v56 = vpop.eup %9898  ;;  %v7126_v55 = vmul.f32 1.050701, %v6998_v11  ;;  %v6999_v0 = vsel %vm6231_vm4, %v13552_v19, %v6871_v13 }
 0x912   : > { %7413 = vst [vmem:[%s12604_s12 + $0x48] sm:$0xff] %v8814_v38  ;;  %9908 = vpow2.f32 %v6578_v9  ;;  %v13640_v1 = vadd.f32 %v13310_v21, %v5972_v16  ;;  %v9901_v61 = vpop.eup %9900  ;;  %v7127_v23 = vmul.f32 1.050701, %v6999_v0  ;;  %v8651_v49 = vadd.f32 -1.0, %v9899_v56 }
 0x913   : > { %vm6239_vm6 = vcmp.gt.f32.partialorder %v13576_v47, 0.0  ;;  %v6390_v44 = vmin.f32 %v13628_v32, 0.0  ;;  %v9903_v48 = vpop.eup %9902  ;;  %v8652_v17 = vadd.f32 -1.0, %v9901_v61  ;;  %vm6246_vm7 = vcmp.gt.f32.partialorder %v13579_v51, 0.0 }
 0x914   : > { %vm6247_vm8 = vcmp.gt.f32.partialorder %v13586_v35, 0.0  ;;  %v6391_v19 = vmin.f32 %v13631_v43, 0.0  ;;  %v8816_v5 = vpack.c.bf16 %v7127_v23, %v7126_v55  ;;  %v6878_v42 = vmul.f32 1.6732632, %v8651_v49  ;;  %v14399_v55 = vld [vmem:[#allocation50_spill] sm:$0xff] }
 0x915   : > { %v8659_v6 = vadd.f32 -1.0, %v9903_v48  ;;  %v6592_v3 = vmul.f32 1.442695, %v6390_v44  ;;  %v9905_v7 = vpop.eup %9904  ;;  %v6879_v57 = vmul.f32 1.6732632, %v8652_v17  ;;  %v6398_v39 = vmin.f32 %v13640_v1, 0.0 }
 0x916   : > { %v6594_v15 = vmul.f32 1.442695, %v6391_v19  ;;  %v13649_v54 = vadd.f32 %v13351_v63, %v5973_v53  ;;  %7415 = vst [vmem:[%s12604_s12 + $0x58] sm:$0xff] %v8816_v5  ;;  %v7006_v60 = vsel %vm6238_vm5, %v13570_v31, %v6878_v42  ;;  %v8660_v41 = vadd.f32 -1.0, %v9905_v7  ;;  %v14398_v53 = vld [vmem:[#allocation47_spill] sm:$0xff] }
 0x917   : > { %v6886_v33 = vmul.f32 1.6732632, %v8659_v6  ;;  %9910 = vpow2.f32 %v6592_v3  ;;  %v7134_v58 = vmul.f32 1.050701, %v7006_v60  ;;  %v7007_v10 = vsel %vm6239_vm6, %v13576_v47, %v6879_v57 }
 0x918   : > { %9912 = vpow2.f32 %v6594_v15  ;;  %v6608_v40 = vmul.f32 1.442695, %v6398_v39  ;;  %v9907_v25 = vpop.eup %9906  ;;  %v7135_v38 = vmul.f32 1.050701, %v7007_v10  ;;  %v6887_v9 = vmul.f32 1.6732632, %v8660_v41 }
 0x919   : > { %v7014_v13 = vsel %vm6246_vm7, %v13579_v51, %v6886_v33  ;;  %vm6254_vm9 = vcmp.gt.f32.partialorder %v13594_v50, 0.0  ;;  %v8667_v16 = vadd.f32 -1.0, %v9907_v25  ;;  %v6399_v11 = vmin.f32 %v13649_v54, 0.0 }
 0x91a   : > { %v7142_v31 = vmul.f32 1.050701, %v7014_v13  ;;  %9914 = vpow2.f32 %v6608_v40  ;;  %v8818_v28 = vpack.c.bf16 %v7135_v38, %v7134_v58  ;;  %v7015_v47 = vsel %vm6247_vm8, %v13586_v35, %v6887_v9 }
 0x91b   : > { %v5980_v56 = vmul.f32 %v13305_v18, %v14398_v53  ;;  %v5981_v51 = vmul.f32 %v13346_v45, %v14399_v55  ;;  %v7143_v61 = vmul.f32 1.050701, %v7015_v47  ;;  %v6894_v23 = vmul.f32 1.6732632, %v8667_v16 }
 0x91c   : > { %v9909_v0 = vpop.eup %9908  ;;  %v6610_v49 = vmul.f32 1.442695, %v6399_v11  ;;  %v5988_v44 = vmul.f32 %v13305_v18, %v13137_v30  ;;  %7417 = vst [vmem:[%s12604_s12 + $0x68] sm:$0xff] %v8818_v28  ;;  %v5989_v19 = vmul.f32 %v13346_v45, %v13145_v14  ;;  %vm6255_vm10 = vcmp.gt.f32.partialorder %v13609_v20, 0.0 }
 0x91d   : > { %v8668_v48 = vadd.f32 -1.0, %v9909_v0  ;;  %v13674_v17 = vadd.f32 %v13310_v21, %v5980_v56  ;;  %v13677_v35 = vadd.f32 %v13351_v63, %v5981_v51  ;;  %v8820_v5 = vpack.c.bf16 %v7143_v61, %v7142_v31 }
 0x91e   : > { %v7022_v42 = vsel %vm6254_vm9, %v13594_v50, %v6894_v23  ;;  %9916 = vpow2.f32 %v6610_v49  ;;  %v13685_v6 = vadd.f32 %v13310_v21, %v5988_v44  ;;  %vm6262_vm11 = vcmp.gt.f32.partialorder %v13628_v32, 0.0 }
 0x91f   : > { %v6895_v30 = vmul.f32 1.6732632, %v8668_v48  ;;  %v6406_v3 = vmin.f32 %v13674_v17, 0.0  ;;  %7419 = vst [vmem:[%s12604_s12 + $0x78] sm:$0xff] %v8820_v5  ;;  %v7150_v7 = vmul.f32 1.050701, %v7022_v42  ;;  %v13695_v60 = vadd.f32 %v13351_v63, %v5989_v19 }
 0x920   : > { %v6407_v14 = vmin.f32 %v13677_v35, 0.0  ;;  %v6414_v57 = vmin.f32 %v13685_v6, 0.0  ;;  %v5996_v33 = vmul.f32 %v13305_v18, %v13149_v12  ;;  %v5997_v25 = vmul.f32 %v13346_v45, %v13153_v62 }
 0x921   : > { %v9911_v15 = vpop.eup %9910  ;;  %v7023_v50 = vsel %vm6255_vm10, %v13609_v20, %v6895_v30  ;;  %v6624_v39 = vmul.f32 1.442695, %v6406_v3  ;;  %vm6263_vm12 = vcmp.gt.f32.partialorder %v13631_v43, 0.0  ;;  %v6415_v16 = vmin.f32 %v13695_v60, 0.0 }
 0x922   : > { %v9913_v41 = vpop.eup %9912  ;;  %v7151_v58 = vmul.f32 1.050701, %v7023_v50  ;;  %v8675_v10 = vadd.f32 -1.0, %v9911_v15  ;;  %v6626_v40 = vmul.f32 1.442695, %v6407_v14  ;;  %v13704_v28 = vadd.f32 %v13310_v21, %v5996_v33 }
 0x923   : > { %v8676_v38 = vadd.f32 -1.0, %v9913_v41  ;;  %9918 = vpow2.f32 %v6624_v39  ;;  %v6640_v20 = vmul.f32 1.442695, %v6414_v57  ;;  %v6642_v47 = vmul.f32 1.442695, %v6415_v16 }
 0x924   : > { %v9915_v13 = vpop.eup %9914  ;;  %v8822_v9 = vpack.c.bf16 %v7151_v58, %v7150_v7  ;;  %v6902_v31 = vmul.f32 1.6732632, %v8675_v10  ;;  %9920 = vpow2.f32 %v6626_v40  ;;  %v13711_v53 = vadd.f32 %v13351_v63, %v5997_v25 }
 0x925   : > { %v6903_v12 = vmul.f32 1.6732632, %v8676_v38  ;;  %v8683_v11 = vadd.f32 -1.0, %v9915_v13  ;;  %9922 = vpow2.f32 %v6640_v20  ;;  %v6004_v56 = vmul.f32 %v13305_v18, %v13181_v36 }
 0x926   : > { %7421 = vst [vmem:[%s12604_s12 + $0x88] sm:$0xff] %v8822_v9  ;;  %v7030_v62 = vsel %vm6262_vm11, %v13628_v32, %v6902_v31  ;;  %vm6270_vm13 = vcmp.gt.f32.partialorder %v13640_v1, 0.0  ;;  %vm6271_vm14 = vcmp.gt.f32.partialorder %v13649_v54, 0.0  ;;  %9924 = vpow2.f32 %v6642_v47 }
 0x927   : > { %v7158_v55 = vmul.f32 1.050701, %v7030_v62  ;;  %v7031_v51 = vsel %vm6263_vm12, %v13631_v43, %v6903_v12  ;;  %v6910_v0 = vmul.f32 1.6732632, %v8683_v11  ;;  %v6422_v32 = vmin.f32 %v13704_v28, 0.0 }
 0x928   : > { %v9917_v61 = vpop.eup %9916  ;;  %v7159_v23 = vmul.f32 1.050701, %v7031_v51  ;;  %v6423_v36 = vmin.f32 %v13711_v53, 0.0  ;;  %v13724_v48 = vadd.f32 %v13310_v21, %v6004_v56  ;;  %v6005_v42 = vmul.f32 %v13346_v45, %v13189_v46 }
 0x929   : > { %v7038_v49 = vsel %vm6270_vm13, %v13640_v1, %v6910_v0  ;;  %v8684_v44 = vadd.f32 -1.0, %v9917_v61  ;;  %v6656_v5 = vmul.f32 1.442695, %v6422_v32  ;;  %vm6278_vm15 = vcmp.gt.f32.partialorder %v13674_v17, 0.0 }
 0x92a   : > { %v8824_v43 = vpack.c.bf16 %v7159_v23, %v7158_v55  ;;  %v7166_v19 = vmul.f32 1.050701, %v7038_v49  ;;  %v6658_v3 = vmul.f32 1.442695, %v6423_v36  ;;  %v6430_v7 = vmin.f32 %v13724_v48, 0.0 }
 0x92b   : > { %v6911_v30 = vmul.f32 1.6732632, %v8684_v44  ;;  %9926 = vpow2.f32 %v6656_v5  ;;  %v13732_v1 = vadd.f32 %v13351_v63, %v6005_v42  ;;  %v6012_v14 = vmul.f32 %v13305_v18, %v13195_v8 }
 0x92c   : > { %7423 = vst [vmem:[%s12604_s12 + $0x98] sm:$0xff] %v8824_v43  ;;  %v6013_v57 = vmul.f32 %v13346_v45, %v13198_v22  ;;  %vm6279_vm0 = vcmp.gt.f32.partialorder %v13677_v35, 0.0  ;;  %9928 = vpow2.f32 %v6658_v3  ;;  %v6672_v50 = vmul.f32 1.442695, %v6430_v7 }
 0x92d   : > { %v9919_v15 = vpop.eup %9918  ;;  %v7039_v46 = vsel %vm6271_vm14, %v13649_v54, %v6911_v30  ;;  %v6431_v58 = vmin.f32 %v13732_v1, 0.0  ;;  %v5928_v8 = vmul.f32 %v13327_v34, %v13215_v27  ;;  %v13746_v45 = vadd.f32 %v13310_v21, %v6012_v14 }
 0x92e   : > { %v9921_v39 = vpop.eup %9920  ;;  %v7167_v33 = vmul.f32 1.050701, %v7039_v46  ;;  %v8691_v41 = vadd.f32 -1.0, %v9919_v15  ;;  %9930 = vpow2.f32 %v6672_v50  ;;  %v13749_v54 = vadd.f32 %v13351_v63, %v6013_v57 }
 0x92f   : > { %v9923_v18 = vpop.eup %9922  ;;  %v8692_v22 = vadd.f32 -1.0, %v9921_v39  ;;  %v6674_v38 = vmul.f32 1.442695, %v6431_v58  ;;  %vm6286_vm1 = vcmp.gt.f32.partialorder %v13685_v6, 0.0  ;;  %vm6287_vm2 = vcmp.gt.f32.partialorder %v13695_v60, 0.0 }
 0x930   : > { %v8826_v10 = vpack.c.bf16 %v7167_v33, %v7166_v19  ;;  %v6918_v40 = vmul.f32 1.6732632, %v8691_v41  ;;  %v8699_v25 = vadd.f32 -1.0, %v9923_v18  ;;  %v6438_v27 = vmin.f32 %v13746_v45, 0.0  ;;  %v9925_v13 = vpop.eup %9924 }
 0x931   : > { %v6919_v20 = vmul.f32 1.6732632, %v8692_v22  ;;  %vm6294_vm3 = vcmp.gt.f32.partialorder %v13704_v28, 0.0  ;;  %9932 = vpow2.f32 %v6674_v38  ;;  %v6439_v63 = vmin.f32 %v13749_v54, 0.0 }
 0x932   : > { %7425 = vst [vmem:[%s12604_s12 + $0xa8] sm:$0xff] %v8826_v10  ;;  %v7046_v21 = vsel %vm6278_vm15, %v13674_v17, %v6918_v40  ;;  %v6926_v9 = vmul.f32 1.6732632, %v8699_v25  ;;  %v8700_v12 = vadd.f32 -1.0, %v9925_v13  ;;  %v6688_v11 = vmul.f32 1.442695, %v6438_v27 }
 0x933   : > { %v7174_v31 = vmul.f32 1.050701, %v7046_v21  ;;  %v7047_v16 = vsel %vm6279_vm0, %v13677_v35, %v6919_v20  ;;  %v6690_v56 = vmul.f32 1.442695, %v6439_v63  ;;  %v13765_v17 = vadd.f32 %v13334_v2, %v5928_v8 }
 0x934   : > { %v7175_v62 = vmul.f32 1.050701, %v7047_v16  ;;  %v7054_v47 = vsel %vm6286_vm1, %v13685_v6, %v6926_v9  ;;  %v6927_v55 = vmul.f32 1.6732632, %v8700_v12  ;;  %vm6295_vm4 = vcmp.gt.f32.partialorder %v13711_v53, 0.0  ;;  %v14400_v9 = vld [vmem:[#allocation26_spill] sm:$0xff] }
 0x935   : > { %9934 = vpow2.f32 %v6688_v11  ;;  %v5929_v51 = vmul.f32 %v13368_v52, %v13221_v4  ;;  %v9927_v0 = vpop.eup %9926  ;;  %v7182_v35 = vmul.f32 1.050701, %v7054_v47  ;;  %v6354_v23 = vmin.f32 %v13765_v17, 0.0  ;;  %v14402_v12 = vld [vmem:[#allocation28_spill] sm:$0xff] }
 0x936   : > { %v8828_v61 = vpack.c.bf16 %v7175_v62, %v7174_v31  ;;  %9936 = vpow2.f32 %v6690_v56  ;;  %v9929_v32 = vpop.eup %9928  ;;  %v7055_v6 = vsel %vm6287_vm2, %v13695_v60, %v6927_v55  ;;  %v8707_v49 = vadd.f32 -1.0, %v9927_v0  ;;  %v14401_v31 = vld [vmem:[#allocation29_spill] sm:$0xff] }
 0x937   : > { %v13775_v44 = vadd.f32 %v13372_v29, %v5929_v51  ;;  %v5936_v36 = vmul.f32 %v13327_v34, %v13231_v37  ;;  %v7183_v4 = vmul.f32 1.050701, %v7055_v6  ;;  %v8708_v43 = vadd.f32 -1.0, %v9929_v32  ;;  %v14403_v32 = vld [vmem:[#allocation30_spill] sm:$0xff] }
 0x938   : > { %7427 = vst [vmem:[%s12604_s12 + $0xb8] sm:$0xff] %v8828_v61  ;;  %v6520_v19 = vmul.f32 1.442695, %v6354_v23  ;;  %v5937_v5 = vmul.f32 %v13368_v52, %v13244_v26  ;;  %v9931_v42 = vpop.eup %9930  ;;  %v6934_v30 = vmul.f32 1.6732632, %v8707_v49  ;;  %vm6302_vm5 = vcmp.gt.f32.partialorder %v13724_v48, 0.0 }
 0x939   : > { %v6355_v60 = vmin.f32 %v13775_v44, 0.0  ;;  %v13785_v3 = vadd.f32 %v13334_v2, %v5936_v36  ;;  %v8830_v7 = vpack.c.bf16 %v7183_v4, %v7182_v35  ;;  %v6935_v14 = vmul.f32 1.6732632, %v8708_v43 }
 0x93a   : > { %v8715_v37 = vadd.f32 -1.0, %v9931_v42  ;;  %9938 = vpow2.f32 %v6520_v19  ;;  %v7062_v57 = vsel %vm6294_vm3, %v13704_v28, %v6934_v30  ;;  %vm6303_vm6 = vcmp.gt.f32.partialorder %v13732_v1, 0.0 }
 0x93b   : > { %v6522_v26 = vmul.f32 1.442695, %v6355_v60  ;;  %v6362_v15 = vmin.f32 %v13785_v3, 0.0  ;;  %v9933_v46 = vpop.eup %9932  ;;  %7429 = vst [vmem:[%s12604_s12 + $0xc8] sm:$0xff] %v8830_v7  ;;  %v7190_v50 = vmul.f32 1.050701, %v7062_v57  ;;  %v7063_v39 = vsel %vm6295_vm4, %v13711_v53, %v6935_v14 }
 0x93c   : > { %v6942_v33 = vmul.f32 1.6732632, %v8715_v37  ;;  %v13797_v41 = vadd.f32 %v13372_v29, %v5937_v5  ;;  %v7191_v58 = vmul.f32 1.050701, %v7063_v39  ;;  %v8716_v8 = vadd.f32 -1.0, %v9933_v46  ;;  %v14405_v46 = vld [vmem:[#allocation31_spill] sm:$0xff] }
 0x93d   : > { %9940 = vpow2.f32 %v6522_v26  ;;  %v6536_v28 = vmul.f32 1.442695, %v6362_v15  ;;  %vm6310_vm7 = vcmp.gt.f32.partialorder %v13746_v45, 0.0  ;;  %v5944_v53 = vmul.f32 %v13327_v34, %v13260_v24 }
 0x93e   : > { %v7070_v18 = vsel %vm6302_vm5, %v13724_v48, %v6942_v33  ;;  %v6363_v22 = vmin.f32 %v13797_v41, 0.0  ;;  %v8832_v40 = vpack.c.bf16 %v7191_v58, %v7190_v50  ;;  %v6943_v38 = vmul.f32 1.6732632, %v8716_v8 }
 0x93f   : > { %v9935_v10 = vpop.eup %9934  ;;  %v7198_v25 = vmul.f32 1.050701, %v7070_v18  ;;  %9942 = vpow2.f32 %v6536_v28  ;;  %v13807_v21 = vadd.f32 %v13334_v2, %v5944_v53  ;;  %v5945_v48 = vmul.f32 %v13368_v52, %v14400_v9 }
 0x940   : > { %v9937_v20 = vpop.eup %9936  ;;  %v8723_v27 = vadd.f32 -1.0, %v9935_v10  ;;  %v6538_v13 = vmul.f32 1.442695, %v6363_v22  ;;  %7431 = vst [vmem:[%s12604_s12 + $0xd8] sm:$0xff] %v8832_v40  ;;  %v7071_v63 = vsel %vm6303_vm6, %v13732_v1, %v6943_v38  ;;  %v5952_v16 = vmul.f32 %v13327_v34, %v14401_v31 }
 0x941   : > { %v8724_v24 = vadd.f32 -1.0, %v9937_v20  ;;  %v5953_v11 = vmul.f32 %v13368_v52, %v14402_v12  ;;  %v7199_v62 = vmul.f32 1.050701, %v7071_v63  ;;  %vm6311_vm8 = vcmp.gt.f32.partialorder %v13749_v54, 0.0 }
 0x942   : > { %v6950_v47 = vmul.f32 1.6732632, %v8723_v27  ;;  %9944 = vpow2.f32 %v6538_v13  ;;  %v6370_v55 = vmin.f32 %v13807_v21, 0.0  ;;  %v13822_v1 = vadd.f32 %v13372_v29, %v5945_v48 }
 0x943   : > { %v6951_v56 = vmul.f32 1.6732632, %v8724_v24  ;;  %v13825_v51 = vadd.f32 %v13334_v2, %v5952_v16  ;;  %v8834_v61 = vpack.c.bf16 %v7199_v62, %v7198_v25  ;;  %v13831_v23 = vadd.f32 %v13372_v29, %v5953_v11 }
 0x944   : > { %v9939_v0 = vpop.eup %9938  ;;  %v7078_v35 = vsel %vm6310_vm7, %v13746_v45, %v6950_v47  ;;  %v5960_v6 = vmul.f32 %v13327_v34, %v14403_v32  ;;  %v6552_v43 = vmul.f32 1.442695, %v6370_v55  ;;  %vm6226_vm9 = vcmp.gt.f32.partialorder %v13765_v17, 0.0 }
 0x945   : > { %v7206_v49 = vmul.f32 1.050701, %v7078_v35  ;;  %v7079_v36 = vsel %vm6311_vm8, %v13749_v54, %v6951_v56  ;;  %v8639_v4 = vadd.f32 -1.0, %v9939_v0  ;;  %7433 = vst [vmem:[%s12604_s12 + $0xe8] sm:$0xff] %v8834_v61  ;;  %v6371_v45 = vmin.f32 %v13822_v1, 0.0 }
 0x946   : > { %v7207_v19 = vmul.f32 1.050701, %v7079_v36  ;;  %vm6227_vm10 = vcmp.gt.f32.partialorder %v13775_v44, 0.0  ;;  %9946 = vpow2.f32 %v6552_v43  ;;  %v6378_v30 = vmin.f32 %v13825_v51, 0.0 }
 0x947   : > { %v9941_v5 = vpop.eup %9940  ;;  %v6866_v42 = vmul.f32 1.6732632, %v8639_v4  ;;  %v6554_v7 = vmul.f32 1.442695, %v6371_v45  ;;  %v6379_v14 = vmin.f32 %v13831_v23, 0.0  ;;  %v13855_v15 = vadd.f32 %v13334_v2, %v5960_v6 }
 0x948   : > { %v8836_v54 = vpack.c.bf16 %v7207_v19, %v7206_v49  ;;  %v8640_v60 = vadd.f32 -1.0, %v9941_v5  ;;  %v6568_v26 = vmul.f32 1.442695, %v6378_v30  ;;  %v5961_v50 = vmul.f32 %v13368_v52, %v14405_v46 }
 0x949   : > { %v9943_v37 = vpop.eup %9942  ;;  %v6994_v57 = vsel %vm6226_vm9, %v13765_v17, %v6866_v42  ;;  %vm6234_vm11 = vcmp.gt.f32.partialorder %v13785_v3, 0.0  ;;  %9948 = vpow2.f32 %v6554_v7  ;;  %v6570_v8 = vmul.f32 1.442695, %v6379_v14 }
 0x94a   : > { %7435 = vst [vmem:[%s12604_s12 + $0xf8] sm:$0xff] %v8836_v54  ;;  %v6867_v39 = vmul.f32 1.6732632, %v8640_v60  ;;  %v8647_v33 = vadd.f32 -1.0, %v9943_v37  ;;  %v7122_v58 = vmul.f32 1.050701, %v6994_v57  ;;  %9950 = vpow2.f32 %v6568_v26 }
 0x94b   : > { %v6386_v17 = vmin.f32 %v13855_v15, 0.0  ;;  %s10192_s12 = scalar_lea.vmem %s10191_s15, 8192 }
 0x94c   : > { %p10194_p2 = scmp.lt.s32.totalorder %s10192_s12, %s10186_s0 }
 0x94e   : > { %p10195_p8 = por %p10194_p2, %p10193_p3 }
 0x950   : > { %p10196_p4 = pnand %p10195_p8, %p10189_p1 }
 0x952   : > { %10199 = shalt.err (!%p10196_p4)
}
 0x953   : > { %s10200_s24 = scalar_lea.hbm %s13848_s13, 4096  ;;  %s10204_s20 = scalar_lea.hbm %s14404_s18, 8192 }
 0x954   : > { %p10201_p10 = scmp.ne.s32.totalorder %s13848_s13, %s10200_s24  ;;  %p10205_p5 = scmp.lt.u32.totalorder %s13848_s13, %s14404_s18 }
 0x955   : > { %p10206_p7 = scmp.lt.u32.totalorder %s10204_s20, %s10200_s24  ;;  %p10208_p9 = scmp.lt.u32.totalorder %s10200_s24, %s13848_s13 }
 0x956   : > { %p10202_p11 = pnand %p10201_p10, %p14406_p12 }
 0x957   : > { %p10207_p6 = por %p10206_p7, %p10205_p5 }
 0x958   : > { %p10203_p0 = pneg %p10202_p11 }
 0x959   : > { %p10209_p13 = por %p10208_p9, %p10207_p6 }
 0x95b   : > { %p10210_p1 = pnand %p10209_p13, %p10203_p0 }
 0x95d   : > { %10213 = shalt.err (!%p10210_p1)
}
 0x95e   : > { %s14202_s0 = smov 256   ;;  %s14203_s12 = smov 16   ;;  %v9945_v28 = vpop.eup %9944  ;;  %v6995_v18 = vsel %vm6227_vm10, %v13775_v44, %v6867_v39  ;;  %v6874_v22 = vmul.f32 1.6732632, %v8647_v33  ;;  %v13893_v53 = vadd.f32 %v13372_v29, %v5961_v50  ;;  %v14408_v10 = vld [vmem:[#allocation32_spill] sm:$0xff]  ;;  %9952 = vpow2.f32 %v6570_v8  ;;  %v14409_v16 = vld [vmem:[#allocation37_spill] sm:$0xff] }
 0x95f   : > { %s14407_s9 = scalar_lea.sflag [#allocation4], %s10709_s8  ;;  %v5968_v40 = vmul.f32 %v13327_v34, %v14408_v10  ;;  %v7123_v25 = vmul.f32 1.050701, %v6995_v18  ;;  %v8648_v38 = vadd.f32 -1.0, %v9945_v28  ;;  %v6584_v20 = vmul.f32 1.442695, %v6386_v17  ;;  %v9947_v12 = vpop.eup %9946 }
 0x960   : > { %9169 = dma.vmem_to_hbm [thread:$0]  (%p14406_p12), %s13850_s2, 4096, %s13848_s13, %s14407_s9, %s14202_s0, %s14202_s0, %s14203_s12   ;;  %v7002_v27 = vsel %vm6234_vm11, %v13785_v3, %v6874_v22  ;;  %vm6235_vm12 = vcmp.gt.f32.partialorder %v13797_v41, 0.0  ;;  %v6387_v44 = vmin.f32 %v13893_v53, 0.0  ;;  %vm6242_vm13 = vcmp.gt.f32.partialorder %v13807_v21, 0.0  ;;  %v14410_v62 = vld [vmem:[#allocation42_spill] sm:$0xff]  ;;  %v14411_v56 = vld [vmem:[#allocation24_spill] sm:$0xff]  ;;  %v9949_v36 = vpop.eup %9948 }
 0x961   : > { %v13903_v13 = vadd.f32 %v13334_v2, %v5968_v40  ;;  %v8846_v9 = vpack.c.bf16 %v7123_v25, %v7122_v58  ;;  %v6875_v48 = vmul.f32 1.6732632, %v8648_v38  ;;  %9954 = vpow2.f32 %v6584_v20  ;;  %v14412_v0 = vld [vmem:[#allocation25_spill] sm:$0xff]  ;;  %v9951_v45 = vpop.eup %9950  ;;  %v14413_v54 = vld [vmem:[#allocation23_spill] sm:$0xff]  ;;  %s7824_s10 = sshll.u32 %s12616_s7, 4  ;;  %s14421_s4 = sshll.u32 %s10462_s29, 12  ;;  %s14064_s10 = int_to_ptr.vmem [resolvable:$true] %s7824_s10 }
 0x962   : > { %v7130_v63 = vmul.f32 1.050701, %v7002_v27  ;;  %vm6243_vm14 = vcmp.gt.f32.partialorder %v13822_v1, 0.0  ;;  %v6586_v24 = vmul.f32 1.442695, %v6387_v44  ;;  %v5969_v3 = vmul.f32 %v13368_v52, %v14409_v16  ;;  %s14422_s24 = sld [smem:[#allocation70_spill]] }
 0x963   : > { %v6394_v31 = vmin.f32 %v13903_v13, 0.0  ;;  %7637 = vst [vmem:[%s12616_s7 + $0x48] sm:$0xff] %v8846_v9  ;;  %v7003_v11 = vsel %vm6235_vm12, %v13797_v41, %v6875_v48  ;;  %v5976_v47 = vmul.f32 %v13327_v34, %v14410_v62  ;;  %v5977_v55 = vmul.f32 %v13368_v52, %v14411_v56  ;;  %s7778_s15 = scalar_lea.sflag [#allocation16], %s10709_s8  ;;  %s10214_s9 = scalar_lea.vmem %s14064_s10, 4096 }
 0x964   : > { %v5984_v61 = vmul.f32 %v13327_v34, %v14412_v0  ;;  %v7131_v35 = vmul.f32 1.050701, %v7003_v11  ;;  %v8655_v32 = vadd.f32 -1.0, %v9947_v12  ;;  %9956 = vpow2.f32 %v6586_v24  ;;  %p10215_p3 = scmp.ne.s32.totalorder %s14064_s10, %s10214_s9  ;;  %s10315_s0 = smov [#allocation15]  }
 0x965   : > { %v6600_v6 = vmul.f32 1.442695, %v6394_v31  ;;  %vm6250_vm15 = vcmp.gt.f32.partialorder %v13825_v51, 0.0  ;;  %vm6251_vm0 = vcmp.gt.f32.partialorder %v13831_v23, 0.0  ;;  %v13921_v41 = vadd.f32 %v13372_v29, %v5969_v3  ;;  %v14414_v3 = vld [vmem:[#allocation33_spill] sm:$0xff]  ;;  %s10218_s29 = sshll.u32 %s10315_s0, 4  ;;  %s10219_s29 = int_to_ptr.vmem [resolvable:$false] %s10218_s29 }
 0x966   : > { %v13924_v49 = vadd.f32 %v13334_v2, %v5976_v47  ;;  %v8848_v4 = vpack.c.bf16 %v7131_v35, %v7130_v63  ;;  %v6882_v43 = vmul.f32 1.6732632, %v8655_v32  ;;  %v13927_v19 = vadd.f32 %v13372_v29, %v5977_v55  ;;  %v14416_v32 = vld [vmem:[#allocation38_spill] sm:$0xff]  ;;  %p10216_p2 = pnand %p10215_p3, %p14406_p12  ;;  %s10220_s12 = scalar_lea.vmem %s10219_s29, 8192 }
 0x967   : > { %9958 = vpow2.f32 %v6600_v6  ;;  %v8656_v5 = vadd.f32 -1.0, %v9949_v36  ;;  %v6395_v42 = vmin.f32 %v13921_v41, 0.0  ;;  %v13931_v30 = vadd.f32 %v13334_v2, %v5984_v61  ;;  %p10221_p4 = scmp.lt.s32.totalorder %s14064_s10, %s10219_s29  ;;  %p10222_p10 = scmp.lt.s32.totalorder %s10220_s12, %s10214_s9 }
 0x968   : > { %v5985_v60 = vmul.f32 %v13368_v52, %v14413_v54  ;;  %7639 = vst [vmem:[%s12616_s7 + $0x58] sm:$0xff] %v8848_v4  ;;  %v7010_v7 = vsel %vm6242_vm13, %v13807_v21, %v6882_v43  ;;  %v8663_v14 = vadd.f32 -1.0, %v9951_v45  ;;  %vm6258_vm1 = vcmp.gt.f32.partialorder %v13855_v15, 0.0  ;;  %v9953_v57 = vpop.eup %9952  ;;  %v14417_v4 = vld [vmem:[#allocation36_spill] sm:$0xff]  ;;  %s14062_s20 = scalar_lea.hbm %s14422_s24, %s14421_s4  ;;  %p10217_p8 = pneg %p10216_p2 }
 0x969   : > { %v6402_v37 = vmin.f32 %v13924_v49, 0.0  ;;  %v7138_v26 = vmul.f32 1.050701, %v7010_v7  ;;  %v6883_v46 = vmul.f32 1.6732632, %v8656_v5  ;;  %v8664_v33 = vadd.f32 -1.0, %v9953_v57  ;;  %p10223_p11 = por %p10222_p10, %p10221_p4 }
 0x96a   : > { %v6602_v50 = vmul.f32 1.442695, %v6395_v42  ;;  %v6890_v39 = vmul.f32 1.6732632, %v8663_v14  ;;  %v6403_v8 = vmin.f32 %v13927_v19, 0.0  ;;  %v6410_v21 = vmin.f32 %v13931_v30, 0.0 }
 0x96b   : > { %v6616_v58 = vmul.f32 1.442695, %v6402_v37  ;;  %v9955_v17 = vpop.eup %9954  ;;  %v7011_v28 = vsel %vm6243_vm14, %v13822_v1, %v6883_v46  ;;  %v13947_v18 = vadd.f32 %v13372_v29, %v5985_v60  ;;  %v6891_v40 = vmul.f32 1.6732632, %v8664_v33  ;;  %v14418_v42 = vld [vmem:[#allocation41_spill] sm:$0xff]  ;;  %p10224_p0 = pnand %p10223_p11, %p10217_p8 }
 0x96c   : > { %9960 = vpow2.f32 %v6602_v50  ;;  %v7139_v22 = vmul.f32 1.050701, %v7011_v28  ;;  %v7018_v10 = vsel %vm6250_vm15, %v13825_v51, %v6890_v39  ;;  %v8671_v25 = vadd.f32 -1.0, %v9955_v17 }
 0x96d   : > { %v7146_v38 = vmul.f32 1.050701, %v7018_v10  ;;  %9962 = vpow2.f32 %v6616_v58  ;;  %v6618_v20 = vmul.f32 1.442695, %v6403_v8  ;;  %v6632_v27 = vmul.f32 1.442695, %v6410_v21 }
 0x96e   : > { %v9957_v44 = vpop.eup %9956  ;;  %v8850_v1 = vpack.c.bf16 %v7139_v22, %v7138_v26  ;;  %v7019_v9 = vsel %vm6251_vm0, %v13831_v23, %v6891_v40  ;;  %v6898_v48 = vmul.f32 1.6732632, %v8671_v25  ;;  %vm6259_vm2 = vcmp.gt.f32.partialorder %v13893_v53, 0.0  ;;  %v14415_v23 = vld [vmem:[#allocation34_spill] sm:$0xff] }
 0x96f   : > { %v7147_v63 = vmul.f32 1.050701, %v7019_v9  ;;  %v8672_v24 = vadd.f32 -1.0, %v9957_v44  ;;  %9964 = vpow2.f32 %v6618_v20  ;;  %v6411_v51 = vmin.f32 %v13947_v18, 0.0 }
 0x970   : > { %7641 = vst [vmem:[%s12616_s7 + $0x68] sm:$0xff] %v8850_v1  ;;  %v7026_v16 = vsel %vm6258_vm1, %v13855_v15, %v6898_v48  ;;  %9966 = vpow2.f32 %v6632_v27  ;;  %v5992_v12 = vmul.f32 %v13327_v34, %v14414_v3  ;;  %v5993_v11 = vmul.f32 %v13368_v52, %v14415_v23 }
 0x971   : > { %v9959_v31 = vpop.eup %9958  ;;  %v8852_v62 = vpack.c.bf16 %v7147_v63, %v7146_v38  ;;  %v7154_v47 = vmul.f32 1.050701, %v7026_v16  ;;  %v6899_v56 = vmul.f32 1.6732632, %v8672_v24  ;;  %v6634_v0 = vmul.f32 1.442695, %v6411_v51 }
 0x972   : > { %v8679_v55 = vadd.f32 -1.0, %v9959_v31  ;;  %v13966_v61 = vadd.f32 %v13334_v2, %v5992_v12  ;;  %v13969_v35 = vadd.f32 %v13372_v29, %v5993_v11  ;;  %v6000_v15 = vmul.f32 %v13327_v34, %v14416_v32  ;;  %v14419_v63 = vld [vmem:[#allocation35_spill] sm:$0xff] }
 0x973   : > { %7643 = vst [vmem:[%s12616_s7 + $0x78] sm:$0xff] %v8852_v62  ;;  %v7027_v6 = vsel %vm6259_vm2, %v13893_v53, %v6899_v56  ;;  %vm6266_vm3 = vcmp.gt.f32.partialorder %v13903_v13, 0.0  ;;  %v6001_v43 = vmul.f32 %v13368_v52, %v14417_v4  ;;  %9968 = vpow2.f32 %v6634_v0 }
 0x974   : > { %v6906_v36 = vmul.f32 1.6732632, %v8679_v55  ;;  %v7155_v45 = vmul.f32 1.050701, %v7027_v6  ;;  %v6418_v5 = vmin.f32 %v13966_v61, 0.0  ;;  %v6008_v54 = vmul.f32 %v13327_v34, %v14418_v42 }
 0x975   : > { %vm6267_vm4 = vcmp.gt.f32.partialorder %v13921_v41, 0.0  ;;  %vm6274_vm5 = vcmp.gt.f32.partialorder %v13924_v49, 0.0  ;;  %v6419_v53 = vmin.f32 %v13969_v35, 0.0  ;;  %v13987_v7 = vadd.f32 %v13334_v2, %v6000_v15 }
 0x976   : > { %v9961_v60 = vpop.eup %9960  ;;  %v8854_v14 = vpack.c.bf16 %v7155_v45, %v7154_v47  ;;  %v7034_v37 = vsel %vm6266_vm3, %v13903_v13, %v6906_v36  ;;  %v6648_v26 = vmul.f32 1.442695, %v6418_v5  ;;  %vm6275_vm6 = vcmp.gt.f32.partialorder %v13927_v19, 0.0 }
 0x977   : > { %v8680_v57 = vadd.f32 -1.0, %v9961_v60  ;;  %v9963_v46 = vpop.eup %9962  ;;  %v6650_v50 = vmul.f32 1.442695, %v6419_v53  ;;  %v6426_v39 = vmin.f32 %v13987_v7, 0.0  ;;  %v13993_v33 = vadd.f32 %v13372_v29, %v6001_v43 }
 0x978   : > { %7645 = vst [vmem:[%s12616_s7 + $0x88] sm:$0xff] %v8854_v14  ;;  %v8687_v8 = vadd.f32 -1.0, %v9963_v46  ;;  %9970 = vpow2.f32 %v6648_v26  ;;  %v13997_v17 = vadd.f32 %v13334_v2, %v6008_v54  ;;  %v7162_v13 = vmul.f32 1.050701, %v7034_v37 }
 0x979   : > { %v6907_v58 = vmul.f32 1.6732632, %v8680_v57  ;;  %v9965_v28 = vpop.eup %9964  ;;  %9972 = vpow2.f32 %v6650_v50  ;;  %v6664_v21 = vmul.f32 1.442695, %v6426_v39  ;;  %v6427_v22 = vmin.f32 %v13993_v33, 0.0 }
 0x97a   : > { %v9967_v10 = vpop.eup %9966  ;;  %v6914_v25 = vmul.f32 1.6732632, %v8687_v8  ;;  %v8688_v38 = vadd.f32 -1.0, %v9965_v28  ;;  %vm6282_vm7 = vcmp.gt.f32.partialorder %v13931_v30, 0.0  ;;  %v6434_v48 = vmin.f32 %v13997_v17, 0.0 }
 0x97b   : > { %v7035_v40 = vsel %vm6267_vm4, %v13921_v41, %v6907_v58  ;;  %v8695_v27 = vadd.f32 -1.0, %v9967_v10  ;;  %9974 = vpow2.f32 %v6664_v21  ;;  %v6666_v44 = vmul.f32 1.442695, %v6427_v22 }
 0x97c   : > { %v7163_v20 = vmul.f32 1.050701, %v7035_v40  ;;  %v7042_v1 = vsel %vm6274_vm5, %v13924_v49, %v6914_v25  ;;  %v6915_v9 = vmul.f32 1.6732632, %v8688_v38  ;;  %v6009_v24 = vmul.f32 %v13368_v52, %v14419_v63  ;;  %v14420_v49 = vld [vmem:[#allocation39_spill] sm:$0xff] }
 0x97d   : > { %v7170_v51 = vmul.f32 1.050701, %v7042_v1  ;;  %v6922_v31 = vmul.f32 1.6732632, %v8695_v27  ;;  %9976 = vpow2.f32 %v6666_v44  ;;  %v9969_v16 = vpop.eup %9968  ;;  %v6680_v12 = vmul.f32 1.442695, %v6434_v48 }
 0x97e   : > { %v8856_v41 = vpack.c.bf16 %v7163_v20, %v7162_v13  ;;  %v7043_v3 = vsel %vm6275_vm6, %v13927_v19, %v6915_v9  ;;  %v14014_v23 = vadd.f32 %v13372_v29, %v6009_v24  ;;  %v6016_v11 = vmul.f32 %v13327_v34, %v14420_v49 }
 0x97f   : > { %v7171_v62 = vmul.f32 1.050701, %v7043_v3  ;;  %v7050_v47 = vsel %vm6282_vm7, %v13931_v30, %v6922_v31  ;;  %v8696_v56 = vadd.f32 -1.0, %v9969_v16  ;;  %v6017_v55 = vmul.f32 %v13368_v52, %v13492_v59 }
 0x980   : > { %7647 = vst [vmem:[%s12616_s7 + $0x98] sm:$0xff] %v8856_v41  ;;  %9978 = vpow2.f32 %v6680_v12  ;;  %v6435_v19 = vmin.f32 %v14014_v23, 0.0  ;;  %v14026_v15 = vadd.f32 %v13334_v2, %v6016_v11  ;;  %v7178_v36 = vmul.f32 1.050701, %v7050_v47 }
 0x981   : > { %v8858_v0 = vpack.c.bf16 %v7171_v62, %v7170_v51  ;;  %v6923_v32 = vmul.f32 1.6732632, %v8696_v56  ;;  %v14029_v34 = vadd.f32 %v13372_v29, %v6017_v55  ;;  %vm6283_vm8 = vcmp.gt.f32.partialorder %v13947_v18, 0.0 }
 0x982   : > { %v9971_v6 = vpop.eup %9970  ;;  %v6682_v30 = vmul.f32 1.442695, %v6435_v19  ;;  %v6442_v43 = vmin.f32 %v14026_v15, 0.0  ;;  %vm6290_vm9 = vcmp.gt.f32.partialorder %v13966_v61, 0.0  ;;  %vm6291_vm10 = vcmp.gt.f32.partialorder %v13969_v35, 0.0 }
 0x983   : > { %v9973_v4 = vpop.eup %9972  ;;  %7649 = vst [vmem:[%s12616_s7 + $0xa8] sm:$0xff] %v8858_v0  ;;  %v7051_v52 = vsel %vm6283_vm8, %v13947_v18, %v6923_v32  ;;  %v8703_v59 = vadd.f32 -1.0, %v9971_v6  ;;  %v6443_v54 = vmin.f32 %v14029_v34, 0.0  ;;  %vm6298_vm11 = vcmp.gt.f32.partialorder %v13987_v7, 0.0 }
 0x984   : > { %v7179_v45 = vmul.f32 1.050701, %v7051_v52  ;;  %v8704_v5 = vadd.f32 -1.0, %v9973_v4  ;;  %9980 = vpow2.f32 %v6682_v30  ;;  %v6696_v29 = vmul.f32 1.442695, %v6442_v43 }
 0x985   : > { %v9975_v2 = vpop.eup %9974  ;;  %v6930_v42 = vmul.f32 1.6732632, %v8703_v59  ;;  %v6698_v57 = vmul.f32 1.442695, %v6443_v54  ;;  %vm6299_vm12 = vcmp.gt.f32.partialorder %v13993_v33, 0.0  ;;  %vm6306_vm13 = vcmp.gt.f32.partialorder %v13997_v17, 0.0 }
 0x986   : > { %v8860_v60 = vpack.c.bf16 %v7179_v45, %v7178_v36  ;;  %v6931_v53 = vmul.f32 1.6732632, %v8704_v5  ;;  %v8711_v14 = vadd.f32 -1.0, %v9975_v2  ;;  %9982 = vpow2.f32 %v6696_v29 }
 0x987   : > { %v9977_v37 = vpop.eup %9976  ;;  %v7058_v18 = vsel %vm6290_vm9, %v13966_v61, %v6930_v42  ;;  %9984 = vpow2.f32 %v6698_v57  ;;  %vm6307_vm14 = vcmp.gt.f32.partialorder %v14014_v23, 0.0  ;;  %vm6314_vm15 = vcmp.gt.f32.partialorder %v14026_v15, 0.0 }
 0x988   : > { %7651 = vst [vmem:[%s12616_s7 + $0xb8] sm:$0xff] %v8860_v60  ;;  %v7186_v26 = vmul.f32 1.050701, %v7058_v18  ;;  %v7059_v46 = vsel %vm6291_vm10, %v13969_v35, %v6931_v53  ;;  %v6938_v50 = vmul.f32 1.6732632, %v8711_v14  ;;  %v8712_v39 = vadd.f32 -1.0, %v9977_v37 }
 0x989   : > { %v7187_v58 = vmul.f32 1.050701, %v7059_v46  ;;  %vm6315_vm0 = vcmp.gt.f32.partialorder %v14029_v34, 0.0 }
 0x98a   : > { %v9979_v8 = vpop.eup %9978  ;;  %v7066_v28 = vsel %vm6298_vm11, %v13987_v7, %v6938_v50  ;;  %v6939_v61 = vmul.f32 1.6732632, %v8712_v39 }
 0x98b   : > { %v8862_v13 = vpack.c.bf16 %v7187_v58, %v7186_v26  ;;  %v7194_v21 = vmul.f32 1.050701, %v7066_v28  ;;  %v8719_v22 = vadd.f32 -1.0, %v9979_v8 }
 0x98c   : > { %v7067_v10 = vsel %vm6299_vm12, %v13993_v33, %v6939_v61 }
 0x98d   : > { %7653 = vst [vmem:[%s12616_s7 + $0xc8] sm:$0xff] %v8862_v13  ;;  %v7195_v35 = vmul.f32 1.050701, %v7067_v10  ;;  %v6946_v40 = vmul.f32 1.6732632, %v8719_v22 }
 0x98e   : > { %v9981_v25 = vpop.eup %9980 }
 0x98f   : > { %v8864_v38 = vpack.c.bf16 %v7195_v35, %v7194_v21  ;;  %v7074_v20 = vsel %vm6306_vm13, %v13997_v17, %v6946_v40  ;;  %v8720_v27 = vadd.f32 -1.0, %v9981_v25 }
 0x990   : > { %v9983_v7 = vpop.eup %9982  ;;  %v7202_v1 = vmul.f32 1.050701, %v7074_v20 }
 0x991   : > { %7655 = vst [vmem:[%s12616_s7 + $0xd8] sm:$0xff] %v8864_v38  ;;  %v6947_v44 = vmul.f32 1.6732632, %v8720_v27  ;;  %v8727_v9 = vadd.f32 -1.0, %v9983_v7  ;;  %v9985_v33 = vpop.eup %9984 }
 0x992   : > { %v8728_v41 = vadd.f32 -1.0, %v9985_v33 }
 0x993   : > { %v7075_v48 = vsel %vm6307_vm14, %v14014_v23, %v6947_v44  ;;  %v6954_v24 = vmul.f32 1.6732632, %v8727_v9 }
 0x994   : > { %v7203_v63 = vmul.f32 1.050701, %v7075_v48  ;;  %v6955_v31 = vmul.f32 1.6732632, %v8728_v41 }
 0x995   : > { %v7082_v51 = vsel %vm6314_vm15, %v14026_v15, %v6954_v24 }
 0x996   : > { %v8866_v17 = vpack.c.bf16 %v7203_v63, %v7202_v1  ;;  %v7210_v16 = vmul.f32 1.050701, %v7082_v51  ;;  %v7083_v3 = vsel %vm6315_vm0, %v14029_v34, %v6955_v31 }
 0x997   : > { %v7211_v12 = vmul.f32 1.050701, %v7083_v3 }
 0x998   : > { %7657 = vst [vmem:[%s12616_s7 + $0xe8] sm:$0xff] %v8866_v17 }
 0x999   : > { %v8868_v23 = vpack.c.bf16 %v7211_v12, %v7210_v16 }
 0x99b   : > { %7659 = vst [vmem:[%s12616_s7 + $0xf8] sm:$0xff] %v8868_v23 }
 0x99c   : > { %10227 = shalt.err (!%p10224_p0)
}
 0x99d   : > { %s10228_s7 = scalar_lea.hbm %s14062_s20, 4096  ;;  %s10232_s0 = scalar_lea.hbm %s14422_s24, 8192 }
 0x99e   : > { %p10229_p5 = scmp.ne.s32.totalorder %s14062_s20, %s10228_s7  ;;  %p10233_p9 = scmp.lt.u32.totalorder %s14062_s20, %s14422_s24 }
 0x99f   : > { %p10234_p13 = scmp.lt.u32.totalorder %s10232_s0, %s10228_s7  ;;  %p10236_p3 = scmp.lt.u32.totalorder %s10228_s7, %s14062_s20 }
 0x9a0   : > { %p10230_p7 = pnand %p10229_p5, %p14406_p12 }
 0x9a1   : > { %p10235_p1 = por %p10234_p13, %p10233_p9 }
 0x9a2   : > { %p10231_p6 = pneg %p10230_p7 }
 0x9a3   : > { %p10237_p2 = por %p10236_p3, %p10235_p1 }
 0x9a5   : > { %p10238_p8 = pnand %p10237_p2, %p10231_p6 }
 0x9a7   : > { %10241 = shalt.err (!%p10238_p8)
}
 0x9a8   : > { %s14423_s12 = smov 16   ;;  %s14424_s9 = smov 256  }
 0x9a9   : > { %9170 = dma.vmem_to_hbm [thread:$0]  (%p14406_p12), %s14064_s10, 4096, %s14062_s20, %s7778_s15, %s14424_s9, %s14424_s9, %s14423_s12  }
 0x9aa PF: > { %s7851_s4 = sand.u32 1, %s10284_s5   ;;  %p14425_p4 = scmp.ne.s32.totalorder %s14235_s25, 0 }
 0x9ab   : > { %p14426_p10 = scmp.ge.s32.totalorder %s10296_s28, 2  ;;  %s7852_s7 = scalar_lea.sflag [#allocation4], %s7851_s4 }
 0x9ad   : > { %p9197_p11 = pnand %p14426_p10, %p14425_p4 }
 0x9af   : > { %10275 = dma.done.wait (!%p9197_p11), %s7852_s7, 4096  }
 0x9b0   : > { %10277 = vsyncadd (!%p9197_p11), %s7852_s7, 4294963200  ;;  %s7861_s1 = scalar_lea.sflag [#allocation16], %s7851_s4 }
 0x9b1   : > { %10279 = dma.done.wait (!%p9197_p11), %s7861_s1, 4096  }
 0x9b2   : > { %10281 = vsyncadd (!%p9197_p11), %s7861_s1, 4294963200  ;;  %p44_p12 = scmp.ge.s32.totalorder %s10627_s6, 4   ;;  %s14427_s5 = smov %s10288_s26 }
 0x9b3   : > { %s14428_s26 = smov %s10292_s27  ;;  %s14429_s27 = smov %s10638_s3 }
 0x9b4   : > { %s14430_s28 = smov %s10627_s6  ;;  %46 = sbr.rel (!%p44_p12) target bundleno = 31 (0x1f), region = 228 }
 0x9bb   :  { %7890 = vsyncpa [#allocation3], 1 }
 0x9bc   :  { %7892 = vsyncpa [#allocation3 + $0x1], 1 }
 0x9bd   :  { %7893 = vsyncpa [#allocation6], 1 }
 0x9be   :  { %7894 = vsyncpa [#allocation9], 1 }
 0x9bf   :  { %7895 = vsyncpa [#allocation12], 1 }
 0x9c0   :  { %7896 = vsyncpa [#allocation4], 1 }
 0x9c1   :  { %7898 = vsyncpa [#allocation4 + $0x1], 1 }
 0x9c2   :  { %7899 = vsyncpa [#allocation16], 1 }
 0x9c3   :  { %7901 = vsyncpa [#allocation16 + $0x1], 1 }

</bundles_post_ra>
